<compile_context>
chip_gen: v7x
topology: tpu7x:2x2x1
jax: 0.10.0
libtpu: 0.0.40
codegen_flags: <defaults>
</compile_context>

<pallas_src>
import functools

import jax
import jax.numpy as jnp
from jax.experimental import pallas as pl
from jax.experimental.pallas import tpu as pltpu


# ----------------------------------------------------------------------------
# Fused Block kernel (one grid step = one batch element, everything in VMEM)
# ----------------------------------------------------------------------------
def _block_kernel(*refs, H, Wp, kc, NC, Cout, reps, skip_conv, start_relu, n_mid):
    f32 = jnp.float32
    CHUNK = kc * Wp                 # rows per chunk (kc whole image rows, 8-aligned)
    L = H * Wp                      # flattened interior (real rows only)
    R = NC * CHUNK + 4 * Wp         # full padded slab length
    NEG = -1e30                     # -inf sentinel for max-pool padding

    # ---- unpack refs (order must match block_forward) -----------------------
    i = 0
    x_ref = refs[i]; i += 1                          # (1, R, Cin) zero-padded flat input
    mask_ref = refs[i]; i += 1                       # (CHUNK, 1) interior-column mask
    if skip_conv:
        sel_ref = refs[i]; i += 1                    # (Mo, CHUNK) one-hot stride-2 selector
    sep = []
    for _ in range(reps):
        sep.append(refs[i:i + 4]); i += 4            # dw(9,ci) f32, pw(ci,Cout) bf16, scale, bias
    if skip_conv:
        wskip_ref, ssc_ref, sbi_ref = refs[i:i + 3]; i += 3
    out_ref = refs[i]; i += 1
    mids = list(refs[i:i + n_mid])                   # ping-pong VMEM (R, Cout) f32 buffers

    col_ok = mask_ref[...] > 0.5                     # (CHUNK, 1) bool, same for every chunk

    # Border-only init: top pad rows + everything past the last real row.
    # Interiors are fully rewritten before they are read (also across grid steps).
    for m_ref in mids:
        m_ref[pl.ds(0, 2 * Wp), :] = jnp.zeros((2 * Wp, Cout), f32)
        m_ref[pl.ds(2 * Wp + L, R - 2 * Wp - L), :] = jnp.zeros((R - 2 * Wp - L, Cout), f32)

    def load_src(r, start, size):
        if r == 0:
            v = x_ref[0, pl.ds(start, size), :]
            return jnp.maximum(v, 0.0) if start_relu else v
        return mids[(r - 1) % 2][pl.ds(start, size), :]

    # ---- reps x (depthwise 3x3 -> pointwise 1x1 -> folded BN), chunked ------
    for r in range(reps):
        dw_ref, pw_ref, sc_ref, bi_ref = sep[r]
        wdw = dw_ref[...]                            # (9, cin_r) f32
        taps = [wdw[t:t + 1, :] for t in range(9)]
        pw = pw_ref[...]                             # (cin_r, Cout) bf16
        sc = sc_ref[...]
        bi = bi_ref[...]
        last = r == reps - 1
        dst = None if (last and not skip_conv) else mids[r % 2]

        for c in range(NC):
            base = 2 * Wp + c * CHUNK
            acc = None
            # one wide slab load per dx (dx shift hoisted); dy taps are aligned
            # slices of that slab at dy*Wp offsets
            for dx in range(3):
                slab = load_src(r, base - Wp + dx - 1, CHUNK + 2 * Wp)
                for dy in range(3):
                    term = slab[dy * Wp:dy * Wp + CHUNK, :] * taps[dy * 3 + dx]
                    acc = term if acc is None else acc + term
            y = jnp.dot(acc.astype(jnp.bfloat16), pw,
                        preferred_element_type=f32)  # (CHUNK, Cout), bf16 MXU, f32 acc
            y = y * sc + bi                          # eval-mode BN (folded)
            if not last:
                # ReLU between separable convs; keep pad columns at exactly zero
                dst[pl.ds(base, CHUNK), :] = jnp.where(col_ok, jnp.maximum(y, 0.0), 0.0)
            elif skip_conv:
                # stage final activation with -inf sentinel at pad columns for pooling
                dst[pl.ds(base, CHUNK), :] = jnp.where(col_ok, y, NEG)
            else:
                # identity residual at full resolution, dense flat store
                resid = x_ref[0, pl.ds(base, CHUNK), :]
                out_ref[0, pl.ds(c * CHUNK, CHUNK), :] = (y + resid).astype(out_ref.dtype)

        if not last and NC * kc > H:
            # last chunk ran past row H-1; keep those rows zero for the next rep
            dst[pl.ds(2 * Wp + L, NC * CHUNK - L), :] = jnp.zeros((NC * CHUNK - L, Cout), f32)

    if not skip_conv:
        return

    # ---- MaxPool(3, s=2, p=1) + 1x1-stride-2 skip ConvBN + residual ---------
    pool = mids[(reps - 1) % 2]
    pool[pl.ds(0, 2 * Wp), :] = jnp.full((2 * Wp, Cout), NEG, f32)
    pool[pl.ds(2 * Wp + L, R - 2 * Wp - L), :] = jnp.full((R - 2 * Wp - L, Cout), NEG, f32)

    sel = sel_ref[...]                               # (Mo, CHUNK) 0/1 selector (exact in f32)
    Mo = sel_ref.shape[0]
    wskip = wskip_ref[...]                           # (Cin, Cout) bf16
    ssc = ssc_ref[...]
    sbi = sbi_ref[...]
    for c in range(NC):
        base = 2 * Wp + c * CHUNK
        m = None
        for dx in range(3):
            slab = pool[pl.ds(base - Wp + dx - 1, CHUNK + 2 * Wp), :]
            for dy in range(3):
                v = slab[dy * Wp:dy * Wp + CHUNK, :]
                m = v if m is None else jnp.maximum(m, v)
        # m[l] == 3x3-window max centred at interior position l of this chunk
        pooled = jnp.dot(sel, m, preferred_element_type=f32)                     # (Mo, Cout)
        xs = jnp.dot(sel, x_ref[0, pl.ds(base, CHUNK), :],
                     preferred_element_type=f32)                                 # (Mo, Cin)
        skip = jnp.dot(xs.astype(jnp.bfloat16), wskip, preferred_element_type=f32)
        skip = skip * ssc + sbi                                                  # skip ConvBN
        out_ref[0, pl.ds(c * Mo, Mo), :] = (pooled + skip).astype(out_ref.dtype)


# ----------------------------------------------------------------------------
# Wrapper: NCHW in / NCHW out.  Builds the padded flat slab, selector, specs.
# ----------------------------------------------------------------------------
def block_forward(x_nchw, params, *, reps, skip_conv, start_relu):
    assert len(params["sep"]) == reps
    N, Cin, H, W = x_nchw.shape
    Cout = params["sep"][-1]["scale"].shape[-1]

    Wp = ((W + 2 + 7) // 8) * 8            # 8-aligned padded row stride
    rows_target = 512
    kc = max(1, min(H, rows_target // Wp)) # whole image rows per chunk
    if kc < H and kc % 2:
        kc = max(2, kc - 1)                # chunk starts must be even rows for stride-2
    NC = -(-H // kc)
    CHUNK = kc * Wp
    L = H * Wp
    R = NC * CHUNK + 4 * Wp
    Ho = (H - 1) // 2 + 1
    Wo = (W - 1) // 2 + 1
    n_io = (kc + 1) // 2
    Mo = n_io * Wo

    # zero-padded, flattened input slab: slab row (h+2)*Wp + w holds x[n, :, h, w]
    x_nhwc = jnp.transpose(x_nchw, (0, 2, 3, 1)).astype(jnp.float32)
    x_p = jnp.pad(x_nhwc, ((0, 0), (0, 0), (0, Wp - W), (0, 0)))
    x_slab = jnp.pad(x_p.reshape(N, L, Cin), ((0, 0), (2 * Wp, R - L - 2 * Wp), (0, 0)))

    # interior-column mask (chunks are row-aligned, so one (CHUNK,1) mask serves all)
    col = jnp.arange(CHUNK, dtype=jnp.int32) % Wp
    mask = (col < W).astype(jnp.float32).reshape(CHUNK, 1)

    inputs = [x_slab, mask]
    in_specs = [
        pl.BlockSpec((1, R, Cin), lambda n: (n, 0, 0)),
        pl.BlockSpec((CHUNK, 1), lambda n: (0, 0)),
    ]
    if skip_conv:
        rows = (2 * jnp.arange(n_io, dtype=jnp.int32)[:, None] * Wp
                + 2 * jnp.arange(Wo, dtype=jnp.int32)[None, :]).reshape(Mo)
        sel = (jnp.arange(CHUNK, dtype=jnp.int32)[None, :] == rows[:, None]).astype(jnp.float32)
        inputs.append(sel)
        in_specs.append(pl.BlockSpec((Mo, CHUNK), lambda n: (0, 0)))

    ci = Cin
    for sp in params["sep"]:
        inputs += [sp["dw"], sp["pw"], sp["scale"], sp["bias"]]
        in_specs += [
            pl.BlockSpec((9, ci), lambda n: (0, 0)),
            pl.BlockSpec((ci, Cout), lambda n: (0, 0)),
            pl.BlockSpec((1, Cout), lambda n: (0, 0)),
            pl.BlockSpec((1, Cout), lambda n: (0, 0)),
        ]
        ci = Cout
    if skip_conv:
        sk = params["skip"]
        inputs += [sk["w"], sk["scale"], sk["bias"]]
        in_specs += [
            pl.BlockSpec((Cin, Cout), lambda n: (0, 0)),
            pl.BlockSpec((1, Cout), lambda n: (0, 0)),
            pl.BlockSpec((1, Cout), lambda n: (0, 0)),
        ]
        out_rows = NC * Mo
    else:
        assert Cin == Cout, "identity residual requires in_channels == out_channels"
        out_rows = NC * CHUNK
    out_shape = jax.ShapeDtypeStruct((N, out_rows, Cout), jnp.float32)
    out_spec = pl.BlockSpec((1, out_rows, Cout), lambda n: (n, 0, 0))

    # ping-pong buffer count (only allocate what is actually read/written)
    used = set()
    for r in range(reps):
        if r >= 1:
            used.add((r - 1) % 2)
        if r < reps - 1 or skip_conv:
            used.add(r % 2)
    n_mid = (max(used) + 1) if used else 0

    # explicit VMEM budget: scratch + double-buffered I/O blocks + constants, 2x headroom
    weight_bytes = sum(int(w.size * w.dtype.itemsize)
                       for sp in params["sep"] for w in sp.values())
    if skip_conv:
        weight_bytes += sum(int(w.size * w.dtype.itemsize) for w in params["skip"].values())
        weight_bytes += int(sel.size) * 4
    work = (4 * R * Cout * n_mid
            + 2 * 4 * R * Cin
            + 2 * 4 * out_rows * Cout
            + 2 * (weight_bytes + CHUNK * 4))
    vmem_limit = int(min(64 * 1024 * 1024, max(32 * 1024 * 1024, 2 * work)))

    kernel = functools.partial(_block_kernel, H=H, Wp=Wp, kc=kc, NC=NC, Cout=Cout,
                               reps=reps, skip_conv=skip_conv, start_relu=start_relu,
                               n_mid=n_mid)
    out = pl.pallas_call(
        kernel,
        out_shape=out_shape,
        grid=(N,),
        in_specs=in_specs,
        out_specs=out_spec,
        scratch_shapes=[pltpu.VMEM((R, Cout), jnp.float32) for _ in range(n_mid)],
        compiler_params=pltpu.CompilerParams(
            dimension_semantics=("parallel",),
            vmem_limit_bytes=vmem_limit),
    )(*inputs)

    # strip pad columns / overrun rows with cheap XLA slices; back to NCHW
    if skip_conv:
        y = out[:, :Ho * Wo, :].reshape(N, Ho, Wo, Cout)
    else:
        y = out[:, :L, :].reshape(N, H, Wp, Cout)[:, :, :W, :]
    return jnp.transpose(y, (0, 3, 1, 2))


# ----------------------------------------------------------------------------
# Deterministic synthetic parameters (eval-mode BN folded to scale/bias)
# ----------------------------------------------------------------------------
def _fold_bn(key, c):
    kg, kb = jax.random.split(key)
    gamma = 1.0 + 0.1 * jax.random.normal(kg, (c,), jnp.float32)
    beta = 0.1 * jax.random.normal(kb, (c,), jnp.float32)
    running_mean = jnp.zeros((c,), jnp.float32)   # real checkpoints: use actual stats
    running_var = jnp.ones((c,), jnp.float32)
    eps = 1e-5
    scale = gamma / jnp.sqrt(running_var + eps)
    bias = beta - running_mean * scale
    return scale.reshape(1, c), bias.reshape(1, c)


def init_block_params(key, in_channels, out_channels, *, reps, skip_conv):
    keys = jax.random.split(key, reps + 1)
    seps = []
    ci = in_channels
    for r in range(reps):
        k1, k2, k3 = jax.random.split(keys[r], 3)
        dw = (1.0 / 3.0) * jax.random.normal(k1, (9, ci), jnp.float32)
        pw = (jax.random.normal(k2, (ci, out_channels), jnp.float32)
              / jnp.sqrt(ci)).astype(jnp.bfloat16)
        scale, bias = _fold_bn(k3, out_channels)
        seps.append({"dw": dw, "pw": pw, "scale": scale, "bias": bias})
        ci = out_channels
    params = {"sep": seps}
    if skip_conv:
        k1, k2 = jax.random.split(keys[reps])
        w = (jax.random.normal(k1, (in_channels, out_channels), jnp.float32)
             / jnp.sqrt(in_channels)).astype(jnp.bfloat16)
        scale, bias = _fold_bn(k2, out_channels)
        params["skip"] = {"w": w, "scale": scale, "bias": bias}
    return params


# ----------------------------------------------------------------------------
# Plain-JAX reference (XLA convs / reduce_window) used to validate the kernel
# ----------------------------------------------------------------------------
def block_reference(x_nchw, params, *, reps, skip_conv, start_relu):
    x = jnp.transpose(x_nchw, (0, 2, 3, 1)).astype(jnp.float32)
    dn = ("NHWC", "HWIO", "NHWC")
    y = jax.nn.relu(x) if start_relu else x
    for r, sp in enumerate(params["sep"]):
        if r > 0:
            y = jax.nn.relu(y)
        c = sp["dw"].shape[1]
        dwk = sp["dw"].reshape(3, 3, 1, c)
        y = jax.lax.conv_general_dilated(y, dwk, (1, 1), ((1, 1), (1, 1)),
                                         dimension_numbers=dn, feature_group_count=c)
        pwk = sp["pw"].astype(jnp.float32).reshape(1, 1, *sp["pw"].shape)
        y = jax.lax.conv_general_dilated(y, pwk, (1, 1), ((0, 0), (0, 0)),
                                         dimension_numbers=dn)
        y = y * sp["scale"].reshape(1, 1, 1, -1) + sp["bias"].reshape(1, 1, 1, -1)
    if skip_conv:
        y = jax.lax.reduce_window(y, -jnp.inf, jax.lax.max,
                                  (1, 3, 3, 1), (1, 2, 2, 1),
                                  ((0, 0), (1, 1), (1, 1), (0, 0)))
        sk = params["skip"]
        skk = sk["w"].astype(jnp.float32).reshape(1, 1, *sk["w"].shape)
        idn = jax.lax.conv_general_dilated(x, skk, (2, 2), ((0, 0), (0, 0)),
                                           dimension_numbers=dn)
        idn = idn * sk["scale"].reshape(1, 1, 1, -1) + sk["bias"].reshape(1, 1, 1, -1)
    else:
        idn = x
    return jnp.transpose(y + idn, (0, 3, 1, 2))


if __name__ == "__main__":
    key = jax.random.PRNGKey(0)
    kp1, kx1, kp2, kx2 = jax.random.split(key, 4)

    # Config 1: Block(32, 64, reps=3, skip_conv=True, start_relu=True)  (module defaults)
    N, Cin, Cout, H, W = 2, 32, 64, 16, 16
    params1 = init_block_params(kp1, Cin, Cout, reps=3, skip_conv=True)
    x1 = jax.random.normal(kx1, (N, Cin, H, W), jnp.float32)
    fwd1 = jax.jit(functools.partial(block_forward, reps=3, skip_conv=True, start_relu=True))
    y1 = fwd1(x1, params1)
    jax.block_until_ready(y1)
    assert y1.shape == (N, Cout, H // 2, W // 2), y1.shape
    assert bool(jnp.isfinite(y1).all())
    ref1 = block_reference(x1, params1, reps=3, skip_conv=True, start_relu=True)
    err1 = float(jnp.max(jnp.abs(y1 - ref1)))
    tol1 = 0.1 * float(jnp.max(jnp.abs(ref1))) + 0.1    # bf16-MXU tolerance
    assert err1 <= tol1, (err1, tol1)

    # Config 2: Block(64, 64, reps=2, skip_conv=False, start_relu=False)  (identity skip)
    C2, H2, W2 = 64, 8, 8
    params2 = init_block_params(kp2, C2, C2, reps=2, skip_conv=False)
    x2 = jax.random.normal(kx2, (N, C2, H2, W2), jnp.float32)
    fwd2 = jax.jit(functools.partial(block_forward, reps=2, skip_conv=False, start_relu=False))
    y2 = fwd2(x2, params2)
    jax.block_until_ready(y2)
    assert y2.shape == (N, C2, H2, W2), y2.shape
    assert bool(jnp.isfinite(y2).all())
    ref2 = block_reference(x2, params2, reps=2, skip_conv=False, start_relu=False)
    err2 = float(jnp.max(jnp.abs(y2 - ref2)))
    tol2 = 0.1 * float(jnp.max(jnp.abs(ref2))) + 0.1
    assert err2 <= tol2, (err2, tol2)

    print("KERNEL_OK")
</pallas_src>

<mosaic_0001>
module attributes {stable_mosaic.version = 11 : i64} {
  func.func @_block_kernel(%arg0: i32, %arg1: memref<1x480x32xf32, #tpu.memory_space<vmem>>, %arg2: memref<384x1xf32, #tpu.memory_space<vmem>>, %arg3: memref<64x384xf32, #tpu.memory_space<vmem>>, %arg4: memref<9x32xf32, #tpu.memory_space<vmem>>, %arg5: memref<32x64xbf16, #tpu.memory_space<vmem>>, %arg6: memref<1x64xf32, #tpu.memory_space<vmem>>, %arg7: memref<1x64xf32, #tpu.memory_space<vmem>>, %arg8: memref<9x64xf32, #tpu.memory_space<vmem>>, %arg9: memref<64x64xbf16, #tpu.memory_space<vmem>>, %arg10: memref<1x64xf32, #tpu.memory_space<vmem>>, %arg11: memref<1x64xf32, #tpu.memory_space<vmem>>, %arg12: memref<9x64xf32, #tpu.memory_space<vmem>>, %arg13: memref<64x64xbf16, #tpu.memory_space<vmem>>, %arg14: memref<1x64xf32, #tpu.memory_space<vmem>>, %arg15: memref<1x64xf32, #tpu.memory_space<vmem>>, %arg16: memref<32x64xbf16, #tpu.memory_space<vmem>>, %arg17: memref<1x64xf32, #tpu.memory_space<vmem>>, %arg18: memref<1x64xf32, #tpu.memory_space<vmem>>, %arg19: memref<1x64x64xf32, #tpu.memory_space<vmem>>, %arg20: memref<480x64xf32, #tpu.memory_space<vmem>>, %arg21: memref<480x64xf32, #tpu.memory_space<vmem>>) attributes {dimension_semantics = [#tpu.dimension_semantics<parallel>], iteration_bounds = array<i64: 2>, scalar_prefetch = 0 : i64, scratch_operands = 2 : i64, tpu.core_type = #tpu.core_type<tc>, window_params = [{transform_indices = @transform_0, window_bounds = array<i64: 1, 480, 32>}, {pipeline_mode = #tpu.pipeline_mode<synchronous>, transform_indices = @transform_1, window_bounds = array<i64: 384, 1>}, {pipeline_mode = #tpu.pipeline_mode<synchronous>, transform_indices = @transform_2, window_bounds = array<i64: 64, 384>}, {pipeline_mode = #tpu.pipeline_mode<synchronous>, transform_indices = @transform_3, window_bounds = array<i64: 9, 32>}, {pipeline_mode = #tpu.pipeline_mode<synchronous>, transform_indices = @transform_4, window_bounds = array<i64: 32, 64>}, {pipeline_mode = #tpu.pipeline_mode<synchronous>, transform_indices = @transform_5, window_bounds = array<i64: 1, 64>}, {pipeline_mode = #tpu.pipeline_mode<synchronous>, transform_indices = @transform_6, window_bounds = array<i64: 1, 64>}, {pipeline_mode = #tpu.pipeline_mode<synchronous>, transform_indices = @transform_7, window_bounds = array<i64: 9, 64>}, {pipeline_mode = #tpu.pipeline_mode<synchronous>, transform_indices = @transform_8, window_bounds = array<i64: 64, 64>}, {pipeline_mode = #tpu.pipeline_mode<synchronous>, transform_indices = @transform_9, window_bounds = array<i64: 1, 64>}, {pipeline_mode = #tpu.pipeline_mode<synchronous>, transform_indices = @transform_10, window_bounds = array<i64: 1, 64>}, {pipeline_mode = #tpu.pipeline_mode<synchronous>, transform_indices = @transform_11, window_bounds = array<i64: 9, 64>}, {pipeline_mode = #tpu.pipeline_mode<synchronous>, transform_indices = @transform_12, window_bounds = array<i64: 64, 64>}, {pipeline_mode = #tpu.pipeline_mode<synchronous>, transform_indices = @transform_13, window_bounds = array<i64: 1, 64>}, {pipeline_mode = #tpu.pipeline_mode<synchronous>, transform_indices = @transform_14, window_bounds = array<i64: 1, 64>}, {pipeline_mode = #tpu.pipeline_mode<synchronous>, transform_indices = @transform_15, window_bounds = array<i64: 32, 64>}, {pipeline_mode = #tpu.pipeline_mode<synchronous>, transform_indices = @transform_16, window_bounds = array<i64: 1, 64>}, {pipeline_mode = #tpu.pipeline_mode<synchronous>, transform_indices = @transform_17, window_bounds = array<i64: 1, 64>}, {transform_indices = @transform_18, window_bounds = array<i64: 1, 64, 64>}]} {
    %c0 = arith.constant 0 : index
    %c0_0 = arith.constant 0 : index
    %0 = vector.load %arg2[%c0, %c0_0] : memref<384x1xf32, #tpu.memory_space<vmem>>, vector<384x1xf32>
    %cst = arith.constant 5.000000e-01 : f32
    %1 = vector.broadcast %cst : f32 to vector<384x1xf32>
    %2 = arith.cmpf ogt, %0, %1 : vector<384x1xf32>
    %cst_1 = arith.constant 0.000000e+00 : f32
    %3 = vector.broadcast %cst_1 : f32 to vector<48x64xf32>
    %c0_2 = arith.constant 0 : index
    %c0_3 = arith.constant 0 : index
    %4 = vector.load %arg20[%c0_2, %c0_3] : memref<480x64xf32, #tpu.memory_space<vmem>>, vector<48x64xf32>
    tpu.vector_store %arg20[%c0_2, %c0_3], %3 {strides = array<i32>} : memref<480x64xf32, #tpu.memory_space<vmem>>, vector<48x64xf32>,
    %cst_4 = arith.constant 0.000000e+00 : f32
    %5 = vector.broadcast %cst_4 : f32 to vector<48x64xf32>
    %c432 = arith.constant 432 : index
    %c0_5 = arith.constant 0 : index
    %6 = vector.load %arg20[%c432, %c0_5] : memref<480x64xf32, #tpu.memory_space<vmem>>, vector<48x64xf32>
    tpu.vector_store %arg20[%c432, %c0_5], %5 {strides = array<i32>} : memref<480x64xf32, #tpu.memory_space<vmem>>, vector<48x64xf32>,
    %cst_6 = arith.constant 0.000000e+00 : f32
    %7 = vector.broadcast %cst_6 : f32 to vector<48x64xf32>
    %c0_7 = arith.constant 0 : index
    %c0_8 = arith.constant 0 : index
    %8 = vector.load %arg21[%c0_7, %c0_8] : memref<480x64xf32, #tpu.memory_space<vmem>>, vector<48x64xf32>
    tpu.vector_store %arg21[%c0_7, %c0_8], %7 {strides = array<i32>} : memref<480x64xf32, #tpu.memory_space<vmem>>, vector<48x64xf32>,
    %cst_9 = arith.constant 0.000000e+00 : f32
    %9 = vector.broadcast %cst_9 : f32 to vector<48x64xf32>
    %c432_10 = arith.constant 432 : index
    %c0_11 = arith.constant 0 : index
    %10 = vector.load %arg21[%c432_10, %c0_11] : memref<480x64xf32, #tpu.memory_space<vmem>>, vector<48x64xf32>
    tpu.vector_store %arg21[%c432_10, %c0_11], %9 {strides = array<i32>} : memref<480x64xf32, #tpu.memory_space<vmem>>, vector<48x64xf32>,
    %c0_12 = arith.constant 0 : index
    %c0_13 = arith.constant 0 : index
    %11 = vector.load %arg4[%c0_12, %c0_13] : memref<9x32xf32, #tpu.memory_space<vmem>>, vector<9x32xf32>
    %12 = vector.extract_strided_slice %11 {offsets = [0, 0], sizes = [1, 32], strides = [1, 1]} : vector<9x32xf32> to vector<1x32xf32>
    %13 = vector.extract_strided_slice %11 {offsets = [1, 0], sizes = [1, 32], strides = [1, 1]} : vector<9x32xf32> to vector<1x32xf32>
    %14 = vector.extract_strided_slice %11 {offsets = [2, 0], sizes = [1, 32], strides = [1, 1]} : vector<9x32xf32> to vector<1x32xf32>
    %15 = vector.extract_strided_slice %11 {offsets = [3, 0], sizes = [1, 32], strides = [1, 1]} : vector<9x32xf32> to vector<1x32xf32>
    %16 = vector.extract_strided_slice %11 {offsets = [4, 0], sizes = [1, 32], strides = [1, 1]} : vector<9x32xf32> to vector<1x32xf32>
    %17 = vector.extract_strided_slice %11 {offsets = [5, 0], sizes = [1, 32], strides = [1, 1]} : vector<9x32xf32> to vector<1x32xf32>
    %18 = vector.extract_strided_slice %11 {offsets = [6, 0], sizes = [1, 32], strides = [1, 1]} : vector<9x32xf32> to vector<1x32xf32>
    %19 = vector.extract_strided_slice %11 {offsets = [7, 0], sizes = [1, 32], strides = [1, 1]} : vector<9x32xf32> to vector<1x32xf32>
    %20 = vector.extract_strided_slice %11 {offsets = [8, 0], sizes = [1, 32], strides = [1, 1]} : vector<9x32xf32> to vector<1x32xf32>
    %c0_14 = arith.constant 0 : index
    %c0_15 = arith.constant 0 : index
    %21 = vector.load %arg5[%c0_14, %c0_15] : memref<32x64xbf16, #tpu.memory_space<vmem>>, vector<32x64xbf16>
    %c0_16 = arith.constant 0 : index
    %c0_17 = arith.constant 0 : index
    %22 = vector.load %arg6[%c0_16, %c0_17] : memref<1x64xf32, #tpu.memory_space<vmem>>, vector<1x64xf32>
    %c0_18 = arith.constant 0 : index
    %c0_19 = arith.constant 0 : index
    %23 = vector.load %arg7[%c0_18, %c0_19] : memref<1x64xf32, #tpu.memory_space<vmem>>, vector<1x64xf32>
    %c0_20 = arith.constant 0 : index
    %c23 = arith.constant 23 : index
    %c0_21 = arith.constant 0 : index
    %24 = vector.load %arg1[%c0_20, %c23, %c0_21] : memref<1x480x32xf32, #tpu.memory_space<vmem>>, vector<1x432x32xf32>
    %25 = vector.shape_cast %24 : vector<1x432x32xf32> to vector<432x32xf32>
    %cst_22 = arith.constant 0.000000e+00 : f32
    %26 = vector.broadcast %cst_22 : f32 to vector<432x32xf32>
    %27 = arith.maximumf %25, %26 : vector<432x32xf32>
    %28 = vector.extract_strided_slice %27 {offsets = [0, 0], sizes = [384, 32], strides = [1, 1]} : vector<432x32xf32> to vector<384x32xf32>
    %29 = vector.broadcast %12 : vector<1x32xf32> to vector<384x32xf32>
    %30 = arith.mulf %28, %29 : vector<384x32xf32>
    %31 = vector.extract_strided_slice %27 {offsets = [24, 0], sizes = [384, 32], strides = [1, 1]} : vector<432x32xf32> to vector<384x32xf32>
    %32 = vector.broadcast %15 : vector<1x32xf32> to vector<384x32xf32>
    %33 = arith.mulf %31, %32 : vector<384x32xf32>
    %34 = arith.addf %30, %33 : vector<384x32xf32>
    %35 = vector.extract_strided_slice %27 {offsets = [48, 0], sizes = [384, 32], strides = [1, 1]} : vector<432x32xf32> to vector<384x32xf32>
    %36 = vector.broadcast %18 : vector<1x32xf32> to vector<384x32xf32>
    %37 = arith.mulf %35, %36 : vector<384x32xf32>
    %38 = arith.addf %34, %37 : vector<384x32xf32>
    %c0_23 = arith.constant 0 : index
    %c24 = arith.constant 24 : index
    %c0_24 = arith.constant 0 : index
    %39 = vector.load %arg1[%c0_23, %c24, %c0_24] : memref<1x480x32xf32, #tpu.memory_space<vmem>>, vector<1x432x32xf32>
    %40 = vector.shape_cast %39 : vector<1x432x32xf32> to vector<432x32xf32>
    %cst_25 = arith.constant 0.000000e+00 : f32
    %41 = vector.broadcast %cst_25 : f32 to vector<432x32xf32>
    %42 = arith.maximumf %40, %41 : vector<432x32xf32>
    %43 = vector.extract_strided_slice %42 {offsets = [0, 0], sizes = [384, 32], strides = [1, 1]} : vector<432x32xf32> to vector<384x32xf32>
    %44 = vector.broadcast %13 : vector<1x32xf32> to vector<384x32xf32>
    %45 = arith.mulf %43, %44 : vector<384x32xf32>
    %46 = arith.addf %38, %45 : vector<384x32xf32>
    %47 = vector.extract_strided_slice %42 {offsets = [24, 0], sizes = [384, 32], strides = [1, 1]} : vector<432x32xf32> to vector<384x32xf32>
    %48 = vector.broadcast %16 : vector<1x32xf32> to vector<384x32xf32>
    %49 = arith.mulf %47, %48 : vector<384x32xf32>
    %50 = arith.addf %46, %49 : vector<384x32xf32>
    %51 = vector.extract_strided_slice %42 {offsets = [48, 0], sizes = [384, 32], strides = [1, 1]} : vector<432x32xf32> to vector<384x32xf32>
    %52 = vector.broadcast %19 : vector<1x32xf32> to vector<384x32xf32>
    %53 = arith.mulf %51, %52 : vector<384x32xf32>
    %54 = arith.addf %50, %53 : vector<384x32xf32>
    %c0_26 = arith.constant 0 : index
    %c25 = arith.constant 25 : index
    %c0_27 = arith.constant 0 : index
    %55 = vector.load %arg1[%c0_26, %c25, %c0_27] : memref<1x480x32xf32, #tpu.memory_space<vmem>>, vector<1x432x32xf32>
    %56 = vector.shape_cast %55 : vector<1x432x32xf32> to vector<432x32xf32>
    %cst_28 = arith.constant 0.000000e+00 : f32
    %57 = vector.broadcast %cst_28 : f32 to vector<432x32xf32>
    %58 = arith.maximumf %56, %57 : vector<432x32xf32>
    %59 = vector.extract_strided_slice %58 {offsets = [0, 0], sizes = [384, 32], strides = [1, 1]} : vector<432x32xf32> to vector<384x32xf32>
    %60 = vector.broadcast %14 : vector<1x32xf32> to vector<384x32xf32>
    %61 = arith.mulf %59, %60 : vector<384x32xf32>
    %62 = arith.addf %54, %61 : vector<384x32xf32>
    %63 = vector.extract_strided_slice %58 {offsets = [24, 0], sizes = [384, 32], strides = [1, 1]} : vector<432x32xf32> to vector<384x32xf32>
    %64 = vector.broadcast %17 : vector<1x32xf32> to vector<384x32xf32>
    %65 = arith.mulf %63, %64 : vector<384x32xf32>
    %66 = arith.addf %62, %65 : vector<384x32xf32>
    %67 = vector.extract_strided_slice %58 {offsets = [48, 0], sizes = [384, 32], strides = [1, 1]} : vector<432x32xf32> to vector<384x32xf32>
    %68 = vector.broadcast %20 : vector<1x32xf32> to vector<384x32xf32>
    %69 = arith.mulf %67, %68 : vector<384x32xf32>
    %70 = arith.addf %66, %69 : vector<384x32xf32>
    %71 = arith.truncf %70 : vector<384x32xf32> to vector<384x32xbf16>
    %cst_29 = arith.constant dense<0.000000e+00> : vector<384x64xf32>
    %72 = tpu.matmul %71, %21, %cst_29 {dimension_numbers = #tpu.dot_dimension_numbers<[1], [0], [0], [1], [0, 0, 1, 1], [], []>} : vector<384x32xbf16>, vector<32x64xbf16>, vector<384x64xf32> -> vector<384x64xf32>
    %73 = vector.broadcast %22 : vector<1x64xf32> to vector<384x64xf32>
    %74 = arith.mulf %72, %73 : vector<384x64xf32>
    %75 = vector.broadcast %23 : vector<1x64xf32> to vector<384x64xf32>
    %76 = arith.addf %74, %75 : vector<384x64xf32>
    %cst_30 = arith.constant 0.000000e+00 : f32
    %77 = vector.broadcast %cst_30 : f32 to vector<384x64xf32>
    %78 = arith.maximumf %76, %77 : vector<384x64xf32>
    %cst_31 = arith.constant 0.000000e+00 : f32
    %79 = vector.shape_cast %2 : vector<384x1xi1> to vector<384x1xi1>
    %80 = vector.broadcast %79 : vector<384x1xi1> to vector<384x64xi1>
    %81 = vector.broadcast %cst_31 : f32 to vector<384x64xf32>
    %82 = arith.select %80, %78, %81 : vector<384x64xi1>, vector<384x64xf32>
    %c48 = arith.constant 48 : index
    %c0_32 = arith.constant 0 : index
    %83 = vector.load %arg20[%c48, %c0_32] : memref<480x64xf32, #tpu.memory_space<vmem>>, vector<384x64xf32>
    tpu.vector_store %arg20[%c48, %c0_32], %82 {strides = array<i32>} : memref<480x64xf32, #tpu.memory_space<vmem>>, vector<384x64xf32>,
    %c0_33 = arith.constant 0 : index
    %c0_34 = arith.constant 0 : index
    %84 = vector.load %arg8[%c0_33, %c0_34] : memref<9x64xf32, #tpu.memory_space<vmem>>, vector<9x64xf32>
    %85 = vector.extract_strided_slice %84 {offsets = [0, 0], sizes = [1, 64], strides = [1, 1]} : vector<9x64xf32> to vector<1x64xf32>
    %86 = vector.extract_strided_slice %84 {offsets = [1, 0], sizes = [1, 64], strides = [1, 1]} : vector<9x64xf32> to vector<1x64xf32>
    %87 = vector.extract_strided_slice %84 {offsets = [2, 0], sizes = [1, 64], strides = [1, 1]} : vector<9x64xf32> to vector<1x64xf32>
    %88 = vector.extract_strided_slice %84 {offsets = [3, 0], sizes = [1, 64], strides = [1, 1]} : vector<9x64xf32> to vector<1x64xf32>
    %89 = vector.extract_strided_slice %84 {offsets = [4, 0], sizes = [1, 64], strides = [1, 1]} : vector<9x64xf32> to vector<1x64xf32>
    %90 = vector.extract_strided_slice %84 {offsets = [5, 0], sizes = [1, 64], strides = [1, 1]} : vector<9x64xf32> to vector<1x64xf32>
    %91 = vector.extract_strided_slice %84 {offsets = [6, 0], sizes = [1, 64], strides = [1, 1]} : vector<9x64xf32> to vector<1x64xf32>
    %92 = vector.extract_strided_slice %84 {offsets = [7, 0], sizes = [1, 64], strides = [1, 1]} : vector<9x64xf32> to vector<1x64xf32>
    %93 = vector.extract_strided_slice %84 {offsets = [8, 0], sizes = [1, 64], strides = [1, 1]} : vector<9x64xf32> to vector<1x64xf32>
    %c0_35 = arith.constant 0 : index
    %c0_36 = arith.constant 0 : index
    %94 = vector.load %arg9[%c0_35, %c0_36] : memref<64x64xbf16, #tpu.memory_space<vmem>>, vector<64x64xbf16>
    %c0_37 = arith.constant 0 : index
    %c0_38 = arith.constant 0 : index
    %95 = vector.load %arg10[%c0_37, %c0_38] : memref<1x64xf32, #tpu.memory_space<vmem>>, vector<1x64xf32>
    %c0_39 = arith.constant 0 : index
    %c0_40 = arith.constant 0 : index
    %96 = vector.load %arg11[%c0_39, %c0_40] : memref<1x64xf32, #tpu.memory_space<vmem>>, vector<1x64xf32>
    %c23_41 = arith.constant 23 : index
    %c0_42 = arith.constant 0 : index
    %97 = vector.load %arg20[%c23_41, %c0_42] : memref<480x64xf32, #tpu.memory_space<vmem>>, vector<432x64xf32>
    %98 = vector.extract_strided_slice %97 {offsets = [0, 0], sizes = [384, 64], strides = [1, 1]} : vector<432x64xf32> to vector<384x64xf32>
    %99 = vector.broadcast %85 : vector<1x64xf32> to vector<384x64xf32>
    %100 = arith.mulf %98, %99 : vector<384x64xf32>
    %101 = vector.extract_strided_slice %97 {offsets = [24, 0], sizes = [384, 64], strides = [1, 1]} : vector<432x64xf32> to vector<384x64xf32>
    %102 = vector.broadcast %88 : vector<1x64xf32> to vector<384x64xf32>
    %103 = arith.mulf %101, %102 : vector<384x64xf32>
    %104 = arith.addf %100, %103 : vector<384x64xf32>
    %105 = vector.extract_strided_slice %97 {offsets = [48, 0], sizes = [384, 64], strides = [1, 1]} : vector<432x64xf32> to vector<384x64xf32>
    %106 = vector.broadcast %91 : vector<1x64xf32> to vector<384x64xf32>
    %107 = arith.mulf %105, %106 : vector<384x64xf32>
    %108 = arith.addf %104, %107 : vector<384x64xf32>
    %c24_43 = arith.constant 24 : index
    %c0_44 = arith.constant 0 : index
    %109 = vector.load %arg20[%c24_43, %c0_44] : memref<480x64xf32, #tpu.memory_space<vmem>>, vector<432x64xf32>
    %110 = vector.extract_strided_slice %109 {offsets = [0, 0], sizes = [384, 64], strides = [1, 1]} : vector<432x64xf32> to vector<384x64xf32>
    %111 = vector.broadcast %86 : vector<1x64xf32> to vector<384x64xf32>
    %112 = arith.mulf %110, %111 : vector<384x64xf32>
    %113 = arith.addf %108, %112 : vector<384x64xf32>
    %114 = vector.extract_strided_slice %109 {offsets = [24, 0], sizes = [384, 64], strides = [1, 1]} : vector<432x64xf32> to vector<384x64xf32>
    %115 = vector.broadcast %89 : vector<1x64xf32> to vector<384x64xf32>
    %116 = arith.mulf %114, %115 : vector<384x64xf32>
    %117 = arith.addf %113, %116 : vector<384x64xf32>
    %118 = vector.extract_strided_slice %109 {offsets = [48, 0], sizes = [384, 64], strides = [1, 1]} : vector<432x64xf32> to vector<384x64xf32>
    %119 = vector.broadcast %92 : vector<1x64xf32> to vector<384x64xf32>
    %120 = arith.mulf %118, %119 : vector<384x64xf32>
    %121 = arith.addf %117, %120 : vector<384x64xf32>
    %c25_45 = arith.constant 25 : index
    %c0_46 = arith.constant 0 : index
    %122 = vector.load %arg20[%c25_45, %c0_46] : memref<480x64xf32, #tpu.memory_space<vmem>>, vector<432x64xf32>
    %123 = vector.extract_strided_slice %122 {offsets = [0, 0], sizes = [384, 64], strides = [1, 1]} : vector<432x64xf32> to vector<384x64xf32>
    %124 = vector.broadcast %87 : vector<1x64xf32> to vector<384x64xf32>
    %125 = arith.mulf %123, %124 : vector<384x64xf32>
    %126 = arith.addf %121, %125 : vector<384x64xf32>
    %127 = vector.extract_strided_slice %122 {offsets = [24, 0], sizes = [384, 64], strides = [1, 1]} : vector<432x64xf32> to vector<384x64xf32>
    %128 = vector.broadcast %90 : vector<1x64xf32> to vector<384x64xf32>
    %129 = arith.mulf %127, %128 : vector<384x64xf32>
    %130 = arith.addf %126, %129 : vector<384x64xf32>
    %131 = vector.extract_strided_slice %122 {offsets = [48, 0], sizes = [384, 64], strides = [1, 1]} : vector<432x64xf32> to vector<384x64xf32>
    %132 = vector.broadcast %93 : vector<1x64xf32> to vector<384x64xf32>
    %133 = arith.mulf %131, %132 : vector<384x64xf32>
    %134 = arith.addf %130, %133 : vector<384x64xf32>
    %135 = arith.truncf %134 : vector<384x64xf32> to vector<384x64xbf16>
    %cst_47 = arith.constant dense<0.000000e+00> : vector<384x64xf32>
    %136 = tpu.matmul %135, %94, %cst_47 {dimension_numbers = #tpu.dot_dimension_numbers<[1], [0], [0], [1], [0, 0, 1, 1], [], []>} : vector<384x64xbf16>, vector<64x64xbf16>, vector<384x64xf32> -> vector<384x64xf32>
    %137 = vector.broadcast %95 : vector<1x64xf32> to vector<384x64xf32>
    %138 = arith.mulf %136, %137 : vector<384x64xf32>
    %139 = vector.broadcast %96 : vector<1x64xf32> to vector<384x64xf32>
    %140 = arith.addf %138, %139 : vector<384x64xf32>
    %cst_48 = arith.constant 0.000000e+00 : f32
    %141 = vector.broadcast %cst_48 : f32 to vector<384x64xf32>
    %142 = arith.maximumf %140, %141 : vector<384x64xf32>
    %cst_49 = arith.constant 0.000000e+00 : f32
    %143 = vector.shape_cast %2 : vector<384x1xi1> to vector<384x1xi1>
    %144 = vector.broadcast %143 : vector<384x1xi1> to vector<384x64xi1>
    %145 = vector.broadcast %cst_49 : f32 to vector<384x64xf32>
    %146 = arith.select %144, %142, %145 : vector<384x64xi1>, vector<384x64xf32>
    %c48_50 = arith.constant 48 : index
    %c0_51 = arith.constant 0 : index
    %147 = vector.load %arg21[%c48_50, %c0_51] : memref<480x64xf32, #tpu.memory_space<vmem>>, vector<384x64xf32>
    tpu.vector_store %arg21[%c48_50, %c0_51], %146 {strides = array<i32>} : memref<480x64xf32, #tpu.memory_space<vmem>>, vector<384x64xf32>,
    %c0_52 = arith.constant 0 : index
    %c0_53 = arith.constant 0 : index
    %148 = vector.load %arg12[%c0_52, %c0_53] : memref<9x64xf32, #tpu.memory_space<vmem>>, vector<9x64xf32>
    %149 = vector.extract_strided_slice %148 {offsets = [0, 0], sizes = [1, 64], strides = [1, 1]} : vector<9x64xf32> to vector<1x64xf32>
    %150 = vector.extract_strided_slice %148 {offsets = [1, 0], sizes = [1, 64], strides = [1, 1]} : vector<9x64xf32> to vector<1x64xf32>
    %151 = vector.extract_strided_slice %148 {offsets = [2, 0], sizes = [1, 64], strides = [1, 1]} : vector<9x64xf32> to vector<1x64xf32>
    %152 = vector.extract_strided_slice %148 {offsets = [3, 0], sizes = [1, 64], strides = [1, 1]} : vector<9x64xf32> to vector<1x64xf32>
    %153 = vector.extract_strided_slice %148 {offsets = [4, 0], sizes = [1, 64], strides = [1, 1]} : vector<9x64xf32> to vector<1x64xf32>
    %154 = vector.extract_strided_slice %148 {offsets = [5, 0], sizes = [1, 64], strides = [1, 1]} : vector<9x64xf32> to vector<1x64xf32>
    %155 = vector.extract_strided_slice %148 {offsets = [6, 0], sizes = [1, 64], strides = [1, 1]} : vector<9x64xf32> to vector<1x64xf32>
    %156 = vector.extract_strided_slice %148 {offsets = [7, 0], sizes = [1, 64], strides = [1, 1]} : vector<9x64xf32> to vector<1x64xf32>
    %157 = vector.extract_strided_slice %148 {offsets = [8, 0], sizes = [1, 64], strides = [1, 1]} : vector<9x64xf32> to vector<1x64xf32>
    %c0_54 = arith.constant 0 : index
    %c0_55 = arith.constant 0 : index
    %158 = vector.load %arg13[%c0_54, %c0_55] : memref<64x64xbf16, #tpu.memory_space<vmem>>, vector<64x64xbf16>
    %c0_56 = arith.constant 0 : index
    %c0_57 = arith.constant 0 : index
    %159 = vector.load %arg14[%c0_56, %c0_57] : memref<1x64xf32, #tpu.memory_space<vmem>>, vector<1x64xf32>
    %c0_58 = arith.constant 0 : index
    %c0_59 = arith.constant 0 : index
    %160 = vector.load %arg15[%c0_58, %c0_59] : memref<1x64xf32, #tpu.memory_space<vmem>>, vector<1x64xf32>
    %c23_60 = arith.constant 23 : index
    %c0_61 = arith.constant 0 : index
    %161 = vector.load %arg21[%c23_60, %c0_61] : memref<480x64xf32, #tpu.memory_space<vmem>>, vector<432x64xf32>
    %162 = vector.extract_strided_slice %161 {offsets = [0, 0], sizes = [384, 64], strides = [1, 1]} : vector<432x64xf32> to vector<384x64xf32>
    %163 = vector.broadcast %149 : vector<1x64xf32> to vector<384x64xf32>
    %164 = arith.mulf %162, %163 : vector<384x64xf32>
    %165 = vector.extract_strided_slice %161 {offsets = [24, 0], sizes = [384, 64], strides = [1, 1]} : vector<432x64xf32> to vector<384x64xf32>
    %166 = vector.broadcast %152 : vector<1x64xf32> to vector<384x64xf32>
    %167 = arith.mulf %165, %166 : vector<384x64xf32>
    %168 = arith.addf %164, %167 : vector<384x64xf32>
    %169 = vector.extract_strided_slice %161 {offsets = [48, 0], sizes = [384, 64], strides = [1, 1]} : vector<432x64xf32> to vector<384x64xf32>
    %170 = vector.broadcast %155 : vector<1x64xf32> to vector<384x64xf32>
    %171 = arith.mulf %169, %170 : vector<384x64xf32>
    %172 = arith.addf %168, %171 : vector<384x64xf32>
    %c24_62 = arith.constant 24 : index
    %c0_63 = arith.constant 0 : index
    %173 = vector.load %arg21[%c24_62, %c0_63] : memref<480x64xf32, #tpu.memory_space<vmem>>, vector<432x64xf32>
    %174 = vector.extract_strided_slice %173 {offsets = [0, 0], sizes = [384, 64], strides = [1, 1]} : vector<432x64xf32> to vector<384x64xf32>
    %175 = vector.broadcast %150 : vector<1x64xf32> to vector<384x64xf32>
    %176 = arith.mulf %174, %175 : vector<384x64xf32>
    %177 = arith.addf %172, %176 : vector<384x64xf32>
    %178 = vector.extract_strided_slice %173 {offsets = [24, 0], sizes = [384, 64], strides = [1, 1]} : vector<432x64xf32> to vector<384x64xf32>
    %179 = vector.broadcast %153 : vector<1x64xf32> to vector<384x64xf32>
    %180 = arith.mulf %178, %179 : vector<384x64xf32>
    %181 = arith.addf %177, %180 : vector<384x64xf32>
    %182 = vector.extract_strided_slice %173 {offsets = [48, 0], sizes = [384, 64], strides = [1, 1]} : vector<432x64xf32> to vector<384x64xf32>
    %183 = vector.broadcast %156 : vector<1x64xf32> to vector<384x64xf32>
    %184 = arith.mulf %182, %183 : vector<384x64xf32>
    %185 = arith.addf %181, %184 : vector<384x64xf32>
    %c25_64 = arith.constant 25 : index
    %c0_65 = arith.constant 0 : index
    %186 = vector.load %arg21[%c25_64, %c0_65] : memref<480x64xf32, #tpu.memory_space<vmem>>, vector<432x64xf32>
    %187 = vector.extract_strided_slice %186 {offsets = [0, 0], sizes = [384, 64], strides = [1, 1]} : vector<432x64xf32> to vector<384x64xf32>
    %188 = vector.broadcast %151 : vector<1x64xf32> to vector<384x64xf32>
    %189 = arith.mulf %187, %188 : vector<384x64xf32>
    %190 = arith.addf %185, %189 : vector<384x64xf32>
    %191 = vector.extract_strided_slice %186 {offsets = [24, 0], sizes = [384, 64], strides = [1, 1]} : vector<432x64xf32> to vector<384x64xf32>
    %192 = vector.broadcast %154 : vector<1x64xf32> to vector<384x64xf32>
    %193 = arith.mulf %191, %192 : vector<384x64xf32>
    %194 = arith.addf %190, %193 : vector<384x64xf32>
    %195 = vector.extract_strided_slice %186 {offsets = [48, 0], sizes = [384, 64], strides = [1, 1]} : vector<432x64xf32> to vector<384x64xf32>
    %196 = vector.broadcast %157 : vector<1x64xf32> to vector<384x64xf32>
    %197 = arith.mulf %195, %196 : vector<384x64xf32>
    %198 = arith.addf %194, %197 : vector<384x64xf32>
    %199 = arith.truncf %198 : vector<384x64xf32> to vector<384x64xbf16>
    %cst_66 = arith.constant dense<0.000000e+00> : vector<384x64xf32>
    %200 = tpu.matmul %199, %158, %cst_66 {dimension_numbers = #tpu.dot_dimension_numbers<[1], [0], [0], [1], [0, 0, 1, 1], [], []>} : vector<384x64xbf16>, vector<64x64xbf16>, vector<384x64xf32> -> vector<384x64xf32>
    %201 = vector.broadcast %159 : vector<1x64xf32> to vector<384x64xf32>
    %202 = arith.mulf %200, %201 : vector<384x64xf32>
    %203 = vector.broadcast %160 : vector<1x64xf32> to vector<384x64xf32>
    %204 = arith.addf %202, %203 : vector<384x64xf32>
    %cst_67 = arith.constant -1.000000e+30 : f32
    %205 = vector.shape_cast %2 : vector<384x1xi1> to vector<384x1xi1>
    %206 = vector.broadcast %205 : vector<384x1xi1> to vector<384x64xi1>
    %207 = vector.broadcast %cst_67 : f32 to vector<384x64xf32>
    %208 = arith.select %206, %204, %207 : vector<384x64xi1>, vector<384x64xf32>
    %c48_68 = arith.constant 48 : index
    %c0_69 = arith.constant 0 : index
    %209 = vector.load %arg20[%c48_68, %c0_69] : memref<480x64xf32, #tpu.memory_space<vmem>>, vector<384x64xf32>
    tpu.vector_store %arg20[%c48_68, %c0_69], %208 {strides = array<i32>} : memref<480x64xf32, #tpu.memory_space<vmem>>, vector<384x64xf32>,
    %cst_70 = arith.constant -1.000000e+30 : f32
    %210 = vector.broadcast %cst_70 : f32 to vector<48x64xf32>
    %c0_71 = arith.constant 0 : index
    %c0_72 = arith.constant 0 : index
    %211 = vector.load %arg20[%c0_71, %c0_72] : memref<480x64xf32, #tpu.memory_space<vmem>>, vector<48x64xf32>
    tpu.vector_store %arg20[%c0_71, %c0_72], %210 {strides = array<i32>} : memref<480x64xf32, #tpu.memory_space<vmem>>, vector<48x64xf32>,
    %cst_73 = arith.constant -1.000000e+30 : f32
    %212 = vector.broadcast %cst_73 : f32 to vector<48x64xf32>
    %c432_74 = arith.constant 432 : index
    %c0_75 = arith.constant 0 : index
    %213 = vector.load %arg20[%c432_74, %c0_75] : memref<480x64xf32, #tpu.memory_space<vmem>>, vector<48x64xf32>
    tpu.vector_store %arg20[%c432_74, %c0_75], %212 {strides = array<i32>} : memref<480x64xf32, #tpu.memory_space<vmem>>, vector<48x64xf32>,
    %c0_76 = arith.constant 0 : index
    %c0_77 = arith.constant 0 : index
    %214 = vector.load %arg3[%c0_76, %c0_77] : memref<64x384xf32, #tpu.memory_space<vmem>>, vector<64x384xf32>
    %c0_78 = arith.constant 0 : index
    %c0_79 = arith.constant 0 : index
    %215 = vector.load %arg16[%c0_78, %c0_79] : memref<32x64xbf16, #tpu.memory_space<vmem>>, vector<32x64xbf16>
    %c0_80 = arith.constant 0 : index
    %c0_81 = arith.constant 0 : index
    %216 = vector.load %arg17[%c0_80, %c0_81] : memref<1x64xf32, #tpu.memory_space<vmem>>, vector<1x64xf32>
    %c0_82 = arith.constant 0 : index
    %c0_83 = arith.constant 0 : index
    %217 = vector.load %arg18[%c0_82, %c0_83] : memref<1x64xf32, #tpu.memory_space<vmem>>, vector<1x64xf32>
    %c23_84 = arith.constant 23 : index
    %c0_85 = arith.constant 0 : index
    %218 = vector.load %arg20[%c23_84, %c0_85] : memref<480x64xf32, #tpu.memory_space<vmem>>, vector<432x64xf32>
    %219 = vector.extract_strided_slice %218 {offsets = [0, 0], sizes = [384, 64], strides = [1, 1]} : vector<432x64xf32> to vector<384x64xf32>
    %220 = vector.extract_strided_slice %218 {offsets = [24, 0], sizes = [384, 64], strides = [1, 1]} : vector<432x64xf32> to vector<384x64xf32>
    %221 = arith.maximumf %219, %220 : vector<384x64xf32>
    %222 = vector.extract_strided_slice %218 {offsets = [48, 0], sizes = [384, 64], strides = [1, 1]} : vector<432x64xf32> to vector<384x64xf32>
    %223 = arith.maximumf %221, %222 : vector<384x64xf32>
    %c24_86 = arith.constant 24 : index
    %c0_87 = arith.constant 0 : index
    %224 = vector.load %arg20[%c24_86, %c0_87] : memref<480x64xf32, #tpu.memory_space<vmem>>, vector<432x64xf32>
    %225 = vector.extract_strided_slice %224 {offsets = [0, 0], sizes = [384, 64], strides = [1, 1]} : vector<432x64xf32> to vector<384x64xf32>
    %226 = arith.maximumf %223, %225 : vector<384x64xf32>
    %227 = vector.extract_strided_slice %224 {offsets = [24, 0], sizes = [384, 64], strides = [1, 1]} : vector<432x64xf32> to vector<384x64xf32>
    %228 = arith.maximumf %226, %227 : vector<384x64xf32>
    %229 = vector.extract_strided_slice %224 {offsets = [48, 0], sizes = [384, 64], strides = [1, 1]} : vector<432x64xf32> to vector<384x64xf32>
    %230 = arith.maximumf %228, %229 : vector<384x64xf32>
    %c25_88 = arith.constant 25 : index
    %c0_89 = arith.constant 0 : index
    %231 = vector.load %arg20[%c25_88, %c0_89] : memref<480x64xf32, #tpu.memory_space<vmem>>, vector<432x64xf32>
    %232 = vector.extract_strided_slice %231 {offsets = [0, 0], sizes = [384, 64], strides = [1, 1]} : vector<432x64xf32> to vector<384x64xf32>
    %233 = arith.maximumf %230, %232 : vector<384x64xf32>
    %234 = vector.extract_strided_slice %231 {offsets = [24, 0], sizes = [384, 64], strides = [1, 1]} : vector<432x64xf32> to vector<384x64xf32>
    %235 = arith.maximumf %233, %234 : vector<384x64xf32>
    %236 = vector.extract_strided_slice %231 {offsets = [48, 0], sizes = [384, 64], strides = [1, 1]} : vector<432x64xf32> to vector<384x64xf32>
    %237 = arith.maximumf %235, %236 : vector<384x64xf32>
    %cst_90 = arith.constant dense<0.000000e+00> : vector<64x64xf32>
    %238 = tpu.matmul %214, %237, %cst_90 {dimension_numbers = #tpu.dot_dimension_numbers<[1], [0], [0], [1], [0, 0, 1, 1], [], []>} : vector<64x384xf32>, vector<384x64xf32>, vector<64x64xf32> -> vector<64x64xf32>
    %c0_91 = arith.constant 0 : index
    %c48_92 = arith.constant 48 : index
    %c0_93 = arith.constant 0 : index
    %239 = vector.load %arg1[%c0_91, %c48_92, %c0_93] : memref<1x480x32xf32, #tpu.memory_space<vmem>>, vector<1x384x32xf32>
    %240 = vector.shape_cast %239 : vector<1x384x32xf32> to vector<384x32xf32>
    %cst_94 = arith.constant dense<0.000000e+00> : vector<64x32xf32>
    %241 = tpu.matmul %214, %240, %cst_94 {dimension_numbers = #tpu.dot_dimension_numbers<[1], [0], [0], [1], [0, 0, 1, 1], [], []>} : vector<64x384xf32>, vector<384x32xf32>, vector<64x32xf32> -> vector<64x32xf32>
    %242 = arith.truncf %241 : vector<64x32xf32> to vector<64x32xbf16>
    %cst_95 = arith.constant dense<0.000000e+00> : vector<64x64xf32>
    %243 = tpu.matmul %242, %215, %cst_95 {dimension_numbers = #tpu.dot_dimension_numbers<[1], [0], [0], [1], [0, 0, 1, 1], [], []>} : vector<64x32xbf16>, vector<32x64xbf16>, vector<64x64xf32> -> vector<64x64xf32>
    %244 = vector.broadcast %216 : vector<1x64xf32> to vector<64x64xf32>
    %245 = arith.mulf %243, %244 : vector<64x64xf32>
    %246 = vector.broadcast %217 : vector<1x64xf32> to vector<64x64xf32>
    %247 = arith.addf %245, %246 : vector<64x64xf32>
    %248 = arith.addf %238, %247 : vector<64x64xf32>
    %c0_96 = arith.constant 0 : index
    %c0_97 = arith.constant 0 : index
    %c0_98 = arith.constant 0 : index
    %249 = vector.load %arg19[%c0_96, %c0_97, %c0_98] : memref<1x64x64xf32, #tpu.memory_space<vmem>>, vector<1x64x64xf32>
    %250 = vector.shape_cast %249 : vector<1x64x64xf32> to vector<64x64xf32>
    %251 = vector.shape_cast %248 : vector<64x64xf32> to vector<1x64x64xf32>
    tpu.vector_store %arg19[%c0_96, %c0_97, %c0_98], %251 {strides = array<i32>} : memref<1x64x64xf32, #tpu.memory_space<vmem>>, vector<1x64x64xf32>,
    return
  }
  func.func @transform_0(%arg0: i32) -> (i32, i32, i32) {
    %c0_i32 = arith.constant 0 : i32
    %c0_i32_0 = arith.constant 0 : i32
    %c0_i32_1 = arith.constant 0 : i32
    return %arg0, %c0_i32, %c0_i32_0 : i32, i32, i32
  }
  func.func @transform_1(%arg0: i32) -> (i32, i32) {
    %c0_i32 = arith.constant 0 : i32
    %c0_i32_0 = arith.constant 0 : i32
    %c0_i32_1 = arith.constant 0 : i32
    return %c0_i32, %c0_i32_0 : i32, i32
  }
  func.func @transform_2(%arg0: i32) -> (i32, i32) {
    %c0_i32 = arith.constant 0 : i32
    %c0_i32_0 = arith.constant 0 : i32
    %c0_i32_1 = arith.constant 0 : i32
    return %c0_i32, %c0_i32_0 : i32, i32
  }
  func.func @transform_3(%arg0: i32) -> (i32, i32) {
    %c0_i32 = arith.constant 0 : i32
    %c0_i32_0 = arith.constant 0 : i32
    %c0_i32_1 = arith.constant 0 : i32
    return %c0_i32, %c0_i32_0 : i32, i32
  }
  func.func @transform_4(%arg0: i32) -> (i32, i32) {
    %c0_i32 = arith.constant 0 : i32
    %c0_i32_0 = arith.constant 0 : i32
    %c0_i32_1 = arith.constant 0 : i32
    return %c0_i32, %c0_i32_0 : i32, i32
  }
  func.func @transform_5(%arg0: i32) -> (i32, i32) {
    %c0_i32 = arith.constant 0 : i32
    %c0_i32_0 = arith.constant 0 : i32
    %c0_i32_1 = arith.constant 0 : i32
    return %c0_i32, %c0_i32_0 : i32, i32
  }
  func.func @transform_6(%arg0: i32) -> (i32, i32) {
    %c0_i32 = arith.constant 0 : i32
    %c0_i32_0 = arith.constant 0 : i32
    %c0_i32_1 = arith.constant 0 : i32
    return %c0_i32, %c0_i32_0 : i32, i32
  }
  func.func @transform_7(%arg0: i32) -> (i32, i32) {
    %c0_i32 = arith.constant 0 : i32
    %c0_i32_0 = arith.constant 0 : i32
    %c0_i32_1 = arith.constant 0 : i32
    return %c0_i32, %c0_i32_0 : i32, i32
  }
  func.func @transform_8(%arg0: i32) -> (i32, i32) {
    %c0_i32 = arith.constant 0 : i32
    %c0_i32_0 = arith.constant 0 : i32
    %c0_i32_1 = arith.constant 0 : i32
    return %c0_i32, %c0_i32_0 : i32, i32
  }
  func.func @transform_9(%arg0: i32) -> (i32, i32) {
    %c0_i32 = arith.constant 0 : i32
    %c0_i32_0 = arith.constant 0 : i32
    %c0_i32_1 = arith.constant 0 : i32
    return %c0_i32, %c0_i32_0 : i32, i32
  }
  func.func @transform_10(%arg0: i32) -> (i32, i32) {
    %c0_i32 = arith.constant 0 : i32
    %c0_i32_0 = arith.constant 0 : i32
    %c0_i32_1 = arith.constant 0 : i32
    return %c0_i32, %c0_i32_0 : i32, i32
  }
  func.func @transform_11(%arg0: i32) -> (i32, i32) {
    %c0_i32 = arith.constant 0 : i32
    %c0_i32_0 = arith.constant 0 : i32
    %c0_i32_1 = arith.constant 0 : i32
    return %c0_i32, %c0_i32_0 : i32, i32
  }
  func.func @transform_12(%arg0: i32) -> (i32, i32) {
    %c0_i32 = arith.constant 0 : i32
    %c0_i32_0 = arith.constant 0 : i32
    %c0_i32_1 = arith.constant 0 : i32
    return %c0_i32, %c0_i32_0 : i32, i32
  }
  func.func @transform_13(%arg0: i32) -> (i32, i32) {
    %c0_i32 = arith.constant 0 : i32
    %c0_i32_0 = arith.constant 0 : i32
    %c0_i32_1 = arith.constant 0 : i32
    return %c0_i32, %c0_i32_0 : i32, i32
  }
  func.func @transform_14(%arg0: i32) -> (i32, i32) {
    %c0_i32 = arith.constant 0 : i32
    %c0_i32_0 = arith.constant 0 : i32
    %c0_i32_1 = arith.constant 0 : i32
    return %c0_i32, %c0_i32_0 : i32, i32
  }
  func.func @transform_15(%arg0: i32) -> (i32, i32) {
    %c0_i32 = arith.constant 0 : i32
    %c0_i32_0 = arith.constant 0 : i32
    %c0_i32_1 = arith.constant 0 : i32
    return %c0_i32, %c0_i32_0 : i32, i32
  }
  func.func @transform_16(%arg0: i32) -> (i32, i32) {
    %c0_i32 = arith.constant 0 : i32
    %c0_i32_0 = arith.constant 0 : i32
    %c0_i32_1 = arith.constant 0 : i32
    return %c0_i32, %c0_i32_0 : i32, i32
  }
  func.func @transform_17(%arg0: i32) -> (i32, i32) {
    %c0_i32 = arith.constant 0 : i32
    %c0_i32_0 = arith.constant 0 : i32
    %c0_i32_1 = arith.constant 0 : i32
    return %c0_i32, %c0_i32_0 : i32, i32
  }
  func.func @transform_18(%arg0: i32) -> (i32, i32, i32) {
    %c0_i32 = arith.constant 0 : i32
    %c0_i32_0 = arith.constant 0 : i32
    %c0_i32_1 = arith.constant 0 : i32
    return %arg0, %c0_i32, %c0_i32_0 : i32, i32, i32
  }
}

</mosaic_0001>

<bundles_post_ra>
// kernel: block_forward.1
= control target key start
LH: loop header
LB: loop body
LE: loop exit
PB: predicated region body
PF: predicated region fallthrough
CT: control target
= control target key end

     0   :  { %s14689_s0 = inlined_call_operand.vmem [shape: f32[2,480,32], index: 0, kind: input, shape index: {}]   ;;  %s14690_s1 = inlined_call_operand.vmem [shape: f32[384,1], index: 1, kind: input, shape index: {}]   ;;  %s14691_s2 = inlined_call_operand.vmem [shape: f32[64,384], index: 2, kind: input, shape index: {}]   ;;  %s14692_s3 = inlined_call_operand.vmem [shape: f32[9,32], index: 3, kind: input, shape index: {}]   ;;  %s14693_s4 = inlined_call_operand.vmem [shape: bf16[32,64], index: 4, kind: input, shape index: {}]   ;;  %s14694_s5 = inlined_call_operand.vmem [shape: f32[1,64], index: 5, kind: input, shape index: {}]   ;;  %s14695_s6 = inlined_call_operand.vmem [shape: f32[1,64], index: 6, kind: input, shape index: {}]   ;;  %s14696_s7 = inlined_call_operand.vmem [shape: f32[9,64], index: 7, kind: input, shape index: {}]   ;;  %s14697_s8 = inlined_call_operand.vmem [shape: bf16[64,64], index: 8, kind: input, shape index: {}]   ;;  %s14698_s9 = inlined_call_operand.vmem [shape: f32[1,64], index: 9, kind: input, shape index: {}]   ;;  %s14699_s10 = inlined_call_operand.vmem [shape: f32[1,64], index: 10, kind: input, shape index: {}]   ;;  %s14700_s11 = inlined_call_operand.vmem [shape: f32[9,64], index: 11, kind: input, shape index: {}]   ;;  %s14701_s12 = inlined_call_operand.vmem [shape: bf16[64,64], index: 12, kind: input, shape index: {}]   ;;  %s14702_s13 = inlined_call_operand.vmem [shape: f32[1,64], index: 13, kind: input, shape index: {}]   ;;  %s14703_s14 = inlined_call_operand.vmem [shape: f32[1,64], index: 14, kind: input, shape index: {}]   ;;  %s14704_s15 = inlined_call_operand.vmem [shape: bf16[32,64], index: 15, kind: input, shape index: {}]   ;;  %s14705_s16 = inlined_call_operand.vmem [shape: f32[1,64], index: 16, kind: input, shape index: {}]   ;;  %s14706_s17 = inlined_call_operand.vmem [shape: f32[1,64], index: 17, kind: input, shape index: {}]   ;;  %s14707_s18 = inlined_call_operand.hbm [shape: f32[2,64,64], index: 18, kind: output, shape index: {}]  }
   0x1   :  { %14916 = sst [smem:[#allocation75_spill]] %s14689_s0 }
   0x2   :  { %14917 = sst [smem:[#allocation76_spill]] %s14690_s1 }
   0x3   :  { %14918 = sst [smem:[#allocation77_spill]] %s14691_s2 }
   0x4   :  { %14919 = sst [smem:[#allocation78_spill]] %s14692_s3 }
   0x5   :  { %14920 = sst [smem:[#allocation79_spill]] %s14693_s4 }
   0x6   :  { %14921 = sst [smem:[#allocation80_spill]] %s14694_s5 }
   0x7   :  { %14922 = sst [smem:[#allocation81_spill]] %s14695_s6 }
   0x8   :  { %23 = vsyncpa [#allocation5], 0 }
   0x9   :  { %25 = vsyncpa [#allocation5 + $0x1], 0  ;;  %s8180_s27 = smov 0   ;;  %s8182_s28 = smov 0  }
   0xa   :  { %s8184_s29 = smov 0   ;;  %s8186_s30 = smov 0  }
   0xb LB: > { %14923 = sst [smem:[#allocation7_spill]] %s8073_s29  ;;  %s8201_s0 = sadd.s32 4294967295, %s8077_s30   ;;  %s8077_s30 = sphi %s8186_s30, %s15334_s30   ;;  %s8073_s29 = sphi %s8184_s29, %s15333_s29   ;;  %s8069_s28 = sphi %s8182_s28, %s15332_s28   ;;  %s8065_s27 = sphi %s8180_s27, %s15331_s27  }
   0xc   : > { %s7165_s19 = sadd.s32 4294967294, %s8077_s30   ;;  %s8205_s1 = sadd.s32 1, %s8077_s30  }
   0xd   : > { %s421_s20 = sadd.s32 1, %s8073_s29  ;;  %s418_s21 = ssub.s32 %s8077_s30, %s8205_s1 }
   0xe   : > { %p431_p0 = scmp.ne.s32.totalorder %s8073_s29, %s8069_s28  ;;  %p419_p1 = scmp.eq.s32.totalorder %s418_s21, 0 }
   0xf   : > { %p432_p2 = scmp.eq.s32.totalorder %s8201_s0, 1  ;;  %p437_p3 = scmp.ne.s32.totalorder %s8069_s28, %s8065_s27 }
  0x10   : > { %p438_p4 = scmp.eq.s32.totalorder %s7165_s19, 1  ;;  %p7168_p7 = scmp.ge.s32.totalorder %s8077_s30, 1 }
  0x11   : > { %s8216_s22 = scalar_select %p419_p1, %s8073_s29, %s421_s20  }
  0x12   : > { %p8218_p5 = por %p432_p2, %p431_p0  ;;  %p8222_p6 = por %p438_p4, %p437_p3 }
  0x13   : > { %14924 = sst [smem:[#allocation8_spill]] %s8216_s22  ;;  %p515_p8 = scmp.lt.s32.totalorder %s8077_s30, 3 }
  0x15   : > { %p516_p9 = pnand %p7168_p7, %p515_p8 }
  0x17   : > { %519 = sbr.rel (%p516_p9) target bundleno = 1383 (0x567), region = 92 }
  0x1e   : > { %s14927_s4 = sld [smem:[#allocation79_spill]]  ;;  %v812_v1 = vlaneseq  ;;  %v14718_v2 = vmov 0   ;;  %p569_p10 = scmp.lt.s32.totalorder %s8201_s0, 1  ;;  %vm14744_vm3 = vcmask 261120  }
  0x1f   : > { %7961 = vset.pattern.permute.xlu0 %v14718_v2  ;;  %7962 = vset.pattern.permute.xlu1 %v14718_v2  ;;  %s14928_s22 = sld [smem:[#allocation76_spill]]  ;;  %s14929_s3 = sld [smem:[#allocation78_spill]] }
  0x20   : > { %v813_v5 = vshrl.u32 %v812_v1, 7  ;;  %s570_s24 = scalar_select %p569_p10, %s8201_s0, 1 }
  0x21   : > { %s14938_s20 = sld [smem:[#allocation75_spill]]  ;;  %s14953_s5 = sld [smem:[#allocation80_spill]] }
  0x22   : > { %v8245_v8 = vsub.s32 0, %v813_v5  ;;  %v8247_v9 = vsub.s32 3, %v813_v5  ;;  %v8249_v10 = vsub.s32 6, %v813_v5  ;;  %s7916_s26 = smul.u32 480, %s570_s24  ;;  %v8251_v11 = vsub.s32 1, %v813_v5  ;;  %s14956_s6 = sld [smem:[#allocation81_spill]] }
  0x23   : > { %v8253_v12 = vsub.s32 4, %v813_v5  ;;  %v8255_v13 = vsub.s32 7, %v813_v5  ;;  %v8257_v14 = vsub.s32 2, %v813_v5  ;;  %v8259_v15 = vsub.s32 5, %v813_v5  ;;  %s566_s19 = sand.u32 1, %s8069_s28   ;;  %s7275_s24 = sshll.u32 %s8201_s0, 10 }
  0x24   : > { %v7963_v0 = vld [vmem:[%s14927_s4] sm:$0xff]   ;;  %v7964_v3 = vld [vmem:[%s14927_s4 + $0x8] sm:$0xff]   ;;  %14930 = vst [vmem:[#allocation9_spill] sm:$0xff] %v8245_v8  ;;  %14931 = vst [vmem:[#allocation10_spill] sm:$0xff] %v8247_v9  ;;  %s14640_s4 = scalar_lea.hbm %s14707_s18, %s7275_s24  ;;  %s14648_s0 = scalar_lea.sflag [#allocation5], %s566_s19 }
  0x25   : > { %7524 = vmatprep.subr.bf16.mxu0 %v7963_v0  ;;  %v575_v4 = vld [vmem:[%s14928_s22] sm:$0xff]  ;;  %14932 = vst [vmem:[#allocation11_spill] sm:$0xff] %v8249_v10  ;;  %14933 = vst [vmem:[#allocation12_spill] sm:$0xff] %v8251_v11  ;;  %v8275_v18 = vld [vmem:[%s14928_s22 + $0x10] sm:$0xff] }
  0x26   : > { %7525 = vmatpush3.bf16.msra.mxu0 %v7963_v0  ;;  %vm623_vm0 = vcmp.gt.f32.partialorder %v575_v4, 0.5  ;;  %v696_v7 = vld [vmem:[%s14929_s3] sm:$0xff]  ;;  %14934 = vst [vmem:[#allocation13_spill] sm:$0xff] %v8253_v12  ;;  %14935 = vst [vmem:[#allocation14_spill] sm:$0xff] %v8255_v13  ;;  %v8295_v26 = vld [vmem:[%s14928_s22 + $0x8] sm:$0xff]  ;;  %vm625_vm1 = vcmp.gt.f32.partialorder %v8275_v18, 0.5 }
  0x27   : > { %7526 = vmatprep.subr.bf16.mxu0 %v7964_v3  ;;  %v2370_v6 = vsel %vm623_vm0, 1, %v14718_v2  ;;  %14936 = vst [vmem:[#allocation15_spill] sm:$0xff] %v8257_v14  ;;  %14937 = vst [vmem:[#allocation16_spill] sm:$0xff] %v8259_v15  ;;  %s8264_s21 = scalar_lea.vmem %s14938_s20, %s7916_s26  ;;  %v8267_v16 = vrot.slane %v696_v7, %v8245_v8  ;;  %v8270_v17 = vrot.slane %v696_v7, %v8247_v9  ;;  %vm624_vm2 = vcmp.gt.f32.partialorder %v8295_v26, 0.5  ;;  %s15072_s26 = sld [smem:[#allocation77_spill]] }
  0x28   : > { %2419 = vperm.xlu0 %7961, %v2370_v6   ;;  %v704_v19 = vld [vmem:[%s8264_s21 + $0x17] sm:$0xff]  ;;  %v705_v20 = vld [vmem:[%s8264_s21 + $0x1f] sm:$0xff]  ;;  %v707_v21 = vld [vmem:[%s8264_s21 + $0x2f] sm:$0xff]  ;;  %v8281_v22 = vrot.slane %v696_v7, %v8249_v10  ;;  %v8284_v23 = vrot.slane %v696_v7, %v8251_v11  ;;  %v8287_v24 = vrot.slane %v696_v7, %v8253_v12  ;;  %v8290_v25 = vrot.slane %v696_v7, %v8255_v13  ;;  %s7169_s20 = sshll.u32 %s566_s19, 6 }
  0x29   : > { %v708_v27 = vld [vmem:[%s8264_s21 + $0x37] sm:$0xff]  ;;  %v710_v28 = vld [vmem:[%s8264_s21 + $0x47] sm:$0xff]  ;;  %v711_v29 = vld [vmem:[%s8264_s21 + $0x4f] sm:$0xff]  ;;  %v758_v30 = vmax.f32 %v704_v19, 0.0  ;;  %v759_v31 = vmax.f32 %v705_v20, 0.0  ;;  %v761_v32 = vmax.f32 %v707_v21, 0.0  ;;  %v8301_v33 = vrot.slane %v696_v7, %v8257_v14 }
  0x2a   : > { %7527 = vmatpush3.bf16.msra.mxu0 %v7964_v3  ;;  %v762_v34 = vmax.f32 %v708_v27, 0.0  ;;  %v8303_v35 = vmax.f32 %v710_v28, 0.0  ;;  %v8305_v36 = vmax.f32 %v711_v29, 0.0  ;;  %v1064_v37 = vld [vmem:[%s8264_s21 + $0x18] sm:$0xff]  ;;  %v1065_v38 = vld [vmem:[%s8264_s21 + $0x20] sm:$0xff]  ;;  %v1067_v39 = vld [vmem:[%s8264_s21 + $0x30] sm:$0xff]  ;;  %v8311_v40 = vrot.slane %v696_v7, %v8259_v15 }
  0x2b   : > { %v816_v41 = vmul.f32 %v8267_v16, %v758_v30  ;;  %v817_v42 = vmul.f32 %v8267_v16, %v759_v31  ;;  %v8316_v43 = vmul.f32 %v8267_v16, %v761_v32  ;;  %v868_v44 = vmul.f32 %v8270_v17, %v761_v32  ;;  %v1068_v45 = vld [vmem:[%s8264_s21 + $0x38] sm:$0xff]  ;;  %v1070_v46 = vld [vmem:[%s8264_s21 + $0x48] sm:$0xff]  ;;  %v1071_v47 = vld [vmem:[%s8264_s21 + $0x50] sm:$0xff] }
  0x2c   : > { %v8323_v48 = vmul.f32 %v8267_v16, %v762_v34  ;;  %v869_v49 = vmul.f32 %v8270_v17, %v762_v34  ;;  %v968_v50 = vmul.f32 %v8281_v22, %v8303_v35  ;;  %v969_v51 = vmul.f32 %v8281_v22, %v8305_v36  ;;  %v1472_v0 = vld [vmem:[%s8264_s21 + $0x19] sm:$0xff]  ;;  %v1473_v1 = vld [vmem:[%s8264_s21 + $0x21] sm:$0xff]  ;;  %v1475_v7 = vld [vmem:[%s8264_s21 + $0x31] sm:$0xff] }
  0x2d   : > { %v916_v52 = vadd.f32 %v868_v44, %v816_v41  ;;  %v1118_v53 = vmax.f32 %v1064_v37, 0.0  ;;  %v1119_v54 = vmax.f32 %v1065_v38, 0.0  ;;  %v1121_v55 = vmax.f32 %v1067_v39, 0.0  ;;  %v1476_v19 = vld [vmem:[%s8264_s21 + $0x39] sm:$0xff]  ;;  %v1478_v20 = vld [vmem:[%s8264_s21 + $0x49] sm:$0xff]  ;;  %v1479_v30 = vld [vmem:[%s8264_s21 + $0x51] sm:$0xff] }
  0x2e   : > { %v917_v56 = vadd.f32 %v869_v49, %v817_v42  ;;  %v1122_v57 = vmax.f32 %v1068_v45, 0.0  ;;  %v8332_v58 = vmax.f32 %v1070_v46, 0.0  ;;  %v8334_v59 = vmax.f32 %v1071_v47, 0.0  ;;  %v8369_v44 = vld [vmem:[%s14928_s22 + $0x18] sm:$0xff]  ;;  %v8374_v45 = vld [vmem:[%s14929_s3 + $0x8] ss:$0 sm:$0xff] }
  0x2f   : > { %v1016_v60 = vadd.f32 %v968_v50, %v916_v52  ;;  %v1176_v61 = vmul.f32 %v8284_v23, %v1118_v53  ;;  %v1177_v62 = vmul.f32 %v8284_v23, %v1119_v54  ;;  %v8339_v63 = vmul.f32 %v8284_v23, %v1121_v55 }
  0x30   : > { %v1017_v3 = vadd.f32 %v969_v51, %v917_v56  ;;  %v8344_v4 = vmul.f32 %v8284_v23, %v1122_v57  ;;  %v8348_v5 = vmul.f32 %v8284_v23, %v8332_v58  ;;  %v8352_v6 = vmul.f32 %v8284_v23, %v8334_v59  ;;  %v8392_v56 = vld [vmem:[%s8264_s21 + $0x3f] sm:$0xff] }
  0x31   : > { %v1224_v21 = vadd.f32 %v1176_v61, %v1016_v60  ;;  %v1276_v27 = vmul.f32 %v8287_v24, %v1121_v55  ;;  %v1277_v28 = vmul.f32 %v8287_v24, %v1122_v57  ;;  %v1376_v29 = vmul.f32 %v8290_v25, %v8332_v58  ;;  %v706_v55 = vld [vmem:[%s8264_s21 + $0x27] sm:$0xff] }
  0x32   : > { %v1225_v31 = vadd.f32 %v1177_v62, %v1017_v3  ;;  %v1377_v32 = vmul.f32 %v8290_v25, %v8334_v59  ;;  %v1526_v34 = vmax.f32 %v1472_v0, 0.0  ;;  %v1527_v37 = vmax.f32 %v1473_v1, 0.0  ;;  %v712_v0 = vld [vmem:[%s8264_s21 + $0x57] sm:$0xff]  ;;  %v713_v1 = vld [vmem:[%s8264_s21 + $0x5f] sm:$0xff] }
  0x33   : > { %v1324_v38 = vadd.f32 %v1276_v27, %v1224_v21  ;;  %v1529_v39 = vmax.f32 %v1475_v7, 0.0  ;;  %v1530_v41 = vmax.f32 %v1476_v19, 0.0  ;;  %v8364_v42 = vmax.f32 %v1478_v20, 0.0  ;;  %v1066_v21 = vld [vmem:[%s8264_s21 + $0x28] sm:$0xff] }
  0x34   : > { %v1325_v46 = vadd.f32 %v1277_v28, %v1225_v31  ;;  %v8376_v47 = vmax.f32 %v1479_v30, 0.0  ;;  %v1584_v49 = vmul.f32 %v8301_v33, %v1526_v34  ;;  %v1585_v50 = vmul.f32 %v8301_v33, %v1527_v37  ;;  %v8422_v37 = vld [vmem:[%s8264_s21 + $0x40] sm:$0xff] }
  0x35   : > { %v1424_v51 = vadd.f32 %v1376_v29, %v1324_v38  ;;  %v8381_v52 = vmul.f32 %v8301_v33, %v1529_v39  ;;  %v8384_v53 = vmul.f32 %v8301_v33, %v1530_v41  ;;  %v8388_v54 = vmul.f32 %v8301_v33, %v8364_v42  ;;  %v1072_v38 = vld [vmem:[%s8264_s21 + $0x58] sm:$0xff] }
  0x36   : > { %v1425_v57 = vadd.f32 %v1377_v32, %v1325_v46  ;;  %v8396_v60 = vmul.f32 %v8301_v33, %v8376_v47  ;;  %v1684_v61 = vmul.f32 %v8311_v40, %v1529_v39  ;;  %v1685_v62 = vmul.f32 %v8311_v40, %v1530_v41  ;;  %v1073_v46 = vld [vmem:[%s8264_s21 + $0x60] sm:$0xff] }
  0x37   : > { %vm626_vm4 = vcmp.gt.f32.partialorder %v8369_v44, 0.5  ;;  %v1632_v3 = vadd.f32 %v1584_v49, %v1424_v51  ;;  %v1784_v7 = vmul.f32 %v8374_v45, %v8364_v42  ;;  %v1785_v19 = vmul.f32 %v8374_v45, %v8376_v47  ;;  %v1075_v44 = vld [vmem:[%s8264_s21 + $0x70] sm:$0xff] }
  0x38   : > { %v2372_v20 = vsel %vm625_vm1, 1, %v14718_v2  ;;  %v1633_v27 = vadd.f32 %v1585_v50, %v1425_v57  ;;  %v2371_v28 = vsel %vm624_vm2, 1, %v14718_v2  ;;  %v760_v29 = vmax.f32 %v706_v55, 0.0 }
  0x39   : > { %2425 = vperm.xlu1 %7962, %v2372_v20   ;;  %v763_v30 = vmax.f32 %v8392_v56, 0.0  ;;  %v1732_v31 = vadd.f32 %v1684_v61, %v1632_v3  ;;  %2422 = vperm.xlu0 %7961, %v2371_v28   ;;  %v8415_v32 = vmax.f32 %v712_v0, 0.0  ;;  %v8417_v34 = vmax.f32 %v713_v1, 0.0  ;;  %v1474_v1 = vld [vmem:[%s8264_s21 + $0x29] sm:$0xff]  ;;  %v8438_v3 = vld [vmem:[%s8264_s21 + $0x41] sm:$0xff] }
  0x3a   : > { %v871_v18 = vmul.f32 %v8270_v17, %v8303_v35  ;;  %v1733_v39 = vadd.f32 %v1685_v62, %v1633_v27  ;;  %v818_v26 = vmul.f32 %v8267_v16, %v760_v29  ;;  %v1120_v49 = vmax.f32 %v1066_v21, 0.0  ;;  %v1480_v27 = vld [vmem:[%s8264_s21 + $0x59] sm:$0xff]  ;;  %v1481_v28 = vld [vmem:[%s8264_s21 + $0x61] sm:$0xff] }
  0x3b   : > { %v870_v41 = vmul.f32 %v8270_v17, %v763_v30  ;;  %v1832_v50 = vadd.f32 %v1784_v7, %v1732_v31  ;;  %v970_v55 = vmul.f32 %v8281_v22, %v8415_v32  ;;  %v971_v56 = vmul.f32 %v8281_v22, %v8417_v34 }
  0x3c   : > { %v919_v51 = vadd.f32 %v871_v18, %v8316_v43  ;;  %v1833_v57 = vadd.f32 %v1785_v19, %v1733_v39  ;;  %v1123_v62 = vmax.f32 %v8422_v37, 0.0  ;;  %v8434_v0 = vmax.f32 %v1072_v38, 0.0 }
  0x3d   : > { %v918_v61 = vadd.f32 %v870_v41, %v818_v26  ;;  %v8440_v21 = vmax.f32 %v1073_v46, 0.0  ;;  %v1178_v43 = vmul.f32 %v8284_v23, %v1120_v49  ;;  %v1279_v7 = vmul.f32 %v8287_v24, %v8332_v58  ;;  %v579_v58 = vld [vmem:[%s14928_s22 + $0x20] sm:$0xff] }
  0x3e   : > { %v1019_v20 = vadd.f32 %v971_v56, %v919_v51  ;;  %v1880_v19 = vpack.c.bf16 %v1833_v57, %v1832_v50  ;;  %v1278_v31 = vmul.f32 %v8287_v24, %v1123_v62  ;;  %v1378_v18 = vmul.f32 %v8290_v25, %v8434_v0  ;;  %v714_v50 = vld [vmem:[%s8264_s21 + $0x67] sm:$0xff]  ;;  %v715_v51 = vld [vmem:[%s8264_s21 + $0x6f] sm:$0xff] }
  0x3f   : > { %v1018_v29 = vadd.f32 %v970_v55, %v918_v61  ;;  %v1379_v38 = vmul.f32 %v8290_v25, %v8440_v21  ;;  %v1528_v39 = vmax.f32 %v1474_v1, 0.0  ;;  %v1531_v26 = vmax.f32 %v8438_v3, 0.0 }
  0x40   : > { %v1227_v37 = vadd.f32 %v8339_v63, %v1019_v20  ;;  %7528 = vmatprep.mubr.msk.bf16.mxu0 %vm14744_vm3, %v1880_v19  ;;  %v8458_v46 = vmax.f32 %v1480_v27, 0.0  ;;  %v8460_v49 = vmax.f32 %v1481_v28, 0.0  ;;  %v1687_v63 = vmul.f32 %v8311_v40, %v8364_v42  ;;  %v1074_v42 = vld [vmem:[%s8264_s21 + $0x68] sm:$0xff] }
  0x41   : > { %v1226_v41 = vadd.f32 %v1178_v43, %v1018_v29  ;;  %v1586_v56 = vmul.f32 %v8301_v33, %v1528_v39  ;;  %v1686_v57 = vmul.f32 %v8311_v40, %v1531_v26  ;;  %v2373_v61 = vsel %vm626_vm4, 1, %v14718_v2 }
  0x42   : > { %v1327_v55 = vadd.f32 %v1279_v7, %v1227_v37  ;;  %v1786_v3 = vmul.f32 %v8374_v45, %v8458_v46  ;;  %v1787_v20 = vmul.f32 %v8374_v45, %v8460_v49  ;;  %2428 = vperm.xlu1 %7962, %v2373_v61   ;;  %vm627_vm5 = vcmp.gt.f32.partialorder %v579_v58, 0.5  ;;  %v1483_v61 = vld [vmem:[%s8264_s21 + $0x71] sm:$0xff] }
  0x43   : > { %v1326_v1 = vadd.f32 %v1278_v31, %v1226_v41  ;;  %v2374_v7 = vsel %vm627_vm5, 1, %v14718_v2  ;;  %v8477_v27 = vmax.f32 %v714_v50, 0.0  ;;  %v8479_v28 = vmax.f32 %v715_v51, 0.0 }
  0x44   : > { %v1427_v43 = vadd.f32 %v1379_v38, %v1327_v55  ;;  %2431 = vperm.xlu0 %7961, %v2374_v7   ;;  %v821_v29 = vmul.f32 %v8267_v16, %v763_v30  ;;  %v872_v31 = vmul.f32 %v8270_v17, %v8305_v36  ;;  %v873_v37 = vmul.f32 %v8270_v17, %v8415_v32  ;;  %v1482_v55 = vld [vmem:[%s8264_s21 + $0x69] sm:$0xff] }
  0x45   : > { %v1426_v19 = vadd.f32 %v1378_v18, %v1326_v1  ;;  %v972_v39 = vmul.f32 %v8281_v22, %v8477_v27  ;;  %v973_v58 = vmul.f32 %v8281_v22, %v8479_v28  ;;  %v8492_v41 = vmax.f32 %v1074_v42, 0.0 }
  0x46   : > { %v1635_v38 = vadd.f32 %v8381_v52, %v1427_v43  ;;  %v920_v50 = vadd.f32 %v872_v31, %v8323_v48  ;;  %v921_v30 = vadd.f32 %v873_v37, %v821_v29  ;;  %v8495_v51 = vmax.f32 %v1075_v44, 0.0 }
  0x47   : > { %v1634_v18 = vadd.f32 %v1586_v56, %v1426_v19  ;;  %v1181_v7 = vmul.f32 %v8284_v23, %v1123_v62  ;;  %v1280_v52 = vmul.f32 %v8287_v24, %v8334_v59  ;;  %v1281_v43 = vmul.f32 %v8287_v24, %v8434_v0  ;;  %v580_v59 = vld [vmem:[%s14928_s22 + $0x28] sm:$0xff] }
  0x48   : > { %v1735_v1 = vadd.f32 %v1687_v63, %v1635_v38  ;;  %v1020_v56 = vadd.f32 %v972_v39, %v920_v50  ;;  %v1021_v19 = vadd.f32 %v973_v58, %v921_v30  ;;  %v1380_v48 = vmul.f32 %v8290_v25, %v8492_v41  ;;  %v716_v39 = vld [vmem:[%s8264_s21 + $0x77] sm:$0xff]  ;;  %v717_v58 = vld [vmem:[%s8264_s21 + $0x7f] sm:$0xff] }
  0x49   : > { %v1734_v42 = vadd.f32 %v1686_v57, %v1634_v18  ;;  %v1381_v63 = vmul.f32 %v8290_v25, %v8495_v51  ;;  %v8508_v29 = vmax.f32 %v1482_v55, 0.0  ;;  %v8510_v62 = vmax.f32 %v1483_v61, 0.0 }
  0x4a   : > { %v1835_v44 = vadd.f32 %v1787_v20, %v1735_v1  ;;  %v1228_v57 = vadd.f32 %v8344_v4, %v1020_v56  ;;  %v1229_v37 = vadd.f32 %v1181_v7, %v1021_v19  ;;  %v1589_v38 = vmul.f32 %v8301_v33, %v1531_v26  ;;  %v581_v20 = vld [vmem:[%s14928_s22 + $0x30] sm:$0xff]  ;;  %v1076_v7 = vld [vmem:[%s8264_s21 + $0x78] sm:$0xff] }
  0x4b   : > { %v1834_v31 = vadd.f32 %v1786_v3, %v1734_v42  ;;  %v1688_v18 = vmul.f32 %v8311_v40, %v8376_v47  ;;  %v1689_v50 = vmul.f32 %v8311_v40, %v8458_v46  ;;  %v1788_v3 = vmul.f32 %v8374_v45, %v8508_v29 }
  0x4c   : > { %v1789_v4 = vmul.f32 %v8374_v45, %v8510_v62  ;;  %v1328_v30 = vadd.f32 %v1280_v52, %v1228_v57  ;;  %v1329_v55 = vadd.f32 %v1281_v43, %v1229_v37  ;;  %vm628_vm6 = vcmp.gt.f32.partialorder %v580_v59, 0.5  ;;  %v1077_v43 = vld [vmem:[%s8264_s21 + $0x80] sm:$0xff] }
  0x4d   : > { %v1881_v26 = vpack.c.bf16 %v1835_v44, %v1834_v31  ;;  %v2375_v61 = vsel %vm628_vm6, 1, %v14718_v2  ;;  %vm629_vm7 = vcmp.gt.f32.partialorder %v581_v20, 0.5  ;;  %v8531_v1 = vmax.f32 %v716_v39, 0.0  ;;  %v1484_v20 = vld [vmem:[%s8264_s21 + $0x79] sm:$0xff] }
  0x4e   : > { %v8533_v47 = vmax.f32 %v717_v58, 0.0  ;;  %v1428_v42 = vadd.f32 %v1380_v48, %v1328_v30  ;;  %v1429_v56 = vadd.f32 %v1381_v63, %v1329_v55  ;;  %2434 = vperm.xlu1 %7962, %v2375_v61   ;;  %v2376_v19 = vsel %vm629_vm7, 1, %v14718_v2  ;;  %v1485_v30 = vld [vmem:[%s8264_s21 + $0x81] sm:$0xff] }
  0x4f   : > { %7529 = vmatmul.mubr.msk.bf16.vlgmr.msra.gmra.mrb[0].mxu0 %vm14744_vm3, %v1881_v26  ;;  %v822_v52 = vmul.f32 %v8267_v16, %v8303_v35  ;;  %2437 = vperm.xlu0 %7961, %v2376_v19   ;;  %v823_v44 = vmul.f32 %v8267_v16, %v8305_v36  ;;  %v874_v59 = vmul.f32 %v8270_v17, %v8417_v34  ;;  %v8552_v37 = vmax.f32 %v1076_v7, 0.0 }
  0x50   : > { %v875_v31 = vmul.f32 %v8270_v17, %v8477_v27  ;;  %v974_v48 = vmul.f32 %v8281_v22, %v8531_v1  ;;  %v1636_v63 = vadd.f32 %v8384_v53, %v1428_v42  ;;  %v1637_v57 = vadd.f32 %v1589_v38, %v1429_v56 }
  0x51   : > { %v975_v35 = vmul.f32 %v8281_v22, %v8533_v47  ;;  %v922_v39 = vadd.f32 %v874_v59, %v822_v52  ;;  %v8555_v58 = vmax.f32 %v1077_v43, 0.0  ;;  %v1282_v26 = vmul.f32 %v8287_v24, %v8440_v21 }
  0x52   : > { %v923_v36 = vadd.f32 %v875_v31, %v823_v44  ;;  %v1736_v55 = vadd.f32 %v1688_v18, %v1636_v63  ;;  %v1737_v61 = vadd.f32 %v1689_v50, %v1637_v57  ;;  %v1283_v53 = vmul.f32 %v8287_v24, %v8492_v41  ;;  %v582_v18 = vld [vmem:[%s14928_s22 + $0x38] sm:$0xff]  ;;  %v583_v50 = vld [vmem:[%s14928_s22 + $0x40] sm:$0xff] }
  0x53   : > { %v1382_v38 = vmul.f32 %v8290_v25, %v8552_v37  ;;  %v1022_v7 = vadd.f32 %v974_v48, %v922_v39  ;;  %v1383_v56 = vmul.f32 %v8290_v25, %v8555_v58  ;;  %v8566_v19 = vmax.f32 %v1484_v20, 0.0  ;;  %v718_v31 = vld [vmem:[%s8264_s21 + $0x87] sm:$0xff]  ;;  %v719_v48 = vld [vmem:[%s8264_s21 + $0x8f] sm:$0xff] }
  0x54   : > { %v1023_v42 = vadd.f32 %v975_v35, %v923_v36  ;;  %v1836_v52 = vadd.f32 %v1788_v3, %v1736_v55  ;;  %v1837_v43 = vadd.f32 %v1789_v4, %v1737_v61  ;;  %v8574_v44 = vmax.f32 %v1485_v30, 0.0  ;;  %v1078_v39 = vld [vmem:[%s8264_s21 + $0x88] sm:$0xff]  ;;  %v1079_v3 = vld [vmem:[%s8264_s21 + $0x90] sm:$0xff] }
  0x55   : > { %v1690_v59 = vmul.f32 %v8311_v40, %v8460_v49  ;;  %v1230_v63 = vadd.f32 %v8348_v5, %v1022_v7  ;;  %v1691_v35 = vmul.f32 %v8311_v40, %v8508_v29  ;;  %v1790_v20 = vmul.f32 %v8374_v45, %v8566_v19 }
  0x56   : > { %v1231_v57 = vadd.f32 %v8352_v6, %v1023_v42  ;;  %v1882_v4 = vpack.c.bf16 %v1837_v43, %v1836_v52  ;;  %v1791_v36 = vmul.f32 %v8374_v45, %v8574_v44  ;;  %vm630_vm8 = vcmp.gt.f32.partialorder %v582_v18, 0.5 }
  0x57   : > { %vm631_vm9 = vcmp.gt.f32.partialorder %v583_v50, 0.5  ;;  %v1330_v30 = vadd.f32 %v1282_v26, %v1230_v63  ;;  %v2377_v5 = vsel %vm630_vm8, 1, %v14718_v2  ;;  %v8593_v61 = vmax.f32 %v718_v31, 0.0 }
  0x58   : > { %v1331_v55 = vadd.f32 %v1283_v53, %v1231_v57  ;;  %v2378_v6 = vsel %vm631_vm9, 1, %v14718_v2  ;;  %7532 = vmatprep.mubr.msk.bf16.mxu0 %vm14744_vm3, %v1882_v4  ;;  %2440 = vperm.xlu1 %7962, %v2377_v5   ;;  %v8595_v7 = vmax.f32 %v719_v48, 0.0  ;;  %v824_v42 = vmul.f32 %v8267_v16, %v8415_v32  ;;  %v1486_v57 = vld [vmem:[%s8264_s21 + $0x89] sm:$0xff]  ;;  %v1487_v4 = vld [vmem:[%s8264_s21 + $0x91] sm:$0xff] }
  0x59   : > { %v825_v26 = vmul.f32 %v8267_v16, %v8417_v34  ;;  %v1430_v53 = vadd.f32 %v1382_v38, %v1330_v30  ;;  %2443 = vperm.xlu0 %7961, %v2378_v6   ;;  %v876_v50 = vmul.f32 %v8270_v17, %v8479_v28  ;;  %v877_v52 = vmul.f32 %v8270_v17, %v8531_v1 }
  0x5a   : > { %v1431_v18 = vadd.f32 %v1383_v56, %v1331_v55  ;;  %v976_v43 = vmul.f32 %v8281_v22, %v8593_v61  ;;  %v977_v31 = vmul.f32 %v8281_v22, %v8595_v7  ;;  %v8609_v32 = vmax.f32 %v1078_v39, 0.0 }
  0x5b   : > { %v8611_v48 = vmax.f32 %v1079_v3, 0.0  ;;  %v1638_v34 = vadd.f32 %v8388_v54, %v1430_v53  ;;  %v924_v56 = vadd.f32 %v876_v50, %v824_v42  ;;  %v925_v63 = vadd.f32 %v877_v52, %v825_v26 }
  0x5c   : > { %v1639_v38 = vadd.f32 %v8396_v60, %v1431_v18  ;;  %v1184_v30 = vmul.f32 %v8284_v23, %v8434_v0  ;;  %v1185_v55 = vmul.f32 %v8284_v23, %v8440_v21  ;;  %v1284_v39 = vmul.f32 %v8287_v24, %v8495_v51 }
  0x5d   : > { %v1285_v3 = vmul.f32 %v8287_v24, %v8552_v37  ;;  %v1738_v54 = vadd.f32 %v1690_v59, %v1638_v34  ;;  %v1024_v60 = vadd.f32 %v976_v43, %v924_v56  ;;  %v1025_v6 = vadd.f32 %v977_v31, %v925_v63  ;;  %v584_v59 = vld [vmem:[%s14928_s22 + $0x48] sm:$0xff]  ;;  %v720_v43 = vld [vmem:[%s8264_s21 + $0x97] sm:$0xff] }
  0x5e   : > { %v1739_v5 = vadd.f32 %v1691_v35, %v1639_v38  ;;  %v1384_v42 = vmul.f32 %v8290_v25, %v8609_v32  ;;  %v1385_v0 = vmul.f32 %v8290_v25, %v8611_v48  ;;  %v8629_v26 = vmax.f32 %v1486_v57, 0.0  ;;  %v585_v35 = vld [vmem:[%s14928_s22 + $0x50] sm:$0xff] }
  0x5f   : > { %v8631_v21 = vmax.f32 %v1487_v4, 0.0  ;;  %v1838_v53 = vadd.f32 %v1790_v20, %v1738_v54  ;;  %v1232_v50 = vadd.f32 %v1184_v30, %v1024_v60  ;;  %v1233_v52 = vadd.f32 %v1185_v55, %v1025_v6  ;;  %v721_v4 = vld [vmem:[%s8264_s21 + $0x9f] sm:$0xff] }
  0x60   : > { %v1839_v18 = vadd.f32 %v1791_v36, %v1739_v5  ;;  %v1592_v31 = vmul.f32 %v8301_v33, %v8458_v46  ;;  %v1593_v34 = vmul.f32 %v8301_v33, %v8460_v49  ;;  %v1692_v20 = vmul.f32 %v8311_v40, %v8510_v62  ;;  %v1081_v5 = vld [vmem:[%s8264_s21 + $0xa0] sm:$0xff] }
  0x61   : > { %v1693_v36 = vmul.f32 %v8311_v40, %v8566_v19  ;;  %v1332_v56 = vadd.f32 %v1284_v39, %v1232_v50  ;;  %v1333_v63 = vadd.f32 %v1285_v3, %v1233_v52  ;;  %v1792_v57 = vmul.f32 %v8374_v45, %v8629_v26  ;;  %v1080_v3 = vld [vmem:[%s8264_s21 + $0x98] sm:$0xff] }
  0x62   : > { %v1883_v38 = vpack.c.bf16 %v1839_v18, %v1838_v53  ;;  %v1793_v46 = vmul.f32 %v8374_v45, %v8631_v21  ;;  %vm632_vm10 = vcmp.gt.f32.partialorder %v584_v59, 0.5  ;;  %vm633_vm11 = vcmp.gt.f32.partialorder %v585_v35, 0.5 }
  0x63   : > { %v8653_v49 = vmax.f32 %v720_v43, 0.0  ;;  %v1432_v30 = vadd.f32 %v1384_v42, %v1332_v56  ;;  %v1433_v55 = vadd.f32 %v1385_v0, %v1333_v63  ;;  %v2379_v54 = vsel %vm632_vm10, 1, %v14718_v2  ;;  %v1489_v63 = vld [vmem:[%s8264_s21 + $0xa1] sm:$0xff] }
  0x64   : > { %7533 = vmatmul.mubr.msk.bf16.gmra.mrb[4].mxu0 %vm14744_vm3, %v1883_v38  ;;  %v2380_v39 = vsel %vm633_vm11, 1, %v14718_v2  ;;  %2446 = vperm.xlu1 %7962, %v2379_v54   ;;  %v8660_v60 = vmax.f32 %v721_v4, 0.0  ;;  %v826_v6 = vmul.f32 %v8267_v16, %v8477_v27  ;;  %v827_v53 = vmul.f32 %v8267_v16, %v8479_v28 }
  0x65   : > { %2449 = vperm.xlu0 %7961, %v2380_v39   ;;  %v878_v42 = vmul.f32 %v8270_v17, %v8533_v47  ;;  %v1640_v0 = vadd.f32 %v1592_v31, %v1432_v30  ;;  %v1641_v18 = vadd.f32 %v1593_v34, %v1433_v55  ;;  %v879_v50 = vmul.f32 %v8270_v17, %v8593_v61  ;;  %v1488_v34 = vld [vmem:[%s8264_s21 + $0x99] sm:$0xff] }
  0x66   : > { %v978_v52 = vmul.f32 %v8281_v22, %v8653_v49  ;;  %v979_v35 = vmul.f32 %v8281_v22, %v8660_v60  ;;  %v8674_v27 = vmax.f32 %v1080_v3, 0.0  ;;  %v8676_v43 = vmax.f32 %v1081_v5, 0.0 }
  0x67   : > { %v926_v59 = vadd.f32 %v878_v42, %v826_v6  ;;  %v1740_v28 = vadd.f32 %v1692_v20, %v1640_v0  ;;  %v1741_v38 = vadd.f32 %v1693_v36, %v1641_v18  ;;  %v927_v56 = vadd.f32 %v879_v50, %v827_v53  ;;  %v586_v53 = vld [vmem:[%s14928_s22 + $0x58] sm:$0xff]  ;;  %v722_v50 = vld [vmem:[%s8264_s21 + $0xa7] sm:$0xff] }
  0x68   : > { %v1186_v31 = vmul.f32 %v8284_v23, %v8492_v41  ;;  %v1187_v30 = vmul.f32 %v8284_v23, %v8495_v51  ;;  %v1286_v55 = vmul.f32 %v8287_v24, %v8555_v58  ;;  %v1287_v54 = vmul.f32 %v8287_v24, %v8609_v32 }
  0x69   : > { %v1026_v4 = vadd.f32 %v978_v52, %v926_v59  ;;  %v1840_v39 = vadd.f32 %v1792_v57, %v1740_v28  ;;  %v1841_v20 = vadd.f32 %v1793_v46, %v1741_v38  ;;  %v1027_v36 = vadd.f32 %v979_v35, %v927_v56  ;;  %v587_v57 = vld [vmem:[%s14928_s22 + $0x60] sm:$0xff]  ;;  %v723_v38 = vld [vmem:[%s8264_s21 + $0xaf] sm:$0xff] }
  0x6a   : > { %v1386_v3 = vmul.f32 %v8290_v25, %v8674_v27  ;;  %v1387_v5 = vmul.f32 %v8290_v25, %v8676_v43  ;;  %v8692_v6 = vmax.f32 %v1488_v34, 0.0  ;;  %v8694_v51 = vmax.f32 %v1489_v63, 0.0 }
  0x6b   : > { %v1234_v41 = vadd.f32 %v1186_v31, %v1026_v4  ;;  %v1884_v46 = vpack.c.bf16 %v1841_v20, %v1840_v39  ;;  %v1235_v42 = vadd.f32 %v1187_v30, %v1027_v36  ;;  %v1594_v0 = vmul.f32 %v8301_v33, %v8508_v29  ;;  %v1082_v4 = vld [vmem:[%s8264_s21 + $0xa8] sm:$0xff]  ;;  %v1083_v30 = vld [vmem:[%s8264_s21 + $0xb0] sm:$0xff] }
  0x6c   : > { %v1595_v18 = vmul.f32 %v8301_v33, %v8510_v62  ;;  %v1694_v59 = vmul.f32 %v8311_v40, %v8574_v44  ;;  %v1695_v35 = vmul.f32 %v8311_v40, %v8629_v26  ;;  %v1794_v28 = vmul.f32 %v8374_v45, %v8692_v6 }
  0x6d   : > { %v1334_v52 = vadd.f32 %v1286_v55, %v1234_v41  ;;  %7536 = vmatprep.mubr.msk.bf16.mxu0 %vm14744_vm3, %v1884_v46  ;;  %v1335_v29 = vadd.f32 %v1287_v54, %v1235_v42  ;;  %v1795_v62 = vmul.f32 %v8374_v45, %v8694_v51  ;;  %vm634_vm12 = vcmp.gt.f32.partialorder %v586_v53, 0.5 }
  0x6e   : > { %vm635_vm13 = vcmp.gt.f32.partialorder %v587_v57, 0.5  ;;  %v2381_v31 = vsel %vm634_vm12, 1, %v14718_v2  ;;  %v8719_v63 = vmax.f32 %v722_v50, 0.0  ;;  %v8723_v39 = vmax.f32 %v723_v38, 0.0  ;;  %v1491_v38 = vld [vmem:[%s8264_s21 + $0xb1] sm:$0xff] }
  0x6f   : > { %v1434_v56 = vadd.f32 %v1386_v3, %v1334_v52  ;;  %v2382_v34 = vsel %vm635_vm13, 1, %v14718_v2  ;;  %v1435_v55 = vadd.f32 %v1387_v5, %v1335_v29  ;;  %2452 = vperm.xlu1 %7962, %v2381_v31   ;;  %v828_v54 = vmul.f32 %v8267_v16, %v8531_v1  ;;  %v1490_v52 = vld [vmem:[%s8264_s21 + $0xa9] sm:$0xff] }
  0x70   : > { %2455 = vperm.xlu0 %7961, %v2382_v34   ;;  %v829_v20 = vmul.f32 %v8267_v16, %v8533_v47  ;;  %v880_v3 = vmul.f32 %v8270_v17, %v8595_v7  ;;  %v881_v41 = vmul.f32 %v8270_v17, %v8653_v49  ;;  %v980_v5 = vmul.f32 %v8281_v22, %v8719_v63 }
  0x71   : > { %v1642_v36 = vadd.f32 %v1594_v0, %v1434_v56  ;;  %v1643_v53 = vadd.f32 %v1595_v18, %v1435_v55  ;;  %v981_v57 = vmul.f32 %v8281_v22, %v8723_v39  ;;  %v8737_v46 = vmax.f32 %v1082_v4, 0.0 }
  0x72   : > { %v8739_v1 = vmax.f32 %v1083_v30, 0.0  ;;  %v928_v47 = vadd.f32 %v880_v3, %v828_v54  ;;  %v929_v0 = vadd.f32 %v881_v41, %v829_v20  ;;  %v1188_v50 = vmul.f32 %v8284_v23, %v8552_v37  ;;  %v588_v54 = vld [vmem:[%s14928_s22 + $0x68] sm:$0xff]  ;;  %v724_v41 = vld [vmem:[%s8264_s21 + $0xb7] sm:$0xff] }
  0x73   : > { %v1742_v42 = vadd.f32 %v1694_v59, %v1642_v36  ;;  %v1743_v29 = vadd.f32 %v1695_v35, %v1643_v53  ;;  %v1189_v56 = vmul.f32 %v8284_v23, %v8555_v58  ;;  %v1288_v18 = vmul.f32 %v8287_v24, %v8611_v48 }
  0x74   : > { %v1289_v31 = vmul.f32 %v8287_v24, %v8674_v27  ;;  %v1028_v34 = vadd.f32 %v980_v5, %v928_v47  ;;  %v1029_v4 = vadd.f32 %v981_v57, %v929_v0  ;;  %v1388_v37 = vmul.f32 %v8290_v25, %v8737_v46  ;;  %v725_v5 = vld [vmem:[%s8264_s21 + $0xbf] sm:$0xff] }
  0x75   : > { %v1842_v59 = vadd.f32 %v1794_v28, %v1742_v42  ;;  %v1843_v30 = vadd.f32 %v1795_v62, %v1743_v29  ;;  %v1389_v35 = vmul.f32 %v8290_v25, %v8739_v1  ;;  %v8755_v55 = vmax.f32 %v1490_v52, 0.0  ;;  %v589_v62 = vld [vmem:[%s14928_s22 + $0x70] sm:$0xff]  ;;  %v1084_v29 = vld [vmem:[%s8264_s21 + $0xb8] sm:$0xff] }
  0x76   : > { %v8757_v58 = vmax.f32 %v1491_v38, 0.0  ;;  %v1236_v20 = vadd.f32 %v1188_v50, %v1028_v34  ;;  %v1237_v36 = vadd.f32 %v1189_v56, %v1029_v4  ;;  %v1596_v28 = vmul.f32 %v8301_v33, %v8566_v19  ;;  %v1085_v34 = vld [vmem:[%s8264_s21 + $0xc0] sm:$0xff] }
  0x77   : > { %v1597_v3 = vmul.f32 %v8301_v33, %v8574_v44  ;;  %v1885_v53 = vpack.c.bf16 %v1843_v30, %v1842_v59  ;;  %v1696_v57 = vmul.f32 %v8311_v40, %v8631_v21  ;;  %v1697_v42 = vmul.f32 %v8311_v40, %v8692_v6 }
  0x78   : > { %v1796_v19 = vmul.f32 %v8374_v45, %v8755_v55  ;;  %v1336_v47 = vadd.f32 %v1288_v18, %v1236_v20  ;;  %v1337_v44 = vadd.f32 %v1289_v31, %v1237_v36  ;;  %v1797_v0 = vmul.f32 %v8374_v45, %v8757_v58 }
  0x79   : > { %vm636_vm14 = vcmp.gt.f32.partialorder %v588_v54, 0.5  ;;  %7537 = vmatmul.mubr.msk.bf16.gmra.mrb[8].mxu0 %vm14744_vm3, %v1885_v53  ;;  %vm637_vm15 = vcmp.gt.f32.partialorder %v589_v62, 0.5  ;;  %v8781_v52 = vmax.f32 %v724_v41, 0.0  ;;  %v8783_v38 = vmax.f32 %v725_v5, 0.0  ;;  %v1492_v53 = vld [vmem:[%s8264_s21 + $0xb9] sm:$0xff] }
  0x7a   : > { %v2383_v50 = vsel %vm636_vm14, 1, %v14718_v2  ;;  %v1436_v56 = vadd.f32 %v1388_v37, %v1336_v47  ;;  %v1437_v59 = vadd.f32 %v1389_v35, %v1337_v44  ;;  %v2384_v18 = vsel %vm637_vm15, 1, %v14718_v2 }
  0x7b   : > { %2458 = vperm.xlu1 %7962, %v2383_v50   ;;  %v830_v31 = vmul.f32 %v8267_v16, %v8593_v61  ;;  %2461 = vperm.xlu0 %7961, %v2384_v18   ;;  %v831_v4 = vmul.f32 %v8267_v16, %v8595_v7  ;;  %v882_v30 = vmul.f32 %v8270_v17, %v8660_v60  ;;  %v8800_v36 = vmax.f32 %v1084_v29, 0.0 }
  0x7c   : > { %v883_v37 = vmul.f32 %v8270_v17, %v8719_v63  ;;  %v982_v35 = vmul.f32 %v8281_v22, %v8781_v52  ;;  %v1644_v54 = vadd.f32 %v1596_v28, %v1436_v56  ;;  %v1645_v20 = vadd.f32 %v1597_v3, %v1437_v59  ;;  %v1493_v3 = vld [vmem:[%s8264_s21 + $0xc1] sm:$0xff] }
  0x7d   : > { %v983_v61 = vmul.f32 %v8281_v22, %v8783_v38  ;;  %v930_v62 = vadd.f32 %v882_v30, %v830_v31  ;;  %v8802_v7 = vmax.f32 %v1085_v34, 0.0  ;;  %v1190_v5 = vmul.f32 %v8284_v23, %v8609_v32  ;;  %v590_v31 = vld [vmem:[%s14928_s22 + $0x78] sm:$0xff] }
  0x7e   : > { %v931_v41 = vadd.f32 %v883_v37, %v831_v4  ;;  %v1744_v47 = vadd.f32 %v1696_v57, %v1644_v54  ;;  %v1745_v44 = vadd.f32 %v1697_v42, %v1645_v20  ;;  %v1191_v50 = vmul.f32 %v8284_v23, %v8611_v48 }
  0x7f   : > { %v1290_v28 = vmul.f32 %v8287_v24, %v8676_v43  ;;  %v1030_v29 = vadd.f32 %v982_v35, %v930_v62  ;;  %v1291_v59 = vmul.f32 %v8287_v24, %v8737_v46  ;;  %v1390_v32 = vmul.f32 %v8290_v25, %v8800_v36  ;;  %v727_v35 = vld [vmem:[%s8264_s21 + $0xcf] sm:$0xff] }
  0x80   : > { %v1031_v56 = vadd.f32 %v983_v61, %v931_v41  ;;  %v1844_v18 = vadd.f32 %v1796_v19, %v1744_v47  ;;  %v1845_v57 = vadd.f32 %v1797_v0, %v1745_v44  ;;  %v1391_v42 = vmul.f32 %v8290_v25, %v8802_v7  ;;  %v591_v19 = vld [vmem:[%s14928_s22 + $0x80] sm:$0xff]  ;;  %v1086_v47 = vld [vmem:[%s8264_s21 + $0xc8] sm:$0xff] }
  0x81   : > { %v8818_v48 = vmax.f32 %v1492_v53, 0.0  ;;  %v1238_v34 = vadd.f32 %v1190_v5, %v1030_v29  ;;  %v8823_v30 = vmax.f32 %v1493_v3, 0.0  ;;  %v1598_v37 = vmul.f32 %v8301_v33, %v8629_v26  ;;  %v726_v0 = vld [vmem:[%s8264_s21 + $0xc7] sm:$0xff] }
  0x82   : > { %v1239_v4 = vadd.f32 %v1191_v50, %v1031_v56  ;;  %v1886_v54 = vpack.c.bf16 %v1845_v57, %v1844_v18  ;;  %v1599_v20 = vmul.f32 %v8301_v33, %v8631_v21  ;;  %v1698_v61 = vmul.f32 %v8311_v40, %v8694_v51  ;;  %v1087_v56 = vld [vmem:[%s8264_s21 + $0xd0] sm:$0xff] }
  0x83   : > { %v1699_v62 = vmul.f32 %v8311_v40, %v8755_v55  ;;  %v1338_v41 = vadd.f32 %v1290_v28, %v1238_v34  ;;  %v1798_v26 = vmul.f32 %v8374_v45, %v8818_v48  ;;  %v1799_v53 = vmul.f32 %v8374_v45, %v8823_v30 }
  0x84   : > { %v1339_v5 = vadd.f32 %v1291_v59, %v1239_v4  ;;  %7540 = vmatprep.mubr.msk.bf16.mxu0 %vm14744_vm3, %v1886_v54  ;;  %vm638_vm0 = vcmp.gt.f32.partialorder %v590_v31, 0.5  ;;  %vm639_vm1 = vcmp.gt.f32.partialorder %v591_v19, 0.5  ;;  %v8844_v21 = vmax.f32 %v726_v0, 0.0 }
  0x85   : > { %v8846_v44 = vmax.f32 %v727_v35, 0.0  ;;  %v1438_v50 = vadd.f32 %v1390_v32, %v1338_v41  ;;  %v2385_v28 = vsel %vm638_vm0, 1, %v14718_v2  ;;  %v2386_v29 = vsel %vm639_vm1, 1, %v14718_v2 }
  0x86   : > { %v1439_v3 = vadd.f32 %v1391_v42, %v1339_v5  ;;  %2464 = vperm.xlu1 %7962, %v2385_v28   ;;  %2467 = vperm.xlu0 %7961, %v2386_v29   ;;  %v832_v59 = vmul.f32 %v8267_v16, %v8653_v49  ;;  %v833_v18 = vmul.f32 %v8267_v16, %v8660_v60  ;;  %v8857_v32 = vmax.f32 %v1086_v47, 0.0  ;;  %v1495_v5 = vld [vmem:[%s8264_s21 + $0xd1] sm:$0xff] }
  0x87   : > { %v884_v57 = vmul.f32 %v8270_v17, %v8723_v39  ;;  %v1646_v42 = vadd.f32 %v1598_v37, %v1438_v50  ;;  %v885_v34 = vmul.f32 %v8270_v17, %v8781_v52  ;;  %v984_v4 = vmul.f32 %v8281_v22, %v8844_v21 }
  0x88   : > { %v1647_v31 = vadd.f32 %v1599_v20, %v1439_v3  ;;  %v985_v49 = vmul.f32 %v8281_v22, %v8846_v44  ;;  %v8865_v0 = vmax.f32 %v1087_v56, 0.0  ;;  %v1192_v60 = vmul.f32 %v8284_v23, %v8674_v27  ;;  %v1494_v20 = vld [vmem:[%s8264_s21 + $0xc9] sm:$0xff] }
  0x89   : > { %v932_v19 = vadd.f32 %v884_v57, %v832_v59  ;;  %v1746_v35 = vadd.f32 %v1698_v61, %v1646_v42  ;;  %v933_v41 = vadd.f32 %v885_v34, %v833_v18  ;;  %v1193_v37 = vmul.f32 %v8284_v23, %v8676_v43  ;;  %v592_v57 = vld [vmem:[%s14928_s22 + $0x88] sm:$0xff] }
  0x8a   : > { %v1747_v54 = vadd.f32 %v1699_v62, %v1647_v31  ;;  %v1292_v50 = vmul.f32 %v8287_v24, %v8739_v1  ;;  %v1293_v3 = vmul.f32 %v8287_v24, %v8800_v36  ;;  %v1392_v28 = vmul.f32 %v8290_v25, %v8857_v32 }
  0x8b   : > { %v1032_v47 = vadd.f32 %v984_v4, %v932_v19  ;;  %v1846_v27 = vadd.f32 %v1798_v26, %v1746_v35  ;;  %v1033_v62 = vadd.f32 %v985_v49, %v933_v41  ;;  %v1393_v43 = vmul.f32 %v8290_v25, %v8865_v0  ;;  %v593_v26 = vld [vmem:[%s14928_s22 + $0x90] sm:$0xff]  ;;  %v729_v19 = vld [vmem:[%s8264_s21 + $0xdf] sm:$0xff] }
  0x8c   : > { %v1847_v61 = vadd.f32 %v1799_v53, %v1747_v54  ;;  %v8881_v56 = vmax.f32 %v1494_v20, 0.0  ;;  %v8883_v59 = vmax.f32 %v1495_v5, 0.0  ;;  %v1600_v18 = vmul.f32 %v8301_v33, %v8692_v6  ;;  %v728_v53 = vld [vmem:[%s8264_s21 + $0xd7] sm:$0xff] }
  0x8d   : > { %v1240_v29 = vadd.f32 %v1192_v60, %v1032_v47  ;;  %v1241_v31 = vadd.f32 %v1193_v37, %v1033_v62  ;;  %v1601_v34 = vmul.f32 %v8301_v33, %v8694_v51  ;;  %v1700_v4 = vmul.f32 %v8311_v40, %v8757_v58  ;;  %v1088_v54 = vld [vmem:[%s8264_s21 + $0xd8] sm:$0xff] }
  0x8e   : > { %v1887_v42 = vpack.c.bf16 %v1847_v61, %v1846_v27  ;;  %v1701_v49 = vmul.f32 %v8311_v40, %v8818_v48  ;;  %v1800_v60 = vmul.f32 %v8374_v45, %v8881_v56  ;;  %v1801_v35 = vmul.f32 %v8374_v45, %v8883_v59 }
  0x8f   : > { %v1340_v6 = vadd.f32 %v1292_v50, %v1240_v29  ;;  %v1341_v41 = vadd.f32 %v1293_v3, %v1241_v31  ;;  %vm640_vm2 = vcmp.gt.f32.partialorder %v592_v57, 0.5  ;;  %vm641_vm4 = vcmp.gt.f32.partialorder %v593_v26, 0.5  ;;  %v1089_v50 = vld [vmem:[%s8264_s21 + $0xe0] sm:$0xff] }
  0x90   : > { %7541 = vmatmul.mubr.msk.bf16.gmra.mrb[12].mxu0 %vm14744_vm3, %v1887_v42  ;;  %v8907_v51 = vmax.f32 %v728_v53, 0.0  ;;  %v2387_v20 = vsel %vm640_vm2, 1, %v14718_v2  ;;  %v2388_v5 = vsel %vm641_vm4, 1, %v14718_v2  ;;  %v8911_v47 = vmax.f32 %v729_v19, 0.0  ;;  %v1496_v19 = vld [vmem:[%s8264_s21 + $0xd9] sm:$0xff] }
  0x91   : > { %v1440_v37 = vadd.f32 %v1392_v28, %v1340_v6  ;;  %v1441_v27 = vadd.f32 %v1393_v43, %v1341_v41  ;;  %2470 = vperm.xlu1 %7962, %v2387_v20   ;;  %2473 = vperm.xlu0 %7961, %v2388_v5   ;;  %v834_v45 = vmul.f32 %v8267_v16, %v8719_v63  ;;  %v8918_v61 = vmax.f32 %v1088_v54, 0.0  ;;  %v1497_v6 = vld [vmem:[%s8264_s21 + $0xe1] sm:$0xff] }
  0x92   : > { %v835_v3 = vmul.f32 %v8267_v16, %v8723_v39  ;;  %v886_v62 = vmul.f32 %v8270_v17, %v8783_v38  ;;  %v887_v29 = vmul.f32 %v8270_v17, %v8844_v21  ;;  %v986_v43 = vmul.f32 %v8281_v22, %v8907_v51 }
  0x93   : > { %v1648_v28 = vadd.f32 %v1600_v18, %v1440_v37  ;;  %v1649_v57 = vadd.f32 %v1601_v34, %v1441_v27  ;;  %v987_v63 = vmul.f32 %v8281_v22, %v8911_v47  ;;  %v8928_v26 = vmax.f32 %v1089_v50, 0.0 }
  0x94   : > { %v1194_v39 = vmul.f32 %v8284_v23, %v8737_v46  ;;  %v934_v18 = vadd.f32 %v886_v62, %v834_v45  ;;  %v935_v42 = vadd.f32 %v887_v29, %v835_v3  ;;  %v1195_v31 = vmul.f32 %v8284_v23, %v8739_v1  ;;  %v594_v45 = vld [vmem:[%s14928_s22 + $0x98] sm:$0xff]  ;;  %v730_v29 = vld [vmem:[%s8264_s21 + $0xe7] sm:$0xff] }
  0x95   : > { %v1748_v53 = vadd.f32 %v1700_v4, %v1648_v28  ;;  %v1749_v54 = vadd.f32 %v1701_v49, %v1649_v57  ;;  %v1294_v34 = vmul.f32 %v8287_v24, %v8802_v7  ;;  %v1295_v41 = vmul.f32 %v8287_v24, %v8857_v32 }
  0x96   : > { %v1394_v37 = vmul.f32 %v8290_v25, %v8918_v61  ;;  %v1034_v4 = vadd.f32 %v986_v43, %v934_v18  ;;  %v1035_v20 = vadd.f32 %v987_v63, %v935_v42  ;;  %v1395_v1 = vmul.f32 %v8290_v25, %v8928_v26  ;;  %v731_v43 = vld [vmem:[%s8264_s21 + $0xef] sm:$0xff]  ;;  %v8967_v63 = vld [vmem:[%s14929_s3 + $0x8] ss:$0 sm:$0xff] }
  0x97   : > { %v1848_v46 = vadd.f32 %v1800_v60, %v1748_v53  ;;  %v1849_v5 = vadd.f32 %v1801_v35, %v1749_v54  ;;  %v8944_v50 = vmax.f32 %v1496_v19, 0.0  ;;  %v8946_v49 = vmax.f32 %v1497_v6, 0.0  ;;  %v595_v60 = vld [vmem:[%s14928_s22 + $0xa0] sm:$0xff]  ;;  %v1090_v53 = vld [vmem:[%s8264_s21 + $0xe8] sm:$0xff] }
  0x98   : > { %v1602_v27 = vmul.f32 %v8301_v33, %v8755_v55  ;;  %v1242_v3 = vadd.f32 %v1194_v39, %v1034_v4  ;;  %v1243_v28 = vadd.f32 %v1195_v31, %v1035_v20  ;;  %v1603_v35 = vmul.f32 %v8301_v33, %v8757_v58 }
  0x99   : > { %v1702_v62 = vmul.f32 %v8311_v40, %v8823_v30  ;;  %v1888_v55 = vpack.c.bf16 %v1849_v5, %v1848_v46  ;;  %v1703_v57 = vmul.f32 %v8311_v40, %v8881_v56  ;;  %v1802_v39 = vmul.f32 %v8967_v63, %v8944_v50  ;;  %v1091_v46 = vld [vmem:[%s8264_s21 + $0xf0] sm:$0xff] }
  0x9a   : > { %v1803_v58 = vmul.f32 %v8967_v63, %v8946_v49  ;;  %v1342_v18 = vadd.f32 %v1294_v34, %v1242_v3  ;;  %v1343_v42 = vadd.f32 %v1295_v41, %v1243_v28  ;;  %vm642_vm5 = vcmp.gt.f32.partialorder %v594_v45, 0.5 }
  0x9b   : > { %vm643_vm6 = vcmp.gt.f32.partialorder %v595_v60, 0.5  ;;  %7544 = vmatprep.mubr.msk.bf16.mxu0 %vm14744_vm3, %v1888_v55  ;;  %v2389_v31 = vsel %vm642_vm5, 1, %v14718_v2  ;;  %v8977_v6 = vmax.f32 %v730_v29, 0.0  ;;  %v8979_v54 = vmax.f32 %v731_v43, 0.0 }
  0x9c   : > { %v2390_v19 = vsel %vm643_vm6, 1, %v14718_v2  ;;  %v1442_v4 = vadd.f32 %v1394_v37, %v1342_v18  ;;  %v1443_v20 = vadd.f32 %v1395_v1, %v1343_v42  ;;  %2476 = vperm.xlu1 %7962, %v2389_v31   ;;  %v836_v34 = vmul.f32 %v8267_v16, %v8781_v52  ;;  %v1499_v18 = vld [vmem:[%s8264_s21 + $0xf1] sm:$0xff] }
  0x9d   : > { %2479 = vperm.xlu0 %7961, %v2390_v19   ;;  %v8984_v41 = vmax.f32 %v1090_v53, 0.0  ;;  %v837_v5 = vmul.f32 %v8267_v16, %v8783_v38  ;;  %v888_v45 = vmul.f32 %v8270_v17, %v8846_v44  ;;  %v889_v60 = vmul.f32 %v8270_v17, %v8907_v51  ;;  %v1498_v53 = vld [vmem:[%s8264_s21 + $0xe9] sm:$0xff] }
  0x9e   : > { %v988_v37 = vmul.f32 %v8281_v22, %v8977_v6  ;;  %v1650_v1 = vadd.f32 %v1602_v27, %v1442_v4  ;;  %v1651_v3 = vadd.f32 %v1603_v35, %v1443_v20  ;;  %v989_v28 = vmul.f32 %v8281_v22, %v8979_v54 }
  0x9f   : > { %v8996_v52 = vmax.f32 %v1091_v46, 0.0  ;;  %v936_v29 = vadd.f32 %v888_v45, %v836_v34  ;;  %v937_v43 = vadd.f32 %v889_v60, %v837_v5  ;;  %v1196_v38 = vmul.f32 %v8284_v23, %v8800_v36  ;;  %v596_v34 = vld [vmem:[%s14928_s22 + $0xa8] sm:$0xff] }
  0xa0   : > { %v1197_v55 = vmul.f32 %v8284_v23, %v8802_v7  ;;  %v1750_v42 = vadd.f32 %v1702_v62, %v1650_v1  ;;  %v1751_v31 = vadd.f32 %v1703_v57, %v1651_v3  ;;  %v1296_v27 = vmul.f32 %v8287_v24, %v8865_v0  ;;  %v733_v1 = vld [vmem:[%s8264_s21 + $0xff] sm:$0xff] }
  0xa1   : > { %v1297_v35 = vmul.f32 %v8287_v24, %v8918_v61  ;;  %v1036_v19 = vadd.f32 %v988_v37, %v936_v29  ;;  %v1037_v46 = vadd.f32 %v989_v28, %v937_v43  ;;  %v1396_v36 = vmul.f32 %v8290_v25, %v8984_v41 }
  0xa2   : > { %v1397_v7 = vmul.f32 %v8290_v25, %v8996_v52  ;;  %v1850_v4 = vadd.f32 %v1802_v39, %v1750_v42  ;;  %v1851_v20 = vadd.f32 %v1803_v58, %v1751_v31  ;;  %v9012_v62 = vmax.f32 %v1498_v53, 0.0  ;;  %v597_v39 = vld [vmem:[%s14928_s22 + $0xb0] sm:$0xff]  ;;  %v1092_v42 = vld [vmem:[%s8264_s21 + $0xf8] sm:$0xff] }
  0xa3   : > { %v9014_v57 = vmax.f32 %v1499_v18, 0.0  ;;  %v1244_v5 = vadd.f32 %v1196_v38, %v1036_v19  ;;  %v1245_v45 = vadd.f32 %v1197_v55, %v1037_v46  ;;  %v1604_v60 = vmul.f32 %v8301_v33, %v8818_v48  ;;  %v732_v58 = vld [vmem:[%s8264_s21 + $0xf7] sm:$0xff]  ;;  %v1093_v46 = vld [vmem:[%s8264_s21 + $0x100] sm:$0xff] }
  0xa4   : > { %v1605_v37 = vmul.f32 %v8301_v33, %v8823_v30  ;;  %v1889_v3 = vpack.c.bf16 %v1851_v20, %v1850_v4  ;;  %v1704_v28 = vmul.f32 %v8311_v40, %v8883_v59  ;;  %v1705_v29 = vmul.f32 %v8311_v40, %v8944_v50 }
  0xa5   : > { %v1804_v48 = vmul.f32 %v8967_v63, %v9012_v62  ;;  %v1344_v43 = vadd.f32 %v1296_v27, %v1244_v5  ;;  %v1345_v30 = vadd.f32 %v1297_v35, %v1245_v45  ;;  %v1805_v38 = vmul.f32 %v8967_v63, %v9014_v57 }
  0xa6   : > { %vm644_vm7 = vcmp.gt.f32.partialorder %v596_v34, 0.5  ;;  %7545 = vmatmul.mubr.msk.bf16.gmra.mrb[16].mxu0 %vm14744_vm3, %v1889_v3  ;;  %vm645_vm8 = vcmp.gt.f32.partialorder %v597_v39, 0.5  ;;  %v9038_v53 = vmax.f32 %v732_v58, 0.0  ;;  %v9040_v18 = vmax.f32 %v733_v1, 0.0  ;;  %v1500_v3 = vld [vmem:[%s8264_s21 + $0xf9] sm:$0xff] }
  0xa7   : > { %v2391_v55 = vsel %vm644_vm7, 1, %v14718_v2  ;;  %v1444_v31 = vadd.f32 %v1396_v36, %v1344_v43  ;;  %v1445_v19 = vadd.f32 %v1397_v7, %v1345_v30  ;;  %v2392_v27 = vsel %vm645_vm8, 1, %v14718_v2 }
  0xa8   : > { %2482 = vperm.xlu1 %7962, %v2391_v55   ;;  %v838_v35 = vmul.f32 %v8267_v16, %v8844_v21  ;;  %2485 = vperm.xlu0 %7961, %v2392_v27   ;;  %v839_v4 = vmul.f32 %v8267_v16, %v8846_v44  ;;  %v890_v20 = vmul.f32 %v8270_v17, %v8911_v47  ;;  %v9057_v45 = vmax.f32 %v1092_v42, 0.0 }
  0xa9   : > { %v891_v36 = vmul.f32 %v8270_v17, %v8977_v6  ;;  %v990_v7 = vmul.f32 %v8281_v22, %v9038_v53  ;;  %v1652_v34 = vadd.f32 %v1604_v60, %v1444_v31  ;;  %v1653_v5 = vadd.f32 %v1605_v37, %v1445_v19  ;;  %v1501_v37 = vld [vmem:[%s8264_s21 + $0x101] sm:$0xff] }
  0xaa   : > { %v991_v21 = vmul.f32 %v8281_v22, %v9040_v18  ;;  %v938_v39 = vadd.f32 %v890_v20, %v838_v35  ;;  %v9059_v44 = vmax.f32 %v1093_v46, 0.0  ;;  %v1198_v1 = vmul.f32 %v8284_v23, %v8857_v32  ;;  %v598_v35 = vld [vmem:[%s14928_s22 + $0xb8] sm:$0xff] }
  0xab   : > { %v939_v58 = vadd.f32 %v891_v36, %v839_v4  ;;  %v1752_v43 = vadd.f32 %v1704_v28, %v1652_v34  ;;  %v1753_v30 = vadd.f32 %v1705_v29, %v1653_v5  ;;  %v1199_v55 = vmul.f32 %v8284_v23, %v8865_v0 }
  0xac   : > { %v1298_v60 = vmul.f32 %v8287_v24, %v8928_v26  ;;  %v1038_v42 = vadd.f32 %v990_v7, %v938_v39  ;;  %v1299_v19 = vmul.f32 %v8287_v24, %v8984_v41  ;;  %v1398_v32 = vmul.f32 %v8290_v25, %v9057_v45  ;;  %v735_v7 = vld [vmem:[%s8264_s21 + $0x10f] sm:$0xff] }
  0xad   : > { %v1039_v31 = vadd.f32 %v991_v21, %v939_v58  ;;  %v1852_v27 = vadd.f32 %v1804_v48, %v1752_v43  ;;  %v1853_v28 = vadd.f32 %v1805_v38, %v1753_v30  ;;  %v1399_v29 = vmul.f32 %v8290_v25, %v9059_v44  ;;  %v599_v48 = vld [vmem:[%s14928_s22 + $0xc0] sm:$0xff]  ;;  %v1094_v43 = vld [vmem:[%s8264_s21 + $0x108] sm:$0xff] }
  0xae   : > { %v9075_v0 = vmax.f32 %v1500_v3, 0.0  ;;  %v1246_v46 = vadd.f32 %v1198_v1, %v1038_v42  ;;  %v9080_v20 = vmax.f32 %v1501_v37, 0.0  ;;  %v1606_v36 = vmul.f32 %v8301_v33, %v8881_v56  ;;  %v734_v38 = vld [vmem:[%s8264_s21 + $0x107] sm:$0xff] }
  0xaf   : > { %v1247_v4 = vadd.f32 %v1199_v55, %v1039_v31  ;;  %v1890_v34 = vpack.c.bf16 %v1853_v28, %v1852_v27  ;;  %v1607_v5 = vmul.f32 %v8301_v33, %v8883_v59  ;;  %v1706_v21 = vmul.f32 %v8311_v40, %v8946_v49  ;;  %v1095_v31 = vld [vmem:[%s8264_s21 + $0x110] sm:$0xff] }
  0xb0   : > { %v1707_v39 = vmul.f32 %v8311_v40, %v9012_v62  ;;  %v1346_v58 = vadd.f32 %v1298_v60, %v1246_v46  ;;  %v1806_v56 = vmul.f32 %v8967_v63, %v9075_v0  ;;  %v1807_v3 = vmul.f32 %v8967_v63, %v9080_v20 }
  0xb1   : > { %v1347_v1 = vadd.f32 %v1299_v19, %v1247_v4  ;;  %7548 = vmatprep.mubr.msk.bf16.mxu0 %vm14744_vm3, %v1890_v34  ;;  %vm646_vm9 = vcmp.gt.f32.partialorder %v598_v35, 0.5  ;;  %vm647_vm10 = vcmp.gt.f32.partialorder %v599_v48, 0.5  ;;  %v9101_v59 = vmax.f32 %v734_v38, 0.0 }
  0xb2   : > { %v9103_v30 = vmax.f32 %v735_v7, 0.0  ;;  %v1446_v55 = vadd.f32 %v1398_v32, %v1346_v58  ;;  %v2393_v60 = vsel %vm646_vm9, 1, %v14718_v2  ;;  %v2394_v42 = vsel %vm647_vm10, 1, %v14718_v2 }
  0xb3   : > { %v1447_v37 = vadd.f32 %v1399_v29, %v1347_v1  ;;  %2488 = vperm.xlu1 %7962, %v2393_v60   ;;  %2491 = vperm.xlu0 %7961, %v2394_v42   ;;  %v840_v19 = vmul.f32 %v8267_v16, %v8907_v51  ;;  %v841_v27 = vmul.f32 %v8267_v16, %v8911_v47  ;;  %v9114_v32 = vmax.f32 %v1094_v43, 0.0  ;;  %v1503_v1 = vld [vmem:[%s8264_s21 + $0x111] sm:$0xff] }
  0xb4   : > { %v892_v28 = vmul.f32 %v8270_v17, %v8979_v54  ;;  %v1654_v29 = vadd.f32 %v1606_v36, %v1446_v55  ;;  %v893_v46 = vmul.f32 %v8270_v17, %v9038_v53  ;;  %v992_v4 = vmul.f32 %v8281_v22, %v9101_v59 }
  0xb5   : > { %v1655_v35 = vadd.f32 %v1607_v5, %v1447_v37  ;;  %v993_v51 = vmul.f32 %v8281_v22, %v9103_v30  ;;  %v9122_v38 = vmax.f32 %v1095_v31, 0.0  ;;  %v1200_v47 = vmul.f32 %v8284_v23, %v8918_v61  ;;  %v1502_v5 = vld [vmem:[%s8264_s21 + $0x109] sm:$0xff] }
  0xb6   : > { %v940_v48 = vadd.f32 %v892_v28, %v840_v19  ;;  %v1754_v7 = vadd.f32 %v1706_v21, %v1654_v29  ;;  %v941_v58 = vadd.f32 %v893_v46, %v841_v27  ;;  %v1201_v36 = vmul.f32 %v8284_v23, %v8928_v26  ;;  %v600_v28 = vld [vmem:[%s14928_s22 + $0xc8] sm:$0xff] }
  0xb7   : > { %v1755_v34 = vadd.f32 %v1707_v39, %v1655_v35  ;;  %v1300_v55 = vmul.f32 %v8287_v24, %v8996_v52  ;;  %v1301_v37 = vmul.f32 %v8287_v24, %v9057_v45  ;;  %v1400_v60 = vmul.f32 %v8290_v25, %v9114_v32 }
  0xb8   : > { %v1040_v43 = vadd.f32 %v992_v4, %v940_v48  ;;  %v1854_v61 = vadd.f32 %v1806_v56, %v1754_v7  ;;  %v1041_v39 = vadd.f32 %v993_v51, %v941_v58  ;;  %v1401_v26 = vmul.f32 %v8290_v25, %v9122_v38  ;;  %v601_v56 = vld [vmem:[%s14928_s22 + $0xd0] sm:$0xff]  ;;  %v737_v48 = vld [vmem:[%s8264_s21 + $0x11f] sm:$0xff] }
  0xb9   : > { %v1855_v21 = vadd.f32 %v1807_v3, %v1755_v34  ;;  %v9138_v31 = vmax.f32 %v1502_v5, 0.0  ;;  %v9140_v19 = vmax.f32 %v1503_v1, 0.0  ;;  %v1608_v27 = vmul.f32 %v8301_v33, %v8944_v50  ;;  %v736_v3 = vld [vmem:[%s8264_s21 + $0x117] sm:$0xff] }
  0xba   : > { %v1248_v42 = vadd.f32 %v1200_v47, %v1040_v43  ;;  %v1249_v35 = vadd.f32 %v1201_v36, %v1041_v39  ;;  %v1609_v46 = vmul.f32 %v8301_v33, %v8946_v49  ;;  %v1708_v4 = vmul.f32 %v8311_v40, %v9014_v57  ;;  %v1096_v34 = vld [vmem:[%s8264_s21 + $0x118] sm:$0xff] }
  0xbb   : > { %v1891_v29 = vpack.c.bf16 %v1855_v21, %v1854_v61  ;;  %v1709_v51 = vmul.f32 %v8311_v40, %v9075_v0  ;;  %v1808_v47 = vmul.f32 %v8967_v63, %v9138_v31  ;;  %v1809_v7 = vmul.f32 %v8967_v63, %v9140_v19 }
  0xbc   : > { %v1348_v50 = vadd.f32 %v1300_v55, %v1248_v42  ;;  %v1349_v58 = vadd.f32 %v1301_v37, %v1249_v35  ;;  %vm648_vm11 = vcmp.gt.f32.partialorder %v600_v28, 0.5  ;;  %vm649_vm12 = vcmp.gt.f32.partialorder %v601_v56, 0.5  ;;  %v1097_v55 = vld [vmem:[%s8264_s21 + $0x120] sm:$0xff] }
  0xbd   : > { %7549 = vmatmul.mubr.msk.bf16.gmra.mrb[20].mxu0 %vm14744_vm3, %v1891_v29  ;;  %v9164_v49 = vmax.f32 %v736_v3, 0.0  ;;  %v2395_v5 = vsel %vm648_vm11, 1, %v14718_v2  ;;  %v2396_v1 = vsel %vm649_vm12, 1, %v14718_v2  ;;  %v9168_v43 = vmax.f32 %v737_v48, 0.0 }
  0xbe   : > { %v1448_v36 = vadd.f32 %v1400_v60, %v1348_v50  ;;  %v1449_v61 = vadd.f32 %v1401_v26, %v1349_v58  ;;  %2494 = vperm.xlu1 %7962, %v2395_v5   ;;  %2497 = vperm.xlu0 %7961, %v2396_v1   ;;  %v842_v21 = vmul.f32 %v8267_v16, %v8977_v6  ;;  %v9175_v39 = vmax.f32 %v1096_v34, 0.0  ;;  %v1504_v50 = vld [vmem:[%s8264_s21 + $0x119] sm:$0xff]  ;;  %v1505_v34 = vld [vmem:[%s8264_s21 + $0x121] sm:$0xff] }
  0xbf   : > { %v843_v37 = vmul.f32 %v8267_v16, %v8979_v54  ;;  %v894_v42 = vmul.f32 %v8270_v17, %v9040_v18  ;;  %v895_v28 = vmul.f32 %v8270_v17, %v9101_v59  ;;  %v994_v26 = vmul.f32 %v8281_v22, %v9164_v49 }
  0xc0   : > { %v1656_v60 = vadd.f32 %v1608_v27, %v1448_v36  ;;  %v1657_v56 = vadd.f32 %v1609_v46, %v1449_v61  ;;  %v995_v6 = vmul.f32 %v8281_v22, %v9168_v43  ;;  %v9185_v3 = vmax.f32 %v1097_v55, 0.0 }
  0xc1   : > { %v1202_v54 = vmul.f32 %v8284_v23, %v8984_v41  ;;  %v942_v27 = vadd.f32 %v894_v42, %v842_v21  ;;  %v943_v35 = vadd.f32 %v895_v28, %v843_v37  ;;  %v1203_v48 = vmul.f32 %v8284_v23, %v8996_v52  ;;  %v602_v37 = vld [vmem:[%s14928_s22 + $0xd8] sm:$0xff] }
  0xc2   : > { %v1756_v29 = vadd.f32 %v1708_v4, %v1656_v60  ;;  %v1757_v58 = vadd.f32 %v1709_v51, %v1657_v56  ;;  %v1302_v46 = vmul.f32 %v8287_v24, %v9059_v44  ;;  %v1303_v36 = vmul.f32 %v8287_v24, %v9114_v32  ;;  %v739_v56 = vld [vmem:[%s8264_s21 + $0x12f] sm:$0xff] }
  0xc3   : > { %v1402_v5 = vmul.f32 %v8290_v25, %v9175_v39  ;;  %v1042_v4 = vadd.f32 %v994_v26, %v942_v27  ;;  %v1043_v1 = vadd.f32 %v995_v6, %v943_v35  ;;  %v1403_v52 = vmul.f32 %v8290_v25, %v9185_v3  ;;  %v738_v26 = vld [vmem:[%s8264_s21 + $0x127] sm:$0xff] }
  0xc4   : > { %v1856_v41 = vadd.f32 %v1808_v47, %v1756_v29  ;;  %v1857_v55 = vadd.f32 %v1809_v7, %v1757_v58  ;;  %v9201_v51 = vmax.f32 %v1504_v50, 0.0  ;;  %v9203_v61 = vmax.f32 %v1505_v34, 0.0  ;;  %v603_v47 = vld [vmem:[%s14928_s22 + $0xe0] sm:$0xff]  ;;  %v1098_v27 = vld [vmem:[%s8264_s21 + $0x128] sm:$0xff] }
  0xc5   : > { %v1610_v21 = vmul.f32 %v8301_v33, %v9012_v62  ;;  %v1250_v60 = vadd.f32 %v1202_v54, %v1042_v4  ;;  %v1251_v42 = vadd.f32 %v1203_v48, %v1043_v1  ;;  %v1611_v7 = vmul.f32 %v8301_v33, %v9014_v57 }
  0xc6   : > { %v1710_v28 = vmul.f32 %v8311_v40, %v9080_v20  ;;  %v1892_v62 = vpack.c.bf16 %v1857_v55, %v1856_v41  ;;  %v1711_v6 = vmul.f32 %v8311_v40, %v9138_v31  ;;  %v1810_v29 = vmul.f32 %v8967_v63, %v9201_v51  ;;  %v1099_v41 = vld [vmem:[%s8264_s21 + $0x130] sm:$0xff] }
  0xc7   : > { %v1811_v54 = vmul.f32 %v8967_v63, %v9203_v61  ;;  %v1350_v35 = vadd.f32 %v1302_v46, %v1250_v60  ;;  %v1351_v48 = vadd.f32 %v1303_v36, %v1251_v42  ;;  %vm650_vm13 = vcmp.gt.f32.partialorder %v602_v37, 0.5 }
  0xc8   : > { %vm651_vm14 = vcmp.gt.f32.partialorder %v603_v47, 0.5  ;;  %7552 = vmatprep.mubr.msk.bf16.mxu0 %vm14744_vm3, %v1892_v62  ;;  %v2397_v57 = vsel %vm650_vm13, 1, %v14718_v2  ;;  %v9229_v34 = vmax.f32 %v738_v26, 0.0  ;;  %v9231_v58 = vmax.f32 %v739_v56, 0.0 }
  0xc9   : > { %v2398_v50 = vsel %vm651_vm14, 1, %v14718_v2  ;;  %v1450_v4 = vadd.f32 %v1402_v5, %v1350_v35  ;;  %v1451_v1 = vadd.f32 %v1403_v52, %v1351_v48  ;;  %2500 = vperm.xlu1 %7962, %v2397_v57   ;;  %v844_v46 = vmul.f32 %v8267_v16, %v9038_v53  ;;  %v1507_v35 = vld [vmem:[%s8264_s21 + $0x131] sm:$0xff] }
  0xca   : > { %2503 = vperm.xlu0 %7961, %v2398_v50   ;;  %v9236_v36 = vmax.f32 %v1098_v27, 0.0  ;;  %v845_v55 = vmul.f32 %v8267_v16, %v9040_v18  ;;  %v896_v37 = vmul.f32 %v8270_v17, %v9103_v30  ;;  %v897_v47 = vmul.f32 %v8270_v17, %v9164_v49  ;;  %v1506_v27 = vld [vmem:[%s8264_s21 + $0x129] sm:$0xff] }
  0xcb   : > { %v996_v5 = vmul.f32 %v8281_v22, %v9229_v34  ;;  %v1658_v52 = vadd.f32 %v1610_v21, %v1450_v4  ;;  %v1659_v60 = vadd.f32 %v1611_v7, %v1451_v1  ;;  %v997_v42 = vmul.f32 %v8281_v22, %v9231_v58 }
  0xcc   : > { %v9248_v53 = vmax.f32 %v1099_v41, 0.0  ;;  %v944_v26 = vadd.f32 %v896_v37, %v844_v46  ;;  %v945_v56 = vadd.f32 %v897_v47, %v845_v55  ;;  %v1204_v18 = vmul.f32 %v8284_v23, %v9057_v45  ;;  %v604_v46 = vld [vmem:[%s14928_s22 + $0xe8] sm:$0xff] }
  0xcd   : > { %v1205_v62 = vmul.f32 %v8284_v23, %v9059_v44  ;;  %v1758_v48 = vadd.f32 %v1710_v28, %v1658_v52  ;;  %v1759_v57 = vadd.f32 %v1711_v6, %v1659_v60  ;;  %v1304_v21 = vmul.f32 %v8287_v24, %v9122_v38  ;;  %v741_v52 = vld [vmem:[%s8264_s21 + $0x13f] sm:$0xff] }
  0xce   : > { %v1305_v7 = vmul.f32 %v8287_v24, %v9175_v39  ;;  %v1044_v50 = vadd.f32 %v996_v5, %v944_v26  ;;  %v1045_v41 = vadd.f32 %v997_v42, %v945_v56  ;;  %v1404_v45 = vmul.f32 %v8290_v25, %v9236_v36 }
  0xcf   : > { %v1405_v44 = vmul.f32 %v8290_v25, %v9248_v53  ;;  %v1858_v4 = vadd.f32 %v1810_v29, %v1758_v48  ;;  %v1859_v1 = vadd.f32 %v1811_v54, %v1759_v57  ;;  %v9264_v28 = vmax.f32 %v1506_v27, 0.0  ;;  %v605_v29 = vld [vmem:[%s14928_s22 + $0xf0] sm:$0xff]  ;;  %v1100_v48 = vld [vmem:[%s8264_s21 + $0x138] sm:$0xff] }
  0xd0   : > { %v9266_v6 = vmax.f32 %v1507_v35, 0.0  ;;  %v1252_v55 = vadd.f32 %v1204_v18, %v1044_v50  ;;  %v1253_v37 = vadd.f32 %v1205_v62, %v1045_v41  ;;  %v1612_v47 = vmul.f32 %v8301_v33, %v9075_v0  ;;  %v740_v54 = vld [vmem:[%s8264_s21 + $0x137] sm:$0xff]  ;;  %v1101_v41 = vld [vmem:[%s8264_s21 + $0x140] sm:$0xff] }
  0xd1   : > { %v1613_v5 = vmul.f32 %v8301_v33, %v9080_v20  ;;  %v1893_v60 = vpack.c.bf16 %v1859_v1, %v1858_v4  ;;  %v1712_v42 = vmul.f32 %v8311_v40, %v9140_v19  ;;  %v1713_v26 = vmul.f32 %v8311_v40, %v9201_v51 }
  0xd2   : > { %v1812_v0 = vmul.f32 %v8967_v63, %v9264_v28  ;;  %v1352_v56 = vadd.f32 %v1304_v21, %v1252_v55  ;;  %v1353_v20 = vadd.f32 %v1305_v7, %v1253_v37  ;;  %v1813_v18 = vmul.f32 %v8967_v63, %v9266_v6 }
  0xd3   : > { %vm652_vm15 = vcmp.gt.f32.partialorder %v604_v46, 0.5  ;;  %7553 = vmatmul.mubr.msk.bf16.gmra.mrb[24].mxu0 %vm14744_vm3, %v1893_v60  ;;  %vm653_vm0 = vcmp.gt.f32.partialorder %v605_v29, 0.5  ;;  %v9290_v27 = vmax.f32 %v740_v54, 0.0  ;;  %v9292_v35 = vmax.f32 %v741_v52, 0.0  ;;  %v1508_v60 = vld [vmem:[%s8264_s21 + $0x139] sm:$0xff] }
  0xd4   : > { %v2399_v62 = vsel %vm652_vm15, 1, %v14718_v2  ;;  %v1452_v57 = vadd.f32 %v1404_v45, %v1352_v56  ;;  %v1453_v50 = vadd.f32 %v1405_v44, %v1353_v20  ;;  %v2400_v21 = vsel %vm653_vm0, 1, %v14718_v2 }
  0xd5   : > { %2506 = vperm.xlu1 %7962, %v2399_v62   ;;  %v846_v7 = vmul.f32 %v8267_v16, %v9101_v59  ;;  %2509 = vperm.xlu0 %7961, %v2400_v21   ;;  %v847_v4 = vmul.f32 %v8267_v16, %v9103_v30  ;;  %v898_v1 = vmul.f32 %v8270_v17, %v9168_v43  ;;  %v9309_v37 = vmax.f32 %v1100_v48, 0.0  ;;  %v1509_v62 = vld [vmem:[%s8264_s21 + $0x141] sm:$0xff] }
  0xd6   : > { %v899_v45 = vmul.f32 %v8270_v17, %v9229_v34  ;;  %v998_v44 = vmul.f32 %v8281_v22, %v9290_v27  ;;  %v1660_v46 = vadd.f32 %v1612_v47, %v1452_v57  ;;  %v1661_v55 = vadd.f32 %v1613_v5, %v1453_v50 }
  0xd7   : > { %v999_v59 = vmul.f32 %v8281_v22, %v9292_v35  ;;  %v946_v29 = vadd.f32 %v898_v1, %v846_v7  ;;  %v9311_v30 = vmax.f32 %v1101_v41, 0.0  ;;  %v1206_v52 = vmul.f32 %v8284_v23, %v9114_v32 }
  0xd8   : > { %v947_v54 = vadd.f32 %v899_v45, %v847_v4  ;;  %v1760_v56 = vadd.f32 %v1712_v42, %v1660_v46  ;;  %v1761_v20 = vadd.f32 %v1713_v26, %v1661_v55  ;;  %v1207_v47 = vmul.f32 %v8284_v23, %v9122_v38  ;;  %v742_v38 = vld [vmem:[%s8264_s21 + $0x147] sm:$0xff] }
  0xd9   : > { %v1306_v5 = vmul.f32 %v8287_v24, %v9185_v3  ;;  %v1046_v48 = vadd.f32 %v998_v44, %v946_v29  ;;  %v1307_v50 = vmul.f32 %v8287_v24, %v9236_v36  ;;  %v1406_v21 = vmul.f32 %v8290_v25, %v9309_v37  ;;  %v606_v44 = vld [vmem:[%s14928_s22 + $0xf8] sm:$0xff] }
  0xda   : > { %v1047_v57 = vadd.f32 %v999_v59, %v947_v54  ;;  %v1860_v32 = vadd.f32 %v1812_v0, %v1760_v56  ;;  %v1861_v7 = vadd.f32 %v1813_v18, %v1761_v20  ;;  %v1407_v42 = vmul.f32 %v8290_v25, %v9311_v30  ;;  %v607_v0 = vld [vmem:[%s14928_s22 + $0x100] sm:$0xff]  ;;  %v743_v18 = vld [vmem:[%s8264_s21 + $0x14f] sm:$0xff] }
  0xdb   : > { %v9327_v26 = vmax.f32 %v1508_v60, 0.0  ;;  %v1254_v41 = vadd.f32 %v1206_v52, %v1046_v48  ;;  %v9330_v1 = vmax.f32 %v1509_v62, 0.0  ;;  %v1614_v45 = vmul.f32 %v8301_v33, %v9138_v31  ;;  %v1102_v56 = vld [vmem:[%s8264_s21 + $0x148] sm:$0xff] }
  0xdc   : > { %v1255_v4 = vadd.f32 %v1207_v47, %v1047_v57  ;;  %v1894_v46 = vpack.c.bf16 %v1861_v7, %v1860_v32  ;;  %v1615_v55 = vmul.f32 %v8301_v33, %v9140_v19  ;;  %v1714_v59 = vmul.f32 %v8311_v40, %v9203_v61  ;;  %v1103_v57 = vld [vmem:[%s8264_s21 + $0x150] sm:$0xff] }
  0xdd   : > { %v1715_v31 = vmul.f32 %v8311_v40, %v9264_v28  ;;  %v1354_v29 = vadd.f32 %v1306_v5, %v1254_v41  ;;  %v1814_v52 = vmul.f32 %v8967_v63, %v9327_v26  ;;  %v1815_v60 = vmul.f32 %v8967_v63, %v9330_v1 }
  0xde   : > { %v1355_v54 = vadd.f32 %v1307_v50, %v1255_v4  ;;  %7556 = vmatprep.mubr.msk.bf16.mxu0 %vm14744_vm3, %v1894_v46  ;;  %vm654_vm1 = vcmp.gt.f32.partialorder %v606_v44, 0.5  ;;  %vm655_vm2 = vcmp.gt.f32.partialorder %v607_v0, 0.5  ;;  %v9353_v19 = vmax.f32 %v742_v38, 0.0 }
  0xdf   : > { %v9355_v20 = vmax.f32 %v743_v18, 0.0  ;;  %v1454_v47 = vadd.f32 %v1406_v21, %v1354_v29  ;;  %v2401_v5 = vsel %vm654_vm1, 1, %v14718_v2  ;;  %v2402_v48 = vsel %vm655_vm2, 1, %v14718_v2 }
  0xe0   : > { %v1455_v62 = vadd.f32 %v1407_v42, %v1355_v54  ;;  %2512 = vperm.xlu1 %7962, %v2401_v5   ;;  %2515 = vperm.xlu0 %7961, %v2402_v48   ;;  %v848_v50 = vmul.f32 %v8267_v16, %v9164_v49  ;;  %v849_v32 = vmul.f32 %v8267_v16, %v9168_v43  ;;  %v9366_v21 = vmax.f32 %v1102_v56, 0.0  ;;  %v1511_v54 = vld [vmem:[%s8264_s21 + $0x151] sm:$0xff] }
  0xe1   : > { %v900_v7 = vmul.f32 %v8270_v17, %v9231_v58  ;;  %v1662_v42 = vadd.f32 %v1614_v45, %v1454_v47  ;;  %v901_v41 = vmul.f32 %v8270_v17, %v9290_v27  ;;  %v1000_v4 = vmul.f32 %v8281_v22, %v9353_v19 }
  0xe2   : > { %v1663_v38 = vadd.f32 %v1615_v55, %v1455_v62  ;;  %v1001_v49 = vmul.f32 %v8281_v22, %v9355_v20  ;;  %v9374_v0 = vmax.f32 %v1103_v57, 0.0  ;;  %v1208_v43 = vmul.f32 %v8284_v23, %v9175_v39  ;;  %v1510_v55 = vld [vmem:[%s8264_s21 + $0x149] sm:$0xff] }
  0xe3   : > { %v948_v44 = vadd.f32 %v900_v7, %v848_v50  ;;  %v1762_v18 = vadd.f32 %v1714_v59, %v1662_v42  ;;  %v949_v29 = vadd.f32 %v901_v41, %v849_v32  ;;  %v1209_v45 = vmul.f32 %v8284_v23, %v9185_v3  ;;  %v608_v7 = vld [vmem:[%s14928_s22 + $0x108] sm:$0xff] }
  0xe4   : > { %v1763_v46 = vadd.f32 %v1715_v31, %v1663_v38  ;;  %v1308_v47 = vmul.f32 %v8287_v24, %v9248_v53  ;;  %v1309_v62 = vmul.f32 %v8287_v24, %v9309_v37  ;;  %v1408_v5 = vmul.f32 %v8290_v25, %v9366_v21 }
  0xe5   : > { %v1048_v56 = vadd.f32 %v1000_v4, %v948_v44  ;;  %v1862_v39 = vadd.f32 %v1814_v52, %v1762_v18  ;;  %v1049_v31 = vadd.f32 %v1001_v49, %v949_v29  ;;  %v1409_v3 = vmul.f32 %v8290_v25, %v9374_v0  ;;  %v609_v52 = vld [vmem:[%s14928_s22 + $0x110] sm:$0xff]  ;;  %v745_v44 = vld [vmem:[%s8264_s21 + $0x15f] sm:$0xff] }
  0xe6   : > { %v1863_v59 = vadd.f32 %v1815_v60, %v1763_v46  ;;  %v9390_v57 = vmax.f32 %v1510_v55, 0.0  ;;  %v9392_v50 = vmax.f32 %v1511_v54, 0.0  ;;  %v1616_v32 = vmul.f32 %v8301_v33, %v9201_v51  ;;  %v744_v60 = vld [vmem:[%s8264_s21 + $0x157] sm:$0xff] }
  0xe7   : > { %v1256_v48 = vadd.f32 %v1208_v43, %v1048_v56  ;;  %v1257_v38 = vadd.f32 %v1209_v45, %v1049_v31  ;;  %v1617_v41 = vmul.f32 %v8301_v33, %v9203_v61  ;;  %v1716_v4 = vmul.f32 %v8311_v40, %v9266_v6  ;;  %v1104_v46 = vld [vmem:[%s8264_s21 + $0x158] sm:$0xff] }
  0xe8   : > { %v1895_v42 = vpack.c.bf16 %v1863_v59, %v1862_v39  ;;  %v1717_v49 = vmul.f32 %v8311_v40, %v9327_v26  ;;  %v1816_v43 = vmul.f32 %v8967_v63, %v9390_v57  ;;  %v1817_v18 = vmul.f32 %v8967_v63, %v9392_v50 }
  0xe9   : > { %v1356_v51 = vadd.f32 %v1308_v47, %v1256_v48  ;;  %v1357_v29 = vadd.f32 %v1309_v62, %v1257_v38  ;;  %vm656_vm4 = vcmp.gt.f32.partialorder %v608_v7, 0.5  ;;  %vm657_vm5 = vcmp.gt.f32.partialorder %v609_v52, 0.5  ;;  %v1105_v47 = vld [vmem:[%s8264_s21 + $0x160] sm:$0xff] }
  0xea   : > { %7557 = vmatmul.mubr.msk.bf16.gmra.mrb[28].mxu0 %vm14744_vm3, %v1895_v42  ;;  %v9416_v61 = vmax.f32 %v744_v60, 0.0  ;;  %v2403_v55 = vsel %vm656_vm4, 1, %v14718_v2  ;;  %v2404_v54 = vsel %vm657_vm5, 1, %v14718_v2  ;;  %v9420_v56 = vmax.f32 %v745_v44, 0.0 }
  0xeb   : > { %v1456_v45 = vadd.f32 %v1408_v5, %v1356_v51  ;;  %v1457_v39 = vadd.f32 %v1409_v3, %v1357_v29  ;;  %2518 = vperm.xlu1 %7962, %v2403_v55   ;;  %2521 = vperm.xlu0 %7961, %v2404_v54   ;;  %v850_v59 = vmul.f32 %v8267_v16, %v9229_v34  ;;  %v9427_v31 = vmax.f32 %v1104_v46, 0.0  ;;  %v1512_v51 = vld [vmem:[%s8264_s21 + $0x159] sm:$0xff]  ;;  %v1513_v46 = vld [vmem:[%s8264_s21 + $0x161] sm:$0xff] }
  0xec   : > { %v851_v62 = vmul.f32 %v8267_v16, %v9231_v58  ;;  %v902_v48 = vmul.f32 %v8270_v17, %v9292_v35  ;;  %v903_v7 = vmul.f32 %v8270_v17, %v9353_v19  ;;  %v1002_v3 = vmul.f32 %v8281_v22, %v9416_v61 }
  0xed   : > { %v1664_v5 = vadd.f32 %v1616_v32, %v1456_v45  ;;  %v1665_v52 = vadd.f32 %v1617_v41, %v1457_v39  ;;  %v1003_v34 = vmul.f32 %v8281_v22, %v9420_v56  ;;  %v9437_v60 = vmax.f32 %v1105_v47, 0.0 }
  0xee   : > { %v1210_v58 = vmul.f32 %v8284_v23, %v9236_v36  ;;  %v950_v32 = vadd.f32 %v902_v48, %v850_v59  ;;  %v951_v38 = vadd.f32 %v903_v7, %v851_v62  ;;  %v1211_v44 = vmul.f32 %v8284_v23, %v9248_v53  ;;  %v610_v62 = vld [vmem:[%s14928_s22 + $0x118] sm:$0xff] }
  0xef   : > { %v1764_v42 = vadd.f32 %v1716_v4, %v1664_v5  ;;  %v1765_v29 = vadd.f32 %v1717_v49, %v1665_v52  ;;  %v1310_v41 = vmul.f32 %v8287_v24, %v9311_v30  ;;  %v1311_v45 = vmul.f32 %v8287_v24, %v9366_v21  ;;  %v747_v52 = vld [vmem:[%s8264_s21 + $0x16f] sm:$0xff] }
  0xf0   : > { %v1410_v55 = vmul.f32 %v8290_v25, %v9427_v31  ;;  %v1050_v4 = vadd.f32 %v1002_v3, %v950_v32  ;;  %v1051_v54 = vadd.f32 %v1003_v34, %v951_v38  ;;  %v1411_v53 = vmul.f32 %v8290_v25, %v9437_v60  ;;  %v746_v3 = vld [vmem:[%s8264_s21 + $0x167] sm:$0xff] }
  0xf1   : > { %v1864_v36 = vadd.f32 %v1816_v43, %v1764_v42  ;;  %v1865_v47 = vadd.f32 %v1817_v18, %v1765_v29  ;;  %v9453_v49 = vmax.f32 %v1512_v51, 0.0  ;;  %v9455_v39 = vmax.f32 %v1513_v46, 0.0  ;;  %v611_v43 = vld [vmem:[%s14928_s22 + $0x120] sm:$0xff]  ;;  %v1106_v32 = vld [vmem:[%s8264_s21 + $0x168] sm:$0xff] }
  0xf2   : > { %v1618_v59 = vmul.f32 %v8301_v33, %v9264_v28  ;;  %v1258_v5 = vadd.f32 %v1210_v58, %v1050_v4  ;;  %v1259_v48 = vadd.f32 %v1211_v44, %v1051_v54  ;;  %v1619_v18 = vmul.f32 %v8301_v33, %v9266_v6 }
  0xf3   : > { %v1718_v7 = vmul.f32 %v8311_v40, %v9330_v1  ;;  %v1896_v28 = vpack.c.bf16 %v1865_v47, %v1864_v36  ;;  %v1719_v34 = vmul.f32 %v8311_v40, %v9390_v57  ;;  %v1818_v42 = vmul.f32 %v8967_v63, %v9453_v49  ;;  %v1107_v36 = vld [vmem:[%s8264_s21 + $0x170] sm:$0xff] }
  0xf4   : > { %v1819_v58 = vmul.f32 %v8967_v63, %v9455_v39  ;;  %v1358_v38 = vadd.f32 %v1310_v41, %v1258_v5  ;;  %v1359_v44 = vadd.f32 %v1311_v45, %v1259_v48  ;;  %vm658_vm6 = vcmp.gt.f32.partialorder %v610_v62, 0.5 }
  0xf5   : > { %vm659_vm7 = vcmp.gt.f32.partialorder %v611_v43, 0.5  ;;  %7560 = vmatprep.mubr.msk.bf16.mxu0 %vm14744_vm3, %v1896_v28  ;;  %v2405_v6 = vsel %vm658_vm6, 1, %v14718_v2  ;;  %v9481_v46 = vmax.f32 %v746_v3, 0.0  ;;  %v9483_v29 = vmax.f32 %v747_v52, 0.0 }
  0xf6   : > { %v2406_v51 = vsel %vm659_vm7, 1, %v14718_v2  ;;  %v1458_v4 = vadd.f32 %v1410_v55, %v1358_v38  ;;  %v1459_v54 = vadd.f32 %v1411_v53, %v1359_v44  ;;  %2524 = vperm.xlu1 %7962, %v2405_v6   ;;  %v852_v41 = vmul.f32 %v8267_v16, %v9290_v27  ;;  %v1515_v38 = vld [vmem:[%s8264_s21 + $0x171] sm:$0xff] }
  0xf7   : > { %2527 = vperm.xlu0 %7961, %v2406_v51   ;;  %v9488_v45 = vmax.f32 %v1106_v32, 0.0  ;;  %v853_v47 = vmul.f32 %v8267_v16, %v9292_v35  ;;  %v904_v62 = vmul.f32 %v8270_v17, %v9355_v20  ;;  %v905_v43 = vmul.f32 %v8270_v17, %v9416_v61  ;;  %v1514_v32 = vld [vmem:[%s8264_s21 + $0x169] sm:$0xff] }
  0xf8   : > { %v1004_v55 = vmul.f32 %v8281_v22, %v9481_v46  ;;  %v1666_v53 = vadd.f32 %v1618_v59, %v1458_v4  ;;  %v1667_v5 = vadd.f32 %v1619_v18, %v1459_v54  ;;  %v1005_v48 = vmul.f32 %v8281_v22, %v9483_v29 }
  0xf9   : > { %v9500_v27 = vmax.f32 %v1107_v36, 0.0  ;;  %v952_v3 = vadd.f32 %v904_v62, %v852_v41  ;;  %v953_v52 = vadd.f32 %v905_v43, %v853_v47  ;;  %v1212_v35 = vmul.f32 %v8284_v23, %v9309_v37  ;;  %v612_v41 = vld [vmem:[%s14928_s22 + $0x128] sm:$0xff] }
  0xfa   : > { %v1213_v28 = vmul.f32 %v8284_v23, %v9311_v30  ;;  %v1766_v44 = vadd.f32 %v1718_v7, %v1666_v53  ;;  %v1767_v6 = vadd.f32 %v1719_v34, %v1667_v5  ;;  %v1312_v59 = vmul.f32 %v8287_v24, %v9374_v0  ;;  %v749_v53 = vld [vmem:[%s8264_s21 + $0x17f] sm:$0xff] }
  0xfb   : > { %v1313_v18 = vmul.f32 %v8287_v24, %v9427_v31  ;;  %v1052_v51 = vadd.f32 %v1004_v55, %v952_v3  ;;  %v1053_v36 = vadd.f32 %v1005_v48, %v953_v52  ;;  %v1412_v37 = vmul.f32 %v8290_v25, %v9488_v45 }
  0xfc   : > { %v1413_v30 = vmul.f32 %v8290_v25, %v9500_v27  ;;  %v1866_v4 = vadd.f32 %v1818_v42, %v1766_v44  ;;  %v1867_v54 = vadd.f32 %v1819_v58, %v1767_v6  ;;  %v9516_v7 = vmax.f32 %v1514_v32, 0.0  ;;  %v613_v42 = vld [vmem:[%s14928_s22 + $0x130] sm:$0xff]  ;;  %v1108_v44 = vld [vmem:[%s8264_s21 + $0x178] sm:$0xff] }
  0xfd   : > { %v9518_v34 = vmax.f32 %v1515_v38, 0.0  ;;  %v1260_v47 = vadd.f32 %v1212_v35, %v1052_v51  ;;  %v1261_v62 = vadd.f32 %v1213_v28, %v1053_v36  ;;  %v1620_v43 = vmul.f32 %v8301_v33, %v9327_v26  ;;  %v748_v58 = vld [vmem:[%s8264_s21 + $0x177] sm:$0xff] }
  0xfe   : > { %v1621_v55 = vmul.f32 %v8301_v33, %v9330_v1  ;;  %v1897_v5 = vpack.c.bf16 %v1867_v54, %v1866_v4  ;;  %v1720_v48 = vmul.f32 %v8311_v40, %v9392_v50  ;;  %v1721_v3 = vmul.f32 %v8311_v40, %v9453_v49 }
  0xff   : > { %v1820_v26 = vmul.f32 %v8967_v63, %v9516_v7  ;;  %v1360_v52 = vadd.f32 %v1312_v59, %v1260_v47  ;;  %v1361_v1 = vadd.f32 %v1313_v18, %v1261_v62  ;;  %v1821_v35 = vmul.f32 %v8967_v63, %v9518_v34  ;;  %v1109_v18 = vld [vmem:[%s8264_s21 + $0x180] sm:$0xff] }
 0x100   : > { %vm660_vm8 = vcmp.gt.f32.partialorder %v612_v41, 0.5  ;;  %7561 = vmatmul.mubr.msk.bf16.gmra.mrb[32].mxu0 %vm14744_vm3, %v1897_v5  ;;  %vm661_vm9 = vcmp.gt.f32.partialorder %v613_v42, 0.5  ;;  %v9542_v32 = vmax.f32 %v748_v58, 0.0  ;;  %v9544_v38 = vmax.f32 %v749_v53, 0.0  ;;  %v1516_v53 = vld [vmem:[%s8264_s21 + $0x179] sm:$0xff] }
 0x101   : > { %v2407_v28 = vsel %vm660_vm8, 1, %v14718_v2  ;;  %v1460_v6 = vadd.f32 %v1412_v37, %v1360_v52  ;;  %v1461_v51 = vadd.f32 %v1413_v30, %v1361_v1  ;;  %v2408_v59 = vsel %vm661_vm9, 1, %v14718_v2  ;;  %v1517_v1 = vld [vmem:[%s8264_s21 + $0x181] sm:$0xff] }
 0x102   : > { %2530 = vperm.xlu1 %7962, %v2407_v28   ;;  %v854_v63 = vmul.f32 %v8267_v16, %v9353_v19  ;;  %2533 = vperm.xlu0 %7961, %v2408_v59   ;;  %v855_v36 = vmul.f32 %v8267_v16, %v9355_v20  ;;  %v906_v4 = vmul.f32 %v8270_v17, %v9420_v56  ;;  %v9561_v47 = vmax.f32 %v1108_v44, 0.0 }
 0x103   : > { %v907_v37 = vmul.f32 %v8270_v17, %v9481_v46  ;;  %v1006_v30 = vmul.f32 %v8281_v22, %v9542_v32  ;;  %v1668_v54 = vadd.f32 %v1620_v43, %v1460_v6  ;;  %v1669_v41 = vadd.f32 %v1621_v55, %v1461_v51 }
 0x104   : > { %v1007_v19 = vmul.f32 %v8281_v22, %v9544_v38  ;;  %v954_v62 = vadd.f32 %v906_v4, %v854_v63  ;;  %v9563_v20 = vmax.f32 %v1109_v18, 0.0  ;;  %v1214_v58 = vmul.f32 %v8284_v23, %v9366_v21 }
 0x105   : > { %v955_v42 = vadd.f32 %v907_v37, %v855_v36  ;;  %v1768_v5 = vadd.f32 %v1720_v48, %v1668_v54  ;;  %v1769_v52 = vadd.f32 %v1721_v3, %v1669_v41  ;;  %v1215_v43 = vmul.f32 %v8284_v23, %v9374_v0  ;;  %v750_v0 = vld [vmem:[%s8264_s21 + $0x187] sm:$0xff]  ;;  %v614_v37 = vld [vmem:[%s14928_s22 + $0x138] sm:$0xff] }
 0x106   : > { %v1314_v55 = vmul.f32 %v8287_v24, %v9437_v60  ;;  %v1054_v28 = vadd.f32 %v1006_v30, %v954_v62  ;;  %v1315_v6 = vmul.f32 %v8287_v24, %v9488_v45  ;;  %v1414_v51 = vmul.f32 %v8290_v25, %v9561_v47 }
 0x107   : > { %v1055_v44 = vadd.f32 %v1007_v19, %v955_v42  ;;  %v1868_v21 = vadd.f32 %v1820_v26, %v1768_v5  ;;  %v1869_v59 = vadd.f32 %v1821_v35, %v1769_v52  ;;  %v1415_v48 = vmul.f32 %v8290_v25, %v9563_v20  ;;  %v615_v26 = vld [vmem:[%s14928_s22 + $0x140] sm:$0xff]  ;;  %v751_v35 = vld [vmem:[%s8264_s21 + $0x18f] sm:$0xff]  ;;  %v9602_v42 = vld [vmem:[%s14929_s3 + $0x8] ss:$0 sm:$0xff] }
 0x108   : > { %v9579_v3 = vmax.f32 %v1516_v53, 0.0  ;;  %v1262_v63 = vadd.f32 %v1214_v58, %v1054_v28  ;;  %v9582_v36 = vmax.f32 %v1517_v1, 0.0  ;;  %v1622_v4 = vmul.f32 %v8301_v33, %v9390_v57  ;;  %v1110_v53 = vld [vmem:[%s8264_s21 + $0x188] sm:$0xff] }
 0x109   : > { %v1263_v18 = vadd.f32 %v1215_v43, %v1055_v44  ;;  %v1898_v30 = vpack.c.bf16 %v1869_v59, %v1868_v21  ;;  %v1623_v54 = vmul.f32 %v8301_v33, %v9392_v50  ;;  %v1722_v41 = vmul.f32 %v8311_v40, %v9455_v39  ;;  %v1111_v44 = vld [vmem:[%s8264_s21 + $0x190] sm:$0xff] }
 0x10a   : > { %v1723_v19 = vmul.f32 %v8311_v40, %v9516_v7  ;;  %v1362_v57 = vadd.f32 %v1314_v55, %v1262_v63  ;;  %v1822_v58 = vmul.f32 %v9602_v42, %v9579_v3  ;;  %v1823_v50 = vmul.f32 %v9602_v42, %v9582_v36 }
 0x10b   : > { %v1363_v62 = vadd.f32 %v1315_v6, %v1263_v18  ;;  %7564 = vmatprep.mubr.msk.bf16.mxu0 %vm14744_vm3, %v1898_v30  ;;  %vm662_vm10 = vcmp.gt.f32.partialorder %v614_v37, 0.5  ;;  %vm663_vm11 = vcmp.gt.f32.partialorder %v615_v26, 0.5  ;;  %v9610_v5 = vmax.f32 %v750_v0, 0.0 }
 0x10c   : > { %v9612_v52 = vmax.f32 %v751_v35, 0.0  ;;  %v1462_v43 = vadd.f32 %v1414_v51, %v1362_v57  ;;  %v2409_v1 = vsel %vm662_vm10, 1, %v14718_v2  ;;  %v2410_v28 = vsel %vm663_vm11, 1, %v14718_v2 }
 0x10d   : > { %v1463_v55 = vadd.f32 %v1415_v48, %v1363_v62  ;;  %2536 = vperm.xlu1 %7962, %v2409_v1   ;;  %2539 = vperm.xlu0 %7961, %v2410_v28   ;;  %v856_v6 = vmul.f32 %v8267_v16, %v9416_v61  ;;  %v857_v21 = vmul.f32 %v8267_v16, %v9420_v56  ;;  %v9623_v51 = vmax.f32 %v1110_v53, 0.0  ;;  %v1519_v62 = vld [vmem:[%s8264_s21 + $0x191] sm:$0xff] }
 0x10e   : > { %v908_v59 = vmul.f32 %v8270_v17, %v9483_v29  ;;  %v1670_v48 = vadd.f32 %v1622_v4, %v1462_v43  ;;  %v909_v63 = vmul.f32 %v8270_v17, %v9542_v32  ;;  %v1008_v18 = vmul.f32 %v8281_v22, %v9610_v5 }
 0x10f   : > { %v1671_v0 = vadd.f32 %v1623_v54, %v1463_v55  ;;  %v1009_v61 = vmul.f32 %v8281_v22, %v9612_v52  ;;  %v9631_v26 = vmax.f32 %v1111_v44, 0.0  ;;  %v1216_v56 = vmul.f32 %v8284_v23, %v9427_v31  ;;  %v1518_v54 = vld [vmem:[%s8264_s21 + $0x189] sm:$0xff] }
 0x110   : > { %v956_v37 = vadd.f32 %v908_v59, %v856_v6  ;;  %v1770_v35 = vadd.f32 %v1722_v41, %v1670_v48  ;;  %v957_v57 = vadd.f32 %v909_v63, %v857_v21  ;;  %v1217_v4 = vmul.f32 %v8284_v23, %v9437_v60  ;;  %v616_v59 = vld [vmem:[%s14928_s22 + $0x148] sm:$0xff] }
 0x111   : > { %v1771_v30 = vadd.f32 %v1723_v19, %v1671_v0  ;;  %v1316_v43 = vmul.f32 %v8287_v24, %v9500_v27  ;;  %v1317_v55 = vmul.f32 %v8287_v24, %v9561_v47  ;;  %v1416_v1 = vmul.f32 %v8290_v25, %v9623_v51 }
 0x112   : > { %v1056_v53 = vadd.f32 %v1008_v18, %v956_v37  ;;  %v1870_v31 = vadd.f32 %v1822_v58, %v1770_v35  ;;  %v1057_v19 = vadd.f32 %v1009_v61, %v957_v57  ;;  %v1417_v60 = vmul.f32 %v8290_v25, %v9631_v26  ;;  %v617_v58 = vld [vmem:[%s14928_s22 + $0x150] sm:$0xff] }
 0x113   : > { %v1871_v41 = vadd.f32 %v1823_v50, %v1771_v30  ;;  %v9647_v44 = vmax.f32 %v1518_v54, 0.0  ;;  %v9649_v6 = vmax.f32 %v1519_v62, 0.0  ;;  %v1624_v21 = vmul.f32 %v8301_v33, %v9453_v49  ;;  %v9660_v50 = vld [vmem:[%s8264_s21 + $0x197] sm:$0xff]  ;;  %v9667_v49 = vld [vmem:[%s8264_s21 + $0x19f] sm:$0xff] }
 0x114   : > { %v1264_v28 = vadd.f32 %v1216_v56, %v1056_v53  ;;  %v1265_v0 = vadd.f32 %v1217_v4, %v1057_v19  ;;  %v1625_v63 = vmul.f32 %v8301_v33, %v9455_v39  ;;  %v1724_v18 = vmul.f32 %v8311_v40, %v9518_v34  ;;  %v9676_v30 = vld [vmem:[%s8264_s21 + $0x198] sm:$0xff] }
 0x115   : > { %v1899_v48 = vpack.c.bf16 %v1871_v41, %v1870_v31  ;;  %v1725_v61 = vmul.f32 %v8311_v40, %v9579_v3  ;;  %v1824_v56 = vmul.f32 %v9602_v42, %v9647_v44  ;;  %v1825_v35 = vmul.f32 %v9602_v42, %v9649_v6 }
 0x116   : > { %v1364_v37 = vadd.f32 %v1316_v43, %v1264_v28  ;;  %v1365_v39 = vadd.f32 %v1317_v55, %v1265_v0  ;;  %vm664_vm12 = vcmp.gt.f32.partialorder %v616_v59, 0.5  ;;  %vm665_vm13 = vcmp.gt.f32.partialorder %v617_v58, 0.5  ;;  %v9684_v43 = vld [vmem:[%s8264_s21 + $0x1a0] sm:$0xff] }
 0x117   : > { %7565 = vmatmul.mubr.msk.bf16.gmra.mrb[36].mxu0 %vm14744_vm3, %v1899_v48  ;;  %v14715_v57 = vmax.f32 %v9660_v50, 0.0  ;;  %v2411_v54 = vsel %vm664_vm12, 1, %v14718_v2  ;;  %v2412_v62 = vsel %vm665_vm13, 1, %v14718_v2  ;;  %v14712_v53 = vmax.f32 %v9667_v49, 0.0 }
 0x118   : > { %v1464_v4 = vadd.f32 %v1416_v1, %v1364_v37  ;;  %v1465_v31 = vadd.f32 %v1417_v60, %v1365_v39  ;;  %2542 = vperm.xlu1 %7962, %v2411_v54   ;;  %2545 = vperm.xlu0 %7961, %v2412_v62   ;;  %v858_v55 = vmul.f32 %v8267_v16, %v9481_v46  ;;  %v14714_v1 = vmax.f32 %v9676_v30, 0.0  ;;  %v9710_v54 = vld [vmem:[%s8264_s21 + $0x1a1] sm:$0xff] }
 0x119   : > { %v859_v41 = vmul.f32 %v8267_v16, %v9483_v29  ;;  %v910_v28 = vmul.f32 %v8270_v17, %v9544_v38  ;;  %v911_v59 = vmul.f32 %v8270_v17, %v9610_v5  ;;  %v1010_v60 = vmul.f32 %v8281_v22, %v14715_v57 }
 0x11a   : > { %v1672_v19 = vadd.f32 %v1624_v21, %v1464_v4  ;;  %v1673_v58 = vadd.f32 %v1625_v63, %v1465_v31  ;;  %v1011_v46 = vmul.f32 %v8281_v22, %v14712_v53  ;;  %v14711_v29 = vmax.f32 %v9684_v43, 0.0  ;;  %v9707_v4 = vld [vmem:[%s8264_s21 + $0x199] sm:$0xff] }
 0x11b   : > { %v1218_v21 = vmul.f32 %v8284_v23, %v9488_v45  ;;  %v958_v0 = vadd.f32 %v910_v28, %v858_v55  ;;  %v959_v37 = vadd.f32 %v911_v59, %v859_v41  ;;  %v1219_v39 = vmul.f32 %v8284_v23, %v9500_v27 }
 0x11c   : > { %v1772_v48 = vadd.f32 %v1724_v18, %v1672_v19  ;;  %v1773_v63 = vadd.f32 %v1725_v61, %v1673_v58  ;;  %v1318_v62 = vmul.f32 %v8287_v24, %v9563_v20  ;;  %v1319_v31 = vmul.f32 %v8287_v24, %v9623_v51  ;;  %v618_v58 = vld [vmem:[%s14928_s22 + $0x158] sm:$0xff] }
 0x11d   : > { %v1418_v45 = vmul.f32 %v8290_v25, %v14714_v1  ;;  %v1058_v55 = vadd.f32 %v1010_v60, %v958_v0  ;;  %v1059_v27 = vadd.f32 %v1011_v46, %v959_v37  ;;  %v1419_v41 = vmul.f32 %v8290_v25, %v14711_v29  ;;  %v9737_v0 = vld [vmem:[%s8264_s21 + $0x1a7] sm:$0xff] }
 0x11e   : > { %v1872_v18 = vadd.f32 %v1824_v56, %v1772_v48  ;;  %v1873_v61 = vadd.f32 %v1825_v35, %v1773_v63  ;;  %v14713_v19 = vmax.f32 %v9707_v4, 0.0  ;;  %v14716_v28 = vmax.f32 %v9710_v54, 0.0  ;;  %v619_v56 = vld [vmem:[%s14928_s22 + $0x160] sm:$0xff] }
 0x11f   : > { %v1626_v59 = vmul.f32 %v8301_v33, %v9516_v7  ;;  %v1266_v60 = vadd.f32 %v1218_v21, %v1058_v55  ;;  %v1267_v46 = vadd.f32 %v1219_v39, %v1059_v27  ;;  %v1627_v35 = vmul.f32 %v8301_v33, %v9518_v34  ;;  %v755_v7 = vld [vmem:[%s8264_s21 + $0x1af] sm:$0xff] }
 0x120   : > { %v1726_v48 = vmul.f32 %v8311_v40, %v9582_v36  ;;  %v1900_v37 = vpack.c.bf16 %v1873_v61, %v1872_v18  ;;  %v1727_v63 = vmul.f32 %v8311_v40, %v9647_v44  ;;  %v1826_v29 = vmul.f32 %v9602_v42, %v14713_v19  ;;  %v9749_v34 = vld [vmem:[%s8264_s21 + $0x1a8] sm:$0xff]  ;;  %v1115_v19 = vld [vmem:[%s8264_s21 + $0x1b0] sm:$0xff] }
 0x121   : > { %v1827_v21 = vmul.f32 %v9602_v42, %v14716_v28  ;;  %v1366_v39 = vadd.f32 %v1318_v62, %v1266_v60  ;;  %v1367_v55 = vadd.f32 %v1319_v31, %v1267_v46  ;;  %vm666_vm14 = vcmp.gt.f32.partialorder %v618_v58, 0.5  ;;  %v9781_v28 = vld [vmem:[%s8264_s21 + $0x1a9] sm:$0xff] }
 0x122   : > { %vm667_vm15 = vcmp.gt.f32.partialorder %v619_v56, 0.5  ;;  %7568 = vmatprep.mubr.msk.bf16.mxu0 %vm14744_vm3, %v1900_v37  ;;  %v2413_v18 = vsel %vm666_vm14, 1, %v14718_v2  ;;  %v14717_v61 = vmax.f32 %v9737_v0, 0.0  ;;  %v809_v53 = vmax.f32 %v755_v7, 0.0  ;;  %v9759_v58 = vpop.f32.mrb[0].mxu0 }
 0x123   : > { %v2414_v27 = vsel %vm667_vm15, 1, %v14718_v2  ;;  %v1466_v1 = vadd.f32 %v1418_v45, %v1366_v39  ;;  %v1467_v57 = vadd.f32 %v1419_v41, %v1367_v55  ;;  %2548 = vperm.xlu1 %7962, %v2413_v18   ;;  %v860_v62 = vmul.f32 %v8267_v16, %v9542_v32  ;;  %v9771_v46 = vpop.f32.mrb[1].mxu0 }
 0x124   : > { %2551 = vperm.xlu0 %7961, %v2414_v27   ;;  %v1168_v31 = vmax.f32 %v9749_v34, 0.0  ;;  %v861_v56 = vmul.f32 %v8267_v16, %v9544_v38  ;;  %v912_v60 = vmul.f32 %v8270_v17, %v9612_v52  ;;  %v14939_v45 = vmax.f32 %v9660_v50, 0.0  ;;  %v9774_v18 = vpop.f32.mrb[2].mxu0  ;;  %v622_v34 = vld [vmem:[%s14928_s22 + $0x178] sm:$0xff] }
 0x125   : > { %v1012_v32 = vmul.f32 %v8281_v22, %v14717_v61  ;;  %v1674_v7 = vadd.f32 %v1626_v59, %v1466_v1  ;;  %v1675_v37 = vadd.f32 %v1627_v35, %v1467_v57  ;;  %v1013_v39 = vmul.f32 %v8281_v22, %v809_v53  ;;  %v1523_v61 = vld [vmem:[%s8264_s21 + $0x1b1] sm:$0xff]  ;;  %v9784_v2 = vpop.f32.mrb[3].mxu0 }
 0x126   : > { %v913_v41 = vmul.f32 %v8270_v17, %v14939_v45  ;;  %v1169_v55 = vmax.f32 %v1115_v19, 0.0  ;;  %v960_v38 = vadd.f32 %v912_v60, %v860_v62  ;;  %v1220_v50 = vmul.f32 %v8284_v23, %v9561_v47 }
 0x127   : > { %v1221_v45 = vmul.f32 %v8284_v23, %v9563_v20  ;;  %v1774_v1 = vadd.f32 %v1726_v48, %v1674_v7  ;;  %v1775_v57 = vadd.f32 %v1727_v63, %v1675_v37  ;;  %v1320_v53 = vmul.f32 %v8287_v24, %v9631_v26 }
 0x128   : > { %v961_v27 = vadd.f32 %v913_v41, %v861_v56  ;;  %v14940_v19 = vmax.f32 %v9676_v30, 0.0  ;;  %v1060_v47 = vadd.f32 %v1012_v32, %v960_v38  ;;  %v1420_v20 = vmul.f32 %v8290_v25, %v1168_v31  ;;  %v620_v30 = vld [vmem:[%s14928_s22 + $0x168] sm:$0xff] }
 0x129   : > { %v1421_v62 = vmul.f32 %v8290_v25, %v1169_v55  ;;  %v1874_v56 = vadd.f32 %v1826_v29, %v1774_v1  ;;  %v1875_v48 = vadd.f32 %v1827_v21, %v1775_v57  ;;  %v1576_v63 = vmax.f32 %v9781_v28, 0.0  ;;  %v621_v29 = vld [vmem:[%s14928_s22 + $0x170] sm:$0xff] }
 0x12a   : > { %v1321_v59 = vmul.f32 %v8287_v24, %v14940_v19  ;;  %v1061_v35 = vadd.f32 %v1013_v39, %v961_v27  ;;  %v1577_v60 = vmax.f32 %v1523_v61, 0.0  ;;  %v1268_v41 = vadd.f32 %v1220_v50, %v1060_v47  ;;  %v756_v21 = vld [vmem:[%s8264_s21 + $0x1b7] sm:$0xff]  ;;  %v757_v39 = vld [vmem:[%s8264_s21 + $0x1bf] sm:$0xff] }
 0x12b   : > { %v1628_v32 = vmul.f32 %v8301_v33, %v9579_v3  ;;  %v1629_v37 = vmul.f32 %v8301_v33, %v9582_v36  ;;  %v1901_v61 = vpack.c.bf16 %v1875_v48, %v1874_v56  ;;  %v1728_v55 = vmul.f32 %v8311_v40, %v9649_v6 }
 0x12c   : > { %v1269_v7 = vadd.f32 %v1221_v45, %v1061_v35  ;;  %v14941_v38 = vmax.f32 %v9707_v4, 0.0  ;;  %v1828_v3 = vmul.f32 %v9602_v42, %v1576_v63  ;;  %v1368_v36 = vadd.f32 %v1320_v53, %v1268_v41  ;;  %v1116_v4 = vld [vmem:[%s8264_s21 + $0x1b8] sm:$0xff]  ;;  %v9820_v35 = vpop.permute.xlu0 %2419 }
 0x12d   : > { %v1829_v45 = vmul.f32 %v9602_v42, %v1577_v60  ;;  %vm668_vm0 = vcmp.gt.f32.partialorder %v620_v30, 0.5  ;;  %7569 = vmatmul.mubr.msk.bf16.gmra.mrb[40].mxu0 %vm14744_vm3, %v1901_v61  ;;  %v14942_v1 = vmov 0   ;;  %vm669_vm1 = vcmp.gt.f32.partialorder %v621_v29, 0.5  ;;  %14943 = vst [vmem:[#allocation17_spill] sm:$0xff] %v9820_v35  ;;  %v1117_v60 = vld [vmem:[%s8264_s21 + $0x1c0] sm:$0xff]  ;;  %v9826_v30 = vpop.permute.xlu1 %2425 }
 0x12e   : > { %v1729_v27 = vmul.f32 %v8311_v40, %v14941_v38  ;;  %v1369_v50 = vadd.f32 %v1321_v59, %v1269_v7  ;;  %v2415_v57 = vsel %vm668_vm0, 1, %v14942_v1  ;;  %v810_v19 = vmax.f32 %v756_v21, 0.0  ;;  %14944 = vst [vmem:[#allocation18_spill] sm:$0xff] %v9826_v30 }
 0x12f   : > { %v811_v47 = vmax.f32 %v757_v39, 0.0  ;;  %v1468_v56 = vadd.f32 %v1420_v20, %v1368_v36  ;;  %2554 = vperm.xlu1 %7962, %v2415_v57   ;;  %v2416_v53 = vsel %vm669_vm1, 1, %v14942_v1  ;;  %v862_v59 = vmul.f32 %v8267_v16, %v9610_v5 }
 0x130   : > { %v1469_v48 = vadd.f32 %v1421_v62, %v1369_v50  ;;  %2557 = vperm.xlu0 %7961, %v2416_v53   ;;  %v863_v41 = vmul.f32 %v8267_v16, %v9612_v52  ;;  %v14945_v7 = vmax.f32 %v9667_v49, 0.0  ;;  %v14946_v20 = vmax.f32 %v9737_v0, 0.0 }
 0x131   : > { %v1014_v21 = vmul.f32 %v8281_v22, %v810_v19  ;;  %v1676_v39 = vadd.f32 %v1628_v32, %v1468_v56  ;;  %v1015_v61 = vmul.f32 %v8281_v22, %v811_v47  ;;  %v1170_v38 = vmax.f32 %v1116_v4, 0.0  ;;  %v1524_v47 = vld [vmem:[%s8264_s21 + $0x1b9] sm:$0xff]  ;;  %v1525_v4 = vld [vmem:[%s8264_s21 + $0x1c1] sm:$0xff]  ;;  %v9850_v56 = vpop.permute.xlu0 %2422 }
 0x132   : > { %v914_v29 = vmul.f32 %v8270_v17, %v14945_v7  ;;  %v915_v62 = vmul.f32 %v8270_v17, %v14946_v20  ;;  %v1677_v5 = vadd.f32 %v1629_v37, %v1469_v48  ;;  %v1171_v16 = vmax.f32 %v1117_v60, 0.0  ;;  %14948 = vst [vmem:[#allocation19_spill] sm:$0xff] %v9850_v56 }
 0x133   : > { %v1222_v52 = vmul.f32 %v8284_v23, %v9623_v51  ;;  %v1776_v49 = vadd.f32 %v1728_v55, %v1676_v39  ;;  %v1223_v17 = vmul.f32 %v8284_v23, %v9631_v26  ;;  %v14947_v32 = vmax.f32 %v9684_v43, 0.0 }
 0x134   : > { %v962_v36 = vadd.f32 %v914_v29, %v862_v59  ;;  %v963_v50 = vadd.f32 %v915_v62, %v863_v41  ;;  %v1777_v57 = vadd.f32 %v1729_v27, %v1677_v5  ;;  %v1323_v22 = vmul.f32 %v8287_v24, %v1168_v31  ;;  %v9852_v27 = vpop.permute.xlu1 %2428 }
 0x135   : > { %v1322_v37 = vmul.f32 %v8287_v24, %v14947_v32  ;;  %v1876_v51 = vadd.f32 %v1828_v3, %v1776_v49  ;;  %14949 = vst [vmem:[#allocation20_spill] sm:$0xff] %v9852_v27  ;;  %v1422_v26 = vmul.f32 %v8290_v25, %v1170_v38  ;;  %v1423_v43 = vmul.f32 %v8290_v25, %v1171_v16 }
 0x136   : > { %v1062_v0 = vadd.f32 %v1014_v21, %v962_v36  ;;  %v1063_v19 = vadd.f32 %v1015_v61, %v963_v50  ;;  %v1877_v55 = vadd.f32 %v1829_v45, %v1777_v57  ;;  %v1578_v24 = vmax.f32 %v1524_v47, 0.0  ;;  %v9871_v21 = vpop.permute.xlu0 %2431  ;;  %v9886_v36 = vld [vmem:[%s14953_s5] ss:$0 sm:$0xff] }
 0x137   : > { %v1579_v31 = vmax.f32 %v1525_v4, 0.0  ;;  %v1630_v3 = vmul.f32 %v8301_v33, %v9647_v44  ;;  %v1631_v45 = vmul.f32 %v8301_v33, %v9649_v6  ;;  %v14950_v41 = vmax.f32 %v9710_v54, 0.0  ;;  %14951 = vst [vmem:[#allocation21_spill] sm:$0xff] %v9871_v21  ;;  %v7534_v33 = vpop.f32.mrb[4].mxu0  ;;  %v7965_v6 = vld [vmem:[%s14697_s8] sm:$0xff]   ;;  %v7968_v4 = vld [vmem:[%s14697_s8 + $0x18] sm:$0xff]  }
 0x138   : > { %v1270_v48 = vadd.f32 %v1222_v52, %v1062_v0  ;;  %v1271_v23 = vadd.f32 %v1223_v17, %v1063_v19  ;;  %v1902_v53 = vpack.c.bf16 %v1877_v55, %v1876_v51  ;;  %vm670_vm2 = vcmp.gt.f32.partialorder %v622_v34, 0.5  ;;  %v9873_v44 = vpop.permute.xlu1 %2434  ;;  %v2039_v61 = vpop.f32.mrb[5].mxu0  ;;  %7576 = vmatprep.subr.bf16.mxu1 %v7965_v6  ;;  %v9904_v17 = vld [vmem:[%s14956_s6] ss:$0 sm:$0xff] }
 0x139   : > { %v1730_v25 = vmul.f32 %v8311_v40, %v14950_v41  ;;  %v1731_v20 = vmul.f32 %v8311_v40, %v1576_v63  ;;  %v2417_v62 = vsel %vm670_vm2, 1, %v14942_v1  ;;  %14952 = vst [vmem:[#allocation22_spill] sm:$0xff] %v9873_v44  ;;  %v1830_v5 = vmul.f32 %v9602_v42, %v1578_v24  ;;  %v7966_v40 = vld [vmem:[%s14697_s8 + $0x8] sm:$0xff]   ;;  %v7535_v63 = vpop.f32.mrb[6].mxu0  ;;  %7577 = vmatpush3.bf16.msra.mxu1 %v7965_v6 }
 0x13a   : > { %v1370_v59 = vadd.f32 %v1322_v37, %v1270_v48  ;;  %v1371_v60 = vadd.f32 %v1323_v22, %v1271_v23  ;;  %7572 = vmatprep.mubr.msk.bf16.mxu0 %vm14744_vm3, %v1902_v53  ;;  %2560 = vperm.xlu1 %7962, %v2417_v62   ;;  %v1831_v28 = vmul.f32 %v9602_v42, %v1579_v31  ;;  %v2042_v50 = vpop.f32.mrb[7].mxu0  ;;  %v7967_v42 = vld [vmem:[%s14697_s8 + $0x10] sm:$0xff]   ;;  %vm2562_vm4 = vcmp.eq.s32.totalorder %v9820_v35, 1  ;;  %v9893_v49 = vpop.permute.xlu0 %2437 }
 0x13b   : > { %7578 = vmatprep.subr.bf16.mxu1 %v7966_v40  ;;  %vm2564_vm5 = vcmp.eq.s32.totalorder %v9826_v30, 1  ;;  %14954 = vst [vmem:[#allocation23_spill] sm:$0xff] %v9893_v49  ;;  %vm2563_vm6 = vcmp.eq.s32.totalorder %v9850_v56, 1  ;;  %vm2565_vm7 = vcmp.eq.s32.totalorder %v9852_v27, 1  ;;  %vm2566_vm8 = vcmp.eq.s32.totalorder %v9871_v21, 1 }
 0x13c   : > { %v1470_v7 = vadd.f32 %v1422_v26, %v1370_v59  ;;  %v1471_v29 = vadd.f32 %v1423_v43, %v1371_v60  ;;  %vm2568_vm9 = vcmp.eq.s32.totalorder %v9893_v49, 1  ;;  %v9899_v57 = vpop.permute.xlu1 %2440  ;;  %vm671_vm11 = vcmask 523264  }
 0x13d   : > { %14955 = vst [vmem:[#allocation24_spill] sm:$0xff] %v9899_v57  ;;  %vm2569_vm10 = vcmp.eq.s32.totalorder %v9899_v57, 1  ;;  %v2222_v19 = vmul.f32 %v9759_v58, %v9886_v36  ;;  %7579 = vmatpush3.bf16.msra.mxu1 %v7966_v40  ;;  %v2220_v32 = vmul.f32 %v9886_v36, %v9771_v46  ;;  %v2223_v37 = vmul.f32 %v9774_v18, %v9886_v36  ;;  %v9979_v40 = vld [vmem:[%s14696_s7] sm:$0xff] }
 0x13e   : > { %v1678_v54 = vadd.f32 %v1630_v3, %v1470_v7  ;;  %v1679_v39 = vadd.f32 %v1631_v45, %v1471_v29  ;;  %v2221_v22 = vmul.f32 %v9886_v36, %v9784_v2  ;;  %v2226_v47 = vmul.f32 %v7534_v33, %v9886_v36  ;;  %7580 = vmatprep.subr.bf16.mxu1 %v7967_v42  ;;  %v9931_v3 = vpop.permute.xlu0 %2443 }
 0x13f   : > { %v2276_v58 = vadd.f32 %v9904_v17, %v2222_v19  ;;  %v2224_v51 = vmul.f32 %v9886_v36, %v2039_v61  ;;  %v2227_v46 = vmul.f32 %v7535_v63, %v9886_v36  ;;  %v2225_v18 = vmul.f32 %v9886_v36, %v2042_v50  ;;  %14957 = vst [vmem:[#allocation25_spill] sm:$0xff] %v9931_v3 }
 0x140   : > { %v1778_v1 = vadd.f32 %v1730_v25, %v1678_v54  ;;  %v1779_v38 = vadd.f32 %v1731_v20, %v1679_v39  ;;  %v2274_v55 = vadd.f32 %v9904_v17, %v2220_v32  ;;  %v2277_v2 = vadd.f32 %v9904_v17, %v2223_v37  ;;  %v9945_v6 = vpop.permute.xlu1 %2446 }
 0x141   : > { %v2275_v48 = vadd.f32 %v9904_v17, %v2221_v22  ;;  %v2280_v23 = vadd.f32 %v9904_v17, %v2226_v47  ;;  %v2324_v26 = vmax.f32 %v2276_v58, 0.0  ;;  %v2278_v43 = vadd.f32 %v9904_v17, %v2224_v51  ;;  %7581 = vmatpush3.bf16.msra.mxu1 %v7967_v42  ;;  %14958 = vst [vmem:[#allocation26_spill] sm:$0xff] %v9945_v6 }
 0x142   : > { %v1878_v16 = vadd.f32 %v1830_v5, %v1778_v1  ;;  %v1879_v52 = vadd.f32 %v1831_v28, %v1779_v38  ;;  %v2281_v34 = vadd.f32 %v9904_v17, %v2227_v46  ;;  %v2279_v53 = vadd.f32 %v9904_v17, %v2225_v18  ;;  %7582 = vmatprep.subr.bf16.mxu1 %v7968_v4  ;;  %v9981_v63 = vpop.permute.xlu0 %2449 }
 0x143   : > { %v2322_v24 = vmax.f32 %v2274_v55, 0.0  ;;  %v2325_v31 = vmax.f32 %v2277_v2, 0.0  ;;  %v2323_v59 = vmax.f32 %v2275_v48, 0.0  ;;  %v2328_v60 = vmax.f32 %v2280_v23, 0.0  ;;  %14959 = vst [vmem:[#allocation27_spill] sm:$0xff] %v9981_v63 }
 0x144   : > { %v1903_v0 = vpack.c.bf16 %v1879_v52, %v1878_v16  ;;  %v2612_v45 = vsel %vm2564_vm5, %v2324_v26, 0.0  ;;  %v2326_v41 = vmax.f32 %v2278_v43, 0.0  ;;  %v2329_v25 = vmax.f32 %v2281_v34, 0.0  ;;  %v9988_v16 = vpop.permute.xlu1 %2452 }
 0x145   : > { %v2327_v7 = vmax.f32 %v2279_v53, 0.0  ;;  %2660 = vst.msk [vmem:[#allocation2 + $0x40] sm:$0xff] %vm671_vm11, %v2612_v45  ;;  %v2610_v29 = vsel %vm2562_vm4, %v2322_v24, 0.0  ;;  %v2613_v20 = vsel %vm2565_vm7, %v2325_v31, 0.0  ;;  %v2611_v62 = vsel %vm2563_vm6, %v2323_v59, 0.0  ;;  %7583 = vmatpush3.bf16.msra.mxu1 %v7968_v4  ;;  %14960 = vst [vmem:[#allocation28_spill] sm:$0xff] %v9988_v16 }
 0x146   : > { %7573 = vmatmul.mubr.msk.bf16.gmra.mrb[44].mxu0 %vm14744_vm3, %v1903_v0  ;;  %v2616_v33 = vsel %vm2568_vm9, %v2328_v60, 0.0  ;;  %vm2567_vm12 = vcmp.eq.s32.totalorder %v9873_v44, 1  ;;  %2658 = vst.msk [vmem:[#allocation2 + $0x30] sm:$0xff] %vm671_vm11, %v2610_v29  ;;  %2661 = vst.msk [vmem:[#allocation2 + $0x48] sm:$0xff] %vm671_vm11, %v2613_v20  ;;  %v2614_v54 = vsel %vm2566_vm8, %v2326_v41, 0.0  ;;  %v2617_v39 = vsel %vm2569_vm10, %v2329_v25, 0.0 }
 0x147   : > { %2659 = vst.msk [vmem:[#allocation2 + $0x38] sm:$0xff] %vm671_vm11, %v2611_v62  ;;  %2664 = vst.msk [vmem:[#allocation2 + $0x60] sm:$0xff] %vm671_vm11, %v2616_v33  ;;  %v2615_v5 = vsel %vm2567_vm12, %v2327_v7, 0.0  ;;  %v8080_v28 = vmov 0.0   ;;  %vm14870_vm13 = vcmp.eq.s32.totalorder %v9931_v3, 1  ;;  %vm14745_vm14 = vcmp.eq.s32.totalorder %v9945_v6, 1 }
 0x148   : > { %2662 = vst.msk [vmem:[#allocation2 + $0x50] sm:$0xff] %vm671_vm11, %v2614_v54  ;;  %2665 = vst.msk [vmem:[#allocation2 + $0x68] sm:$0xff] %vm671_vm11, %v2617_v39  ;;  %vm14874_vm15 = vcmp.eq.s32.totalorder %v9981_v63, 1  ;;  %v9994_v32 = vrot.slane %v9979_v40, %v8245_v8  ;;  %v9998_v37 = vrot.slane %v9979_v40, %v8247_v9  ;;  %vm14873_vm0 = vcmp.eq.s32.totalorder %v9988_v16, 1  ;;  %v10106_v6 = vld [vmem:[%s14696_s7 + $0x8] ss:$0 sm:$0xff] }
 0x149   : > { %2663 = vst.msk [vmem:[#allocation2 + $0x58] sm:$0xff] %vm671_vm11, %v2615_v5  ;;  %674 = vst.msk [vmem:[#allocation2 + $0x10] sm:$0xff] %vm671_vm11, %v8080_v28  ;;  %v10007_v58 = vrot.slane %v9979_v40, %v8249_v10  ;;  %v10018_v48 = vrot.slane %v9979_v40, %v8251_v11  ;;  %v10025_v24 = vrot.slane %v9979_v40, %v8253_v12  ;;  %v14726_v29 = vmov -1e+30  }
 0x14a   : > { %675 = vst.msk [vmem:[#allocation2 + $0x18] sm:$0xff] %vm671_vm11, %v8080_v28  ;;  %676 = vst.msk [vmem:[#allocation2 + $0x20] sm:$0xff] %vm671_vm11, %v8080_v28 }
 0x14b   : > { %677 = vst.msk [vmem:[#allocation2 + $0x28] sm:$0xff] %vm671_vm11, %v8080_v28  ;;  %678 = vst.msk [vmem:[#allocation2 + $0x1b0] sm:$0xff] %vm671_vm11, %v8080_v28 }
 0x14c   : > { %679 = vst.msk [vmem:[#allocation2 + $0x1b8] sm:$0xff] %vm671_vm11, %v8080_v28  ;;  %680 = vst.msk [vmem:[#allocation2 + $0x1c0] sm:$0xff] %vm671_vm11, %v8080_v28  ;;  %v7538_v61 = vpop.f32.mrb[8].mxu0 }
 0x14d   : > { %681 = vst.msk [vmem:[#allocation2 + $0x1c8] sm:$0xff] %vm671_vm11, %v8080_v28  ;;  %686 = vst.msk [vmem:[#allocation3 + $0x10] sm:$0xff] %vm671_vm11, %v8080_v28  ;;  %v2230_v1 = vmul.f32 %v7538_v61, %v9886_v36  ;;  %v2055_v38 = vpop.f32.mrb[9].mxu0  ;;  %v10010_v18 = vld [vmem:[#allocation2 + $0x47] sm:$0xff] }
 0x14e   : > { %687 = vst.msk [vmem:[#allocation3 + $0x18] sm:$0xff] %vm671_vm11, %v8080_v28  ;;  %688 = vst.msk [vmem:[#allocation3 + $0x20] sm:$0xff] %vm671_vm11, %v8080_v28  ;;  %v2228_v50 = vmul.f32 %v9886_v36, %v2055_v38  ;;  %v7539_v42 = vpop.f32.mrb[10].mxu0  ;;  %v10003_v4 = vld [vmem:[#allocation2 + $0x37] sm:$0xff]  ;;  %v2928_v39 = vmul.f32 %v10007_v58, %v10010_v18  ;;  %v2831_v63 = vmul.f32 %v9998_v37, %v10010_v18  ;;  %v10126_v21 = vld [vmem:[#allocation2 + $0x60] sm:$0xff] }
 0x14f   : > { %689 = vst.msk [vmem:[#allocation3 + $0x28] sm:$0xff] %vm671_vm11, %v8080_v28  ;;  %690 = vst.msk [vmem:[#allocation3 + $0x1b0] sm:$0xff] %vm671_vm11, %v8080_v28  ;;  %v2284_v52 = vadd.f32 %v9904_v17, %v2230_v1  ;;  %v2231_v0 = vmul.f32 %v7539_v42, %v9886_v36  ;;  %v2058_v19 = vpop.f32.mrb[11].mxu0  ;;  %v10012_v55 = vld [vmem:[#allocation2 + $0x4f] sm:$0xff]  ;;  %v2829_v2 = vmul.f32 %v9998_v37, %v10003_v4 }
 0x150   : > { %691 = vst.msk [vmem:[#allocation3 + $0x1b8] sm:$0xff] %vm671_vm11, %v8080_v28  ;;  %692 = vst.msk [vmem:[#allocation3 + $0x1c0] sm:$0xff] %vm671_vm11, %v8080_v28  ;;  %v2282_v22 = vadd.f32 %v9904_v17, %v2228_v50  ;;  %v2229_v47 = vmul.f32 %v9886_v36, %v2058_v19  ;;  %v2929_v53 = vmul.f32 %v10007_v58, %v10012_v55  ;;  %v3027_v38 = vld [vmem:[#allocation2 + $0x30] sm:$0xff] }
 0x151   : > { %693 = vst.msk [vmem:[#allocation3 + $0x1c8] sm:$0xff] %vm671_vm11, %v8080_v28  ;;  %v2332_v51 = vmax.f32 %v2284_v52, 0.0  ;;  %v2285_v46 = vadd.f32 %v9904_v17, %v2231_v0  ;;  %v2718_v43 = vld [vmem:[#allocation2 + $0x17] sm:$0xff]  ;;  %v2719_v34 = vld [vmem:[#allocation2 + $0x1f] sm:$0xff]  ;;  %v10044_v50 = vrot.slane %v9979_v40, %v8255_v13  ;;  %v10048_v42 = vrot.slane %v9979_v40, %v8259_v15  ;;  %v10108_v3 = vld [vmem:[#allocation2 + $0x49] sm:$0xff] }
 0x152   : > { %v2330_v23 = vmax.f32 %v2282_v22, 0.0  ;;  %v2283_v26 = vadd.f32 %v9904_v17, %v2229_v47  ;;  %v2721_v60 = vld [vmem:[#allocation2 + $0x2f] sm:$0xff]  ;;  %v2776_v45 = vmul.f32 %v9994_v32, %v2718_v43  ;;  %v2777_v41 = vmul.f32 %v9994_v32, %v2719_v34  ;;  %v3024_v25 = vld [vmem:[#allocation2 + $0x18] sm:$0xff]  ;;  %v3025_v7 = vld [vmem:[#allocation2 + $0x20] sm:$0xff]  ;;  %5906 = vst.msk [vmem:[#allocation2 + $0x10] sm:$0xff] %vm671_vm11, %v14726_v29 }
 0x153   : > { %v2620_v31 = vsel %vm14874_vm15, %v2332_v51, 0.0  ;;  %v2333_v59 = vmax.f32 %v2285_v46, 0.0  ;;  %v2720_v33 = vld [vmem:[#allocation2 + $0x27] sm:$0xff]  ;;  %v2828_v54 = vmul.f32 %v9998_v37, %v2721_v60  ;;  %v3378_v5 = vld [vmem:[#allocation2 + $0x19] sm:$0xff]  ;;  %v10063_v51 = vld [vmem:[#allocation2 + $0x50] sm:$0xff]  ;;  %v3082_v46 = vmul.f32 %v10018_v48, %v3024_v25 }
 0x154   : > { %2668 = vst.msk [vmem:[#allocation2 + $0x80] sm:$0xff] %vm671_vm11, %v2620_v31  ;;  %v2618_v20 = vsel %vm14870_vm13, %v2330_v23, 0.0  ;;  %v2331_v62 = vmax.f32 %v2283_v26, 0.0  ;;  %v3379_v28 = vld [vmem:[#allocation2 + $0x21] sm:$0xff]  ;;  %v2877_v1 = vadd.f32 %v2829_v2, %v2777_v41  ;;  %5907 = vst.msk [vmem:[#allocation2 + $0x18] sm:$0xff] %vm671_vm11, %v14726_v29  ;;  %v10059_v22 = vld [vmem:[#allocation2 + $0x38] sm:$0xff]  ;;  %v3083_v2 = vmul.f32 %v10018_v48, %v3025_v7 }
 0x155   : > { %2666 = vst.msk [vmem:[#allocation2 + $0x70] sm:$0xff] %vm671_vm11, %v2618_v20  ;;  %v2621_v61 = vsel %vm14873_vm0, %v2333_v59, 0.0  ;;  %5908 = vst.msk [vmem:[#allocation2 + $0x20] sm:$0xff] %vm671_vm11, %v14726_v29  ;;  %v10054_v52 = vld [vmem:[#allocation2 + $0x40] sm:$0xff]  ;;  %v2876_v19 = vadd.f32 %v2828_v54, %v2776_v45  ;;  %v10061_v47 = vld [vmem:[#allocation2 + $0x48] sm:$0xff]  ;;  %v10070_v43 = vrot.slane %v9979_v40, %v8257_v14  ;;  %v10073_v31 = vmul.f32 %v10018_v48, %v3027_v38 }
 0x156   : > { %2669 = vst.msk [vmem:[#allocation2 + $0x88] sm:$0xff] %vm671_vm11, %v2621_v61  ;;  %v2619_v0 = vsel %vm14745_vm14, %v2331_v62, 0.0  ;;  %v2977_v23 = vadd.f32 %v2929_v53, %v2877_v1  ;;  %v3381_v26 = vld [vmem:[#allocation2 + $0x31] sm:$0xff]  ;;  %v3182_v59 = vmul.f32 %v10025_v24, %v3027_v38  ;;  %v10076_v45 = vld [vmem:[#allocation2 + $0x3f] sm:$0xff]  ;;  %v3026_v41 = vld [vmem:[#allocation2 + $0x28] sm:$0xff]  ;;  %v10080_v25 = vmul.f32 %v10025_v24, %v10054_v52  ;;  %v10082_v53 = vpop.permute.xlu0 %2455 }
 0x157   : > { %2667 = vst.msk [vmem:[#allocation2 + $0x78] sm:$0xff] %vm671_vm11, %v2619_v0  ;;  %v2976_v34 = vadd.f32 %v2928_v39, %v2876_v19  ;;  %v3380_v7 = vld [vmem:[#allocation2 + $0x29] sm:$0xff]  ;;  %14961 = vst [vmem:[#allocation29_spill] sm:$0xff] %v10082_v53  ;;  %v3183_v40 = vmul.f32 %v10025_v24, %v10059_v22  ;;  %v3282_v62 = vmul.f32 %v10044_v50, %v10061_v47  ;;  %v10090_v39 = vld [vmem:[#allocation2 + $0x57] sm:$0xff]  ;;  %vm14756_vm2 = vcmp.eq.s32.totalorder %v10082_v53, 1 }
 0x158   : > { %v3131_v20 = vadd.f32 %v3083_v2, %v2977_v23  ;;  %v3283_v54 = vmul.f32 %v10044_v50, %v10063_v51  ;;  %v10092_v61 = vld [vmem:[#allocation2 + $0x5f] sm:$0xff]  ;;  %5909 = vst.msk [vmem:[#allocation2 + $0x28] sm:$0xff] %vm671_vm11, %v14726_v29  ;;  %v3436_v0 = vmul.f32 %v10070_v43, %v3378_v5  ;;  %v3437_v19 = vmul.f32 %v10070_v43, %v3379_v28  ;;  %v10101_v23 = vpop.permute.xlu1 %2458  ;;  %v10110_v29 = vld [vmem:[#allocation2 + $0x51] sm:$0xff] }
 0x159   : > { %v3130_v1 = vadd.f32 %v3082_v46, %v2976_v34  ;;  %v10096_v38 = vld [vmem:[#allocation2 + $0x39] sm:$0xff]  ;;  %v3536_v2 = vmul.f32 %v10048_v42, %v3381_v26  ;;  %14962 = vst [vmem:[#allocation30_spill] sm:$0xff] %v10101_v23  ;;  %v2778_v46 = vmul.f32 %v9994_v32, %v2720_v33  ;;  %v2779_v5 = vmul.f32 %v9994_v32, %v2721_v60  ;;  %v10133_v13 = vld [vmem:[#allocation2 + $0x41] sm:$0xff] }
 0x15a   : > { %v3231_v16 = vadd.f32 %v3183_v40, %v3131_v20  ;;  %v2830_v28 = vmul.f32 %v9998_v37, %v10076_v45  ;;  %v2930_v44 = vmul.f32 %v10007_v58, %v10090_v39  ;;  %v2931_v20 = vmul.f32 %v10007_v58, %v10092_v61  ;;  %v10122_v40 = vld [vmem:[#allocation2 + $0x58] sm:$0xff]  ;;  %v10135_v12 = vpop.permute.xlu0 %2461 }
 0x15b   : > { %v3230_v34 = vadd.f32 %v3182_v59, %v3130_v1  ;;  %v3537_v33 = vmul.f32 %v10048_v42, %v10096_v38  ;;  %v3084_v59 = vmul.f32 %v10018_v48, %v3026_v41  ;;  %v3636_v49 = vmul.f32 %v10106_v6, %v10108_v3  ;;  %14963 = vst [vmem:[#allocation31_spill] sm:$0xff] %v10135_v12 }
 0x15c   : > { %v3331_v57 = vadd.f32 %v3283_v54, %v3231_v16  ;;  %v2878_v60 = vadd.f32 %v2830_v28, %v2778_v46  ;;  %v3637_v15 = vmul.f32 %v10106_v6, %v10110_v29  ;;  %v2879_v14 = vadd.f32 %v2831_v63, %v2779_v5  ;;  %v10146_v5 = vld [vmem:[#allocation2 + $0x61] sm:$0xff] }
 0x15d   : > { %v3330_v1 = vadd.f32 %v3282_v62, %v3230_v34  ;;  %v3185_v46 = vmul.f32 %v10025_v24, %v10061_v47  ;;  %v3284_v41 = vmul.f32 %v10044_v50, %v10122_v40  ;;  %v10141_v62 = vld [vmem:[#allocation2 + $0x59] sm:$0xff]  ;;  %vm14767_vm1 = vcmp.eq.s32.totalorder %v10135_v12, 1  ;;  %v10310_v35 = vld [vmem:[#allocation2 + $0x81] sm:$0xff] }
 0x15e   : > { %v3485_v16 = vadd.f32 %v3437_v19, %v3331_v57  ;;  %v2978_v54 = vadd.f32 %v2930_v44, %v2878_v60  ;;  %v2979_v34 = vadd.f32 %v2931_v20, %v2879_v14  ;;  %v3285_v63 = vmul.f32 %v10044_v50, %v10126_v21  ;;  %v10150_v44 = vpop.permute.xlu1 %2464 }
 0x15f   : > { %v3484_v28 = vadd.f32 %v3436_v0, %v3330_v1  ;;  %v3438_v57 = vmul.f32 %v10070_v43, %v3380_v7  ;;  %14964 = vst [vmem:[#allocation32_spill] sm:$0xff] %v10150_v44  ;;  %v3439_v11 = vmul.f32 %v10070_v43, %v3381_v26  ;;  %v3538_v10 = vmul.f32 %v10048_v42, %v10133_v13 }
 0x160   : > { %v3585_v19 = vadd.f32 %v3537_v33, %v3485_v16  ;;  %v3132_v60 = vadd.f32 %v3084_v59, %v2978_v54  ;;  %vm14755_vm3 = vcmp.eq.s32.totalorder %v10150_v44, 1  ;;  %v3133_v20 = vadd.f32 %v10073_v31, %v2979_v34 }
 0x161   : > { %v3584_v0 = vadd.f32 %v3536_v2, %v3484_v28  ;;  %v3539_v7 = vmul.f32 %v10048_v42, %v10108_v3  ;;  %v3638_v1 = vmul.f32 %v10106_v6, %v10141_v62  ;;  %vm14754_vm14 = vcmp.eq.s32.totalorder %v10101_v23, 1  ;;  %v10271_v23 = vld [vmem:[#allocation2 + $0x79] sm:$0xff] }
 0x162   : > { %v3685_v59 = vadd.f32 %v3637_v15, %v3585_v19  ;;  %v3232_v16 = vadd.f32 %v10080_v25, %v3132_v60  ;;  %v3639_v54 = vmul.f32 %v10106_v6, %v10146_v5  ;;  %v3233_v34 = vadd.f32 %v3185_v46, %v3133_v20 }
 0x163   : > { %v7542_v14 = vpop.f32.mrb[12].mxu0  ;;  %v3684_v28 = vadd.f32 %v3636_v49, %v3584_v0  ;;  %v2780_v9 = vmul.f32 %v9994_v32, %v10003_v4  ;;  %v2832_v15 = vmul.f32 %v9998_v37, %v10012_v55  ;;  %v10176_v4 = vld [vmem:[#allocation2 + $0x67] sm:$0xff]  ;;  %v2833_v20 = vmul.f32 %v9998_v37, %v10090_v39 }
 0x164   : > { %v2234_v33 = vmul.f32 %v7542_v14, %v9886_v36  ;;  %v2071_v26 = vpop.f32.mrb[13].mxu0  ;;  %v3332_v27 = vadd.f32 %v3284_v41, %v3232_v16 }
 0x165   : > { %v2232_v2 = vmul.f32 %v9886_v36, %v2071_v26  ;;  %v7543_v31 = vpop.f32.mrb[14].mxu0  ;;  %v3732_v60 = vpack.c.bf16 %v3685_v59, %v3684_v28  ;;  %v3333_v26 = vadd.f32 %v3285_v63, %v3233_v34 }
 0x166   : > { %v2288_v8 = vadd.f32 %v9904_v17, %v2234_v33  ;;  %v2235_v56 = vmul.f32 %v7543_v31, %v9886_v36  ;;  %v2074_v14 = vpop.f32.mrb[15].mxu0  ;;  %v3486_v0 = vadd.f32 %v3438_v57, %v3332_v27  ;;  %v10184_v31 = vld [vmem:[#allocation2 + $0x6f] sm:$0xff] }
 0x167   : > { %v2286_v25 = vadd.f32 %v9904_v17, %v2232_v2  ;;  %v2233_v19 = vmul.f32 %v9886_v36, %v2074_v14  ;;  %7584 = vmatprep.mubr.msk.bf16.mxu1 %vm671_vm11, %v3732_v60  ;;  %v3487_v16 = vadd.f32 %v3439_v11, %v3333_v26  ;;  %v2880_v2 = vadd.f32 %v2832_v15, %v2780_v9  ;;  %v10205_v60 = vld [vmem:[#allocation2 + $0x70] sm:$0xff] }
 0x168   : > { %v2336_v49 = vmax.f32 %v2288_v8, 0.0  ;;  %v2289_v46 = vadd.f32 %v9904_v17, %v2235_v56  ;;  %v3586_v8 = vadd.f32 %v3538_v10, %v3486_v0  ;;  %v2781_v56 = vmul.f32 %v9994_v32, %v10076_v45 }
 0x169   : > { %v2334_v33 = vmax.f32 %v2286_v25, 0.0  ;;  %v2287_v41 = vadd.f32 %v9904_v17, %v2233_v19  ;;  %v3587_v28 = vadd.f32 %v3539_v7, %v3487_v16  ;;  %v2932_v9 = vmul.f32 %v10007_v58, %v10176_v4  ;;  %v10203_v19 = vld [vmem:[#allocation2 + $0x68] sm:$0xff]  ;;  %v10228_v16 = vld [vmem:[#allocation2 + $0x7f] sm:$0xff] }
 0x16a   : > { %v2624_v59 = vsel %vm14767_vm1, %v2336_v49, 0.0  ;;  %v2337_v63 = vmax.f32 %v2289_v46, 0.0  ;;  %v3086_v11 = vmul.f32 %v10018_v48, %v10059_v22  ;;  %v3686_v34 = vadd.f32 %v3638_v1, %v3586_v8  ;;  %v10233_v8 = vld [vmem:[#allocation2 + $0x69] sm:$0xff] }
 0x16b   : > { %2672 = vst.msk [vmem:[#allocation2 + $0xa0] sm:$0xff] %vm671_vm11, %v2624_v59  ;;  %v2622_v27 = vsel %vm14756_vm2, %v2334_v33, 0.0  ;;  %v2335_v57 = vmax.f32 %v2287_v41, 0.0  ;;  %v2881_v45 = vadd.f32 %v2833_v20, %v2781_v56  ;;  %v3687_v15 = vadd.f32 %v3639_v54, %v3587_v28  ;;  %v10218_v33 = vld [vmem:[#allocation2 + $0x77] sm:$0xff] }
 0x16c   : > { %2670 = vst.msk [vmem:[#allocation2 + $0x90] sm:$0xff] %vm671_vm11, %v2622_v27  ;;  %v2625_v10 = vsel %vm14755_vm3, %v2337_v63, 0.0  ;;  %v2933_v7 = vmul.f32 %v10007_v58, %v10184_v31  ;;  %v2980_v25 = vadd.f32 %v2932_v9, %v2880_v2  ;;  %v3088_v22 = vmul.f32 %v10018_v48, %v10061_v47  ;;  %v10230_v2 = vpop.permute.xlu0 %2467  ;;  %v10235_v56 = vld [vmem:[#allocation2 + $0x71] sm:$0xff] }
 0x16d   : > { %2673 = vst.msk [vmem:[#allocation2 + $0xa8] sm:$0xff] %vm671_vm11, %v2625_v10  ;;  %v2623_v14 = vsel %vm14754_vm14, %v2335_v57, 0.0  ;;  %v3089_v1 = vmul.f32 %v10018_v48, %v10063_v51  ;;  %v3087_v26 = vmul.f32 %v10018_v48, %v10054_v52  ;;  %v3186_v54 = vmul.f32 %v10025_v24, %v10063_v51  ;;  %14965 = vst [vmem:[#allocation33_spill] sm:$0xff] %v10230_v2  ;;  %v10249_v10 = vpop.permute.xlu1 %2470 }
 0x16e   : > { %2671 = vst.msk [vmem:[#allocation2 + $0x98] sm:$0xff] %vm671_vm11, %v2623_v14  ;;  %v3733_v49 = vpack.c.bf16 %v3687_v15, %v3686_v34  ;;  %v2981_v46 = vadd.f32 %v2933_v7, %v2881_v45  ;;  %v3134_v0 = vadd.f32 %v3086_v11, %v2980_v25  ;;  %v3187_v20 = vmul.f32 %v10025_v24, %v10122_v40  ;;  %v10257_v14 = vld [vmem:[#allocation2 + $0x80] sm:$0xff] }
 0x16f   : > { %v3286_v47 = vmul.f32 %v10044_v50, %v10203_v19  ;;  %v3287_v41 = vmul.f32 %v10044_v50, %v10205_v60  ;;  %v3440_v52 = vmul.f32 %v10070_v43, %v10096_v38  ;;  %v3441_v51 = vmul.f32 %v10070_v43, %v10133_v13  ;;  %14966 = vst [vmem:[#allocation34_spill] sm:$0xff] %v10249_v10 }
 0x170   : > { %7585 = vmatmul.mubr.msk.bf16.vlgmr.msra.gmra.mrb[0].mxu1 %vm671_vm11, %v3733_v49  ;;  %v3135_v59 = vadd.f32 %v3087_v26, %v2981_v46  ;;  %v3234_v63 = vadd.f32 %v3186_v54, %v3134_v0  ;;  %v3540_v27 = vmul.f32 %v10048_v42, %v10110_v29  ;;  %v2782_v38 = vmul.f32 %v9994_v32, %v10010_v18 }
 0x171   : > { %v2783_v13 = vmul.f32 %v9994_v32, %v10012_v55  ;;  %v2834_v57 = vmul.f32 %v9998_v37, %v10092_v61  ;;  %v2835_v28 = vmul.f32 %v9998_v37, %v10176_v4  ;;  %v2934_v9 = vmul.f32 %v10007_v58, %v10218_v33  ;;  %v10255_v55 = vld [vmem:[#allocation2 + $0x78] sm:$0xff] }
 0x172   : > { %v3235_v11 = vadd.f32 %v3187_v20, %v3135_v59  ;;  %v3334_v34 = vadd.f32 %v3286_v47, %v3234_v63  ;;  %v3541_v45 = vmul.f32 %v10048_v42, %v10141_v62  ;;  %v2935_v18 = vmul.f32 %v10007_v58, %v10228_v16 }
 0x173   : > { %v3640_v15 = vmul.f32 %v10106_v6, %v10233_v8  ;;  %v3641_v7 = vmul.f32 %v10106_v6, %v10235_v56  ;;  %v2882_v25 = vadd.f32 %v2834_v57, %v2782_v38  ;;  %v2883_v26 = vadd.f32 %v2835_v28, %v2783_v13  ;;  %v10273_v38 = vpop.permute.xlu0 %2473 }
 0x174   : > { %v3335_v54 = vadd.f32 %v3287_v41, %v3235_v11  ;;  %v3488_v49 = vadd.f32 %v3440_v52, %v3334_v34  ;;  %v3188_v46 = vmul.f32 %v10025_v24, %v10126_v21  ;;  %v3189_v0 = vmul.f32 %v10025_v24, %v10203_v19  ;;  %14967 = vst [vmem:[#allocation35_spill] sm:$0xff] %v10273_v38 }
 0x175   : > { %v2982_v20 = vadd.f32 %v2934_v9, %v2882_v25  ;;  %v2983_v47 = vadd.f32 %v2935_v18, %v2883_v26  ;;  %v3288_v59 = vmul.f32 %v10044_v50, %v10255_v55  ;;  %v3289_v63 = vmul.f32 %v10044_v50, %v10257_v14  ;;  %v10284_v18 = vld [vmem:[#allocation2 + $0x87] sm:$0xff] }
 0x176   : > { %v3489_v41 = vadd.f32 %v3441_v51, %v3335_v54  ;;  %v3588_v52 = vadd.f32 %v3540_v27, %v3488_v49  ;;  %v3442_v13 = vmul.f32 %v10070_v43, %v10108_v3  ;;  %v3443_v57 = vmul.f32 %v10070_v43, %v10110_v29  ;;  %v10287_v51 = vpop.permute.xlu1 %2476 }
 0x177   : > { %vm14779_vm14 = vcmp.eq.s32.totalorder %v10273_v38, 1  ;;  %v3136_v28 = vadd.f32 %v3088_v22, %v2982_v20  ;;  %v3137_v9 = vadd.f32 %v3089_v1, %v2983_v47  ;;  %v3542_v11 = vmul.f32 %v10048_v42, %v10146_v5  ;;  %14968 = vst [vmem:[#allocation36_spill] sm:$0xff] %v10287_v51 }
 0x178   : > { %v3543_v34 = vmul.f32 %v10048_v42, %v10233_v8  ;;  %vm14770_vm3 = vcmp.eq.s32.totalorder %v10230_v2, 1  ;;  %v3589_v3 = vadd.f32 %v3541_v45, %v3489_v41  ;;  %v3688_v27 = vadd.f32 %v3640_v15, %v3588_v52 }
 0x179   : > { %v3642_v29 = vmul.f32 %v10106_v6, %v10271_v23  ;;  %v2784_v22 = vmul.f32 %v9994_v32, %v10090_v39  ;;  %vm14769_vm2 = vcmp.eq.s32.totalorder %v10287_v51, 1  ;;  %v7546_v1 = vpop.f32.mrb[16].mxu0  ;;  %v3236_v25 = vadd.f32 %v3188_v46, %v3136_v28  ;;  %v10304_v28 = vld [vmem:[#allocation2 + $0x8f] sm:$0xff] }
 0x17a   : > { %v3237_v26 = vadd.f32 %v3189_v0, %v3137_v9  ;;  %v2785_v54 = vmul.f32 %v9994_v32, %v10092_v61  ;;  %v2836_v49 = vmul.f32 %v9998_v37, %v10184_v31  ;;  %v2238_v45 = vmul.f32 %v7546_v1, %v9886_v36  ;;  %v2087_v15 = vpop.f32.mrb[17].mxu0 }
 0x17b   : > { %v3689_v20 = vadd.f32 %v3641_v7, %v3589_v3  ;;  %v2837_v47 = vmul.f32 %v9998_v37, %v10218_v33  ;;  %v2936_v39 = vmul.f32 %v10007_v58, %v10284_v18  ;;  %v2236_v41 = vmul.f32 %v9886_v36, %v2087_v15  ;;  %v7547_v46 = vpop.f32.mrb[18].mxu0 }
 0x17c   : > { %v3336_v0 = vadd.f32 %v3288_v59, %v3236_v25  ;;  %v3337_v52 = vadd.f32 %v3289_v63, %v3237_v26  ;;  %v2884_v61 = vadd.f32 %v2836_v49, %v2784_v22  ;;  %v2292_v9 = vadd.f32 %v9904_v17, %v2238_v45  ;;  %v2090_v44 = vpop.f32.mrb[19].mxu0 }
 0x17d   : > { %v2239_v1 = vmul.f32 %v7547_v46, %v9886_v36  ;;  %v3734_v7 = vpack.c.bf16 %v3689_v20, %v3688_v27  ;;  %v2885_v3 = vadd.f32 %v2837_v47, %v2785_v54  ;;  %v2290_v53 = vadd.f32 %v9904_v17, %v2236_v41 }
 0x17e   : > { %v2237_v12 = vmul.f32 %v9886_v36, %v2090_v44  ;;  %v3490_v15 = vadd.f32 %v3442_v13, %v3336_v0  ;;  %v3491_v30 = vadd.f32 %v3443_v57, %v3337_v52  ;;  %v2340_v59 = vmax.f32 %v2292_v9, 0.0 }
 0x17f   : > { %v2293_v63 = vadd.f32 %v9904_v17, %v2239_v1  ;;  %7588 = vmatprep.mubr.msk.bf16.mxu1 %vm671_vm11, %v3734_v7  ;;  %v2937_v22 = vmul.f32 %v10007_v58, %v10304_v28  ;;  %v2984_v25 = vadd.f32 %v2936_v39, %v2884_v61  ;;  %v2338_v26 = vmax.f32 %v2290_v53, 0.0 }
 0x180   : > { %v2291_v27 = vadd.f32 %v9904_v17, %v2237_v12  ;;  %v3590_v54 = vadd.f32 %v3542_v11, %v3490_v15  ;;  %v3591_v49 = vadd.f32 %v3543_v34, %v3491_v30  ;;  %v2628_v44 = vsel %vm14779_vm14, %v2340_v59, 0.0  ;;  %v10330_v11 = vld [vmem:[#allocation2 + $0x88] sm:$0xff]  ;;  %v10332_v34 = vld [vmem:[#allocation2 + $0x90] sm:$0xff]  ;;  %v10352_v15 = vld [vmem:[#allocation2 + $0x9f] sm:$0xff]  ;;  %v10354_v59 = vpop.permute.xlu0 %2479 }
 0x181   : > { %v2341_v45 = vmax.f32 %v2293_v63, 0.0  ;;  %v3643_v13 = vmul.f32 %v10106_v6, %v10310_v35  ;;  %v2985_v57 = vadd.f32 %v2937_v22, %v2885_v3  ;;  %2676 = vst.msk [vmem:[#allocation2 + $0xc0] sm:$0xff] %vm671_vm11, %v2628_v44  ;;  %v2626_v20 = vsel %vm14770_vm3, %v2338_v26, 0.0  ;;  %v10350_v3 = vld [vmem:[#allocation2 + $0x97] sm:$0xff]  ;;  %14969 = vst [vmem:[#allocation37_spill] sm:$0xff] %v10354_v59  ;;  %v10357_v22 = vld [vmem:[#allocation2 + $0x89] sm:$0xff] }
 0x182   : > { %v2339_v47 = vmax.f32 %v2291_v27, 0.0  ;;  %v3690_v39 = vadd.f32 %v3642_v29, %v3590_v54  ;;  %v3090_v12 = vmul.f32 %v10018_v48, %v10122_v40  ;;  %vm14768_vm1 = vcmp.eq.s32.totalorder %v10249_v10, 1  ;;  %2674 = vst.msk [vmem:[#allocation2 + $0xb0] sm:$0xff] %vm671_vm11, %v2626_v20 }
 0x183   : > { %v2629_v30 = vsel %vm14769_vm2, %v2341_v45, 0.0  ;;  %v3691_v53 = vadd.f32 %v3643_v13, %v3591_v49  ;;  %v3091_v41 = vmul.f32 %v10018_v48, %v10126_v21  ;;  %v3190_v46 = vmul.f32 %v10025_v24, %v10205_v60  ;;  %v10373_v13 = vpop.permute.xlu1 %2482 }
 0x184   : > { %2677 = vst.msk [vmem:[#allocation2 + $0xc8] sm:$0xff] %vm671_vm11, %v2629_v30  ;;  %v2627_v40 = vsel %vm14768_vm1, %v2339_v47, 0.0  ;;  %v3138_v29 = vadd.f32 %v3090_v12, %v2984_v25  ;;  %v3191_v61 = vmul.f32 %v10025_v24, %v10255_v55  ;;  %v3290_v21 = vmul.f32 %v10044_v50, %v10330_v11  ;;  %v10359_v25 = vld [vmem:[#allocation2 + $0x91] sm:$0xff]  ;;  %14970 = vst [vmem:[#allocation38_spill] sm:$0xff] %v10373_v13 }
 0x185   : > { %2675 = vst.msk [vmem:[#allocation2 + $0xb8] sm:$0xff] %vm671_vm11, %v2627_v40  ;;  %v3735_v0 = vpack.c.bf16 %v3691_v53, %v3690_v39  ;;  %v3139_v52 = vadd.f32 %v3091_v41, %v2985_v57  ;;  %v3291_v1 = vmul.f32 %v10044_v50, %v10332_v34  ;;  %v3444_v7 = vmul.f32 %v10070_v43, %v10141_v62  ;;  %v10385_v30 = vld [vmem:[#allocation2 + $0x98] sm:$0xff]  ;;  %v10387_v53 = vld [vmem:[#allocation2 + $0xa0] sm:$0xff] }
 0x186   : > { %v3238_v9 = vadd.f32 %v3190_v46, %v3138_v29  ;;  %v3445_v26 = vmul.f32 %v10070_v43, %v10146_v5  ;;  %v3544_v27 = vmul.f32 %v10048_v42, %v10235_v56  ;;  %v3545_v62 = vmul.f32 %v10048_v42, %v10271_v23 }
 0x187   : > { %7589 = vmatmul.mubr.msk.bf16.gmra.mrb[4].mxu1 %vm671_vm11, %v3735_v0  ;;  %v3239_v63 = vadd.f32 %v3191_v61, %v3139_v52  ;;  %v2786_v49 = vmul.f32 %v9994_v32, %v10176_v4  ;;  %v2787_v44 = vmul.f32 %v9994_v32, %v10184_v31  ;;  %v2838_v45 = vmul.f32 %v9998_v37, %v10228_v16 }
 0x188   : > { %v3338_v54 = vadd.f32 %v3290_v21, %v3238_v9  ;;  %v2839_v5 = vmul.f32 %v9998_v37, %v10284_v18  ;;  %v2938_v20 = vmul.f32 %v10007_v58, %v10350_v3  ;;  %v2939_v47 = vmul.f32 %v10007_v58, %v10352_v15  ;;  %v10397_v21 = vpop.permute.xlu0 %2485 }
 0x189   : > { %v3339_v57 = vadd.f32 %v3291_v1, %v3239_v63  ;;  %v3644_v4 = vmul.f32 %v10106_v6, %v10357_v22  ;;  %v3645_v31 = vmul.f32 %v10106_v6, %v10359_v25  ;;  %v2886_v12 = vadd.f32 %v2838_v45, %v2786_v49  ;;  %14971 = vst [vmem:[#allocation39_spill] sm:$0xff] %v10397_v21 }
 0x18a   : > { %v3492_v39 = vadd.f32 %v3444_v7, %v3338_v54  ;;  %v2887_v40 = vadd.f32 %v2839_v5, %v2787_v44  ;;  %v3092_v29 = vmul.f32 %v10018_v48, %v10203_v19  ;;  %v3093_v46 = vmul.f32 %v10018_v48, %v10205_v60  ;;  %v10405_v60 = vld [vmem:[#allocation2 + $0xa1] sm:$0xff]  ;;  %v10413_v44 = vpop.permute.xlu1 %2488 }
 0x18b   : > { %v3493_v41 = vadd.f32 %v3445_v26, %v3339_v57  ;;  %v2986_v52 = vadd.f32 %v2938_v20, %v2886_v12  ;;  %v3192_v61 = vmul.f32 %v10025_v24, %v10257_v14  ;;  %v3193_v9 = vmul.f32 %v10025_v24, %v10330_v11  ;;  %v10403_v26 = vld [vmem:[#allocation2 + $0x99] sm:$0xff]  ;;  %14972 = vst [vmem:[#allocation40_spill] sm:$0xff] %v10413_v44 }
 0x18c   : > { %v3592_v0 = vadd.f32 %v3544_v27, %v3492_v39  ;;  %v2987_v7 = vadd.f32 %v2939_v47, %v2887_v40  ;;  %v3292_v63 = vmul.f32 %v10044_v50, %v10385_v30  ;;  %v3293_v19 = vmul.f32 %v10044_v50, %v10387_v53 }
 0x18d   : > { %v3593_v1 = vadd.f32 %v3545_v62, %v3493_v41  ;;  %vm14785_vm1 = vcmp.eq.s32.totalorder %v10397_v21, 1  ;;  %v3140_v54 = vadd.f32 %v3092_v29, %v2986_v52  ;;  %v3446_v49 = vmul.f32 %v10070_v43, %v10233_v8 }
 0x18e   : > { %v3692_v27 = vadd.f32 %v3644_v4, %v3592_v0  ;;  %v3447_v62 = vmul.f32 %v10070_v43, %v10235_v56  ;;  %vm14782_vm2 = vcmp.eq.s32.totalorder %v10354_v59, 1  ;;  %v3141_v57 = vadd.f32 %v3093_v46, %v2987_v7  ;;  %v10424_v4 = vld [vmem:[#allocation2 + $0xa7] sm:$0xff] }
 0x18f   : > { %v3693_v45 = vadd.f32 %v3645_v31, %v3593_v1  ;;  %v3546_v5 = vmul.f32 %v10048_v42, %v10310_v35  ;;  %v3547_v20 = vmul.f32 %v10048_v42, %v10357_v22  ;;  %vm14781_vm3 = vcmp.eq.s32.totalorder %v10413_v44, 1 }
 0x190   : > { %v7550_v47 = vpop.f32.mrb[20].mxu0  ;;  %v3240_v39 = vadd.f32 %v3192_v61, %v3140_v54  ;;  %v3646_v8 = vmul.f32 %v10106_v6, %v10403_v26  ;;  %v3647_v56 = vmul.f32 %v10106_v6, %v10405_v60  ;;  %v2788_v31 = vmul.f32 %v9994_v32, %v10218_v33 }
 0x191   : > { %v2242_v12 = vmul.f32 %v7550_v47, %v9886_v36  ;;  %v2103_v41 = vpop.f32.mrb[21].mxu0  ;;  %v3736_v40 = vpack.c.bf16 %v3693_v45, %v3692_v27  ;;  %v3241_v29 = vadd.f32 %v3193_v9, %v3141_v57  ;;  %v2789_v46 = vmul.f32 %v9994_v32, %v10228_v16  ;;  %v10439_v27 = vld [vmem:[#allocation2 + $0xaf] sm:$0xff] }
 0x192   : > { %v2240_v0 = vmul.f32 %v9886_v36, %v2103_v41  ;;  %v7551_v52 = vpop.f32.mrb[22].mxu0  ;;  %v3340_v61 = vadd.f32 %v3292_v63, %v3240_v39  ;;  %v2840_v1 = vmul.f32 %v9998_v37, %v10304_v28  ;;  %v2841_v7 = vmul.f32 %v9998_v37, %v10350_v3 }
 0x193   : > { %v2296_v33 = vadd.f32 %v9904_v17, %v2242_v12  ;;  %v2243_v54 = vmul.f32 %v7551_v52, %v9886_v36  ;;  %v2106_v47 = vpop.f32.mrb[23].mxu0  ;;  %7592 = vmatprep.mubr.msk.bf16.mxu1 %vm671_vm11, %v3736_v40  ;;  %v3341_v9 = vadd.f32 %v3293_v19, %v3241_v29  ;;  %v2940_v16 = vmul.f32 %v10007_v58, %v10424_v4 }
 0x194   : > { %v2294_v63 = vadd.f32 %v9904_v17, %v2240_v0  ;;  %v2241_v45 = vmul.f32 %v9886_v36, %v2106_v47  ;;  %v3494_v57 = vadd.f32 %v3446_v49, %v3340_v61  ;;  %v2888_v39 = vadd.f32 %v2840_v1, %v2788_v31  ;;  %v10458_v61 = vld [vmem:[#allocation2 + $0xa8] sm:$0xff] }
 0x195   : > { %v2344_v41 = vmax.f32 %v2296_v33, 0.0  ;;  %v2297_v12 = vadd.f32 %v9904_v17, %v2243_v54  ;;  %v3495_v10 = vadd.f32 %v3447_v62, %v3341_v9  ;;  %v2889_v52 = vadd.f32 %v2841_v7, %v2789_v46  ;;  %v10476_v54 = vld [vmem:[#allocation2 + $0xb7] sm:$0xff]  ;;  %v10483_v47 = vld [vmem:[#allocation2 + $0xa9] sm:$0xff] }
 0x196   : > { %v2342_v51 = vmax.f32 %v2294_v63, 0.0  ;;  %v2295_v40 = vadd.f32 %v9904_v17, %v2241_v45  ;;  %v3594_v19 = vadd.f32 %v3546_v5, %v3494_v57  ;;  %v2941_v29 = vmul.f32 %v10007_v58, %v10439_v27  ;;  %v10491_v45 = vpop.permute.xlu0 %2491 }
 0x197   : > { %v2632_v2 = vsel %vm14785_vm1, %v2344_v41, 0.0  ;;  %v2345_v0 = vmax.f32 %v2297_v12, 0.0  ;;  %v3595_v38 = vadd.f32 %v3547_v20, %v3495_v10  ;;  %v2988_v36 = vadd.f32 %v2940_v16, %v2888_v39  ;;  %v10463_v10 = vld [vmem:[#allocation2 + $0xb0] sm:$0xff]  ;;  %14973 = vst [vmem:[#allocation41_spill] sm:$0xff] %v10491_v45 }
 0x198   : > { %2680 = vst.msk [vmem:[#allocation2 + $0xe0] sm:$0xff] %vm671_vm11, %v2632_v2  ;;  %v2630_v49 = vsel %vm14782_vm2, %v2342_v51, 0.0  ;;  %v2343_v62 = vmax.f32 %v2295_v40, 0.0  ;;  %v3694_v31 = vadd.f32 %v3646_v8, %v3594_v19  ;;  %v2989_v46 = vadd.f32 %v2941_v29, %v2889_v52  ;;  %v10493_v41 = vld [vmem:[#allocation2 + $0xb1] sm:$0xff]  ;;  %v10507_v29 = vpop.permute.xlu1 %2494 }
 0x199   : > { %vm14780_vm14 = vcmp.eq.s32.totalorder %v10373_v13, 1  ;;  %2678 = vst.msk [vmem:[#allocation2 + $0xd0] sm:$0xff] %vm671_vm11, %v2630_v49  ;;  %v2633_v17 = vsel %vm14781_vm3, %v2345_v0, 0.0  ;;  %v3695_v5 = vadd.f32 %v3647_v56, %v3595_v38  ;;  %v3094_v51 = vmul.f32 %v10018_v48, %v10255_v55  ;;  %v10478_v55 = vld [vmem:[#allocation2 + $0xbf] sm:$0xff]  ;;  %14974 = vst [vmem:[#allocation42_spill] sm:$0xff] %v10507_v29 }
 0x19a   : > { %2681 = vst.msk [vmem:[#allocation2 + $0xe8] sm:$0xff] %vm671_vm11, %v2633_v17  ;;  %v2631_v2 = vsel %vm14780_vm14, %v2343_v62, 0.0  ;;  %v3095_v20 = vmul.f32 %v10018_v48, %v10257_v14  ;;  %v3194_v38 = vmul.f32 %v10025_v24, %v10332_v34  ;;  %v3195_v7 = vmul.f32 %v10025_v24, %v10385_v30  ;;  %v10513_v49 = vld [vmem:[#allocation2 + $0xb8] sm:$0xff]  ;;  %v10517_v17 = vld [vmem:[#allocation2 + $0xc0] sm:$0xff] }
 0x19b   : > { %2679 = vst.msk [vmem:[#allocation2 + $0xd8] sm:$0xff] %vm671_vm11, %v2631_v2  ;;  %v3737_v8 = vpack.c.bf16 %v3695_v5, %v3694_v31  ;;  %v3142_v56 = vadd.f32 %v3094_v51, %v2988_v36  ;;  %v3294_v33 = vmul.f32 %v10044_v50, %v10458_v61  ;;  %v3295_v14 = vmul.f32 %v10044_v50, %v10463_v10 }
 0x19c   : > { %v3143_v1 = vadd.f32 %v3095_v20, %v2989_v46  ;;  %v3448_v9 = vmul.f32 %v10070_v43, %v10271_v23  ;;  %v3449_v16 = vmul.f32 %v10070_v43, %v10310_v35  ;;  %v3548_v63 = vmul.f32 %v10048_v42, %v10359_v25 }
 0x19d   : > { %7593 = vmatmul.mubr.msk.bf16.gmra.mrb[8].mxu1 %vm671_vm11, %v3737_v8  ;;  %v3242_v57 = vadd.f32 %v3194_v38, %v3142_v56  ;;  %v2790_v12 = vmul.f32 %v9994_v32, %v10284_v18  ;;  %v2791_v52 = vmul.f32 %v9994_v32, %v10304_v28  ;;  %v2842_v23 = vmul.f32 %v9998_v37, %v10352_v15 }
 0x19e   : > { %v3243_v39 = vadd.f32 %v3195_v7, %v3143_v1  ;;  %v2843_v35 = vmul.f32 %v9998_v37, %v10424_v4  ;;  %v2942_v40 = vmul.f32 %v10007_v58, %v10476_v54  ;;  %v2943_v19 = vmul.f32 %v10007_v58, %v10478_v55 }
 0x19f   : > { %v3342_v0 = vadd.f32 %v3294_v33, %v3242_v57  ;;  %v3549_v18 = vmul.f32 %v10048_v42, %v10403_v26  ;;  %v3648_v28 = vmul.f32 %v10106_v6, %v10483_v47  ;;  %v3649_v62 = vmul.f32 %v10106_v6, %v10493_v41  ;;  %v10529_v33 = vld [vmem:[#allocation2 + $0xb9] sm:$0xff] }
 0x1a0   : > { %v3343_v36 = vadd.f32 %v3295_v14, %v3243_v39  ;;  %v2890_v31 = vadd.f32 %v2842_v23, %v2790_v12  ;;  %v2891_v46 = vadd.f32 %v2843_v35, %v2791_v52  ;;  %v3096_v5 = vmul.f32 %v10018_v48, %v10330_v11  ;;  %v10531_v14 = vpop.permute.xlu0 %2497 }
 0x1a1   : > { %v3496_v2 = vadd.f32 %v3448_v9, %v3342_v0  ;;  %v3097_v20 = vmul.f32 %v10018_v48, %v10332_v34  ;;  %v3196_v8 = vmul.f32 %v10025_v24, %v10387_v53  ;;  %v3197_v1 = vmul.f32 %v10025_v24, %v10458_v61  ;;  %14975 = vst [vmem:[#allocation43_spill] sm:$0xff] %v10531_v14 }
 0x1a2   : > { %v3497_v51 = vadd.f32 %v3449_v16, %v3343_v36  ;;  %v2990_v38 = vadd.f32 %v2942_v40, %v2890_v31  ;;  %v2991_v56 = vadd.f32 %v2943_v19, %v2891_v46  ;;  %v3296_v7 = vmul.f32 %v10044_v50, %v10513_v49  ;;  %v10549_v19 = vld [vmem:[#allocation2 + $0xc7] sm:$0xff] }
 0x1a3   : > { %v3596_v11 = vadd.f32 %v3548_v63, %v3496_v2  ;;  %v3297_v34 = vmul.f32 %v10044_v50, %v10517_v17  ;;  %v3450_v16 = vmul.f32 %v10070_v43, %v10357_v22  ;;  %vm14789_vm14 = vcmp.eq.s32.totalorder %v10531_v14, 1  ;;  %v10543_v63 = vpop.permute.xlu1 %2500 }
 0x1a4   : > { %v3597_v9 = vadd.f32 %v3549_v18, %v3497_v51  ;;  %v3144_v57 = vadd.f32 %v3096_v5, %v2990_v38  ;;  %v3145_v39 = vadd.f32 %v3097_v20, %v2991_v56  ;;  %v3451_v12 = vmul.f32 %v10070_v43, %v10359_v25  ;;  %14976 = vst [vmem:[#allocation44_spill] sm:$0xff] %v10543_v63  ;;  %v10567_v38 = vld [vmem:[#allocation2 + $0xcf] sm:$0xff] }
 0x1a5   : > { %v3550_v52 = vmul.f32 %v10048_v42, %v10405_v60  ;;  %vm14788_vm3 = vcmp.eq.s32.totalorder %v10491_v45, 1  ;;  %v3696_v23 = vadd.f32 %v3648_v28, %v3596_v11  ;;  %v3551_v40 = vmul.f32 %v10048_v42, %v10483_v47 }
 0x1a6   : > { %v3697_v35 = vadd.f32 %v3649_v62, %v3597_v9  ;;  %v3650_v22 = vmul.f32 %v10106_v6, %v10529_v33  ;;  %vm14787_vm2 = vcmp.eq.s32.totalorder %v10543_v63, 1  ;;  %v7554_v25 = vpop.f32.mrb[24].mxu0  ;;  %v3244_v0 = vadd.f32 %v3196_v8, %v3144_v57  ;;  %v10559_v62 = vld [vmem:[%s14953_s5] ss:$0 sm:$0xff] }
 0x1a7   : > { %v3245_v36 = vadd.f32 %v3197_v1, %v3145_v39  ;;  %v2792_v18 = vmul.f32 %v9994_v32, %v10350_v3  ;;  %v2793_v28 = vmul.f32 %v9994_v32, %v10352_v15  ;;  %v2246_v31 = vmul.f32 %v10559_v62, %v7554_v25  ;;  %v2119_v46 = vpop.f32.mrb[25].mxu0  ;;  %v10574_v1 = vld [vmem:[%s14956_s6] ss:$0 sm:$0xff] }
 0x1a8   : > { %v3738_v5 = vpack.c.bf16 %v3697_v35, %v3696_v23  ;;  %v2844_v2 = vmul.f32 %v9998_v37, %v10439_v27  ;;  %v2845_v51 = vmul.f32 %v9998_v37, %v10476_v54  ;;  %v2244_v3 = vmul.f32 %v10559_v62, %v2119_v46  ;;  %v7555_v20 = vpop.f32.mrb[26].mxu0  ;;  %v10581_v35 = vld [vmem:[#allocation2 + $0xc1] sm:$0xff] }
 0x1a9   : > { %v3344_v8 = vadd.f32 %v3296_v7, %v3244_v0  ;;  %v3345_v15 = vadd.f32 %v3297_v34, %v3245_v36  ;;  %v2944_v56 = vmul.f32 %v10007_v58, %v10549_v19  ;;  %v2300_v11 = vadd.f32 %v10574_v1, %v2246_v31  ;;  %v2122_v57 = vpop.f32.mrb[27].mxu0 }
 0x1aa   : > { %v2247_v9 = vmul.f32 %v10559_v62, %v7555_v20  ;;  %7596 = vmatprep.mubr.msk.bf16.mxu1 %vm671_vm11, %v3738_v5  ;;  %v2892_v39 = vadd.f32 %v2844_v2, %v2792_v18  ;;  %v2893_v7 = vadd.f32 %v2845_v51, %v2793_v28  ;;  %v2298_v34 = vadd.f32 %v10574_v1, %v2244_v3 }
 0x1ab   : > { %v2245_v23 = vmul.f32 %v10559_v62, %v2122_v57  ;;  %v3498_v25 = vadd.f32 %v3450_v16, %v3344_v8  ;;  %v3499_v0 = vadd.f32 %v3451_v12, %v3345_v15  ;;  %v2348_v36 = vmax.f32 %v2300_v11, 0.0 }
 0x1ac   : > { %v2301_v46 = vadd.f32 %v10574_v1, %v2247_v9  ;;  %v2945_v31 = vmul.f32 %v10007_v58, %v10567_v38  ;;  %v2992_v20 = vadd.f32 %v2944_v56, %v2892_v39  ;;  %v2346_v13 = vmax.f32 %v2298_v34, 0.0  ;;  %v10594_v56 = vld [vmem:[#allocation2 + $0xc8] sm:$0xff]  ;;  %v10602_v9 = vld [vmem:[#allocation2 + $0xd0] sm:$0xff] }
 0x1ad   : > { %v2299_v5 = vadd.f32 %v10574_v1, %v2245_v23  ;;  %v3598_v18 = vadd.f32 %v3550_v52, %v3498_v25  ;;  %v3599_v28 = vadd.f32 %v3551_v40, %v3499_v0  ;;  %v2636_v2 = vsel %vm14789_vm14, %v2348_v36, 0.0  ;;  %v10611_v39 = vld [vmem:[#allocation2 + $0xc9] sm:$0xff] }
 0x1ae   : > { %v2349_v51 = vmax.f32 %v2301_v46, 0.0  ;;  %v3651_v16 = vmul.f32 %v10106_v6, %v10581_v35  ;;  %v2993_v12 = vadd.f32 %v2945_v31, %v2893_v7  ;;  %2684 = vst.msk [vmem:[#allocation2 + $0x100] sm:$0xff] %vm671_vm11, %v2636_v2  ;;  %v2634_v3 = vsel %vm14788_vm3, %v2346_v13, 0.0  ;;  %v10624_v31 = vld [vmem:[#allocation2 + $0xd7] sm:$0xff] }
 0x1af   : > { %v2347_v8 = vmax.f32 %v2299_v5, 0.0  ;;  %v3698_v15 = vadd.f32 %v3650_v22, %v3598_v18  ;;  %v3098_v52 = vmul.f32 %v10018_v48, %v10385_v30  ;;  %vm14786_vm1 = vcmp.eq.s32.totalorder %v10507_v29, 1  ;;  %2682 = vst.msk [vmem:[#allocation2 + $0xf0] sm:$0xff] %vm671_vm11, %v2634_v3  ;;  %14977 = vst [vmem:[#allocation45_spill] sm:$0xff] %v10624_v31  ;;  %v10628_v5 = vpop.permute.xlu0 %2503 }
 0x1b0   : > { %v2637_v40 = vsel %vm14787_vm2, %v2349_v51, 0.0  ;;  %v3699_v11 = vadd.f32 %v3651_v16, %v3599_v28  ;;  %v3099_v13 = vmul.f32 %v10018_v48, %v10387_v53  ;;  %v3198_v30 = vmul.f32 %v10025_v24, %v10463_v10  ;;  %14978 = vst [vmem:[#allocation46_spill] sm:$0xff] %v10628_v5  ;;  %v10631_v28 = vld [vmem:[#allocation2 + $0xd1] sm:$0xff] }
 0x1b1   : > { %2685 = vst.msk [vmem:[#allocation2 + $0x108] sm:$0xff] %vm671_vm11, %v2637_v40  ;;  %v2635_v22 = vsel %vm14786_vm1, %v2347_v8, 0.0  ;;  %v3146_v57 = vadd.f32 %v3098_v52, %v2992_v20  ;;  %v3199_v23 = vmul.f32 %v10025_v24, %v10513_v49  ;;  %v3298_v53 = vmul.f32 %v10044_v50, %v10594_v56  ;;  %v10626_v20 = vld [vmem:[#allocation2 + $0xdf] sm:$0xff]  ;;  %v10645_v8 = vpop.permute.xlu1 %2506 }
 0x1b2   : > { %2683 = vst.msk [vmem:[#allocation2 + $0xf8] sm:$0xff] %vm671_vm11, %v2635_v22  ;;  %v3739_v7 = vpack.c.bf16 %v3699_v11, %v3698_v15  ;;  %v3147_v34 = vadd.f32 %v3099_v13, %v2993_v12  ;;  %v3299_v0 = vmul.f32 %v10044_v50, %v10602_v9  ;;  %v3452_v36 = vmul.f32 %v10070_v43, %v10403_v26  ;;  %v10653_v13 = vld [vmem:[#allocation2 + $0xd8] sm:$0xff] }
 0x1b3   : > { %v3246_v25 = vadd.f32 %v3198_v30, %v3146_v57  ;;  %v3453_v46 = vmul.f32 %v10070_v43, %v10405_v60  ;;  %v3552_v2 = vmul.f32 %v10048_v42, %v10493_v41  ;;  %v3553_v26 = vmul.f32 %v10048_v42, %v10529_v33  ;;  %14979 = vst [vmem:[#allocation47_spill] sm:$0xff] %v10645_v8  ;;  %v10657_v57 = vld [vmem:[#allocation2 + $0xe0] sm:$0xff] }
 0x1b4   : > { %7597 = vmatmul.mubr.msk.bf16.gmra.mrb[12].mxu1 %vm671_vm11, %v3739_v7  ;;  %v3247_v18 = vadd.f32 %v3199_v23, %v3147_v34  ;;  %v3652_v60 = vmul.f32 %v10106_v6, %v10611_v39  ;;  %v2794_v16 = vmul.f32 %v9994_v32, %v10424_v4  ;;  %v2795_v12 = vmul.f32 %v9994_v32, %v10439_v27 }
 0x1b5   : > { %v3346_v51 = vadd.f32 %v3298_v53, %v3246_v25  ;;  %v2846_v3 = vmul.f32 %v9998_v37, %v10478_v55  ;;  %v2847_v52 = vmul.f32 %v9998_v37, %v10549_v19  ;;  %v2946_v40 = vmul.f32 %v10007_v58, %v10624_v31 }
 0x1b6   : > { %v3347_v15 = vadd.f32 %v3299_v0, %v3247_v18  ;;  %v2947_v11 = vmul.f32 %v10007_v58, %v10626_v20  ;;  %v3653_v27 = vmul.f32 %v10106_v6, %v10631_v28  ;;  %v3100_v30 = vmul.f32 %v10018_v48, %v10458_v61  ;;  %v10710_v63 = vld [vmem:[#allocation2 + $0xef] sm:$0xff] }
 0x1b7   : > { %v3500_v4 = vadd.f32 %v3452_v36, %v3346_v51  ;;  %v2894_v22 = vadd.f32 %v2846_v3, %v2794_v16  ;;  %v2895_v34 = vadd.f32 %v2847_v52, %v2795_v12  ;;  %v3101_v23 = vmul.f32 %v10018_v48, %v10463_v10  ;;  %v10669_v51 = vld [vmem:[#allocation2 + $0xd9] sm:$0xff]  ;;  %v10671_v16 = vpop.permute.xlu0 %2509  ;;  %v10675_v12 = vld [vmem:[#allocation2 + $0xe1] sm:$0xff] }
 0x1b8   : > { %v3501_v7 = vadd.f32 %v3453_v46, %v3347_v15  ;;  %v3200_v53 = vmul.f32 %v10025_v24, %v10517_v17  ;;  %v3201_v36 = vmul.f32 %v10025_v24, %v10594_v56  ;;  %v3300_v18 = vmul.f32 %v10044_v50, %v10653_v13  ;;  %14980 = vst [vmem:[#allocation48_spill] sm:$0xff] %v10671_v16 }
 0x1b9   : > { %v3600_v25 = vadd.f32 %v3552_v2, %v3500_v4  ;;  %v2994_v0 = vadd.f32 %v2946_v40, %v2894_v22  ;;  %v2995_v46 = vadd.f32 %v2947_v11, %v2895_v34  ;;  %v3301_v10 = vmul.f32 %v10044_v50, %v10657_v57 }
 0x1ba   : > { %v3601_v61 = vadd.f32 %v3553_v26, %v3501_v7  ;;  %v3454_v2 = vmul.f32 %v10070_v43, %v10483_v47  ;;  %vm14816_vm1 = vcmp.eq.s32.totalorder %v10671_v16, 1  ;;  %v3455_v52 = vmul.f32 %v10070_v43, %v10493_v41  ;;  %v10685_v26 = vpop.permute.xlu1 %2512  ;;  %v10697_v7 = vld [vmem:[%s14696_s7 + $0x8] ss:$0 sm:$0xff] }
 0x1bb   : > { %v3700_v3 = vadd.f32 %v3652_v60, %v3600_v25  ;;  %v3148_v15 = vadd.f32 %v3100_v30, %v2994_v0  ;;  %v3554_v40 = vmul.f32 %v10048_v42, %v10581_v35  ;;  %vm14809_vm2 = vcmp.eq.s32.totalorder %v10628_v5, 1  ;;  %14981 = vst [vmem:[#allocation49_spill] sm:$0xff] %v10685_v26  ;;  %v10691_v60 = vld [vmem:[#allocation2 + $0xe7] sm:$0xff] }
 0x1bc   : > { %v3701_v11 = vadd.f32 %v3653_v27, %v3601_v61  ;;  %v3149_v4 = vadd.f32 %v3101_v23, %v2995_v46  ;;  %v3555_v22 = vmul.f32 %v10048_v42, %v10611_v39  ;;  %v3654_v47 = vmul.f32 %v10106_v6, %v10669_v51 }
 0x1bd   : > { %vm14808_vm3 = vcmp.eq.s32.totalorder %v10685_v26, 1  ;;  %v7558_v41 = vpop.f32.mrb[28].mxu0  ;;  %v3248_v30 = vadd.f32 %v3200_v53, %v3148_v15  ;;  %v3655_v27 = vmul.f32 %v10697_v7, %v10675_v12  ;;  %v2796_v34 = vmul.f32 %v9994_v32, %v10476_v54 }
 0x1be   : > { %v2797_v6 = vmul.f32 %v9994_v32, %v10478_v55  ;;  %vm14805_vm14 = vcmp.eq.s32.totalorder %v10645_v8, 1  ;;  %v2250_v23 = vmul.f32 %v10559_v62, %v7558_v41  ;;  %v2135_v25 = vpop.f32.mrb[29].mxu0  ;;  %v3740_v53 = vpack.c.bf16 %v3701_v11, %v3700_v3 }
 0x1bf   : > { %v3249_v0 = vadd.f32 %v3201_v36, %v3149_v4  ;;  %v2848_v61 = vmul.f32 %v9998_v37, %v10567_v38  ;;  %v2248_v46 = vmul.f32 %v10559_v62, %v2135_v25  ;;  %v7559_v15 = vpop.f32.mrb[30].mxu0  ;;  %v3348_v29 = vadd.f32 %v3300_v18, %v3248_v30 }
 0x1c0   : > { %v2849_v54 = vmul.f32 %v9998_v37, %v10624_v31  ;;  %v2948_v55 = vmul.f32 %v10007_v58, %v10691_v60  ;;  %v2304_v41 = vadd.f32 %v10574_v1, %v2250_v23  ;;  %v2251_v3 = vmul.f32 %v10559_v62, %v7559_v15  ;;  %v2138_v36 = vpop.f32.mrb[31].mxu0  ;;  %7600 = vmatprep.mubr.msk.bf16.mxu1 %vm671_vm11, %v3740_v53 }
 0x1c1   : > { %v3349_v11 = vadd.f32 %v3301_v10, %v3249_v0  ;;  %v2896_v4 = vadd.f32 %v2848_v61, %v2796_v34  ;;  %v2302_v25 = vadd.f32 %v10574_v1, %v2248_v46  ;;  %v2249_v18 = vmul.f32 %v10559_v62, %v2138_v36  ;;  %v10732_v46 = vld [vmem:[#allocation2 + $0xf0] sm:$0xff] }
 0x1c2   : > { %v3502_v30 = vadd.f32 %v3454_v2, %v3348_v29  ;;  %v2897_v45 = vadd.f32 %v2849_v54, %v2797_v6  ;;  %v2352_v14 = vmax.f32 %v2304_v41, 0.0  ;;  %v2305_v44 = vadd.f32 %v10574_v1, %v2251_v3  ;;  %v10727_v29 = vld [vmem:[#allocation2 + $0xe8] sm:$0xff] }
 0x1c3   : > { %v3503_v59 = vadd.f32 %v3455_v52, %v3349_v11  ;;  %v2949_v23 = vmul.f32 %v10007_v58, %v10710_v63  ;;  %v2350_v21 = vmax.f32 %v2302_v25, 0.0  ;;  %v2303_v15 = vadd.f32 %v10574_v1, %v2249_v18  ;;  %v10765_v25 = vld [vmem:[#allocation2 + $0xf7] sm:$0xff]  ;;  %v10767_v18 = vld [vmem:[#allocation2 + $0xff] sm:$0xff] }
 0x1c4   : > { %v3602_v31 = vadd.f32 %v3554_v40, %v3502_v30  ;;  %v2996_v53 = vadd.f32 %v2948_v55, %v2896_v4  ;;  %v2640_v10 = vsel %vm14816_vm1, %v2352_v14, 0.0  ;;  %v2353_v34 = vmax.f32 %v2305_v44, 0.0 }
 0x1c5   : > { %v3603_v0 = vadd.f32 %v3555_v22, %v3503_v59  ;;  %v2997_v61 = vadd.f32 %v2949_v23, %v2897_v45  ;;  %2688 = vst.msk [vmem:[#allocation2 + $0x120] sm:$0xff] %vm671_vm11, %v2640_v10  ;;  %v2638_v2 = vsel %vm14809_vm2, %v2350_v21, 0.0  ;;  %v2351_v52 = vmax.f32 %v2303_v15, 0.0  ;;  %v10776_v15 = vpop.permute.xlu0 %2515 }
 0x1c6   : > { %v3702_v6 = vadd.f32 %v3654_v47, %v3602_v31  ;;  %v3102_v40 = vmul.f32 %v10018_v48, %v10513_v49  ;;  %2686 = vst.msk [vmem:[#allocation2 + $0x110] sm:$0xff] %vm671_vm11, %v2638_v2  ;;  %v2641_v59 = vsel %vm14808_vm3, %v2353_v34, 0.0  ;;  %v3103_v45 = vmul.f32 %v10018_v48, %v10517_v17  ;;  %v10750_v47 = vld [vmem:[#allocation2 + $0xe9] sm:$0xff]  ;;  %14982 = vst [vmem:[#allocation50_spill] sm:$0xff] %v10776_v15 }
 0x1c7   : > { %v3703_v44 = vadd.f32 %v3655_v27, %v3603_v0  ;;  %v3202_v14 = vmul.f32 %v10025_v24, %v10602_v9  ;;  %2689 = vst.msk [vmem:[#allocation2 + $0x128] sm:$0xff] %vm671_vm11, %v2641_v59  ;;  %v2639_v21 = vsel %vm14805_vm14, %v2351_v52, 0.0  ;;  %v3203_v49 = vmul.f32 %v10025_v24, %v10653_v13  ;;  %v10752_v27 = vld [vmem:[#allocation2 + $0xf1] sm:$0xff] }
 0x1c8   : > { %v3150_v31 = vadd.f32 %v3102_v40, %v2996_v53  ;;  %v3302_v22 = vmul.f32 %v10044_v50, %v10727_v29  ;;  %2687 = vst.msk [vmem:[#allocation2 + $0x118] sm:$0xff] %vm671_vm11, %v2639_v21  ;;  %v3151_v54 = vadd.f32 %v3103_v45, %v2997_v61  ;;  %v3303_v55 = vmul.f32 %v10044_v50, %v10732_v46  ;;  %v10784_v61 = vld [vmem:[#allocation2 + $0xf8] sm:$0xff]  ;;  %v10794_v40 = vpop.permute.xlu1 %2518 }
 0x1c9   : > { %v3741_v17 = vpack.c.bf16 %v3703_v44, %v3702_v6  ;;  %v3456_v41 = vmul.f32 %v10070_v43, %v10529_v33  ;;  %v3457_v36 = vmul.f32 %v10070_v43, %v10581_v35  ;;  %v3556_v11 = vmul.f32 %v10048_v42, %v10631_v28  ;;  %v10790_v6 = vld [vmem:[#allocation2 + $0x100] sm:$0xff]  ;;  %14983 = vst [vmem:[#allocation51_spill] sm:$0xff] %v10794_v40 }
 0x1ca   : > { %v3250_v3 = vadd.f32 %v3202_v14, %v3150_v31  ;;  %v3557_v4 = vmul.f32 %v10048_v42, %v10669_v51  ;;  %v3251_v30 = vadd.f32 %v3203_v49, %v3151_v54  ;;  %v3656_v33 = vmul.f32 %v10697_v7, %v10750_v47 }
 0x1cb   : > { %7601 = vmatmul.mubr.msk.bf16.gmra.mrb[16].mxu1 %vm671_vm11, %v3741_v17  ;;  %v3657_v23 = vmul.f32 %v10697_v7, %v10752_v27  ;;  %v2798_v35 = vmul.f32 %v9994_v32, %v10549_v19  ;;  %v2799_v10 = vmul.f32 %v9994_v32, %v10567_v38  ;;  %v2850_v34 = vmul.f32 %v9998_v37, %v10626_v20  ;;  %v10804_v17 = vld [vmem:[#allocation2 + $0x101] sm:$0xff] }
 0x1cc   : > { %v3350_v53 = vadd.f32 %v3302_v22, %v3250_v3  ;;  %v2851_v0 = vmul.f32 %v9998_v37, %v10691_v60  ;;  %v3351_v2 = vadd.f32 %v3303_v55, %v3251_v30  ;;  %v2950_v52 = vmul.f32 %v10007_v58, %v10765_v25  ;;  %v10808_v3 = vld [vmem:[#allocation2 + $0xf9] sm:$0xff] }
 0x1cd   : > { %v2951_v19 = vmul.f32 %v10007_v58, %v10767_v18  ;;  %v3104_v38 = vmul.f32 %v10018_v48, %v10594_v56  ;;  %v2898_v44 = vadd.f32 %v2850_v34, %v2798_v35  ;;  %v3105_v14 = vmul.f32 %v10018_v48, %v10602_v9  ;;  %v10810_v9 = vld [vmem:[#allocation2 + $0x107] sm:$0xff]  ;;  %v10814_v30 = vld [vmem:[#allocation2 + $0x1bf] sm:$0xff]  ;;  %v10822_v34 = vld [vmem:[#allocation2 + $0x10f] sm:$0xff] }
 0x1ce   : > { %v3504_v59 = vadd.f32 %v3456_v41, %v3350_v53  ;;  %v2899_v45 = vadd.f32 %v2851_v0, %v2799_v10  ;;  %v3505_v21 = vadd.f32 %v3457_v36, %v3351_v2  ;;  %v3204_v31 = vmul.f32 %v10025_v24, %v10657_v57  ;;  %v10812_v36 = vld [vmem:[#allocation2 + $0x1b1] sm:$0xff]  ;;  %14985 = vst [vmem:[#allocation53_spill] sm:$0xff] %v10814_v30 }
 0x1cf   : > { %v3205_v49 = vmul.f32 %v10025_v24, %v10727_v29  ;;  %v3304_v22 = vmul.f32 %v10044_v50, %v10784_v61  ;;  %v2998_v54 = vadd.f32 %v2950_v52, %v2898_v44  ;;  %v3305_v41 = vmul.f32 %v10044_v50, %v10790_v6  ;;  %14984 = vst [vmem:[#allocation52_spill] sm:$0xff] %v10812_v36  ;;  %v10824_v0 = vld [vmem:[#allocation2 + $0x1b7] sm:$0xff]  ;;  %v10828_v52 = vpop.permute.xlu0 %2521  ;;  %v10832_v44 = vld [vmem:[#allocation2 + $0x1c0] sm:$0xff] }
 0x1d0   : > { %v3604_v56 = vadd.f32 %v3556_v11, %v3504_v59  ;;  %v2999_v55 = vadd.f32 %v2951_v19, %v2899_v45  ;;  %v3605_v35 = vadd.f32 %v3557_v4, %v3505_v21  ;;  %v3458_v53 = vmul.f32 %v10070_v43, %v10611_v39  ;;  %14986 = vst [vmem:[#allocation54_spill] sm:$0xff] %v10824_v0  ;;  %v10826_v2 = vld [vmem:[#allocation2 + $0x1b8] sm:$0xff]  ;;  %v10836_v45 = vld [vmem:[#allocation2 + $0x1c1] sm:$0xff] }
 0x1d1   : > { %v3459_v11 = vmul.f32 %v10070_v43, %v10631_v28  ;;  %v3558_v10 = vmul.f32 %v10048_v42, %v10675_v12  ;;  %14987 = vst [vmem:[#allocation55_spill] sm:$0xff] %v10826_v2  ;;  %14988 = vst [vmem:[#allocation56_spill] sm:$0xff] %v10828_v52  ;;  %v3152_v59 = vadd.f32 %v3104_v38, %v2998_v54  ;;  %v10834_v28 = vld [vmem:[#allocation2 + $0x1b9] sm:$0xff]  ;;  %vm14820_vm14 = vcmp.eq.s32.totalorder %v10828_v52, 1 }
 0x1d2   : > { %v3704_v19 = vadd.f32 %v3656_v33, %v3604_v56  ;;  %v3153_v4 = vadd.f32 %v3105_v14, %v2999_v55  ;;  %v3559_v39 = vmul.f32 %v10048_v42, %v10750_v47  ;;  %14989 = vst [vmem:[#allocation57_spill] sm:$0xff] %v10832_v44  ;;  %14990 = vst [vmem:[#allocation58_spill] sm:$0xff] %v10834_v28  ;;  %v14992_v38 = vld [vmem:[#allocation45_spill] sm:$0xff]  ;;  %v14993_v56 = vmov -1e+30  }
 0x1d3   : > { %14991 = vst [vmem:[#allocation59_spill] sm:$0xff] %v10836_v45  ;;  %v3705_v21 = vadd.f32 %v3657_v23, %v3605_v35  ;;  %v3658_v8 = vmul.f32 %v10697_v7, %v10808_v3  ;;  %v3659_v33 = vmul.f32 %v10697_v7, %v10804_v17  ;;  %v2800_v14 = vmul.f32 %v9994_v32, %v14992_v38  ;;  %v10852_v23 = vpop.permute.xlu1 %2524  ;;  %v7562_v26 = vpop.f32.mrb[32].mxu0 }
 0x1d4   : > { %5911 = vst.msk [vmem:[#allocation2 + $0x1b8] sm:$0xff] %vm671_vm11, %v14993_v56  ;;  %5912 = vst.msk [vmem:[#allocation2 + $0x1c0] sm:$0xff] %vm671_vm11, %v14993_v56  ;;  %vm14819_vm3 = vcmp.eq.s32.totalorder %v10776_v15, 1  ;;  %v3252_v54 = vadd.f32 %v3204_v31, %v3152_v59  ;;  %v3253_v55 = vadd.f32 %v3205_v49, %v3153_v4  ;;  %v2801_v35 = vmul.f32 %v9994_v32, %v10626_v20  ;;  %v2151_v49 = vpop.f32.mrb[33].mxu0 }
 0x1d5   : > { %5913 = vst.msk [vmem:[#allocation2 + $0x1c8] sm:$0xff] %vm671_vm11, %v14993_v56  ;;  %14994 = vst [vmem:[#allocation45_spill] sm:$0xff] %v10852_v23  ;;  %v2852_v38 = vmul.f32 %v9998_v37, %v10710_v63  ;;  %vm14818_vm2 = vcmp.eq.s32.totalorder %v10852_v23, 1  ;;  %v3742_v5 = vpack.c.bf16 %v3705_v21, %v3704_v19  ;;  %v2853_v16 = vmul.f32 %v9998_v37, %v10765_v25  ;;  %v7563_v19 = vpop.f32.mrb[34].mxu0 }
 0x1d6   : > { %v2952_v45 = vmul.f32 %v10007_v58, %v10810_v9  ;;  %v2953_v31 = vmul.f32 %v10007_v58, %v10822_v34  ;;  %vm14817_vm1 = vcmp.eq.s32.totalorder %v10794_v40, 1  ;;  %v2254_v20 = vmul.f32 %v10559_v62, %v7562_v26  ;;  %v2154_v0 = vpop.f32.mrb[35].mxu0 }
 0x1d7   : > { %v3352_v59 = vadd.f32 %v3304_v22, %v3252_v54  ;;  %v3353_v4 = vadd.f32 %v3305_v41, %v3253_v55  ;;  %v2900_v28 = vadd.f32 %v2852_v38, %v2800_v14  ;;  %v2252_v44 = vmul.f32 %v10559_v62, %v2151_v49  ;;  %7604 = vmatprep.mubr.msk.bf16.mxu1 %vm671_vm11, %v3742_v5 }
 0x1d8   : > { %v2901_v21 = vadd.f32 %v2853_v16, %v2801_v35  ;;  %v3106_v2 = vmul.f32 %v10018_v48, %v10653_v13  ;;  %v3107_v36 = vmul.f32 %v10018_v48, %v10657_v57  ;;  %v2308_v30 = vadd.f32 %v10574_v1, %v2254_v20  ;;  %v10879_v20 = vld [vmem:[#allocation2 + $0x108] sm:$0xff] }
 0x1d9   : > { %v2255_v26 = vmul.f32 %v10559_v62, %v7563_v19  ;;  %v3506_v22 = vadd.f32 %v3458_v53, %v3352_v59  ;;  %v3507_v41 = vadd.f32 %v3459_v11, %v3353_v4  ;;  %v2306_v14 = vadd.f32 %v10574_v1, %v2252_v44  ;;  %v10881_v19 = vld [vmem:[#allocation2 + $0x110] sm:$0xff] }
 0x1da   : > { %v2253_v54 = vmul.f32 %v10559_v62, %v2154_v0  ;;  %v3000_v55 = vadd.f32 %v2952_v45, %v2900_v28  ;;  %v3001_v5 = vadd.f32 %v2953_v31, %v2901_v21  ;;  %v2356_v16 = vmax.f32 %v2308_v30, 0.0  ;;  %v10901_v4 = vld [vmem:[#allocation2 + $0x111] sm:$0xff] }
 0x1db   : > { %v2309_v35 = vadd.f32 %v10574_v1, %v2255_v26  ;;  %v3606_v13 = vadd.f32 %v3558_v10, %v3506_v22  ;;  %v3607_v38 = vadd.f32 %v3559_v39, %v3507_v41  ;;  %v2354_v49 = vmax.f32 %v2306_v14, 0.0  ;;  %v10908_v14 = vld [vmem:[#allocation2 + $0x117] sm:$0xff] }
 0x1dc   : > { %v2307_v57 = vadd.f32 %v10574_v1, %v2253_v54  ;;  %v3154_v53 = vadd.f32 %v3106_v2, %v3000_v55  ;;  %v3155_v11 = vadd.f32 %v3107_v36, %v3001_v5  ;;  %v2644_v44 = vsel %vm14820_vm14, %v2356_v16, 0.0  ;;  %v10892_v2 = vld [vmem:[#allocation2 + $0x109] sm:$0xff] }
 0x1dd   : > { %v2357_v0 = vmax.f32 %v2309_v35, 0.0  ;;  %v3706_v28 = vadd.f32 %v3658_v8, %v3606_v13  ;;  %v3707_v45 = vadd.f32 %v3659_v33, %v3607_v38  ;;  %2692 = vst.msk [vmem:[#allocation2 + $0x140] sm:$0xff] %vm671_vm11, %v2644_v44  ;;  %v2642_v30 = vsel %vm14819_vm3, %v2354_v49, 0.0  ;;  %v10920_v35 = vld [vmem:[#allocation2 + $0x11f] sm:$0xff] }
 0x1de   : > { %v2355_v10 = vmax.f32 %v2307_v57, 0.0  ;;  %v3206_v39 = vmul.f32 %v10025_v24, %v10732_v46  ;;  %v3207_v31 = vmul.f32 %v10025_v24, %v10784_v61  ;;  %2690 = vst.msk [vmem:[#allocation2 + $0x130] sm:$0xff] %vm671_vm11, %v2642_v30  ;;  %v3306_v33 = vmul.f32 %v10044_v50, %v10879_v20  ;;  %v10940_v30 = vld [vmem:[#allocation2 + $0x120] sm:$0xff] }
 0x1df   : > { %v2645_v8 = vsel %vm14818_vm2, %v2357_v0, 0.0  ;;  %v3743_v36 = vpack.c.bf16 %v3707_v45, %v3706_v28  ;;  %v3307_v59 = vmul.f32 %v10044_v50, %v10881_v19  ;;  %v3460_v41 = vmul.f32 %v10070_v43, %v10669_v51  ;;  %v10936_v0 = vld [vmem:[#allocation2 + $0x118] sm:$0xff] }
 0x1e0   : > { %2693 = vst.msk [vmem:[#allocation2 + $0x148] sm:$0xff] %vm671_vm11, %v2645_v8  ;;  %v2643_v21 = vsel %vm14817_vm1, %v2355_v10, 0.0  ;;  %v3254_v26 = vadd.f32 %v3206_v39, %v3154_v53  ;;  %v3255_v22 = vadd.f32 %v3207_v31, %v3155_v11  ;;  %v3461_v54 = vmul.f32 %v10070_v43, %v10675_v12  ;;  %v10926_v12 = vpop.permute.xlu0 %2527  ;;  %14996 = vst [vmem:[#allocation61_spill] sm:$0xff] %v10936_v0  ;;  %v10944_v10 = vpop.permute.xlu1 %2530 }
 0x1e1   : > { %2691 = vst.msk [vmem:[#allocation2 + $0x138] sm:$0xff] %vm671_vm11, %v2643_v21  ;;  %7605 = vmatmul.mubr.msk.bf16.gmra.mrb[20].mxu1 %vm671_vm11, %v3743_v36  ;;  %v3560_v55 = vmul.f32 %v10048_v42, %v10752_v27  ;;  %v3561_v5 = vmul.f32 %v10048_v42, %v10808_v3  ;;  %v3660_v16 = vmul.f32 %v10697_v7, %v10892_v2  ;;  %14995 = vst [vmem:[#allocation60_spill] sm:$0xff] %v10926_v12 }
 0x1e2   : > { %v3354_v51 = vadd.f32 %v3306_v33, %v3254_v26  ;;  %v3355_v13 = vadd.f32 %v3307_v59, %v3255_v22  ;;  %v3661_v38 = vmul.f32 %v10697_v7, %v10901_v4  ;;  %v2802_v49 = vmul.f32 %v9994_v32, %v10691_v60  ;;  %14997 = vst [vmem:[#allocation62_spill] sm:$0xff] %v10944_v10  ;;  %v10954_v22 = vld [vmem:[#allocation2 + $0x119] sm:$0xff] }
 0x1e3   : > { %v2803_v57 = vmul.f32 %v9994_v32, %v10710_v63  ;;  %v2854_v53 = vmul.f32 %v9998_v37, %v10767_v18  ;;  %v2855_v11 = vmul.f32 %v9998_v37, %v10810_v9  ;;  %v2954_v44 = vmul.f32 %v10007_v58, %v10908_v14 }
 0x1e4   : > { %v3508_v28 = vadd.f32 %v3460_v41, %v3354_v51  ;;  %v3509_v45 = vadd.f32 %v3461_v54, %v3355_v13  ;;  %v2955_v60 = vmul.f32 %v10007_v58, %v10920_v35  ;;  %v3108_v63 = vmul.f32 %v10018_v48, %v10727_v29  ;;  %v10958_v51 = vld [vmem:[#allocation2 + $0x121] sm:$0xff] }
 0x1e5   : > { %v2902_v39 = vadd.f32 %v2854_v53, %v2802_v49  ;;  %v2903_v31 = vadd.f32 %v2855_v11, %v2803_v57  ;;  %v3109_v8 = vmul.f32 %v10018_v48, %v10732_v46  ;;  %v3208_v36 = vmul.f32 %v10025_v24, %v10790_v6  ;;  %v10966_v57 = vpop.permute.xlu0 %2533 }
 0x1e6   : > { %v3608_v33 = vadd.f32 %v3560_v55, %v3508_v28  ;;  %v3609_v59 = vadd.f32 %v3561_v5, %v3509_v45  ;;  %v3209_v21 = vmul.f32 %v10025_v24, %v10879_v20  ;;  %v3308_v26 = vmul.f32 %v10044_v50, %v10936_v0  ;;  %14998 = vst [vmem:[#allocation63_spill] sm:$0xff] %v10966_v57  ;;  %v10972_v45 = vld [vmem:[#allocation2 + $0x127] sm:$0xff] }
 0x1e7   : > { %v3002_v29 = vadd.f32 %v2954_v44, %v2902_v39  ;;  %v3003_v41 = vadd.f32 %v2955_v60, %v2903_v31  ;;  %v3309_v54 = vmul.f32 %v10044_v50, %v10940_v30  ;;  %v3462_v46 = vmul.f32 %v10070_v43, %v10750_v47  ;;  %v10974_v47 = vld [vmem:[#allocation2 + $0x12f] sm:$0xff]  ;;  %v10987_v39 = vpop.permute.xlu1 %2536 }
 0x1e8   : > { %v3708_v55 = vadd.f32 %v3660_v16, %v3608_v33  ;;  %v3709_v5 = vadd.f32 %v3661_v38, %v3609_v59  ;;  %v3463_v13 = vmul.f32 %v10070_v43, %v10752_v27  ;;  %v3562_v49 = vmul.f32 %v10048_v42, %v10804_v17  ;;  %v7969_v27 = vld [vmem:[%s14701_s12] sm:$0xff]   ;;  %14999 = vst [vmem:[#allocation64_spill] sm:$0xff] %v10987_v39 }
 0x1e9   : > { %v3156_v53 = vadd.f32 %v3108_v63, %v3002_v29  ;;  %v3157_v11 = vadd.f32 %v3109_v8, %v3003_v41  ;;  %v3563_v44 = vmul.f32 %v10048_v42, %v10892_v2  ;;  %v3662_v28 = vmul.f32 %v10697_v7, %v10954_v22  ;;  %7632 = vmatprep.subr.bf16.mxu0 %v7969_v27 }
 0x1ea   : > { %vm14834_vm1 = vcmp.eq.s32.totalorder %v10966_v57, 1  ;;  %v3744_v16 = vpack.c.bf16 %v3709_v5, %v3708_v55  ;;  %v3663_v38 = vmul.f32 %v10697_v7, %v10958_v51  ;;  %v2804_v60 = vmul.f32 %v9994_v32, %v10765_v25  ;;  %v7566_v29 = vpop.f32.mrb[36].mxu0  ;;  %7633 = vmatpush3.bf16.msra.mxu0 %v7969_v27 }
 0x1eb   : > { %v2805_v63 = vmul.f32 %v9994_v32, %v10767_v18  ;;  %vm14833_vm2 = vcmp.eq.s32.totalorder %v10926_v12, 1  ;;  %v3256_v31 = vadd.f32 %v3208_v36, %v3156_v53  ;;  %v3257_v8 = vadd.f32 %v3209_v21, %v3157_v11  ;;  %v2167_v55 = vpop.f32.mrb[37].mxu0 }
 0x1ec   : > { %v2856_v33 = vmul.f32 %v9998_v37, %v10822_v34  ;;  %v2857_v59 = vmul.f32 %v9998_v37, %v10908_v14  ;;  %vm14832_vm3 = vcmp.eq.s32.totalorder %v10987_v39, 1  ;;  %7608 = vmatprep.mubr.msk.bf16.mxu1 %vm671_vm11, %v3744_v16  ;;  %v2956_v25 = vmul.f32 %v10007_v58, %v10972_v45  ;;  %v7567_v40 = vpop.f32.mrb[38].mxu0 }
 0x1ed   : > { %v2957_v18 = vmul.f32 %v10007_v58, %v10974_v47  ;;  %v3110_v36 = vmul.f32 %v10018_v48, %v10784_v61  ;;  %v3111_v21 = vmul.f32 %v10018_v48, %v10790_v6  ;;  %vm14831_vm14 = vcmp.eq.s32.totalorder %v10944_v10, 1 }
 0x1ee   : > { %v2258_v41 = vmul.f32 %v10559_v62, %v7566_v29  ;;  %v3356_v5 = vadd.f32 %v3308_v26, %v3256_v31  ;;  %v3357_v53 = vadd.f32 %v3309_v54, %v3257_v8  ;;  %v2904_v11 = vadd.f32 %v2856_v33, %v2804_v60  ;;  %v2170_v29 = vpop.f32.mrb[39].mxu0 }
 0x1ef   : > { %v2256_v16 = vmul.f32 %v10559_v62, %v2167_v55  ;;  %v2905_v23 = vadd.f32 %v2857_v59, %v2805_v63  ;;  %v3210_v15 = vmul.f32 %v10025_v24, %v10881_v19  ;;  %v3211_v61 = vmul.f32 %v10025_v24, %v10936_v0 }
 0x1f0   : > { %v2312_v6 = vadd.f32 %v10574_v1, %v2258_v41  ;;  %v2259_v52 = vmul.f32 %v10559_v62, %v7567_v40  ;;  %v3510_v56 = vadd.f32 %v3462_v46, %v3356_v5  ;;  %v3511_v26 = vadd.f32 %v3463_v13, %v3357_v53  ;;  %v11016_v41 = vld [vmem:[#allocation2 + $0x128] sm:$0xff]  ;;  %v11018_v40 = vld [vmem:[#allocation2 + $0x130] sm:$0xff] }
 0x1f1   : > { %v2310_v54 = vadd.f32 %v10574_v1, %v2256_v16  ;;  %v2257_v27 = vmul.f32 %v10559_v62, %v2170_v29  ;;  %v3004_v60 = vadd.f32 %v2956_v25, %v2904_v11  ;;  %v3005_v31 = vadd.f32 %v2957_v18, %v2905_v23  ;;  %v11025_v18 = vld [vmem:[#allocation2 + $0x129] sm:$0xff]  ;;  %v11034_v11 = vld [vmem:[#allocation2 + $0x131] sm:$0xff] }
 0x1f2   : > { %v2360_v63 = vmax.f32 %v2312_v6, 0.0  ;;  %v2313_v8 = vadd.f32 %v10574_v1, %v2259_v52  ;;  %v3610_v33 = vadd.f32 %v3562_v49, %v3510_v56  ;;  %v3611_v59 = vadd.f32 %v3563_v44, %v3511_v26  ;;  %v11045_v6 = vld [vmem:[#allocation2 + $0x137] sm:$0xff] }
 0x1f3   : > { %v2358_v55 = vmax.f32 %v2310_v54, 0.0  ;;  %v2311_v0 = vadd.f32 %v10574_v1, %v2257_v27  ;;  %v3158_v46 = vadd.f32 %v3110_v36, %v3004_v60  ;;  %v3159_v13 = vadd.f32 %v3111_v21, %v3005_v31  ;;  %v11053_v27 = vld [vmem:[#allocation2 + $0x13f] sm:$0xff] }
 0x1f4   : > { %v2648_v5 = vsel %vm14834_vm1, %v2360_v63, 0.0  ;;  %v2361_v53 = vmax.f32 %v2313_v8, 0.0  ;;  %v3710_v25 = vadd.f32 %v3662_v28, %v3610_v33  ;;  %v3711_v23 = vadd.f32 %v3663_v38, %v3611_v59 }
 0x1f5   : > { %2696 = vst.msk [vmem:[#allocation2 + $0x160] sm:$0xff] %vm671_vm11, %v2648_v5  ;;  %v2646_v52 = vsel %vm14833_vm2, %v2358_v55, 0.0  ;;  %v2359_v56 = vmax.f32 %v2311_v0, 0.0  ;;  %v3258_v49 = vadd.f32 %v3210_v15, %v3158_v46  ;;  %v3259_v44 = vadd.f32 %v3211_v61, %v3159_v13  ;;  %v11067_v46 = vld [vmem:[#allocation2 + $0x138] sm:$0xff]  ;;  %v11069_v13 = vld [vmem:[#allocation2 + $0x140] sm:$0xff]  ;;  %v11071_v5 = vpop.permute.xlu0 %2539 }
 0x1f6   : > { %2694 = vst.msk [vmem:[#allocation2 + $0x150] sm:$0xff] %vm671_vm11, %v2646_v52  ;;  %v2649_v36 = vsel %vm14832_vm3, %v2361_v53, 0.0  ;;  %v3745_v21 = vpack.c.bf16 %v3711_v23, %v3710_v25  ;;  %v3310_v28 = vmul.f32 %v10044_v50, %v11016_v41  ;;  %v3311_v38 = vmul.f32 %v10044_v50, %v11018_v40  ;;  %15000 = vst [vmem:[#allocation65_spill] sm:$0xff] %v11071_v5 }
 0x1f7   : > { %2697 = vst.msk [vmem:[#allocation2 + $0x168] sm:$0xff] %vm671_vm11, %v2649_v36  ;;  %v2647_v15 = vsel %vm14831_vm14, %v2359_v56, 0.0  ;;  %v3464_v0 = vmul.f32 %v10070_v43, %v10808_v3  ;;  %v3465_v16 = vmul.f32 %v10070_v43, %v10804_v17  ;;  %v3564_v61 = vmul.f32 %v10048_v42, %v10901_v4 }
 0x1f8   : > { %2695 = vst.msk [vmem:[#allocation2 + $0x158] sm:$0xff] %vm671_vm11, %v2647_v15  ;;  %7609 = vmatmul.mubr.msk.bf16.gmra.mrb[24].mxu1 %vm671_vm11, %v3745_v21  ;;  %v3358_v29 = vadd.f32 %v3310_v28, %v3258_v49  ;;  %v3359_v26 = vadd.f32 %v3311_v38, %v3259_v44  ;;  %v3565_v54 = vmul.f32 %v10048_v42, %v10954_v22  ;;  %v11081_v44 = vpop.permute.xlu1 %2542  ;;  %v11089_v38 = vld [vmem:[#allocation2 + $0x139] sm:$0xff]  ;;  %vm14845_vm3 = vcmp.eq.s32.totalorder %v11071_v5, 1 }
 0x1f9   : > { %v3664_v3 = vmul.f32 %v10697_v7, %v11025_v18  ;;  %v3665_v17 = vmul.f32 %v10697_v7, %v11034_v11  ;;  %v2806_v60 = vmul.f32 %v9994_v32, %v10810_v9  ;;  %v2807_v31 = vmul.f32 %v9994_v32, %v10822_v34  ;;  %15001 = vst [vmem:[#allocation66_spill] sm:$0xff] %v11081_v44 }
 0x1fa   : > { %v2858_v63 = vmul.f32 %v9998_v37, %v10920_v35  ;;  %v3512_v8 = vadd.f32 %v3464_v0, %v3358_v29  ;;  %v3513_v33 = vadd.f32 %v3465_v16, %v3359_v26  ;;  %v2859_v59 = vmul.f32 %v9998_v37, %v10972_v45 }
 0x1fb   : > { %v2958_v55 = vmul.f32 %v10007_v58, %v11045_v6  ;;  %v2959_v34 = vmul.f32 %v10007_v58, %v11053_v27  ;;  %v3112_v53 = vmul.f32 %v10018_v48, %v10879_v20  ;;  %v3113_v25 = vmul.f32 %v10018_v48, %v10881_v19  ;;  %v11091_v19 = vld [vmem:[#allocation2 + $0x141] sm:$0xff] }
 0x1fc   : > { %v2906_v9 = vadd.f32 %v2858_v63, %v2806_v60  ;;  %v3612_v23 = vadd.f32 %v3564_v61, %v3512_v8  ;;  %v3613_v52 = vadd.f32 %v3565_v54, %v3513_v33  ;;  %v2907_v56 = vadd.f32 %v2859_v59, %v2807_v31  ;;  %v11101_v31 = vld [vmem:[#allocation2 + $0x147] sm:$0xff]  ;;  %v11109_v33 = vpop.permute.xlu0 %2545 }
 0x1fd   : > { %v3212_v49 = vmul.f32 %v10025_v24, %v10940_v30  ;;  %v3213_v21 = vmul.f32 %v10025_v24, %v11016_v41  ;;  %v3312_v28 = vmul.f32 %v10044_v50, %v11067_v46  ;;  %v3313_v20 = vmul.f32 %v10044_v50, %v11069_v13  ;;  %v11103_v63 = vld [vmem:[#allocation2 + $0x14f] sm:$0xff]  ;;  %15002 = vst [vmem:[#allocation67_spill] sm:$0xff] %v11109_v33 }
 0x1fe   : > { %v3006_v36 = vadd.f32 %v2958_v55, %v2906_v9  ;;  %v3712_v15 = vadd.f32 %v3664_v3, %v3612_v23  ;;  %v3713_v0 = vadd.f32 %v3665_v17, %v3613_v52  ;;  %v3007_v16 = vadd.f32 %v2959_v34, %v2907_v56  ;;  %v11125_v23 = vld [vmem:[#allocation2 + $0x148] sm:$0xff] }
 0x1ff   : > { %v3466_v61 = vmul.f32 %v10070_v43, %v10892_v2  ;;  %v3467_v26 = vmul.f32 %v10070_v43, %v10901_v4  ;;  %v3566_v54 = vmul.f32 %v10048_v42, %v10958_v51  ;;  %v3567_v60 = vmul.f32 %v10048_v42, %v11025_v18 }
 0x200   : > { %v3160_v29 = vadd.f32 %v3112_v53, %v3006_v36  ;;  %v3746_v3 = vpack.c.bf16 %v3713_v0, %v3712_v15  ;;  %v3161_v17 = vadd.f32 %v3113_v25, %v3007_v16  ;;  %v3666_v8 = vmul.f32 %v10697_v7, %v11089_v38  ;;  %v15004_v36 = vld [vmem:[#allocation61_spill] sm:$0xff]  ;;  %v7570_v0 = vpop.f32.mrb[40].mxu0 }
 0x201   : > { %v3667_v2 = vmul.f32 %v10697_v7, %v11091_v19  ;;  %v2808_v59 = vmul.f32 %v9994_v32, %v10908_v14  ;;  %v2809_v55 = vmul.f32 %v9994_v32, %v10920_v35  ;;  %v2860_v9 = vmul.f32 %v9998_v37, %v10974_v47  ;;  %v11128_v35 = vpop.permute.xlu1 %2548 }
 0x202   : > { %v3260_v4 = vadd.f32 %v3212_v49, %v3160_v29  ;;  %vm14846_vm14 = vcmp.eq.s32.totalorder %v11109_v33, 1  ;;  %7612 = vmatprep.mubr.msk.bf16.mxu1 %vm671_vm11, %v3746_v3  ;;  %v3261_v34 = vadd.f32 %v3213_v21, %v3161_v17  ;;  %v2861_v53 = vmul.f32 %v9998_v37, %v11045_v6  ;;  %15003 = vst [vmem:[#allocation68_spill] sm:$0xff] %v11128_v35  ;;  %v11130_v49 = vld [vmem:[#allocation2 + $0x150] sm:$0xff] }
 0x203   : > { %v2960_v25 = vmul.f32 %v10007_v58, %v11101_v31  ;;  %v2961_v14 = vmul.f32 %v10007_v58, %v11103_v63  ;;  %v2908_v56 = vadd.f32 %v2860_v9, %v2808_v59  ;;  %v3114_v21 = vmul.f32 %v10018_v48, %v15004_v36 }
 0x204   : > { %v3360_v52 = vadd.f32 %v3312_v28, %v3260_v4  ;;  %v3115_v15 = vmul.f32 %v10018_v48, %v10940_v30  ;;  %vm14844_vm2 = vcmp.eq.s32.totalorder %v11128_v35, 1  ;;  %v3361_v16 = vadd.f32 %v3313_v20, %v3261_v34  ;;  %v2183_v4 = vpop.f32.mrb[41].mxu0 }
 0x205   : > { %v2909_v29 = vadd.f32 %v2861_v53, %v2809_v55  ;;  %v3214_v3 = vmul.f32 %v10025_v24, %v11018_v40  ;;  %v3215_v28 = vmul.f32 %v10025_v24, %v11067_v46  ;;  %vm14843_vm1 = vcmp.eq.s32.totalorder %v11081_v44, 1  ;;  %v7571_v20 = vpop.f32.mrb[42].mxu0  ;;  %v7981_v44 = vld [vmem:[%s14956_s6] ss:$0 sm:$0xff]  ;;  %s8082_s6 = smov [#allocation4]  }
 0x206   : > { %v2262_v17 = vmul.f32 %v10559_v62, %v7570_v0  ;;  %v3514_v59 = vadd.f32 %v3466_v61, %v3360_v52  ;;  %v3008_v9 = vadd.f32 %v2960_v25, %v2908_v56  ;;  %v3314_v30 = vmul.f32 %v10044_v50, %v11125_v23  ;;  %v2186_v12 = vpop.f32.mrb[43].mxu0  ;;  %v11154_v25 = vld [vmem:[%s14953_s5] ss:$0 sm:$0xff] }
 0x207   : > { %v2260_v36 = vmul.f32 %v10559_v62, %v2183_v4  ;;  %v3515_v55 = vadd.f32 %v3467_v26, %v3361_v16  ;;  %v3009_v34 = vadd.f32 %v2961_v14, %v2909_v29  ;;  %v3315_v53 = vmul.f32 %v10044_v50, %v11130_v49 }
 0x208   : > { %v2316_v10 = vadd.f32 %v10574_v1, %v2262_v17  ;;  %v2263_v39 = vmul.f32 %v10559_v62, %v7571_v20  ;;  %v3614_v0 = vadd.f32 %v3566_v54, %v3514_v59  ;;  %v3162_v57 = vadd.f32 %v3114_v21, %v3008_v9  ;;  %v11161_v20 = vld [vmem:[#allocation2 + $0x149] sm:$0xff] }
 0x209   : > { %v2314_v61 = vadd.f32 %v10574_v1, %v2260_v36  ;;  %v2261_v26 = vmul.f32 %v11154_v25, %v2186_v12  ;;  %v3615_v14 = vadd.f32 %v3567_v60, %v3515_v55  ;;  %v3163_v52 = vadd.f32 %v3115_v15, %v3009_v34  ;;  %v11163_v12 = vld [vmem:[#allocation2 + $0x151] sm:$0xff] }
 0x20a   : > { %v2364_v56 = vmax.f32 %v2316_v10, 0.0  ;;  %v2317_v16 = vadd.f32 %v10574_v1, %v2263_v39  ;;  %v3714_v29 = vadd.f32 %v3666_v8, %v3614_v0  ;;  %v3262_v17 = vadd.f32 %v3214_v3, %v3162_v57  ;;  %v11177_v3 = vld [vmem:[#allocation2 + $0x157] sm:$0xff] }
 0x20b   : > { %v2362_v62 = vmax.f32 %v2314_v61, 0.0  ;;  %v2315_v54 = vadd.f32 %v10574_v1, %v2261_v26  ;;  %v3715_v21 = vadd.f32 %v3667_v2, %v3615_v14  ;;  %v3263_v4 = vadd.f32 %v3215_v28, %v3163_v52  ;;  %v11179_v28 = vld [vmem:[#allocation2 + $0x15f] sm:$0xff] }
 0x20c   : > { %v2652_v59 = vsel %vm14846_vm14, %v2364_v56, 0.0  ;;  %v2365_v9 = vmax.f32 %v2317_v16, 0.0  ;;  %v3362_v36 = vadd.f32 %v3314_v30, %v3262_v17  ;;  %v3468_v10 = vmul.f32 %v10070_v43, %v10954_v22  ;;  %v11206_v17 = vld [vmem:[#allocation2 + $0x158] sm:$0xff] }
 0x20d   : > { %2700 = vst.msk [vmem:[#allocation2 + $0x180] sm:$0xff] %vm671_vm11, %v2652_v59  ;;  %v2650_v57 = vsel %vm14845_vm3, %v2362_v62, 0.0  ;;  %v2363_v1 = vmax.f32 %v2315_v54, 0.0  ;;  %v3747_v39 = vpack.c.bf16 %v3715_v21, %v3714_v29  ;;  %v3363_v60 = vadd.f32 %v3315_v53, %v3263_v4  ;;  %v11191_v53 = vpop.permute.xlu0 %2551  ;;  %15006 = vst [vmem:[#allocation69_spill] sm:$0xff] %v11206_v17  ;;  %v11208_v62 = vld [vmem:[#allocation2 + $0x160] sm:$0xff] }
 0x20e   : > { %2698 = vst.msk [vmem:[#allocation2 + $0x170] sm:$0xff] %vm671_vm11, %v2650_v57  ;;  %v2653_v8 = vsel %vm14844_vm2, %v2365_v9, 0.0  ;;  %v3469_v2 = vmul.f32 %v10070_v43, %v10958_v51  ;;  %v3516_v15 = vadd.f32 %v3468_v10, %v3362_v36  ;;  %v3568_v22 = vmul.f32 %v10048_v42, %v11034_v11  ;;  %15005 = vst [vmem:[#allocation61_spill] sm:$0xff] %v11191_v53  ;;  %v11220_v57 = vld [vmem:[#allocation2 + $0x159] sm:$0xff] }
 0x20f   : > { %2701 = vst.msk [vmem:[#allocation2 + $0x188] sm:$0xff] %vm671_vm11, %v2653_v8  ;;  %v2651_v30 = vsel %vm14843_vm1, %v2363_v1, 0.0  ;;  %7613 = vmatmul.mubr.msk.bf16.gmra.mrb[28].mxu1 %vm671_vm11, %v3747_v39  ;;  %v3569_v55 = vmul.f32 %v10048_v42, %v11089_v38  ;;  %v3668_v51 = vmul.f32 %v10697_v7, %v11161_v20  ;;  %v3669_v34 = vmul.f32 %v10697_v7, %v11163_v12  ;;  %v11222_v1 = vld [vmem:[#allocation2 + $0x161] sm:$0xff] }
 0x210   : > { %2699 = vst.msk [vmem:[#allocation2 + $0x178] sm:$0xff] %vm671_vm11, %v2651_v30  ;;  %v3517_v0 = vadd.f32 %v3469_v2, %v3363_v60  ;;  %v3616_v61 = vadd.f32 %v3568_v22, %v3516_v15  ;;  %v2810_v26 = vmul.f32 %v9994_v32, %v10972_v45  ;;  %v2811_v14 = vmul.f32 %v9994_v32, %v10974_v47  ;;  %v11210_v45 = vpop.permute.xlu1 %2554  ;;  %v11234_v30 = vld [vmem:[#allocation2 + $0x167] sm:$0xff] }
 0x211   : > { %v2862_v52 = vmul.f32 %v9998_v37, %v11053_v27  ;;  %v2863_v56 = vmul.f32 %v9998_v37, %v11101_v31  ;;  %v2962_v16 = vmul.f32 %v10007_v58, %v11177_v3  ;;  %v2963_v29 = vmul.f32 %v10007_v58, %v11179_v28  ;;  %15007 = vst [vmem:[#allocation70_spill] sm:$0xff] %v11210_v45 }
 0x212   : > { %v3617_v54 = vadd.f32 %v3569_v55, %v3517_v0  ;;  %v3716_v47 = vadd.f32 %v3668_v51, %v3616_v61  ;;  %v3116_v21 = vmul.f32 %v10018_v48, %v11016_v41  ;;  %v3117_v4 = vmul.f32 %v10018_v48, %v11018_v40  ;;  %v11238_v51 = vpop.permute.xlu0 %2557 }
 0x213   : > { %v2910_v59 = vadd.f32 %v2862_v52, %v2810_v26  ;;  %v2911_v9 = vadd.f32 %v2863_v56, %v2811_v14  ;;  %v3216_v36 = vmul.f32 %v10025_v24, %v11069_v13  ;;  %v3217_v10 = vmul.f32 %v10025_v24, %v11125_v23  ;;  %15009 = vst [vmem:[#allocation72_spill] sm:$0xff] %v11238_v51 }
 0x214   : > { %v3717_v39 = vadd.f32 %v3669_v34, %v3617_v54  ;;  %v3316_v60 = vmul.f32 %v10044_v50, %v11206_v17  ;;  %v3317_v41 = vmul.f32 %v10044_v50, %v11208_v62  ;;  %v3470_v40 = vmul.f32 %v10070_v43, %v11025_v18  ;;  %v11250_v56 = vpop.permute.xlu1 %2560 }
 0x215   : > { %v3010_v8 = vadd.f32 %v2962_v16, %v2910_v59  ;;  %v3011_v2 = vadd.f32 %v2963_v29, %v2911_v9  ;;  %v3471_v15 = vmul.f32 %v10070_v43, %v11034_v11  ;;  %v3570_v22 = vmul.f32 %v10048_v42, %v11091_v19  ;;  %v11236_v55 = vld [vmem:[#allocation2 + $0x16f] sm:$0xff]  ;;  %15010 = vst [vmem:[#allocation73_spill] sm:$0xff] %v11250_v56 }
 0x216   : > { %15008 = vst [vmem:[#allocation71_spill] sm:$0xff] %v11236_v55  ;;  %v3748_v34 = vpack.c.bf16 %v3717_v39, %v3716_v47  ;;  %v3571_v0 = vmul.f32 %v10048_v42, %v11161_v20  ;;  %v3670_v18 = vmul.f32 %v10697_v7, %v11220_v57  ;;  %v3671_v61 = vmul.f32 %v10697_v7, %v11222_v1  ;;  %v11263_v47 = vld [vmem:[#allocation2 + $0x170] sm:$0xff] }
 0x217   : > { %v3164_v11 = vadd.f32 %v3116_v21, %v3010_v8  ;;  %v3165_v26 = vadd.f32 %v3117_v4, %v3011_v2  ;;  %v2812_v14 = vmul.f32 %v9994_v32, %v11045_v6  ;;  %v2813_v52 = vmul.f32 %v9994_v32, %v11053_v27  ;;  %v11261_v6 = vld [vmem:[#allocation2 + $0x168] sm:$0xff]  ;;  %15011 = vst [vmem:[#allocation74_spill] sm:$0xff] %v11263_v47 }
 0x218   : > { %7616 = vmatprep.mubr.msk.bf16.mxu1 %vm671_vm11, %v3748_v34  ;;  %v2864_v16 = vmul.f32 %v9998_v37, %v11103_v63  ;;  %v2865_v29 = vmul.f32 %v9998_v37, %v11177_v3  ;;  %v2964_v7 = vmul.f32 %v10007_v58, %v11234_v30  ;;  %v2965_v54 = vmul.f32 %v10007_v58, %v11236_v55 }
 0x219   : > { %vm2608_vm1 = vcmp.eq.s32.totalorder %v11238_v51, 1  ;;  %v3264_v27 = vadd.f32 %v3216_v36, %v3164_v11  ;;  %v3265_v21 = vadd.f32 %v3217_v10, %v3165_v26  ;;  %v3118_v4 = vmul.f32 %v10018_v48, %v11067_v46  ;;  %v7574_v36 = vpop.f32.mrb[44].mxu0 }
 0x21a   : > { %v3119_v59 = vmul.f32 %v10018_v48, %v11069_v13  ;;  %vm2606_vm2 = vcmp.eq.s32.totalorder %v11191_v53, 1  ;;  %v2912_v9 = vadd.f32 %v2864_v16, %v2812_v14  ;;  %v2913_v39 = vadd.f32 %v2865_v29, %v2813_v52  ;;  %v2199_v26 = vpop.f32.mrb[45].mxu0 }
 0x21b   : > { %v3218_v8 = vmul.f32 %v10025_v24, %v11130_v49  ;;  %v3219_v2 = vmul.f32 %v10025_v24, %v11206_v17  ;;  %vm2609_vm3 = vcmp.eq.s32.totalorder %v11250_v56, 1  ;;  %v3364_v10 = vadd.f32 %v3316_v60, %v3264_v27  ;;  %v7575_v60 = vpop.f32.mrb[46].mxu0 }
 0x21c   : > { %v3365_v34 = vadd.f32 %v3317_v41, %v3265_v21  ;;  %v3318_v46 = vmul.f32 %v10044_v50, %v11261_v6  ;;  %v3319_v13 = vmul.f32 %v10044_v50, %v11263_v47  ;;  %vm2607_vm14 = vcmp.eq.s32.totalorder %v11210_v45, 1 }
 0x21d   : > { %v2266_v11 = vmul.f32 %v11154_v25, %v7574_v36  ;;  %v3012_v14 = vadd.f32 %v2964_v7, %v2912_v9  ;;  %v3013_v52 = vadd.f32 %v2965_v54, %v2913_v39  ;;  %v3472_v16 = vmul.f32 %v10070_v43, %v11089_v38  ;;  %v2202_v7 = vpop.f32.mrb[47].mxu0 }
 0x21e   : > { %v2264_v29 = vmul.f32 %v11154_v25, %v2199_v26  ;;  %v3518_v41 = vadd.f32 %v3470_v40, %v3364_v10  ;;  %v3519_v27 = vadd.f32 %v3471_v15, %v3365_v34  ;;  %v3473_v21 = vmul.f32 %v10070_v43, %v11091_v19 }
 0x21f   : > { %v2320_v35 = vadd.f32 %v7981_v44, %v2266_v11  ;;  %v2267_v36 = vmul.f32 %v11154_v25, %v7575_v60  ;;  %v3166_v54 = vadd.f32 %v3118_v4, %v3012_v14  ;;  %v3167_v9 = vadd.f32 %v3119_v59, %v3013_v52  ;;  %v11294_v59 = vld [vmem:[#allocation2 + $0x169] sm:$0xff]  ;;  %v11296_v14 = vld [vmem:[#allocation2 + $0x171] sm:$0xff] }
 0x220   : > { %v2318_v39 = vadd.f32 %v7981_v44, %v2264_v29  ;;  %v2265_v38 = vmul.f32 %v11154_v25, %v2202_v7  ;;  %v3618_v26 = vadd.f32 %v3570_v22, %v3518_v41  ;;  %v3619_v5 = vadd.f32 %v3571_v0, %v3519_v27 }
 0x221   : > { %v2368_v40 = vmax.f32 %v2320_v35, 0.0  ;;  %v2321_v15 = vadd.f32 %v7981_v44, %v2267_v36  ;;  %v3266_v10 = vadd.f32 %v3218_v8, %v3166_v54  ;;  %v3267_v34 = vadd.f32 %v3219_v2, %v3167_v9  ;;  %v11308_v8 = vld [vmem:[#allocation2 + $0x177] sm:$0xff]  ;;  %v11310_v2 = vld [vmem:[#allocation2 + $0x17f] sm:$0xff] }
 0x222   : > { %v2366_v19 = vmax.f32 %v2318_v39, 0.0  ;;  %v2319_v33 = vadd.f32 %v7981_v44, %v2265_v38  ;;  %v3718_v47 = vadd.f32 %v3670_v18, %v3618_v26  ;;  %v3719_v17 = vadd.f32 %v3671_v61, %v3619_v5  ;;  %v11338_v54 = vld [vmem:[#allocation2 + $0x178] sm:$0xff]  ;;  %v11340_v9 = vld [vmem:[#allocation2 + $0x180] sm:$0xff] }
 0x223   : > { %v2656_v11 = vsel %vm2608_vm1, %v2368_v40, 0.0  ;;  %v2369_v60 = vmax.f32 %v2321_v15, 0.0  ;;  %v3366_v55 = vadd.f32 %v3318_v46, %v3266_v10  ;;  %v3367_v4 = vadd.f32 %v3319_v13, %v3267_v34  ;;  %v7970_v34 = vld [vmem:[%s14701_s12 + $0x8] sm:$0xff]  }
 0x224   : > { %2704 = vst.msk [vmem:[#allocation2 + $0x1a0] sm:$0xff] %vm671_vm11, %v2656_v11  ;;  %v2654_v35 = vsel %vm2606_vm2, %v2366_v19, 0.0  ;;  %v2367_v25 = vmax.f32 %v2319_v33, 0.0  ;;  %v3749_v22 = vpack.c.bf16 %v3719_v17, %v3718_v47  ;;  %v3572_v5 = vmul.f32 %v10048_v42, %v11163_v12  ;;  %v11319_v17 = vld [vmem:[%s14696_s7 + $0x8] ss:$0 sm:$0xff]  ;;  %7634 = vmatprep.subr.bf16.mxu0 %v7970_v34 }
 0x225   : > { %2702 = vst.msk [vmem:[#allocation2 + $0x190] sm:$0xff] %vm671_vm11, %v2654_v35  ;;  %v2657_v44 = vsel %vm2609_vm3, %v2369_v60, 0.0  ;;  %v3520_v0 = vadd.f32 %v3472_v16, %v3366_v55  ;;  %v3521_v18 = vadd.f32 %v3473_v21, %v3367_v4  ;;  %v3573_v61 = vmul.f32 %v10048_v42, %v11220_v57  ;;  %v11359_v60 = vld [vmem:[#allocation2 + $0x187] sm:$0xff]  ;;  %7635 = vmatpush3.bf16.msra.mxu0 %v7970_v34 }
 0x226   : > { %2705 = vst.msk [vmem:[#allocation2 + $0x1a8] sm:$0xff] %vm671_vm11, %v2657_v44  ;;  %v2655_v33 = vsel %vm2607_vm14, %v2367_v25, 0.0  ;;  %7617 = vmatmul.mubr.msk.bf16.gmra.mrb[32].mxu1 %vm671_vm11, %v3749_v22  ;;  %v3672_v55 = vmul.f32 %v11319_v17, %v11294_v59  ;;  %v3673_v47 = vmul.f32 %v11319_v17, %v11296_v14  ;;  %v2814_v46 = vmul.f32 %v9994_v32, %v11101_v31  ;;  %v11364_v25 = vld [vmem:[#allocation2 + $0x179] sm:$0xff] }
 0x227   : > { %2703 = vst.msk [vmem:[#allocation2 + $0x198] sm:$0xff] %vm671_vm11, %v2655_v33  ;;  %v3620_v13 = vadd.f32 %v3572_v5, %v3520_v0  ;;  %v3621_v52 = vadd.f32 %v3573_v61, %v3521_v18  ;;  %v2815_v16 = vmul.f32 %v9994_v32, %v11103_v63  ;;  %v2866_v29 = vmul.f32 %v9998_v37, %v11179_v28  ;;  %v15012_v61 = vld [vmem:[#allocation71_spill] sm:$0xff] }
 0x228   : > { %v2867_v41 = vmul.f32 %v9998_v37, %v11234_v30  ;;  %v2966_v27 = vmul.f32 %v10007_v58, %v11308_v8  ;;  %v2967_v21 = vmul.f32 %v10007_v58, %v11310_v2  ;;  %v3120_v39 = vmul.f32 %v10018_v48, %v11125_v23 }
 0x229   : > { %v3720_v31 = vadd.f32 %v3672_v55, %v3620_v13  ;;  %v3721_v36 = vadd.f32 %v3673_v47, %v3621_v52  ;;  %v2914_v7 = vadd.f32 %v2866_v29, %v2814_v46  ;;  %v3121_v38 = vmul.f32 %v10018_v48, %v11130_v49  ;;  %v11386_v13 = vld [vmem:[#allocation2 + $0x188] sm:$0xff]  ;;  %v11390_v52 = vld [vmem:[#allocation2 + $0x1b0] sm:$0xff] }
 0x22a   : > { %v2915_v63 = vadd.f32 %v2867_v41, %v2815_v16  ;;  %v3220_v15 = vmul.f32 %v10025_v24, %v11208_v62  ;;  %v3221_v10 = vmul.f32 %v10025_v24, %v11261_v6  ;;  %v3320_v11 = vmul.f32 %v10044_v50, %v11338_v54 }
 0x22b   : > { %v3750_v26 = vpack.c.bf16 %v3721_v36, %v3720_v31  ;;  %v3014_v40 = vadd.f32 %v2966_v27, %v2914_v7  ;;  %v3321_v23 = vmul.f32 %v10044_v50, %v11340_v9  ;;  %v3474_v49 = vmul.f32 %v10070_v43, %v11161_v20  ;;  %v11372_v20 = vld [vmem:[#allocation2 + $0x181] sm:$0xff]  ;;  %v7971_v36 = vld [vmem:[%s14701_s12 + $0x10] sm:$0xff]  }
 0x22c   : > { %v3015_v19 = vadd.f32 %v2967_v21, %v2915_v63  ;;  %v11361_v4 = vld [vmem:[#allocation2 + $0x18f] sm:$0xff]  ;;  %v3475_v22 = vmul.f32 %v10070_v43, %v11163_v12  ;;  %v3574_v5 = vmul.f32 %v10048_v42, %v11222_v1  ;;  %v2816_v44 = vmul.f32 %v9994_v32, %v11177_v3  ;;  %7636 = vmatprep.subr.bf16.mxu0 %v7971_v36 }
 0x22d   : > { %7620 = vmatprep.mubr.msk.bf16.mxu1 %vm671_vm11, %v3750_v26  ;;  %v3168_v35 = vadd.f32 %v3120_v39, %v3014_v40  ;;  %v2817_v18 = vmul.f32 %v9994_v32, %v11179_v28  ;;  %v2868_v33 = vmul.f32 %v9998_v37, %v15012_v61  ;;  %v2869_v55 = vmul.f32 %v9998_v37, %v11308_v8  ;;  %v11388_v28 = vld [vmem:[#allocation2 + $0x190] sm:$0xff]  ;;  %v15013_v39 = vld [vmem:[#allocation69_spill] sm:$0xff] }
 0x22e   : > { %v3169_v0 = vadd.f32 %v3121_v38, %v3015_v19  ;;  %v3575_v47 = vmul.f32 %v10048_v42, %v11294_v59  ;;  %v2968_v3 = vmul.f32 %v10007_v58, %v11359_v60  ;;  %v2969_v46 = vmul.f32 %v10007_v58, %v11361_v4  ;;  %v11394_v21 = vld [vmem:[#allocation2 + $0x1af] sm:$0xff]  ;;  %7637 = vmatpush3.bf16.msra.mxu0 %v7971_v36 }
 0x22f   : > { %v3268_v12 = vadd.f32 %v3220_v15, %v3168_v35  ;;  %v3674_v29 = vmul.f32 %v11319_v17, %v11364_v25  ;;  %v2916_v41 = vadd.f32 %v2868_v33, %v2816_v44  ;;  %v2917_v27 = vadd.f32 %v2869_v55, %v2817_v18  ;;  %v11396_v31 = vld [vmem:[#allocation2 + $0x1a9] sm:$0xff] }
 0x230   : > { %v3269_v16 = vadd.f32 %v3221_v10, %v3169_v0  ;;  %v3675_v63 = vmul.f32 %v11319_v17, %v11372_v20  ;;  %v3122_v38 = vmul.f32 %v10018_v48, %v15013_v39  ;;  %v3123_v26 = vmul.f32 %v10018_v48, %v11208_v62  ;;  %v15015_v19 = vld [vmem:[#allocation74_spill] sm:$0xff]  ;;  %v11431_v39 = vld [vmem:[#allocation2 + $0x191] sm:$0xff] }
 0x231   : > { %v3368_v7 = vadd.f32 %v3320_v11, %v3268_v12  ;;  %v15014_v40 = vmov -1e+30   ;;  %v3016_v10 = vadd.f32 %v2968_v3, %v2916_v41  ;;  %v3017_v34 = vadd.f32 %v2969_v46, %v2917_v27  ;;  %v2766_v12 = vld [vmem:[#allocation2 + $0x197] sm:$0xff] }
 0x232   : > { %5910 = vst.msk [vmem:[#allocation2 + $0x1b0] sm:$0xff] %vm671_vm11, %v15014_v40  ;;  %v3369_v15 = vadd.f32 %v3321_v23, %v3269_v16  ;;  %v3222_v35 = vmul.f32 %v10025_v24, %v15015_v19  ;;  %v3223_v44 = vmul.f32 %v10025_v24, %v11338_v54  ;;  %v3322_v0 = vmul.f32 %v10044_v50, %v11386_v13  ;;  %v11423_v16 = vld [vmem:[#allocation2 + $0x19f] sm:$0xff] }
 0x233   : > { %v3522_v11 = vadd.f32 %v3474_v49, %v3368_v7  ;;  %v3323_v62 = vmul.f32 %v10044_v50, %v11388_v28  ;;  %v3170_v33 = vadd.f32 %v3122_v38, %v3016_v10  ;;  %v3171_v23 = vadd.f32 %v3123_v26, %v3017_v34  ;;  %v11427_v7 = vld [vmem:[#allocation2 + $0x189] sm:$0xff] }
 0x234   : > { %v3523_v18 = vadd.f32 %v3475_v22, %v3369_v15  ;;  %v3476_v55 = vmul.f32 %v10070_v43, %v11220_v57  ;;  %v3477_v49 = vmul.f32 %v10070_v43, %v11222_v1  ;;  %v3576_v46 = vmul.f32 %v10048_v42, %v11296_v14 }
 0x235   : > { %v3622_v3 = vadd.f32 %v3574_v5, %v3522_v11  ;;  %v2818_v41 = vmul.f32 %v9994_v32, %v11234_v30  ;;  %v3270_v22 = vadd.f32 %v3222_v35, %v3170_v33  ;;  %v3271_v36 = vadd.f32 %v3223_v44, %v3171_v23 }
 0x236   : > { %v3623_v27 = vadd.f32 %v3575_v47, %v3523_v18  ;;  %v2819_v57 = vmul.f32 %v9994_v32, %v15012_v61  ;;  %v2870_v1 = vmul.f32 %v9998_v37, %v11310_v2  ;;  %v2871_v38 = vmul.f32 %v9998_v37, %v11359_v60 }
 0x237   : > { %v3722_v5 = vadd.f32 %v3674_v29, %v3622_v3  ;;  %v2970_v26 = vmul.f32 %v10007_v58, %v2766_v12  ;;  %v3370_v47 = vadd.f32 %v3322_v0, %v3270_v22  ;;  %v3371_v40 = vadd.f32 %v3323_v62, %v3271_v36  ;;  %v11446_v0 = vld [vmem:[#allocation2 + $0x1a0] sm:$0xff] }
 0x238   : > { %v3723_v30 = vadd.f32 %v3675_v63, %v3623_v27  ;;  %v2971_v15 = vmul.f32 %v10007_v58, %v11423_v16  ;;  %v3577_v61 = vmul.f32 %v10048_v42, %v11364_v25  ;;  %v3676_v29 = vmul.f32 %v11319_v17, %v11427_v7  ;;  %v3072_v63 = vld [vmem:[#allocation2 + $0x198] sm:$0xff] }
 0x239   : > { %v2918_v10 = vadd.f32 %v2870_v1, %v2818_v41  ;;  %v2919_v34 = vadd.f32 %v2871_v38, %v2819_v57  ;;  %v3524_v11 = vadd.f32 %v3476_v55, %v3370_v47  ;;  %v3525_v44 = vadd.f32 %v3477_v49, %v3371_v40  ;;  %v2768_v38 = vld [vmem:[#allocation2 + $0x1a7] sm:$0xff]  ;;  %v3426_v47 = vld [vmem:[#allocation2 + $0x199] sm:$0xff] }
 0x23a   : > { %v3751_v35 = vpack.c.bf16 %v3723_v30, %v3722_v5  ;;  %v3677_v18 = vmul.f32 %v11319_v17, %v11431_v39  ;;  %v3124_v23 = vmul.f32 %v10018_v48, %v11261_v6  ;;  %v3125_v3 = vmul.f32 %v10018_v48, %v15015_v19 }
 0x23b   : > { %v3018_v62 = vadd.f32 %v2970_v26, %v2918_v10  ;;  %v3019_v33 = vadd.f32 %v2971_v15, %v2919_v34  ;;  %v3624_v41 = vadd.f32 %v3576_v46, %v3524_v11  ;;  %v3625_v27 = vadd.f32 %v3577_v61, %v3525_v44  ;;  %v11468_v10 = vld [vmem:[#allocation2 + $0x1a1] sm:$0xff]  ;;  %v7972_v34 = vld [vmem:[%s14701_s12 + $0x18] sm:$0xff]  }
 0x23c   : > { %7621 = vmatmul.mubr.msk.bf16.gmra.mrb[36].mxu1 %vm671_vm11, %v3751_v35  ;;  %v3224_v55 = vmul.f32 %v10025_v24, %v11340_v9  ;;  %v3225_v49 = vmul.f32 %v10025_v24, %v11386_v13  ;;  %v3324_v57 = vmul.f32 %v10044_v50, %v3072_v63  ;;  %v3325_v6 = vmul.f32 %v10044_v50, %v11446_v0 }
 0x23d   : > { %v3172_v22 = vadd.f32 %v3124_v23, %v3018_v62  ;;  %v3173_v36 = vadd.f32 %v3125_v3, %v3019_v33  ;;  %v3724_v5 = vadd.f32 %v3676_v29, %v3624_v41  ;;  %v3725_v1 = vadd.f32 %v3677_v18, %v3625_v27  ;;  %v3074_v33 = vld [vmem:[#allocation2 + $0x1a8] sm:$0xff]  ;;  %7638 = vmatprep.subr.bf16.mxu0 %v7972_v34 }
 0x23e   : > { %v3478_v19 = vmul.f32 %v10070_v43, %v11294_v59  ;;  %v3479_v46 = vmul.f32 %v10070_v43, %v11296_v14  ;;  %v3578_v40 = vmul.f32 %v10048_v42, %v11372_v20  ;;  %v2820_v15 = vmul.f32 %v9994_v32, %v11308_v8  ;;  %7639 = vmatpush3.bf16.msra.mxu0 %v7972_v34 }
 0x23f   : > { %v3272_v26 = vadd.f32 %v3224_v55, %v3172_v22  ;;  %v3273_v30 = vadd.f32 %v3225_v49, %v3173_v36  ;;  %v3752_v61 = vpack.c.bf16 %v3725_v1, %v3724_v5  ;;  %v2821_v29 = vmul.f32 %v9994_v32, %v11310_v2 }
 0x240   : > { %v2872_v59 = vmul.f32 %v9998_v37, %v11361_v4  ;;  %v2873_v14 = vmul.f32 %v9998_v37, %v2766_v12  ;;  %v3579_v8 = vmul.f32 %v10048_v42, %v11427_v7  ;;  %v2972_v44 = vmul.f32 %v10007_v58, %v2768_v38 }
 0x241   : > { %v3372_v35 = vadd.f32 %v3324_v57, %v3272_v26  ;;  %v3373_v11 = vadd.f32 %v3325_v6, %v3273_v30  ;;  %7624 = vmatprep.mubr.msk.bf16.mxu1 %vm671_vm11, %v3752_v61  ;;  %v3678_v2 = vmul.f32 %v11319_v17, %v3426_v47  ;;  %v2973_v12 = vmul.f32 %v10007_v58, %v11394_v21 }
 0x242   : > { %v2920_v18 = vadd.f32 %v2872_v59, %v2820_v15  ;;  %v2921_v62 = vadd.f32 %v2873_v14, %v2821_v29  ;;  %v3679_v41 = vmul.f32 %v11319_v17, %v11468_v10  ;;  %v3126_v27 = vmul.f32 %v10018_v48, %v11338_v54  ;;  %v15016_v14 = vld [vmem:[#allocation54_spill] sm:$0xff] }
 0x243   : > { %v3526_v23 = vadd.f32 %v3478_v19, %v3372_v35  ;;  %v3527_v3 = vadd.f32 %v3479_v46, %v3373_v11  ;;  %v3127_v22 = vmul.f32 %v10018_v48, %v11340_v9  ;;  %v3226_v36 = vmul.f32 %v10025_v24, %v11388_v28  ;;  %v7586_v34 = vpop.f32.mrb[0].mxu1 }
 0x244   : > { %v3020_v55 = vadd.f32 %v2972_v44, %v2920_v18  ;;  %v3021_v49 = vadd.f32 %v2973_v12, %v2921_v62  ;;  %v3227_v6 = vmul.f32 %v10025_v24, %v3072_v63  ;;  %v3326_v5 = vmul.f32 %v10044_v50, %v3074_v33  ;;  %v15017_v44 = vld [vmem:[#allocation53_spill] sm:$0xff] }
 0x245   : > { %v3626_v21 = vadd.f32 %v3578_v40, %v3526_v23  ;;  %v3627_v57 = vadd.f32 %v3579_v8, %v3527_v3  ;;  %v3327_v54 = vmul.f32 %v10044_v50, %v11390_v52  ;;  %v3480_v46 = vmul.f32 %v10070_v43, %v11364_v25 }
 0x246   : > { %v3174_v1 = vadd.f32 %v3126_v27, %v3020_v55  ;;  %v3175_v19 = vadd.f32 %v3127_v22, %v3021_v49  ;;  %v3481_v30 = vmul.f32 %v10070_v43, %v11372_v20  ;;  %v3580_v40 = vmul.f32 %v10048_v42, %v11431_v39  ;;  %v11530_v49 = vld [vmem:[%s14698_s9] ss:$0 sm:$0xff] }
 0x247   : > { %v3726_v26 = vadd.f32 %v3678_v2, %v3626_v21  ;;  %v3727_v9 = vadd.f32 %v3679_v41, %v3627_v57  ;;  %v2822_v61 = vmul.f32 %v9994_v32, %v11359_v60  ;;  %v2823_v29 = vmul.f32 %v9994_v32, %v11361_v4  ;;  %v3886_v2 = vpop.f32.mrb[1].mxu1  ;;  %v15018_v4 = vld [vmem:[#allocation52_spill] sm:$0xff]  ;;  %v15019_v21 = vld [vmem:[#allocation55_spill] sm:$0xff]  ;;  %v15020_v57 = vld [vmem:[#allocation57_spill] sm:$0xff] }
 0x248   : > { %v3274_v15 = vadd.f32 %v3226_v36, %v3174_v1  ;;  %v3275_v63 = vadd.f32 %v3227_v6, %v3175_v19  ;;  %v2874_v25 = vmul.f32 %v9998_v37, %v11423_v16  ;;  %v2875_v59 = vmul.f32 %v9998_v37, %v2768_v38  ;;  %v7587_v18 = vpop.f32.mrb[2].mxu1 }
 0x249   : > { %v3753_v52 = vpack.c.bf16 %v3727_v9, %v3726_v26  ;;  %v2974_v20 = vmul.f32 %v10007_v58, %v15016_v14  ;;  %v3581_v8 = vmul.f32 %v10048_v42, %v3426_v47  ;;  %v2975_v60 = vmul.f32 %v10007_v58, %v15017_v44  ;;  %v3889_v23 = vpop.f32.mrb[3].mxu1  ;;  %v4329_v44 = vld [vmem:[%s14700_s11] sm:$0xff] }
 0x24a   : > { %v3374_v35 = vadd.f32 %v3326_v5, %v3274_v15  ;;  %v3375_v11 = vadd.f32 %v3327_v54, %v3275_v63  ;;  %v3680_v32 = vmul.f32 %v11319_v17, %v11396_v31  ;;  %v3681_v37 = vmul.f32 %v11319_v17, %v15018_v4 }
 0x24b   : > { %7625 = vmatmul.mubr.msk.bf16.gmra.mrb[40].mxu1 %vm671_vm11, %v3753_v52  ;;  %v2922_v16 = vadd.f32 %v2874_v25, %v2822_v61  ;;  %v2923_v38 = vadd.f32 %v2875_v59, %v2823_v29  ;;  %v3128_v47 = vmul.f32 %v10018_v48, %v11386_v13  ;;  %v3129_v58 = vmul.f32 %v10018_v48, %v11388_v28  ;;  %v15021_v61 = vld [vmem:[#allocation58_spill] sm:$0xff]  ;;  %v15022_v52 = vld [vmem:[#allocation59_spill] sm:$0xff] }
 0x24c   : > { %v3528_v62 = vadd.f32 %v3480_v46, %v3374_v35  ;;  %v3529_v12 = vadd.f32 %v3481_v30, %v3375_v11  ;;  %v3228_v27 = vmul.f32 %v10025_v24, %v11446_v0  ;;  %v3229_v55 = vmul.f32 %v10025_v24, %v3074_v33  ;;  %v11543_v33 = vld [vmem:[%s14699_s10] ss:$0 sm:$0xff] }
 0x24d   : > { %v3022_v3 = vadd.f32 %v2974_v20, %v2922_v16  ;;  %v3023_v41 = vadd.f32 %v2975_v60, %v2923_v38  ;;  %v3328_v13 = vmul.f32 %v10044_v50, %v15019_v21  ;;  %v3329_v48 = vmul.f32 %v10044_v50, %v15020_v57  ;;  %v6509_v38 = vld [vmem:[%s8264_s21 + $0xb8] sm:$0xff]  ;;  %v6494_v57 = vld [vmem:[%s8264_s21 + $0x40] sm:$0xff] }
 0x24e   : > { %v3628_v22 = vadd.f32 %v3580_v40, %v3528_v62  ;;  %v3629_v36 = vadd.f32 %v3581_v8, %v3529_v12  ;;  %v3482_v0 = vmul.f32 %v10070_v43, %v11427_v7  ;;  %v3483_v24 = vmul.f32 %v10070_v43, %v11431_v39  ;;  %v6493_v62 = vld [vmem:[%s8264_s21 + $0x38] sm:$0xff] }
 0x24f   : > { %v3176_v28 = vadd.f32 %v3128_v47, %v3022_v3  ;;  %v3177_v6 = vadd.f32 %v3129_v58, %v3023_v41  ;;  %v3582_v19 = vmul.f32 %v10048_v42, %v11468_v10  ;;  %v4085_v50 = vmul.f32 %v7586_v34, %v11530_v49  ;;  %v6510_v3 = vld [vmem:[%s8264_s21 + $0xc0] sm:$0xff]  ;;  %v6511_v41 = vld [vmem:[%s8264_s21 + $0xc8] sm:$0xff] }
 0x250   : > { %v3728_v5 = vadd.f32 %v3680_v32, %v3628_v22  ;;  %v3729_v1 = vadd.f32 %v3681_v37, %v3629_v36  ;;  %v4083_v26 = vmul.f32 %v11530_v49, %v3886_v2  ;;  %v4086_v7 = vmul.f32 %v7587_v18, %v11530_v49  ;;  %v6492_v18 = vld [vmem:[%s8264_s21 + $0x30] sm:$0xff] }
 0x251   : > { %v3276_v54 = vadd.f32 %v3228_v27, %v3176_v28  ;;  %v3277_v46 = vadd.f32 %v3229_v55, %v3177_v6  ;;  %v3583_v43 = vmul.f32 %v10048_v42, %v11396_v31  ;;  %v4139_v39 = vadd.f32 %v11543_v33, %v4085_v50  ;;  %v15027_v27 = vld [vmem:[#allocation9_spill] sm:$0xff]  ;;  %v15028_v6 = vld [vmem:[#allocation10_spill] sm:$0xff] }
 0x252   : > { %v3754_v9 = vpack.c.bf16 %v3729_v1, %v3728_v5  ;;  %v4084_v30 = vmul.f32 %v11530_v49, %v3889_v23  ;;  %v4137_v10 = vadd.f32 %v11543_v33, %v4083_v26  ;;  %v4140_v63 = vadd.f32 %v11543_v33, %v4086_v7  ;;  %v4342_v28 = vld [vmem:[#allocation3 + $0x1f] sm:$0xff]  ;;  %v6512_v5 = vld [vmem:[%s8264_s21 + $0xd0] sm:$0xff] }
 0x253   : > { %v3376_v40 = vadd.f32 %v3328_v13, %v3276_v54  ;;  %v3377_v15 = vadd.f32 %v3329_v48, %v3277_v46  ;;  %v3682_v29 = vmul.f32 %v11319_v17, %v15021_v61  ;;  %v3683_v25 = vmul.f32 %v11319_v17, %v15022_v52  ;;  %v6508_v17 = vld [vmem:[%s8264_s21 + $0xb0] sm:$0xff]  ;;  %v6495_v48 = vld [vmem:[%s8264_s21 + $0x48] sm:$0xff]  ;;  %v6513_v1 = vld [vmem:[%s8264_s21 + $0xd8] sm:$0xff] }
 0x254   : > { %7628 = vmatprep.mubr.msk.bf16.mxu1 %vm671_vm11, %v3754_v9  ;;  %v4187_v42 = vmax.f32 %v4139_v39, 0.0  ;;  %v4138_v31 = vadd.f32 %v11543_v33, %v4084_v30  ;;  %v4185_v20 = vmax.f32 %v4137_v10, 0.0  ;;  %v4188_v34 = vmax.f32 %v4140_v63, 0.0  ;;  %v4341_v13 = vld [vmem:[#allocation3 + $0x17] sm:$0xff]  ;;  %v15033_v10 = vld [vmem:[#allocation13_spill] sm:$0xff] }
 0x255   : > { %v3530_v59 = vadd.f32 %v3482_v0, %v3376_v40  ;;  %v3531_v14 = vadd.f32 %v3483_v24, %v3377_v15  ;;  %v11584_v55 = vrot.slane %v4329_v44, %v15027_v27  ;;  %v7788_v22 = vpack.c.bf16 %v6509_v38, %v6508_v17  ;;  %v4647_v46 = vld [vmem:[#allocation3 + $0x18] sm:$0xff]  ;;  %v6496_v7 = vld [vmem:[%s8264_s21 + $0x50] sm:$0xff] }
 0x256   : > { %v4235_v11 = vsel %vm2564_vm5, %v4187_v42, 0.0  ;;  %v4186_v8 = vmax.f32 %v4138_v31, 0.0  ;;  %v4233_v4 = vsel %vm2562_vm4, %v4185_v20, 0.0  ;;  %v4236_v16 = vsel %vm2565_vm7, %v4188_v34, 0.0  ;;  %v15032_v40 = vld [vmem:[#allocation12_spill] sm:$0xff]  ;;  %v4648_v31 = vld [vmem:[#allocation3 + $0x20] sm:$0xff] }
 0x257   : > { %v3630_v60 = vadd.f32 %v3582_v19, %v3530_v59  ;;  %v3631_v2 = vadd.f32 %v3583_v43, %v3531_v14  ;;  %4283 = vst.msk [vmem:[#allocation3 + $0x40] sm:$0xff] %vm671_vm11, %v4235_v11  ;;  %4281 = vst.msk [vmem:[#allocation3 + $0x30] sm:$0xff] %vm671_vm11, %v4233_v4  ;;  %v7790_v36 = vpack.c.bf16 %v6493_v62, %v6492_v18  ;;  %7789 = vmatprep.subr.bf16.mxu1 %v7788_v22  ;;  %v15030_v19 = vld [vmem:[#allocation11_spill] sm:$0xff]  ;;  %v15034_v59 = vld [vmem:[#allocation14_spill] sm:$0xff] }
 0x258   : > { %4284 = vst.msk [vmem:[#allocation3 + $0x48] sm:$0xff] %vm671_vm11, %v4236_v16  ;;  %v4234_v47 = vsel %vm2563_vm6, %v4186_v8, 0.0  ;;  %v11589_v0 = vrot.slane %v4329_v44, %v15028_v6  ;;  %v7792_v24 = vpack.c.bf16 %v6511_v41, %v6510_v3  ;;  %v11595_v50 = vrot.slane %v4329_v44, %v15030_v19  ;;  %v15036_v20 = vld [vmem:[#allocation15_spill] sm:$0xff]  ;;  %v6514_v11 = vld [vmem:[%s8264_s21 + $0xe0] sm:$0xff]  ;;  %v6515_v8 = vld [vmem:[%s8264_s21 + $0xe8] sm:$0xff] }
 0x259   : > { %v3730_v58 = vadd.f32 %v3682_v29, %v3630_v60  ;;  %v3731_v23 = vadd.f32 %v3683_v25, %v3631_v2  ;;  %4282 = vst.msk [vmem:[#allocation3 + $0x38] sm:$0xff] %vm671_vm11, %v4234_v47  ;;  %v4399_v54 = vmul.f32 %v11584_v55, %v4341_v13  ;;  %7791 = vmatpush3.bf16.msra.mxu1 %v7790_v36  ;;  %v6497_v29 = vld [vmem:[%s8264_s21 + $0x58] sm:$0xff] }
 0x25a   : > { %15029 = vst [vmem:[#allocation71_spill] sm:$0xff] %v11589_v0  ;;  %15031 = vst [vmem:[#allocation69_spill] sm:$0xff] %v11595_v50  ;;  %v7794_v26 = vpack.c.bf16 %v6495_v48, %v6494_v57  ;;  %v7590_v9 = vpop.f32.mrb[4].mxu1  ;;  %v11602_v30 = vmul.f32 %v11584_v55, %v4342_v28  ;;  %v11605_v15 = vrot.slane %v4329_v44, %v15032_v40  ;;  %7793 = vmatprep.subr.bf16.mxu1 %v7792_v24  ;;  %v5001_v16 = vld [vmem:[#allocation3 + $0x19] sm:$0xff]  ;;  %v5002_v28 = vld [vmem:[#allocation3 + $0x21] sm:$0xff] }
 0x25b   : > { %v3755_v21 = vpack.c.bf16 %v3731_v23, %v3730_v58  ;;  %v11608_v63 = vrot.slane %v4329_v44, %v15033_v10  ;;  %v7796_v61 = vpack.c.bf16 %v6513_v1, %v6512_v5  ;;  %v4089_v52 = vmul.f32 %v7590_v9, %v11530_v49  ;;  %v3902_v25 = vpop.f32.mrb[5].mxu1  ;;  %v15037_v38 = vld [vmem:[#allocation16_spill] sm:$0xff] }
 0x25c   : > { %v11614_v14 = vrot.slane %v4329_v44, %v15034_v59  ;;  %v11617_v34 = vrot.slane %v4329_v44, %v15036_v20  ;;  %v4087_v17 = vmul.f32 %v11530_v49, %v3902_v25  ;;  %v7591_v60 = vpop.f32.mrb[6].mxu1  ;;  %v4705_v4 = vmul.f32 %v11605_v15, %v4647_v46  ;;  %v4343_v46 = vld [vmem:[#allocation3 + $0x27] sm:$0xff] }
 0x25d   : > { %7629 = vmatmul.mubr.msk.bf16.gmra.mrb[44].mxu1 %vm671_vm11, %v3755_v21  ;;  %v11626_v18 = vrot.slane %v4329_v44, %v15037_v38  ;;  %v4143_v62 = vadd.f32 %v11543_v33, %v4089_v52  ;;  %v4090_v47 = vmul.f32 %v7591_v60, %v11530_v49  ;;  %v3905_v58 = vpop.f32.mrb[7].mxu1  ;;  %v7798_v3 = vpack.c.bf16 %v6497_v29, %v6496_v7 }
 0x25e   : > { %v4344_v43 = vld [vmem:[#allocation3 + $0x2f] sm:$0xff]  ;;  %15035 = vst [vmem:[#allocation74_spill] sm:$0xff] %v11614_v14  ;;  %7795 = vmatpush3.bf16.msra.mxu1 %v7794_v26  ;;  %v4141_v41 = vadd.f32 %v11543_v33, %v4087_v17  ;;  %v4088_v27 = vmul.f32 %v11530_v49, %v3905_v58  ;;  %v11633_v36 = vmul.f32 %v11605_v15, %v4648_v31  ;;  %v4652_v29 = vld [vmem:[#allocation3 + $0x40] sm:$0xff] }
 0x25f   : > { %v11599_v39 = vld [vmem:[#allocation3 + $0x47] sm:$0xff]  ;;  %v4451_v42 = vmul.f32 %v11589_v0, %v4344_v43  ;;  %v4650_v22 = vld [vmem:[#allocation3 + $0x30] sm:$0xff]  ;;  %7797 = vmatprep.subr.bf16.mxu1 %v7796_v61  ;;  %v7800_v21 = vpack.c.bf16 %v6515_v8, %v6514_v11  ;;  %v4191_v44 = vmax.f32 %v4143_v62, 0.0  ;;  %v4144_v13 = vadd.f32 %v11543_v33, %v4090_v47 }
 0x260   : > { %v4551_v2 = vmul.f32 %v11595_v50, %v11599_v39  ;;  %v4345_v57 = vld [vmem:[#allocation3 + $0x37] sm:$0xff]  ;;  %v5059_v6 = vmul.f32 %v11617_v34, %v5001_v16  ;;  %v4189_v24 = vmax.f32 %v4141_v41, 0.0  ;;  %v4142_v5 = vadd.f32 %v11543_v33, %v4088_v27  ;;  %v4649_v61 = vld [vmem:[#allocation3 + $0x28] sm:$0xff]  ;;  %v4346_v59 = vld [vmem:[#allocation3 + $0x3f] sm:$0xff] }
 0x261   : > { %v4499_v23 = vadd.f32 %v4451_v42, %v4399_v54  ;;  %v4402_v1 = vmul.f32 %v11584_v55, %v4344_v43  ;;  %v4454_v19 = vmul.f32 %v11589_v0, %v11599_v39  ;;  %v11641_v54 = vld [vmem:[#allocation3 + $0x48] sm:$0xff]  ;;  %v4239_v7 = vsel %vm2568_vm9, %v4191_v44, 0.0  ;;  %v4651_v8 = vld [vmem:[#allocation3 + $0x38] sm:$0xff] }
 0x262   : > { %v4192_v9 = vmax.f32 %v4144_v13, 0.0  ;;  %v4805_v10 = vmul.f32 %v11608_v63, %v4650_v22  ;;  %7799 = vmatpush3.bf16.msra.mxu1 %v7798_v3  ;;  %4287 = vst.msk [vmem:[#allocation3 + $0x60] sm:$0xff] %vm671_vm11, %v4239_v7  ;;  %v4237_v43 = vsel %vm2566_vm8, %v4189_v24, 0.0  ;;  %v4190_v25 = vmax.f32 %v4142_v5, 0.0  ;;  %v5005_v62 = vld [vmem:[#allocation3 + $0x39] sm:$0xff]  ;;  %v5003_v44 = vld [vmem:[#allocation3 + $0x29] sm:$0xff] }
 0x263   : > { %v4599_v48 = vadd.f32 %v4551_v2, %v4499_v23  ;;  %v4452_v42 = vmul.f32 %v11589_v0, %v4345_v57  ;;  %v11651_v31 = vmul.f32 %v11617_v34, %v5002_v28  ;;  %7801 = vmatprep.subr.bf16.mxu1 %v7800_v21  ;;  %4285 = vst.msk [vmem:[#allocation3 + $0x50] sm:$0xff] %vm671_vm11, %v4237_v43  ;;  %v5004_v2 = vld [vmem:[#allocation3 + $0x31] sm:$0xff]  ;;  %v5006_v13 = vld [vmem:[#allocation3 + $0x41] sm:$0xff] }
 0x264   : > { %v4240_v11 = vsel %vm2569_vm10, %v4192_v9, 0.0  ;;  %v4905_v60 = vmul.f32 %v11614_v14, %v11641_v54  ;;  %v4238_v38 = vsel %vm2567_vm12, %v4190_v25, 0.0  ;;  %v11663_v47 = vmul.f32 %v11605_v15, %v4649_v61  ;;  %v11696_v9 = vld [vmem:[%s14700_s11 + $0x8] ss:$0 sm:$0xff] }
 0x265   : > { %v4753_v40 = vadd.f32 %v4705_v4, %v4599_v48  ;;  %v4401_v4 = vmul.f32 %v11584_v55, %v4343_v46  ;;  %4288 = vst.msk [vmem:[#allocation3 + $0x68] sm:$0xff] %vm671_vm11, %v4240_v11  ;;  %v11666_v58 = vmul.f32 %v11608_v63, %v4652_v29  ;;  %v11669_v23 = vmul.f32 %v11605_v15, %v4652_v29 }
 0x266   : > { %4286 = vst.msk [vmem:[#allocation3 + $0x58] sm:$0xff] %vm671_vm11, %v4238_v38  ;;  %v4502_v3 = vadd.f32 %v4454_v19, %v4402_v1  ;;  %v11673_v41 = vmul.f32 %v11605_v15, %v4650_v22  ;;  %v4453_v21 = vmul.f32 %v11589_v0, %v4346_v59  ;;  %v4500_v48 = vadd.f32 %v4452_v42, %v11602_v30  ;;  %v6498_v1 = vld [vmem:[%s8264_s21 + $0x60] sm:$0xff]  ;;  %v6499_v22 = vld [vmem:[%s8264_s21 + $0x68] sm:$0xff] }
 0x267   : > { %v4853_v17 = vadd.f32 %v4805_v10, %v4753_v40  ;;  %15042 = vst [vmem:[#allocation54_spill] sm:$0xff] %v11669_v23  ;;  %v11678_v28 = vmul.f32 %v11608_v63, %v4651_v8  ;;  %v11682_v24 = vmul.f32 %v11608_v63, %v11641_v54  ;;  %v11685_v5 = vmul.f32 %v11617_v34, %v5004_v2 }
 0x268   : > { %v5159_v46 = vmul.f32 %v11626_v18, %v5004_v2  ;;  %v11691_v7 = vmul.f32 %v11626_v18, %v5005_v62  ;;  %v7802_v30 = vpack.c.bf16 %v6499_v22, %v6498_v1  ;;  %15043 = vst [vmem:[#allocation53_spill] sm:$0xff] %v11696_v9  ;;  %v11699_v40 = vmul.f32 %v11617_v34, %v5003_v44 }
 0x269   : > { %v4953_v27 = vadd.f32 %v4905_v60, %v4853_v17  ;;  %v11702_v10 = vmul.f32 %v11626_v18, %v5006_v13  ;;  %v11706_v61 = vmul.f32 %v11584_v55, %v4346_v59  ;;  %v4656_v29 = vld [vmem:[#allocation3 + $0x60] sm:$0xff]  ;;  %v4501_v43 = vadd.f32 %v4453_v21, %v4401_v4  ;;  %v6516_v17 = vld [vmem:[%s8264_s21 + $0xf0] sm:$0xff]  ;;  %v6517_v60 = vld [vmem:[%s8264_s21 + $0xf8] sm:$0xff] }
 0x26a   : > { %v11709_v25 = vmul.f32 %v11605_v15, %v4651_v8  ;;  %v11712_v42 = vmul.f32 %v11617_v34, %v5005_v62  ;;  %v11715_v11 = vmul.f32 %v11617_v34, %v5006_v13  ;;  %7803 = vmatpush3.bf16.msra.mxu1 %v7802_v30  ;;  %v4348_v2 = vld [vmem:[#allocation3 + $0x4f] sm:$0xff]  ;;  %v11725_v4 = vmul.f32 %v11584_v55, %v11599_v39 }
 0x26b   : > { %v5107_v19 = vadd.f32 %v5059_v6, %v4953_v27  ;;  %v4403_v6 = vmul.f32 %v11584_v55, %v4345_v57  ;;  %v11719_v38 = vld [vmem:[#allocation3 + $0x50] sm:$0xff]  ;;  %v11729_v8 = vmul.f32 %v11605_v15, %v11641_v54  ;;  %v7804_v62 = vpack.c.bf16 %v6517_v60, %v6516_v17 }
 0x26c   : > { %15044 = vst [vmem:[#allocation52_spill] sm:$0xff] %v11715_v11  ;;  %v11721_v57 = vld [vmem:[#allocation3 + $0x49] sm:$0xff]  ;;  %v4552_v27 = vmul.f32 %v11595_v50, %v4348_v2  ;;  %v4908_v21 = vmul.f32 %v11614_v14, %v4656_v29  ;;  %v11733_v44 = vld [vmem:[#allocation3 + $0x61] sm:$0xff]  ;;  %v11738_v1 = vmul.f32 %v11608_v63, %v4656_v29  ;;  %v11741_v22 = vmul.f32 %v11605_v15, %v4656_v29 }
 0x26d   : > { %v5207_v59 = vadd.f32 %v5159_v46, %v5107_v19  ;;  %15045 = vst [vmem:[#allocation55_spill] sm:$0xff] %v11729_v8  ;;  %v11735_v13 = vld [vmem:[#allocation3 + $0x67] sm:$0xff]  ;;  %v11743_v39 = vld [vmem:[#allocation3 + $0x5f] sm:$0xff]  ;;  %v4906_v54 = vmul.f32 %v11614_v14, %v11719_v38  ;;  %v11747_v19 = vld [vmem:[#allocation3 + $0x51] sm:$0xff]  ;;  %v11751_v46 = vmul.f32 %v11626_v18, %v11721_v57  ;;  %v5259_v30 = vmul.f32 %v11696_v9, %v11721_v57 }
 0x26e   : > { %15046 = vst [vmem:[#allocation57_spill] sm:$0xff] %v11738_v1  ;;  %15047 = vst [vmem:[#allocation58_spill] sm:$0xff] %v11741_v22  ;;  %v11755_v17 = vld [vmem:[#allocation3 + $0x57] sm:$0xff]  ;;  %v4455_v60 = vmul.f32 %v11589_v0, %v4348_v2  ;;  %7805 = vmatprep.subr.bf16.mxu1 %v7804_v62  ;;  %v4554_v29 = vmul.f32 %v11595_v50, %v11743_v39  ;;  %v4600_v16 = vadd.f32 %v4552_v27, %v4500_v48  ;;  %v11781_v53 = vld [vmem:[#allocation3 + $0x68] sm:$0xff] }
 0x26f   : > { %v11760_v20 = vld [vmem:[#allocation3 + $0x58] sm:$0xff]  ;;  %v11766_v26 = vmul.f32 %v11696_v9, %v11733_v44  ;;  %v4555_v12 = vmul.f32 %v11595_v50, %v11735_v13  ;;  %v5260_v37 = vmul.f32 %v11696_v9, %v11747_v19  ;;  %v11772_v32 = vadd.f32 %v5259_v30, %v5207_v59 }
 0x270   : > { %v11762_v52 = vld [vmem:[#allocation3 + $0x59] sm:$0xff]  ;;  %v4553_v62 = vmul.f32 %v11595_v50, %v11755_v17  ;;  %v4809_v48 = vmul.f32 %v11608_v63, %v11719_v38  ;;  %v4602_v27 = vadd.f32 %v4554_v29, %v4502_v3  ;;  %v4754_v35 = vadd.f32 %v11633_v36, %v4600_v16  ;;  %v7594_v51 = vpop.f32.mrb[8].mxu1 }
 0x271   : > { %v4907_v45 = vmul.f32 %v11614_v14, %v11760_v20  ;;  %v4503_v56 = vadd.f32 %v4455_v60, %v4403_v6  ;;  %v5261_v59 = vmul.f32 %v11696_v9, %v11762_v52  ;;  %v4456_v30 = vmul.f32 %v11589_v0, %v11755_v17  ;;  %v3918_v16 = vpop.f32.mrb[9].mxu1 }
 0x272   : > { %v4601_v22 = vadd.f32 %v4553_v62, %v4501_v43  ;;  %v11789_v11 = vmul.f32 %v11608_v63, %v11760_v20  ;;  %v4093_v36 = vmul.f32 %v7594_v51, %v11530_v49  ;;  %v4756_v3 = vadd.f32 %v11673_v41, %v4602_v27  ;;  %v7595_v29 = vpop.f32.mrb[10].mxu1 }
 0x273   : > { %v4854_v6 = vadd.f32 %v11678_v28, %v4754_v35  ;;  %v4603_v60 = vadd.f32 %v4555_v12, %v4503_v56  ;;  %v4091_v43 = vmul.f32 %v11530_v49, %v3918_v16  ;;  %v4909_v1 = vmul.f32 %v11614_v14, %v11781_v53  ;;  %v3921_v23 = vpop.f32.mrb[11].mxu1 }
 0x274   : > { %15048 = vst [vmem:[#allocation59_spill] sm:$0xff] %v11789_v11  ;;  %v4755_v62 = vadd.f32 %v11663_v47, %v4601_v22  ;;  %v4406_v8 = vmul.f32 %v11584_v55, %v4348_v2  ;;  %v4147_v11 = vadd.f32 %v11543_v33, %v4093_v36  ;;  %v4094_v51 = vmul.f32 %v7595_v29, %v11530_v49 }
 0x275   : > { %v4856_v41 = vadd.f32 %v11682_v24, %v4756_v3  ;;  %v4954_v27 = vadd.f32 %v4906_v54, %v4854_v6  ;;  %v4145_v56 = vadd.f32 %v11543_v33, %v4091_v43  ;;  %v4092_v35 = vmul.f32 %v11530_v49, %v3921_v23 }
 0x276   : > { %v4855_v12 = vadd.f32 %v11666_v58, %v4755_v62  ;;  %v4757_v47 = vadd.f32 %v11709_v25, %v4603_v60  ;;  %v4195_v28 = vmax.f32 %v4147_v11, 0.0  ;;  %v4148_v22 = vadd.f32 %v11543_v33, %v4094_v51 }
 0x277   : > { %v4956_v2 = vadd.f32 %v4908_v21, %v4856_v41  ;;  %v5108_v36 = vadd.f32 %v11651_v31, %v4954_v27  ;;  %v4193_v16 = vmax.f32 %v4145_v56, 0.0  ;;  %v4146_v29 = vadd.f32 %v11543_v33, %v4092_v35  ;;  %v6500_v35 = vld [vmem:[%s8264_s21 + $0x70] sm:$0xff] }
 0x278   : > { %v4955_v9 = vadd.f32 %v4907_v45, %v4855_v12  ;;  %v4857_v24 = vadd.f32 %v4809_v48, %v4757_v47  ;;  %v4243_v3 = vsel %vm14874_vm15, %v4195_v28, 0.0  ;;  %v4196_v6 = vmax.f32 %v4148_v22, 0.0  ;;  %v6519_v47 = vld [vmem:[%s8264_s21 + $0x108] sm:$0xff] }
 0x279   : > { %v5110_v23 = vadd.f32 %v11685_v5, %v4956_v2  ;;  %v5208_v58 = vadd.f32 %v11691_v7, %v5108_v36  ;;  %4291 = vst.msk [vmem:[#allocation3 + $0x80] sm:$0xff] %vm671_vm11, %v4243_v3  ;;  %v4241_v11 = vsel %vm14870_vm13, %v4193_v16, 0.0  ;;  %v4194_v21 = vmax.f32 %v4146_v29, 0.0  ;;  %v15052_v7 = vld [vmem:[#allocation26_spill] sm:$0xff]  ;;  %v6502_v2 = vld [vmem:[%s8264_s21 + $0x80] sm:$0xff] }
 0x27a   : > { %v5109_v31 = vadd.f32 %v11699_v40, %v4955_v9  ;;  %v4957_v60 = vadd.f32 %v4909_v1, %v4857_v24  ;;  %4289 = vst.msk [vmem:[#allocation3 + $0x70] sm:$0xff] %vm671_vm11, %v4241_v11  ;;  %v4244_v48 = vsel %vm14873_vm0, %v4196_v6, 0.0  ;;  %v4457_v5 = vmul.f32 %v11589_v0, %v11743_v39  ;;  %v6503_v36 = vld [vmem:[%s8264_s21 + $0x88] sm:$0xff] }
 0x27b   : > { %v5210_v43 = vadd.f32 %v11751_v46, %v5110_v23  ;;  %v5308_v62 = vadd.f32 %v5260_v37, %v5208_v58  ;;  %4292 = vst.msk [vmem:[#allocation3 + $0x88] sm:$0xff] %vm671_vm11, %v4244_v48  ;;  %vm15053_vm13 = vcmp.eq.s32.totalorder %v15052_v7, 1  ;;  %v4458_v1 = vmul.f32 %v11589_v0, %v11735_v13  ;;  %v15057_v48 = vld [vmem:[#allocation53_spill] sm:$0xff]  ;;  %v15060_v25 = vld [vmem:[#allocation59_spill] sm:$0xff] }
 0x27c   : > { %v4242_v51 = vsel %vm15053_vm13, %v4194_v21, 0.0  ;;  %v5209_v9 = vadd.f32 %v11702_v10, %v5109_v31  ;;  %v5111_v40 = vadd.f32 %v11712_v42, %v4957_v60  ;;  %v4504_v41 = vadd.f32 %v4456_v30, %v11706_v61 }
 0x27d   : > { %4290 = vst.msk [vmem:[#allocation3 + $0x78] sm:$0xff] %vm671_vm11, %v4242_v51  ;;  %v5355_v37 = vpack.c.bf16 %v5308_v62, %v11772_v32  ;;  %v5310_v46 = vadd.f32 %v11766_v26, %v5210_v43  ;;  %v5163_v27 = vmul.f32 %v11626_v18, %v11747_v19  ;;  %v11838_v10 = vmul.f32 %v11626_v18, %v11762_v52  ;;  %v6501_v26 = vld [vmem:[%s8264_s21 + $0x78] sm:$0xff] }
 0x27e   : > { %v5309_v56 = vadd.f32 %v5261_v59, %v5209_v9  ;;  %v4505_v42 = vadd.f32 %v4457_v5, %v11725_v4  ;;  %v11843_v32 = vmul.f32 %v11605_v15, %v11719_v38  ;;  %v4506_v30 = vadd.f32 %v4458_v1, %v4406_v8  ;;  %v6518_v4 = vld [vmem:[%s8264_s21 + $0x100] sm:$0xff] }
 0x27f   : > { %7640 = vmatprep.mubr.msk.bf16.mxu0 %vm671_vm11, %v5355_v37  ;;  %v5211_v61 = vadd.f32 %v5163_v27, %v5111_v40  ;;  %v11850_v59 = vmul.f32 %v11608_v63, %v11781_v53  ;;  %v11854_v12 = vmul.f32 %v11617_v34, %v11721_v57  ;;  %v11860_v38 = vmul.f32 %v11617_v34, %v11747_v19 }
 0x280   : > { %v5356_v28 = vpack.c.bf16 %v5310_v46, %v5309_v56  ;;  %v11864_v22 = vmul.f32 %v11626_v18, %v11733_v44  ;;  %v4407_v8 = vmul.f32 %v11584_v55, %v11755_v17  ;;  %v11870_v16 = vld [vmem:[#allocation3 + $0x80] sm:$0xff]  ;;  %v11874_v57 = vmul.f32 %v11584_v55, %v11743_v39 }
 0x281   : > { %v4713_v29 = vmul.f32 %v11605_v15, %v11760_v20  ;;  %v11880_v19 = vmul.f32 %v11617_v34, %v11762_v52  ;;  %v7806_v24 = vpack.c.bf16 %v6501_v26, %v6500_v35  ;;  %v4352_v3 = vld [vmem:[#allocation3 + $0x6f] sm:$0xff]  ;;  %v11889_v23 = vmul.f32 %v11617_v34, %v11733_v44 }
 0x282   : > { %7641 = vmatmul.mubr.msk.bf16.vlgmr.msra.gmra.mrb[48].mxu0 %vm671_vm11, %v5356_v28  ;;  %v11883_v17 = vld [vmem:[#allocation3 + $0x70] sm:$0xff]  ;;  %v11893_v39 = vmul.f32 %v11584_v55, %v11735_v13  ;;  %v11897_v52 = vmul.f32 %v11605_v15, %v11781_v53  ;;  %v7808_v20 = vpack.c.bf16 %v6519_v47, %v6518_v4  ;;  %v4556_v58 = vmul.f32 %v11595_v50, %v4352_v3  ;;  %v11902_v21 = vld [vmem:[#allocation3 + $0x81] sm:$0xff] }
 0x283   : > { %v11885_v6 = vld [vmem:[#allocation3 + $0x69] sm:$0xff]  ;;  %15054 = vst [vmem:[#allocation9_spill] sm:$0xff] %v11889_v23  ;;  %v4912_v11 = vmul.f32 %v11614_v14, %v11870_v16  ;;  %7807 = vmatpush3.bf16.msra.mxu1 %v7806_v24  ;;  %v11908_v44 = vmul.f32 %v11608_v63, %v11870_v16  ;;  %v7810_v13 = vpack.c.bf16 %v6503_v36, %v6502_v2 }
 0x284   : > { %15055 = vst [vmem:[#allocation10_spill] sm:$0xff] %v11897_v52  ;;  %v11904_v31 = vld [vmem:[#allocation3 + $0x87] sm:$0xff]  ;;  %v4910_v53 = vmul.f32 %v11614_v14, %v11883_v17  ;;  %v11912_v60 = vld [vmem:[#allocation3 + $0x71] sm:$0xff]  ;;  %v5263_v43 = vmul.f32 %v15057_v48, %v11885_v6  ;;  %v11918_v5 = vld [vmem:[#allocation3 + $0x7f] sm:$0xff]  ;;  %v11922_v51 = vmul.f32 %v11626_v18, %v11885_v6  ;;  %v4459_v9 = vmul.f32 %v11589_v0, %v4352_v3 }
 0x285   : > { %15056 = vst [vmem:[#allocation11_spill] sm:$0xff] %v11908_v44  ;;  %v11916_v62 = vld [vmem:[#allocation3 + $0x77] sm:$0xff]  ;;  %7809 = vmatprep.subr.bf16.mxu1 %v7808_v20  ;;  %v4604_v40 = vadd.f32 %v4556_v58, %v4504_v41  ;;  %v11933_v27 = vmul.f32 %v15057_v48, %v11902_v21  ;;  %v4559_v56 = vmul.f32 %v11595_v50, %v11904_v31  ;;  %v11943_v4 = vld [vmem:[#allocation3 + $0x88] sm:$0xff] }
 0x286   : > { %v4557_v1 = vmul.f32 %v11595_v50, %v11916_v62  ;;  %v11927_v37 = vld [vmem:[#allocation3 + $0x78] sm:$0xff]  ;;  %v5264_v35 = vmul.f32 %v15057_v48, %v11912_v60  ;;  %v11939_v26 = vadd.f32 %v5263_v43, %v5211_v61  ;;  %v4558_v41 = vmul.f32 %v11595_v50, %v11918_v5  ;;  %v15058_v28 = vld [vmem:[#allocation54_spill] sm:$0xff] }
 0x287   : > { %v11929_v46 = vld [vmem:[#allocation3 + $0x79] sm:$0xff]  ;;  %v4813_v47 = vmul.f32 %v11608_v63, %v11883_v17  ;;  %v4758_v2 = vadd.f32 %v15058_v28, %v4604_v40  ;;  %v4911_v24 = vmul.f32 %v11614_v14, %v11927_v37  ;;  %v4507_v20 = vadd.f32 %v4459_v9, %v4407_v8  ;;  %7811 = vmatpush3.bf16.msra.mxu1 %v7810_v13  ;;  %v7598_v45 = vpop.f32.mrb[12].mxu1 }
 0x288   : > { %v4605_v36 = vadd.f32 %v4557_v1, %v4505_v42  ;;  %v4606_v58 = vadd.f32 %v4558_v41, %v4506_v30  ;;  %v5265_v61 = vmul.f32 %v15057_v48, %v11929_v46  ;;  %v4460_v43 = vmul.f32 %v11589_v0, %v11916_v62  ;;  %v15061_v42 = vld [vmem:[#allocation55_spill] sm:$0xff]  ;;  %v3934_v13 = vpop.f32.mrb[13].mxu1 }
 0x289   : > { %v11956_v7 = vmul.f32 %v11608_v63, %v11927_v37  ;;  %v4858_v40 = vadd.f32 %v15060_v25, %v4758_v2  ;;  %v4607_v28 = vadd.f32 %v4559_v56, %v4507_v20  ;;  %v4913_v8 = vmul.f32 %v11614_v14, %v11943_v4  ;;  %v7599_v44 = vpop.f32.mrb[14].mxu1  ;;  %v15062_v2 = vld [vmem:[#allocation57_spill] sm:$0xff] }
 0x28a   : > { %v4759_v1 = vadd.f32 %v15061_v42, %v4605_v36  ;;  %v4097_v30 = vmul.f32 %v7598_v45, %v11530_v49  ;;  %v4760_v9 = vadd.f32 %v11843_v32, %v4606_v58  ;;  %v4410_v41 = vmul.f32 %v11584_v55, %v4352_v3  ;;  %v3937_v45 = vpop.f32.mrb[15].mxu1 }
 0x28b   : > { %15059 = vst [vmem:[#allocation12_spill] sm:$0xff] %v11956_v7  ;;  %v4461_v54 = vmul.f32 %v11589_v0, %v11918_v5  ;;  %v4095_v23 = vmul.f32 %v11530_v49, %v3934_v13  ;;  %v4958_v25 = vadd.f32 %v4910_v53, %v4858_v40  ;;  %v4761_v56 = vadd.f32 %v4713_v29, %v4607_v28  ;;  %v15063_v13 = vld [vmem:[#allocation52_spill] sm:$0xff] }
 0x28c   : > { %v4859_v36 = vadd.f32 %v15062_v2, %v4759_v1  ;;  %v4151_v20 = vadd.f32 %v11543_v33, %v4097_v30  ;;  %v4098_v42 = vmul.f32 %v7599_v44, %v11530_v49  ;;  %v4860_v52 = vadd.f32 %v11850_v59, %v4760_v9  ;;  %v15064_v2 = vld [vmem:[#allocation31_spill] sm:$0xff] }
 0x28d   : > { %v4462_v32 = vmul.f32 %v11589_v0, %v11904_v31  ;;  %v4149_v3 = vadd.f32 %v11543_v33, %v4095_v23  ;;  %v4096_v58 = vmul.f32 %v11530_v49, %v3937_v45  ;;  %v5112_v7 = vadd.f32 %v15063_v13, %v4958_v25 }
 0x28e   : > { %v4959_v53 = vadd.f32 %v4911_v24, %v4859_v36  ;;  %v4199_v40 = vmax.f32 %v4151_v20, 0.0  ;;  %v4152_v29 = vadd.f32 %v11543_v33, %v4098_v42  ;;  %v4960_v1 = vadd.f32 %v4912_v11, %v4860_v52  ;;  %v15066_v24 = vld [vmem:[#allocation29_spill] sm:$0xff]  ;;  %v6504_v42 = vld [vmem:[%s8264_s21 + $0x90] sm:$0xff] }
 0x28f   : > { %v4861_v28 = vadd.f32 %v4813_v47, %v4761_v56  ;;  %v4197_v30 = vmax.f32 %v4149_v3, 0.0  ;;  %v4150_v44 = vadd.f32 %v11543_v33, %v4096_v58  ;;  %v5212_v59 = vadd.f32 %v11838_v10, %v5112_v7  ;;  %v15068_v7 = vld [vmem:[#allocation32_spill] sm:$0xff] }
 0x290   : > { %v5113_v9 = vadd.f32 %v11854_v12, %v4959_v53  ;;  %vm15065_vm13 = vcmp.eq.s32.totalorder %v15064_v2, 1  ;;  %v4200_v0 = vmax.f32 %v4152_v29, 0.0  ;;  %v5114_v45 = vadd.f32 %v11860_v38, %v4960_v1  ;;  %v6505_v3 = vld [vmem:[%s8264_s21 + $0x98] sm:$0xff]  ;;  %v6506_v29 = vld [vmem:[%s8264_s21 + $0xa0] sm:$0xff]  ;;  %v6507_v1 = vld [vmem:[%s8264_s21 + $0xa8] sm:$0xff] }
 0x291   : > { %v4247_v23 = vsel %vm15065_vm13, %v4199_v40, 0.0  ;;  %v4961_v25 = vadd.f32 %v4913_v8, %v4861_v28  ;;  %vm15067_vm0 = vcmp.eq.s32.totalorder %v15066_v24, 1  ;;  %v4198_v11 = vmax.f32 %v4150_v44, 0.0  ;;  %v5920_v2 = vld [vmem:[%s15072_s26 + $0x20] sm:$0xff] }
 0x292   : > { %4295 = vst.msk [vmem:[#allocation3 + $0xa0] sm:$0xff] %vm671_vm11, %v4247_v23  ;;  %v4245_v52 = vsel %vm15067_vm0, %v4197_v30, 0.0  ;;  %v5312_v47 = vadd.f32 %v5264_v35, %v5212_v59  ;;  %v5213_v36 = vadd.f32 %v11864_v22, %v5113_v9  ;;  %vm15069_vm15 = vcmp.eq.s32.totalorder %v15068_v7, 1  ;;  %v15070_v35 = vld [vmem:[#allocation30_spill] sm:$0xff]  ;;  %v6524_v59 = vld [vmem:[%s8264_s21 + $0x130] sm:$0xff]  ;;  %v6525_v9 = vld [vmem:[%s8264_s21 + $0x138] sm:$0xff] }
 0x293   : > { %4293 = vst.msk [vmem:[#allocation3 + $0x90] sm:$0xff] %vm671_vm11, %v4245_v52  ;;  %v4248_v10 = vsel %vm15069_vm15, %v4200_v0, 0.0  ;;  %v5214_v12 = vadd.f32 %v11922_v51, %v5114_v45  ;;  %v11993_v38 = vadd.f32 %v4460_v43, %v11874_v57  ;;  %v5115_v8 = vadd.f32 %v11880_v19, %v4961_v25  ;;  %v6520_v51 = vld [vmem:[%s8264_s21 + $0x110] sm:$0xff] }
 0x294   : > { %4296 = vst.msk [vmem:[#allocation3 + $0xa8] sm:$0xff] %vm671_vm11, %v4248_v10  ;;  %vm15071_vm0 = vcmp.eq.s32.totalorder %v15070_v35, 1  ;;  %v5357_v56 = vpack.c.bf16 %v5312_v47, %v11939_v26  ;;  %v5313_v20 = vadd.f32 %v5265_v61, %v5213_v36  ;;  %v5167_v0 = vmul.f32 %v11626_v18, %v11912_v60  ;;  %v6521_v61 = vld [vmem:[%s8264_s21 + $0x118] sm:$0xff] }
 0x295   : > { %v4246_v22 = vsel %vm15071_vm0, %v4198_v11, 0.0  ;;  %v5314_v57 = vadd.f32 %v11933_v27, %v5214_v12  ;;  %v12007_v19 = vmul.f32 %v11626_v18, %v11929_v46  ;;  %v12010_v43 = vadd.f32 %v4461_v54, %v11893_v39  ;;  %v6522_v39 = vld [vmem:[%s8264_s21 + $0x120] sm:$0xff] }
 0x296   : > { %4294 = vst.msk [vmem:[#allocation3 + $0x98] sm:$0xff] %vm671_vm11, %v4246_v22  ;;  %v12012_v26 = vadd.f32 %v4462_v32, %v4410_v41  ;;  %7644 = vmatprep.mubr.msk.bf16.mxu0 %vm671_vm11, %v5357_v56  ;;  %v5215_v58 = vadd.f32 %v5167_v0, %v5115_v8  ;;  %v12020_v27 = vmul.f32 %v11605_v15, %v11883_v17  ;;  %v6523_v41 = vld [vmem:[%s8264_s21 + $0x128] sm:$0xff] }
 0x297   : > { %v12024_v13 = vmul.f32 %v11608_v63, %v11943_v4  ;;  %v12028_v54 = vmul.f32 %v11617_v34, %v11885_v6  ;;  %v5358_v32 = vpack.c.bf16 %v5314_v57, %v5313_v20  ;;  %v12034_v53 = vmul.f32 %v11617_v34, %v11912_v60  ;;  %v5917_v6 = vld [vmem:[%s15072_s26 + $0x8] sm:$0xff] }
 0x298   : > { %v12038_v17 = vmul.f32 %v11626_v18, %v11902_v21  ;;  %v4411_v40 = vmul.f32 %v11584_v55, %v11916_v62  ;;  %v12049_v28 = vmul.f32 %v11584_v55, %v11918_v5  ;;  %v12053_v60 = vmul.f32 %v11605_v15, %v11927_v37  ;;  %6604 = vmatprep.mubr.f32.mxu1 %v5917_v6 }
 0x299   : > { %v7812_v30 = vpack.c.bf16 %v6521_v61, %v6520_v51  ;;  %v7814_v44 = vpack.c.bf16 %v6505_v3, %v6504_v42  ;;  %7645 = vmatmul.mubr.msk.bf16.gmra.mrb[52].mxu0 %vm671_vm11, %v5358_v32  ;;  %v4664_v62 = vld [vmem:[#allocation3 + $0xa0] sm:$0xff]  ;;  %v12060_v23 = vmul.f32 %v11605_v15, %v11870_v16  ;;  %v12064_v5 = vmul.f32 %v11617_v34, %v11929_v46  ;;  %v15077_v61 = vld [vmem:[#allocation71_spill] sm:$0xff] }
 0x29a   : > { %v12068_v37 = vmul.f32 %v11617_v34, %v11902_v21  ;;  %v7816_v45 = vpack.c.bf16 %v6523_v41, %v6522_v39  ;;  %v4356_v25 = vld [vmem:[#allocation3 + $0x8f] sm:$0xff]  ;;  %v12075_v47 = vmul.f32 %v11614_v14, %v4664_v62  ;;  %v12079_v16 = vmul.f32 %v11584_v55, %v11904_v31 }
 0x29b   : > { %v12070_v52 = vld [vmem:[#allocation3 + $0x90] sm:$0xff]  ;;  %7813 = vmatprep.subr.bf16.mxu1 %v7812_v30  ;;  %v12083_v46 = vmul.f32 %v11605_v15, %v11943_v4  ;;  %v7818_v21 = vpack.c.bf16 %v6507_v1, %v6506_v29  ;;  %v4560_v36 = vmul.f32 %v11595_v50, %v4356_v25  ;;  %v12086_v10 = vld [vmem:[#allocation3 + $0xa1] sm:$0xff]  ;;  %v12091_v8 = vmul.f32 %v11608_v63, %v4664_v62 }
 0x29c   : > { %15073 = vst [vmem:[#allocation13_spill] sm:$0xff] %v12068_v37  ;;  %v12072_v11 = vld [vmem:[#allocation3 + $0x89] sm:$0xff]  ;;  %7815 = vmatpush3.bf16.msra.mxu1 %v7814_v44  ;;  %v12094_v22 = vmul.f32 %v11605_v15, %v4664_v62  ;;  %v7820_v31 = vpack.c.bf16 %v6525_v9, %v6524_v59  ;;  %v4914_v56 = vmul.f32 %v11614_v14, %v12070_v52 }
 0x29d   : > { %15074 = vst [vmem:[#allocation14_spill] sm:$0xff] %v12083_v46  ;;  %v12088_v12 = vld [vmem:[#allocation3 + $0xa7] sm:$0xff]  ;;  %15075 = vst [vmem:[#allocation15_spill] sm:$0xff] %v12091_v8  ;;  %v12098_v4 = vld [vmem:[#allocation3 + $0x91] sm:$0xff]  ;;  %v5267_v20 = vmul.f32 %v15057_v48, %v12072_v11  ;;  %v12108_v57 = vmul.f32 %v11626_v18, %v12072_v11  ;;  %v4463_v42 = vmul.f32 %v15077_v61, %v4356_v25  ;;  %7817 = vmatprep.subr.bf16.mxu1 %v7816_v45 }
 0x29e   : > { %15076 = vst [vmem:[#allocation16_spill] sm:$0xff] %v12094_v22  ;;  %v12102_v0 = vld [vmem:[#allocation3 + $0x97] sm:$0xff]  ;;  %v12104_v51 = vld [vmem:[#allocation3 + $0x9f] sm:$0xff]  ;;  %v4608_v3 = vadd.f32 %v4560_v36, %v11993_v38  ;;  %v12120_v29 = vmul.f32 %v15057_v48, %v12086_v10  ;;  %v4563_v1 = vmul.f32 %v11595_v50, %v12088_v12  ;;  %v12126_v6 = vmul.f32 %v15057_v48, %v12098_v4  ;;  %v15078_v59 = vld [vmem:[#allocation58_spill] sm:$0xff] }
 0x29f   : > { %v4561_v39 = vmul.f32 %v11595_v50, %v12102_v0  ;;  %v12114_v41 = vld [vmem:[#allocation3 + $0x98] sm:$0xff]  ;;  %v12128_v30 = vadd.f32 %v5267_v20, %v5215_v58  ;;  %v4562_v38 = vmul.f32 %v11595_v50, %v12104_v51  ;;  %v4817_v44 = vmul.f32 %v11608_v63, %v12070_v52  ;;  %v12138_v35 = vld [vmem:[#allocation3 + $0xa8] sm:$0xff]  ;;  %v5916_v58 = vld [vmem:[%s15072_s26] sm:$0xff]  ;;  %v7602_v20 = vpop.f32.mrb[16].mxu1 }
 0x2a0   : > { %v12116_v32 = vld [vmem:[#allocation3 + $0x99] sm:$0xff]  ;;  %v4762_v9 = vadd.f32 %v15078_v59, %v4608_v3  ;;  %v4915_v45 = vmul.f32 %v11614_v14, %v12114_v41  ;;  %v4511_v36 = vadd.f32 %v4463_v42, %v4411_v40  ;;  %7819 = vmatpush3.bf16.msra.mxu1 %v7818_v21  ;;  %v12154_v40 = vmul.f32 %v11608_v63, %v12114_v41  ;;  %v3950_v42 = vpop.f32.mrb[17].mxu1  ;;  %v15080_v59 = vld [vmem:[#allocation10_spill] sm:$0xff] }
 0x2a1   : > { %v4609_v62 = vadd.f32 %v4561_v39, %v12010_v43  ;;  %v4610_v7 = vadd.f32 %v4562_v38, %v12012_v26  ;;  %v12146_v24 = vmul.f32 %v15057_v48, %v12116_v32  ;;  %v12150_v43 = vmul.f32 %v15077_v61, %v12102_v0  ;;  %7821 = vmatprep.subr.bf16.mxu1 %v7820_v31  ;;  %v15079_v3 = vld [vmem:[#allocation12_spill] sm:$0xff]  ;;  %v7603_v37 = vpop.f32.mrb[18].mxu1 }
 0x2a2   : > { %v4101_v21 = vmul.f32 %v7602_v20, %v11530_v49  ;;  %v4862_v39 = vadd.f32 %v15079_v3, %v4762_v9  ;;  %v4611_v38 = vadd.f32 %v4563_v1, %v4511_v36  ;;  %v4099_v22 = vmul.f32 %v11530_v49, %v3950_v42  ;;  %v15081_v3 = vld [vmem:[#allocation11_spill] sm:$0xff] }
 0x2a3   : > { %v4763_v26 = vadd.f32 %v15080_v59, %v4609_v62  ;;  %v4764_v8 = vadd.f32 %v12020_v27, %v4610_v7  ;;  %v4917_v46 = vmul.f32 %v11614_v14, %v12138_v35  ;;  %v12167_v20 = vmul.f32 %v11584_v55, %v4356_v25  ;;  %6605 = vmatmul.mubr.f32.vlgmr.msra.gmra.mrb[48].mxu1 %v5916_v58  ;;  %v3953_v62 = vpop.f32.mrb[19].mxu1  ;;  %v5919_v7 = vld [vmem:[%s15072_s26 + $0x18] sm:$0xff] }
 0x2a4   : > { %v4155_v9 = vadd.f32 %v11543_v33, %v4101_v21  ;;  %v4102_v1 = vmul.f32 %v7603_v37, %v11530_v49  ;;  %v4962_v36 = vadd.f32 %v4914_v56, %v4862_v39  ;;  %7823 = vmatpush3.bf16.msra.mxu1 %v7820_v31  ;;  %v4153_v27 = vadd.f32 %v11543_v33, %v4099_v22  ;;  %v5923_v37 = vld [vmem:[%s15072_s26 + $0x38] sm:$0xff]  ;;  %v15082_v21 = vld [vmem:[#allocation9_spill] sm:$0xff] }
 0x2a5   : > { %v4863_v59 = vadd.f32 %v15081_v3, %v4763_v26  ;;  %v4100_v42 = vmul.f32 %v11530_v49, %v3953_v62  ;;  %v4864_v25 = vadd.f32 %v12024_v13, %v4764_v8  ;;  %v4765_v58 = vadd.f32 %v12053_v60, %v4611_v38  ;;  %6609 = vmatprep.mubr.f32.mxu1 %v5920_v2  ;;  %v15083_v13 = vld [vmem:[#allocation35_spill] sm:$0xff] }
 0x2a6   : > { %v4203_v56 = vmax.f32 %v4155_v9, 0.0  ;;  %v4156_v31 = vadd.f32 %v11543_v33, %v4102_v1  ;;  %v5116_v39 = vadd.f32 %v15082_v21, %v4962_v36  ;;  %v4201_v3 = vmax.f32 %v4153_v27, 0.0  ;;  %v5929_v21 = vld [vmem:[%s15072_s26 + $0x68] sm:$0xff] }
 0x2a7   : > { %v4963_v26 = vadd.f32 %v4915_v45, %v4863_v59  ;;  %v4154_v22 = vadd.f32 %v11543_v33, %v4100_v42  ;;  %v4964_v49 = vadd.f32 %v12075_v47, %v4864_v25  ;;  %v4865_v62 = vadd.f32 %v4817_v44, %v4765_v58  ;;  %6610 = vmatmul.mubr.f32.gmra.mrb[50].mxu1 %v5919_v7  ;;  %v5922_v45 = vld [vmem:[%s15072_s26 + $0x30] sm:$0xff]  ;;  %v15085_v33 = vld [vmem:[#allocation33_spill] sm:$0xff] }
 0x2a8   : > { %vm15084_vm15 = vcmp.eq.s32.totalorder %v15083_v13, 1  ;;  %v4204_v60 = vmax.f32 %v4156_v31, 0.0  ;;  %v5216_v8 = vadd.f32 %v12007_v19, %v5116_v39  ;;  %6614 = vmatprep.mubr.f32.mxu1 %v5923_v37  ;;  %vm15086_vm13 = vcmp.eq.s32.totalorder %v15085_v33, 1  ;;  %v5926_v19 = vld [vmem:[%s15072_s26 + $0x50] sm:$0xff]  ;;  %v6527_v31 = vld [vmem:[%s8264_s21 + $0x148] sm:$0xff] }
 0x2a9   : > { %v4251_v2 = vsel %vm15084_vm15, %v4203_v56, 0.0  ;;  %v5117_v38 = vadd.f32 %v12028_v54, %v4963_v26  ;;  %v4249_v47 = vsel %vm15086_vm13, %v4201_v3, 0.0  ;;  %v4202_v44 = vmax.f32 %v4154_v22, 0.0  ;;  %v15087_v54 = vld [vmem:[#allocation36_spill] sm:$0xff] }
 0x2aa   : > { %4299 = vst.msk [vmem:[#allocation3 + $0xc0] sm:$0xff] %vm671_vm11, %v4251_v2  ;;  %v5118_v9 = vadd.f32 %v12034_v53, %v4964_v49  ;;  %v4965_v1 = vadd.f32 %v4917_v46, %v4865_v62  ;;  %4297 = vst.msk [vmem:[#allocation3 + $0xb0] sm:$0xff] %vm671_vm11, %v4249_v47  ;;  %vm15088_vm0 = vcmp.eq.s32.totalorder %v15087_v54, 1  ;;  %v5316_v59 = vadd.f32 %v12126_v6, %v5216_v8  ;;  %v15089_v53 = vld [vmem:[#allocation34_spill] sm:$0xff]  ;;  %v6529_v3 = vld [vmem:[%s8264_s21 + $0x158] sm:$0xff] }
 0x2ab   : > { %v4252_v36 = vsel %vm15088_vm0, %v4204_v60, 0.0  ;;  %v5217_v7 = vadd.f32 %v12038_v17, %v5117_v38  ;;  %v4465_v27 = vmul.f32 %v15077_v61, %v12104_v51  ;;  %vm15090_vm15 = vcmp.eq.s32.totalorder %v15089_v53, 1  ;;  %6615 = vmatmul.mubr.f32.gmra.mrb[52].mxu1 %v5922_v45 }
 0x2ac   : > { %4300 = vst.msk [vmem:[#allocation3 + $0xc8] sm:$0xff] %vm671_vm11, %v4252_v36  ;;  %v4250_v46 = vsel %vm15090_vm15, %v4202_v44, 0.0  ;;  %v5218_v42 = vadd.f32 %v12108_v57, %v5118_v9  ;;  %v5119_v25 = vadd.f32 %v12064_v5, %v4965_v1  ;;  %v4466_v58 = vmul.f32 %v15077_v61, %v12088_v12  ;;  %6619 = vmatprep.mubr.f32.mxu1 %v5926_v19  ;;  %v5925_v5 = vld [vmem:[%s15072_s26 + $0x48] sm:$0xff] }
 0x2ad   : > { %4298 = vst.msk [vmem:[#allocation3 + $0xb8] sm:$0xff] %vm671_vm11, %v4250_v46  ;;  %v5359_v17 = vpack.c.bf16 %v5316_v59, %v12128_v30  ;;  %v5317_v6 = vadd.f32 %v12146_v24, %v5217_v7  ;;  %v4512_v37 = vadd.f32 %v12150_v43, %v12049_v28  ;;  %v5171_v57 = vmul.f32 %v11626_v18, %v12098_v4  ;;  %v6526_v43 = vld [vmem:[%s8264_s21 + $0x140] sm:$0xff] }
 0x2ae   : > { %v5318_v56 = vadd.f32 %v12120_v29, %v5218_v42  ;;  %v12227_v30 = vmul.f32 %v11626_v18, %v12116_v32  ;;  %v4513_v24 = vadd.f32 %v4465_v27, %v12079_v16  ;;  %v12232_v28 = vmul.f32 %v11605_v15, %v12070_v52  ;;  %v6528_v16 = vld [vmem:[%s8264_s21 + $0x150] sm:$0xff] }
 0x2af   : > { %7648 = vmatprep.mubr.msk.bf16.mxu0 %vm671_vm11, %v5359_v17  ;;  %v5219_v39 = vadd.f32 %v5171_v57, %v5119_v25  ;;  %v12241_v29 = vadd.f32 %v4466_v58, %v12167_v20  ;;  %v12245_v26 = vmul.f32 %v11608_v63, %v12138_v35  ;;  %v12249_v52 = vmul.f32 %v11617_v34, %v12072_v11 }
 0x2b0   : > { %v5360_v22 = vpack.c.bf16 %v5318_v56, %v5317_v6  ;;  %v12255_v49 = vmul.f32 %v11617_v34, %v12098_v4  ;;  %v12259_v62 = vmul.f32 %v11626_v18, %v12086_v10  ;;  %v4415_v20 = vmul.f32 %v11584_v55, %v12102_v0  ;;  %6620 = vmatmul.mubr.f32.gmra.mrb[54].mxu1 %v5925_v5 }
 0x2b1   : > { %v4668_v2 = vld [vmem:[#allocation3 + $0xc0] sm:$0xff]  ;;  %v12265_v11 = vmul.f32 %v11584_v55, %v12104_v51  ;;  %v12269_v60 = vmul.f32 %v11605_v15, %v12114_v41  ;;  %v12273_v4 = vmul.f32 %v11617_v34, %v12116_v32  ;;  %v7824_v8 = vpack.c.bf16 %v6527_v31, %v6526_v43  ;;  %6624 = vmatprep.mubr.f32.mxu1 %v5929_v21  ;;  %v12276_v38 = vld [vmem:[#allocation3 + $0xaf] sm:$0xff] }
 0x2b2   : > { %7649 = vmatmul.mubr.msk.bf16.gmra.mrb[56].mxu0 %vm671_vm11, %v5360_v22  ;;  %v12278_v0 = vld [vmem:[#allocation3 + $0xb0] sm:$0xff]  ;;  %v12284_v51 = vmul.f32 %v11617_v34, %v12086_v10  ;;  %v12288_v41 = vmul.f32 %v11584_v55, %v12088_v12  ;;  %v12292_v32 = vmul.f32 %v11605_v15, %v12138_v35  ;;  %v7828_v47 = vpack.c.bf16 %v6529_v3, %v6528_v16  ;;  %v5928_v35 = vld [vmem:[%s15072_s26 + $0x60] sm:$0xff] }
 0x2b3   : > { %v12280_v45 = vld [vmem:[#allocation3 + $0xa9] sm:$0xff]  ;;  %v4564_v44 = vmul.f32 %v11595_v50, %v12276_v38  ;;  %v12297_v9 = vmul.f32 %v11614_v14, %v4668_v2  ;;  %v12299_v1 = vld [vmem:[#allocation3 + $0xc1] sm:$0xff]  ;;  %v12304_v10 = vmul.f32 %v11608_v63, %v4668_v2  ;;  %7825 = vmatprep.subr.bf16.mxu1 %v7824_v8  ;;  %v12307_v12 = vmul.f32 %v11605_v15, %v4668_v2 }
 0x2b4   : > { %15091 = vst [vmem:[#allocation53_spill] sm:$0xff] %v12284_v51  ;;  %v12301_v19 = vld [vmem:[#allocation3 + $0xc7] sm:$0xff]  ;;  %v4918_v36 = vmul.f32 %v11614_v14, %v12278_v0  ;;  %v12314_v59 = vld [vmem:[#allocation3 + $0xb1] sm:$0xff]  ;;  %v5271_v7 = vmul.f32 %v15057_v48, %v12280_v45  ;;  %v12320_v46 = vld [vmem:[#allocation3 + $0xbf] sm:$0xff]  ;;  %v12324_v42 = vmul.f32 %v11626_v18, %v12280_v45  ;;  %v4467_v25 = vmul.f32 %v15077_v61, %v12276_v38  ;;  %v7606_v3 = vpop.f32.mrb[20].mxu1 }
 0x2b5   : > { %15092 = vst [vmem:[#allocation54_spill] sm:$0xff] %v12307_v12  ;;  %v12318_v27 = vld [vmem:[#allocation3 + $0xb7] sm:$0xff]  ;;  %7827 = vmatpush3.bf16.msra.mxu1 %v7824_v8  ;;  %v4612_v58 = vadd.f32 %v4564_v44, %v4512_v37  ;;  %v12336_v5 = vmul.f32 %v15057_v48, %v12299_v1  ;;  %v4567_v56 = vmul.f32 %v11595_v50, %v12301_v19  ;;  %v5932_v43 = vld [vmem:[%s15072_s26 + $0x80] sm:$0xff]  ;;  %v12356_v53 = vld [vmem:[#allocation3 + $0xc8] sm:$0xff] }
 0x2b6   : > { %v4565_v17 = vmul.f32 %v11595_v50, %v12318_v27  ;;  %v12330_v6 = vld [vmem:[#allocation3 + $0xb8] sm:$0xff]  ;;  %7829 = vmatprep.subr.bf16.mxu1 %v7828_v47  ;;  %v12345_v37 = vmul.f32 %v15057_v48, %v12314_v59  ;;  %v12347_v31 = vadd.f32 %v5271_v7, %v5219_v39  ;;  %v4566_v21 = vmul.f32 %v11595_v50, %v12320_v46  ;;  %v12364_v7 = vld [vmem:[%s14698_s9] ss:$0 sm:$0xff] }
 0x2b7   : > { %v12332_v57 = vld [vmem:[#allocation3 + $0xb9] sm:$0xff]  ;;  %v4821_v16 = vmul.f32 %v11608_v63, %v12278_v0  ;;  %6625 = vmatmul.mubr.f32.gmra.mrb[56].mxu1 %v5928_v35  ;;  %v4766_v22 = vadd.f32 %v12060_v23, %v4612_v58  ;;  %v4919_v8 = vmul.f32 %v11614_v14, %v12330_v6  ;;  %v4515_v44 = vadd.f32 %v4467_v25, %v4415_v20  ;;  %v3966_v23 = vpop.f32.mrb[21].mxu1 }
 0x2b8   : > { %v4613_v2 = vadd.f32 %v4565_v17, %v4513_v24  ;;  %6629 = vmatprep.mubr.f32.mxu1 %v5932_v43  ;;  %v5931_v39 = vld [vmem:[%s15072_s26 + $0x78] sm:$0xff]  ;;  %v4105_v35 = vmul.f32 %v12364_v7, %v7606_v3  ;;  %v4614_v24 = vadd.f32 %v4566_v21, %v12241_v29  ;;  %v5273_v20 = vmul.f32 %v15057_v48, %v12332_v57  ;;  %v7607_v43 = vpop.f32.mrb[22].mxu1  ;;  %v15093_v3 = vld [vmem:[#allocation14_spill] sm:$0xff]  ;;  %v12381_v48 = vld [vmem:[%s14699_s10] ss:$0 sm:$0xff] }
 0x2b9   : > { %v4468_v25 = vmul.f32 %v15077_v61, %v12318_v27  ;;  %7831 = vmatpush3.bf16.msra.mxu1 %v7828_v47  ;;  %v5935_v58 = vld [vmem:[%s15072_s26 + $0x98] sm:$0xff]  ;;  %v4103_v17 = vmul.f32 %v12364_v7, %v3966_v23  ;;  %v4866_v54 = vadd.f32 %v12154_v40, %v4766_v22  ;;  %v4615_v13 = vadd.f32 %v4567_v56, %v4515_v44  ;;  %v3969_v21 = vpop.f32.mrb[23].mxu1 }
 0x2ba   : > { %v4767_v33 = vadd.f32 %v15093_v3, %v4613_v2  ;;  %v4159_v29 = vadd.f32 %v12381_v48, %v4105_v35  ;;  %v4106_v47 = vmul.f32 %v12364_v7, %v7607_v43  ;;  %v4768_v12 = vadd.f32 %v12232_v28, %v4614_v24  ;;  %v15094_v2 = vld [vmem:[#allocation15_spill] sm:$0xff] }
 0x2bb   : > { %v4921_v23 = vmul.f32 %v11614_v14, %v12356_v53  ;;  %6630 = vmatmul.mubr.f32.gmra.mrb[58].mxu1 %v5931_v39  ;;  %v4157_v40 = vadd.f32 %v12381_v48, %v4103_v17  ;;  %v4104_v56 = vmul.f32 %v12364_v7, %v3969_v21  ;;  %v4966_v22 = vadd.f32 %v4918_v36, %v4866_v54  ;;  %v5934_v35 = vld [vmem:[%s15072_s26 + $0x90] sm:$0xff] }
 0x2bc   : > { %v4867_v44 = vadd.f32 %v15094_v2, %v4767_v33  ;;  %6634 = vmatprep.mubr.f32.mxu1 %v5935_v58  ;;  %v4207_v43 = vmax.f32 %v4159_v29, 0.0  ;;  %v4160_v3 = vadd.f32 %v12381_v48, %v4106_v47  ;;  %v4868_v28 = vadd.f32 %v12245_v26, %v4768_v12  ;;  %v5938_v39 = vld [vmem:[%s15072_s26 + $0xb0] sm:$0xff]  ;;  %v15095_v33 = vld [vmem:[#allocation13_spill] sm:$0xff] }
 0x2bd   : > { %v4769_v24 = vadd.f32 %v12269_v60, %v4615_v13  ;;  %v4205_v17 = vmax.f32 %v4157_v40, 0.0  ;;  %v4158_v54 = vadd.f32 %v12381_v48, %v4104_v56  ;;  %v5120_v36 = vadd.f32 %v15095_v33, %v4966_v22  ;;  %v15096_v21 = vld [vmem:[#allocation39_spill] sm:$0xff]  ;;  %v15098_v13 = vld [vmem:[#allocation37_spill] sm:$0xff] }
 0x2be   : > { %v4967_v58 = vadd.f32 %v4919_v8, %v4867_v44  ;;  %vm15097_vm13 = vcmp.eq.s32.totalorder %v15096_v21, 1  ;;  %v4208_v29 = vmax.f32 %v4160_v3, 0.0  ;;  %v4968_v47 = vadd.f32 %v12297_v9, %v4868_v28  ;;  %v5937_v8 = vld [vmem:[%s15072_s26 + $0xa8] sm:$0xff]  ;;  %v15100_v9 = vld [vmem:[#allocation40_spill] sm:$0xff] }
 0x2bf   : > { %v4255_v2 = vsel %vm15097_vm13, %v4207_v43, 0.0  ;;  %v4869_v51 = vadd.f32 %v4821_v16, %v4769_v24  ;;  %6635 = vmatmul.mubr.f32.gmra.mrb[60].mxu1 %v5934_v35  ;;  %vm15099_vm0 = vcmp.eq.s32.totalorder %v15098_v13, 1  ;;  %v4206_v60 = vmax.f32 %v4158_v54, 0.0 }
 0x2c0   : > { %4303 = vst.msk [vmem:[#allocation3 + $0xe0] sm:$0xff] %vm671_vm11, %v4255_v2  ;;  %v4253_v26 = vsel %vm15099_vm0, %v4205_v17, 0.0  ;;  %v5220_v12 = vadd.f32 %v12227_v30, %v5120_v36  ;;  %v5121_v40 = vadd.f32 %v12249_v52, %v4967_v58  ;;  %6639 = vmatprep.mubr.f32.mxu1 %v5938_v39  ;;  %vm15101_vm15 = vcmp.eq.s32.totalorder %v15100_v9, 1  ;;  %v5918_v30 = vld [vmem:[%s15072_s26 + $0x10] sm:$0xff]  ;;  %v15102_v52 = vld [vmem:[#allocation38_spill] sm:$0xff] }
 0x2c1   : > { %4301 = vst.msk [vmem:[#allocation3 + $0xd0] sm:$0xff] %vm671_vm11, %v4253_v26  ;;  %v4256_v16 = vsel %vm15101_vm15, %v4208_v29, 0.0  ;;  %v5122_v56 = vadd.f32 %v12255_v49, %v4968_v47  ;;  %v12419_v22 = vmul.f32 %v11608_v63, %v12330_v6  ;;  %v4969_v44 = vadd.f32 %v4921_v23, %v4869_v51 }
 0x2c2   : > { %4304 = vst.msk [vmem:[#allocation3 + $0xe8] sm:$0xff] %vm671_vm11, %v4256_v16  ;;  %vm15103_vm13 = vcmp.eq.s32.totalorder %v15102_v52, 1  ;;  %v5320_v43 = vadd.f32 %v12345_v37, %v5220_v12  ;;  %v5221_v3 = vadd.f32 %v12259_v62, %v5121_v40  ;;  %v4418_v49 = vmul.f32 %v11584_v55, %v12276_v38  ;;  %v12514_v16 = vld [vmem:[%s14700_s11 + $0x8] ss:$0 sm:$0xff] }
 0x2c3   : > { %v4254_v35 = vsel %vm15103_vm13, %v4206_v60, 0.0  ;;  %v5222_v51 = vadd.f32 %v12324_v42, %v5122_v56  ;;  %v5123_v23 = vadd.f32 %v12273_v4, %v4969_v44  ;;  %v4469_v28 = vmul.f32 %v15077_v61, %v12320_v46  ;;  %6640 = vmatmul.mubr.f32.gmra.mrb[62].mxu1 %v5937_v8  ;;  %15106 = vst [vmem:[#allocation57_spill] sm:$0xff] %v12514_v16 }
 0x2c4   : > { %4302 = vst.msk [vmem:[#allocation3 + $0xd8] sm:$0xff] %vm671_vm11, %v4254_v35  ;;  %v4470_v24 = vmul.f32 %v15077_v61, %v12301_v19  ;;  %v5361_v37 = vpack.c.bf16 %v5320_v43, %v12347_v31  ;;  %v5321_v39 = vadd.f32 %v5273_v20, %v5221_v3  ;;  %v4516_v62 = vadd.f32 %v4468_v25, %v12265_v11 }
 0x2c5   : > { %v5175_v38 = vmul.f32 %v11626_v18, %v12314_v59  ;;  %7720 = vmatprep.mubr.f32.mxu1 %v5918_v30  ;;  %v5322_v42 = vadd.f32 %v12336_v5, %v5222_v51  ;;  %v12445_v4 = vmul.f32 %v11626_v18, %v12332_v57  ;;  %v4724_v17 = vmul.f32 %v11605_v15, %v12278_v0 }
 0x2c6   : > { %v12451_v54 = vmul.f32 %v11608_v63, %v12356_v53  ;;  %7652 = vmatprep.mubr.msk.bf16.mxu0 %vm671_vm11, %v5361_v37  ;;  %v4517_v31 = vadd.f32 %v4469_v28, %v12288_v41  ;;  %v4518_v20 = vadd.f32 %v4470_v24, %v4418_v49  ;;  %v12457_v5 = vmul.f32 %v11617_v34, %v12280_v45 }
 0x2c7   : > { %v5223_v11 = vadd.f32 %v5175_v38, %v5123_v23  ;;  %v5362_v25 = vpack.c.bf16 %v5322_v42, %v5321_v39  ;;  %v12459_v33 = vld [vmem:[#allocation3 + $0xe0] sm:$0xff]  ;;  %v12463_v0 = vmul.f32 %v11617_v34, %v12314_v59  ;;  %v12467_v36 = vmul.f32 %v11626_v18, %v12299_v1  ;;  %v15107_v39 = vld [vmem:[#allocation16_spill] sm:$0xff] }
 0x2c8   : > { %v4419_v58 = vmul.f32 %v11584_v55, %v12318_v27  ;;  %v4364_v41 = vld [vmem:[#allocation3 + $0xcf] sm:$0xff]  ;;  %v12477_v45 = vmul.f32 %v11614_v14, %v12459_v33  ;;  %v12481_v59 = vmul.f32 %v11584_v55, %v12320_v46  ;;  %v4725_v47 = vmul.f32 %v11605_v15, %v12330_v6 }
 0x2c9   : > { %v12471_v2 = vld [vmem:[#allocation3 + $0xd0] sm:$0xff]  ;;  %v12487_v26 = vmul.f32 %v11617_v34, %v12332_v57  ;;  %7653 = vmatmul.mubr.msk.bf16.gmra.mrb[60].mxu0 %vm671_vm11, %v5362_v25  ;;  %v4568_v27 = vmul.f32 %v11595_v50, %v4364_v41  ;;  %v12491_v60 = vld [vmem:[#allocation3 + $0xe1] sm:$0xff]  ;;  %v12497_v40 = vmul.f32 %v11617_v34, %v12299_v1  ;;  %v12501_v46 = vmul.f32 %v11584_v55, %v12301_v19 }
 0x2ca   : > { %v12473_v29 = vld [vmem:[#allocation3 + $0xc9] sm:$0xff]  ;;  %v12505_v6 = vmul.f32 %v11605_v15, %v12356_v53  ;;  %v4922_v57 = vmul.f32 %v11614_v14, %v12471_v2  ;;  %v4471_v44 = vmul.f32 %v15077_v61, %v4364_v41  ;;  %v12535_v49 = vmul.f32 %v12514_v16, %v12491_v60 }
 0x2cb   : > { %v12493_v12 = vld [vmem:[#allocation3 + $0xe7] sm:$0xff]  ;;  %15104 = vst [vmem:[#allocation59_spill] sm:$0xff] %v12497_v40  ;;  %v12509_v8 = vld [vmem:[#allocation3 + $0xd1] sm:$0xff]  ;;  %v5275_v1 = vmul.f32 %v12514_v16, %v12473_v29  ;;  %v12520_v19 = vld [vmem:[#allocation3 + $0xdf] sm:$0xff]  ;;  %v12524_v53 = vmul.f32 %v11626_v18, %v12473_v29  ;;  %v4616_v30 = vadd.f32 %v4568_v27, %v4516_v62  ;;  %v4825_v37 = vmul.f32 %v11608_v63, %v12471_v2  ;;  %v7610_v52 = vpop.f32.mrb[24].mxu1 }
 0x2cc   : > { %15105 = vst [vmem:[#allocation55_spill] sm:$0xff] %v12505_v6  ;;  %v12518_v56 = vld [vmem:[#allocation3 + $0xd7] sm:$0xff]  ;;  %v4571_v51 = vmul.f32 %v11595_v50, %v12493_v12  ;;  %v5276_v23 = vmul.f32 %v12514_v16, %v12509_v8  ;;  %v4570_v24 = vmul.f32 %v11595_v50, %v12520_v19  ;;  %v4519_v25 = vadd.f32 %v4471_v44, %v4419_v58  ;;  %v12550_v27 = vld [vmem:[#allocation3 + $0xe8] sm:$0xff] }
 0x2cd   : > { %v4569_v35 = vmul.f32 %v11595_v50, %v12518_v56  ;;  %v12529_v43 = vld [vmem:[#allocation3 + $0xd8] sm:$0xff]  ;;  %v12541_v28 = vadd.f32 %v5275_v1, %v5223_v11  ;;  %v4770_v62 = vadd.f32 %v15107_v39, %v4616_v30  ;;  %v4472_v1 = vmul.f32 %v15077_v61, %v12518_v56  ;;  %v3982_v30 = vpop.f32.mrb[25].mxu1 }
 0x2ce   : > { %v12531_v3 = vld [vmem:[#allocation3 + $0xd9] sm:$0xff]  ;;  %v4923_v42 = vmul.f32 %v11614_v14, %v12529_v43  ;;  %v4618_v9 = vadd.f32 %v4570_v24, %v4518_v20  ;;  %v12558_v13 = vmul.f32 %v11608_v63, %v12529_v43  ;;  %v4619_v44 = vadd.f32 %v4571_v51, %v4519_v25  ;;  %v7611_v24 = vpop.f32.mrb[26].mxu1 }
 0x2cf   : > { %v4617_v38 = vadd.f32 %v4569_v35, %v4517_v31  ;;  %v5277_v11 = vmul.f32 %v12514_v16, %v12531_v3  ;;  %v4109_v31 = vmul.f32 %v12364_v7, %v7610_v52  ;;  %v4870_v35 = vadd.f32 %v12419_v22, %v4770_v62  ;;  %v3985_v52 = vpop.f32.mrb[27].mxu1  ;;  %v15109_v25 = vld [vmem:[#allocation53_spill] sm:$0xff] }
 0x2d0   : > { %15108 = vst [vmem:[#allocation52_spill] sm:$0xff] %v12558_v13  ;;  %v4107_v20 = vmul.f32 %v12364_v7, %v3982_v30  ;;  %v4772_v39 = vadd.f32 %v4724_v17, %v4618_v9  ;;  %v4925_v21 = vmul.f32 %v11614_v14, %v12550_v27  ;;  %v4422_v40 = vmul.f32 %v11584_v55, %v4364_v41 }
 0x2d1   : > { %v4771_v58 = vadd.f32 %v12292_v32, %v4617_v38  ;;  %v4163_v6 = vadd.f32 %v12381_v48, %v4109_v31  ;;  %v4110_v13 = vmul.f32 %v12364_v7, %v7611_v24  ;;  %v4970_v16 = vadd.f32 %v4922_v57, %v4870_v35 }
 0x2d2   : > { %v4161_v32 = vadd.f32 %v12381_v48, %v4107_v20  ;;  %v4108_v51 = vmul.f32 %v12364_v7, %v3985_v52  ;;  %v4872_v62 = vadd.f32 %v12451_v54, %v4772_v39  ;;  %v4773_v9 = vadd.f32 %v4725_v47, %v4619_v44  ;;  %v15116_v39 = vld [vmem:[#allocation42_spill] sm:$0xff] }
 0x2d3   : > { %v4871_v22 = vadd.f32 %v12304_v10, %v4771_v58  ;;  %v4211_v17 = vmax.f32 %v4163_v6, 0.0  ;;  %v4164_v38 = vadd.f32 %v12381_v48, %v4110_v13  ;;  %v5124_v41 = vadd.f32 %v15109_v25, %v4970_v16  ;;  %v15110_v10 = vld [vmem:[#allocation43_spill] sm:$0xff]  ;;  %v15112_v13 = vld [vmem:[#allocation41_spill] sm:$0xff] }
 0x2d4   : > { %v4209_v31 = vmax.f32 %v4161_v32, 0.0  ;;  %v4162_v24 = vadd.f32 %v12381_v48, %v4108_v51  ;;  %v4972_v57 = vadd.f32 %v12477_v45, %v4872_v62  ;;  %v4873_v35 = vadd.f32 %v4825_v37, %v4773_v9  ;;  %v15114_v45 = vld [vmem:[#allocation44_spill] sm:$0xff]  ;;  %v6530_v9 = vld [vmem:[%s8264_s21 + $0x160] sm:$0xff]  ;;  %v6532_v25 = vld [vmem:[%s8264_s21 + $0x170] sm:$0xff] }
 0x2d5   : > { %v4971_v30 = vadd.f32 %v4923_v42, %v4871_v22  ;;  %vm15111_vm0 = vcmp.eq.s32.totalorder %v15110_v10, 1  ;;  %v4212_v20 = vmax.f32 %v4164_v38, 0.0  ;;  %v5224_v52 = vadd.f32 %v12445_v4, %v5124_v41  ;;  %v6533_v41 = vld [vmem:[%s8264_s21 + $0x178] sm:$0xff] }
 0x2d6   : > { %v4259_v58 = vsel %vm15111_vm0, %v4211_v17, 0.0  ;;  %vm15113_vm15 = vcmp.eq.s32.totalorder %v15112_v13, 1  ;;  %v4210_v6 = vmax.f32 %v4162_v24, 0.0  ;;  %v5126_v16 = vadd.f32 %v12463_v0, %v4972_v57  ;;  %v6531_v17 = vld [vmem:[%s8264_s21 + $0x168] sm:$0xff] }
 0x2d7   : > { %v5125_v54 = vadd.f32 %v12457_v5, %v4971_v30  ;;  %4307 = vst.msk [vmem:[#allocation3 + $0x100] sm:$0xff] %vm671_vm11, %v4259_v58  ;;  %v4257_v47 = vsel %vm15113_vm15, %v4209_v31, 0.0  ;;  %v4973_v42 = vadd.f32 %v4925_v21, %v4873_v35  ;;  %vm15115_vm13 = vcmp.eq.s32.totalorder %v15114_v45, 1 }
 0x2d8   : > { %4305 = vst.msk [vmem:[#allocation3 + $0xf0] sm:$0xff] %vm671_vm11, %v4257_v47  ;;  %v4260_v37 = vsel %vm15115_vm13, %v4212_v20, 0.0  ;;  %v5324_v44 = vadd.f32 %v5276_v23, %v5224_v52  ;;  %v4473_v5 = vmul.f32 %v15077_v61, %v12520_v19  ;;  %vm15117_vm0 = vcmp.eq.s32.totalorder %v15116_v39, 1 }
 0x2d9   : > { %v5225_v4 = vadd.f32 %v12467_v36, %v5125_v54  ;;  %4308 = vst.msk [vmem:[#allocation3 + $0x108] sm:$0xff] %vm671_vm11, %v4260_v37  ;;  %v4258_v22 = vsel %vm15117_vm0, %v4210_v6, 0.0  ;;  %v5226_v21 = vadd.f32 %v12524_v53, %v5126_v16  ;;  %v5127_v0 = vadd.f32 %v12487_v26, %v4973_v42  ;;  %v15120_v37 = vld [vmem:[#allocation57_spill] sm:$0xff] }
 0x2da   : > { %v4474_v32 = vmul.f32 %v15077_v61, %v12493_v12  ;;  %4306 = vst.msk [vmem:[#allocation3 + $0xf8] sm:$0xff] %vm671_vm11, %v4258_v22  ;;  %v5363_v36 = vpack.c.bf16 %v5324_v44, %v12541_v28  ;;  %v4520_v51 = vadd.f32 %v4472_v1, %v12481_v59  ;;  %v5179_v62 = vmul.f32 %v11626_v18, %v12509_v8 }
 0x2db   : > { %v5325_v23 = vadd.f32 %v5277_v11, %v5225_v4  ;;  %v5326_v53 = vadd.f32 %v12535_v49, %v5226_v21  ;;  %v12608_v26 = vmul.f32 %v11626_v18, %v12531_v3  ;;  %v4521_v38 = vadd.f32 %v4473_v5, %v12501_v46 }
 0x2dc   : > { %v12613_v28 = vmul.f32 %v11605_v15, %v12471_v2  ;;  %7656 = vmatprep.mubr.msk.bf16.mxu0 %vm671_vm11, %v5363_v36  ;;  %v5227_v59 = vadd.f32 %v5179_v62, %v5127_v0  ;;  %v4522_v11 = vadd.f32 %v4474_v32, %v4422_v40  ;;  %v12618_v1 = vmul.f32 %v11608_v63, %v12459_v33 }
 0x2dd   : > { %v12622_v49 = vmul.f32 %v11608_v63, %v12550_v27  ;;  %v5364_v30 = vpack.c.bf16 %v5326_v53, %v5325_v23  ;;  %v12628_v46 = vmul.f32 %v11617_v34, %v12473_v29  ;;  %v12632_v2 = vmul.f32 %v11617_v34, %v12509_v8  ;;  %v15121_v53 = vld [vmem:[#allocation54_spill] sm:$0xff] }
 0x2de   : > { %v7832_v40 = vpack.c.bf16 %v6531_v17, %v6530_v9  ;;  %v12634_v31 = vld [vmem:[#allocation3 + $0x100] sm:$0xff]  ;;  %v12638_v24 = vmul.f32 %v11626_v18, %v12491_v60  ;;  %v4423_v57 = vmul.f32 %v11584_v55, %v12518_v56  ;;  %v12644_v35 = vmul.f32 %v11584_v55, %v12520_v19 }
 0x2df   : > { %v12648_v29 = vmul.f32 %v11605_v15, %v12529_v43  ;;  %7657 = vmatmul.mubr.msk.bf16.gmra.mrb[64].mxu0 %vm671_vm11, %v5364_v30  ;;  %v4368_v8 = vld [vmem:[#allocation3 + $0xef] sm:$0xff]  ;;  %v12657_v52 = vmul.f32 %v11605_v15, %v12459_v33  ;;  %v12661_v56 = vmul.f32 %v11617_v34, %v12531_v3  ;;  %v7836_v19 = vpack.c.bf16 %v6533_v41, %v6532_v25 }
 0x2e0   : > { %v12651_v58 = vld [vmem:[#allocation3 + $0xf0] sm:$0xff]  ;;  %7833 = vmatprep.subr.bf16.mxu1 %v7832_v40  ;;  %v4572_v43 = vmul.f32 %v11595_v50, %v4368_v8  ;;  %v4928_v54 = vmul.f32 %v11614_v14, %v12634_v31  ;;  %v12666_v47 = vld [vmem:[#allocation3 + $0x101] sm:$0xff]  ;;  %v12672_v16 = vmul.f32 %v11617_v34, %v12491_v60  ;;  %v12676_v33 = vmul.f32 %v11584_v55, %v12493_v12 }
 0x2e1   : > { %v12653_v20 = vld [vmem:[#allocation3 + $0xe9] sm:$0xff]  ;;  %15118 = vst [vmem:[#allocation71_spill] sm:$0xff] %v12657_v52  ;;  %7835 = vmatpush3.bf16.msra.mxu1 %v7832_v40  ;;  %v4926_v3 = vmul.f32 %v11614_v14, %v12651_v58  ;;  %v12680_v42 = vld [vmem:[#allocation3 + $0xf1] sm:$0xff]  ;;  %v12686_v5 = vld [vmem:[#allocation3 + $0xff] sm:$0xff]  ;;  %v4475_v22 = vmul.f32 %v15077_v61, %v4368_v8  ;;  %v12701_v36 = vmul.f32 %v15120_v37, %v12666_v47 }
 0x2e2   : > { %v12668_v6 = vld [vmem:[#allocation3 + $0x107] sm:$0xff]  ;;  %15119 = vst [vmem:[#allocation58_spill] sm:$0xff] %v12672_v16  ;;  %v5279_v44 = vmul.f32 %v15120_v37, %v12653_v20  ;;  %v12684_v4 = vld [vmem:[#allocation3 + $0xf7] sm:$0xff]  ;;  %v12690_v60 = vmul.f32 %v11626_v18, %v12653_v20  ;;  %7837 = vmatprep.subr.bf16.mxu1 %v7836_v19  ;;  %v4620_v12 = vadd.f32 %v4572_v43, %v4520_v51  ;;  %v7614_v39 = vpop.f32.mrb[28].mxu1 }
 0x2e3   : > { %v4573_v21 = vmul.f32 %v11595_v50, %v12684_v4  ;;  %v12695_v0 = vld [vmem:[#allocation3 + $0xf8] sm:$0xff]  ;;  %v4575_v23 = vmul.f32 %v11595_v50, %v12668_v6  ;;  %v5280_v62 = vmul.f32 %v15120_v37, %v12680_v42  ;;  %v4574_v51 = vmul.f32 %v11595_v50, %v12686_v5  ;;  %v12716_v43 = vld [vmem:[#allocation3 + $0x108] sm:$0xff] }
 0x2e4   : > { %v12697_v32 = vld [vmem:[#allocation3 + $0xf9] sm:$0xff]  ;;  %v12707_v9 = vadd.f32 %v5279_v44, %v5227_v59  ;;  %v4829_v17 = vmul.f32 %v11608_v63, %v12651_v58  ;;  %v4774_v25 = vadd.f32 %v15121_v53, %v4620_v12  ;;  %v4927_v30 = vmul.f32 %v11614_v14, %v12695_v0  ;;  %v3998_v12 = vpop.f32.mrb[29].mxu1 }
 0x2e5   : > { %v4621_v41 = vadd.f32 %v4573_v21, %v4521_v38  ;;  %v4523_v40 = vadd.f32 %v4475_v22, %v4423_v57  ;;  %7839 = vmatpush3.bf16.msra.mxu1 %v7836_v19  ;;  %v4622_v45 = vadd.f32 %v4574_v51, %v4522_v11  ;;  %v5281_v59 = vmul.f32 %v15120_v37, %v12697_v32  ;;  %v15123_v21 = vld [vmem:[#allocation52_spill] sm:$0xff]  ;;  %v15124_v22 = vld [vmem:[#allocation55_spill] sm:$0xff]  ;;  %v7615_v51 = vpop.f32.mrb[30].mxu1 }
 0x2e6   : > { %v4476_v44 = vmul.f32 %v15077_v61, %v12684_v4  ;;  %v12724_v13 = vmul.f32 %v11608_v63, %v12695_v0  ;;  %v4113_v38 = vmul.f32 %v12364_v7, %v7614_v39  ;;  %v4874_v57 = vadd.f32 %v15123_v21, %v4774_v25  ;;  %v4001_v37 = vpop.f32.mrb[31].mxu1 }
 0x2e7   : > { %v4775_v53 = vadd.f32 %v15124_v22, %v4621_v41  ;;  %v4623_v19 = vadd.f32 %v4575_v23, %v4523_v40  ;;  %v4111_v11 = vmul.f32 %v12364_v7, %v3998_v12  ;;  %v4776_v10 = vadd.f32 %v12613_v28, %v4622_v45 }
 0x2e8   : > { %15122 = vst [vmem:[#allocation12_spill] sm:$0xff] %v12724_v13  ;;  %v4929_v16 = vmul.f32 %v11614_v14, %v12716_v43  ;;  %v4426_v52 = vmul.f32 %v11584_v55, %v4368_v8  ;;  %v4167_v13 = vadd.f32 %v12381_v48, %v4113_v38  ;;  %v4114_v39 = vmul.f32 %v12364_v7, %v7615_v51  ;;  %v15125_v8 = vld [vmem:[#allocation59_spill] sm:$0xff] }
 0x2e9   : > { %v4974_v50 = vadd.f32 %v4926_v3, %v4874_v57  ;;  %v4875_v25 = vadd.f32 %v12618_v1, %v4775_v53  ;;  %v4165_v23 = vadd.f32 %v12381_v48, %v4111_v11  ;;  %v4112_v41 = vmul.f32 %v12364_v7, %v4001_v37  ;;  %v15126_v1 = vld [vmem:[#allocation48_spill] sm:$0xff] }
 0x2ea   : > { %v4876_v40 = vadd.f32 %v12622_v49, %v4776_v10  ;;  %v4777_v45 = vadd.f32 %v12648_v29, %v4623_v19  ;;  %v4215_v28 = vmax.f32 %v4167_v13, 0.0  ;;  %v4168_v12 = vadd.f32 %v12381_v48, %v4114_v39  ;;  %v15128_v13 = vld [vmem:[#allocation46_spill] sm:$0xff]  ;;  %v15132_v39 = vld [vmem:[#allocation47_spill] sm:$0xff] }
 0x2eb   : > { %v5128_v21 = vadd.f32 %v15125_v8, %v4974_v50  ;;  %v4975_v38 = vadd.f32 %v4927_v30, %v4875_v25  ;;  %v4213_v22 = vmax.f32 %v4165_v23, 0.0  ;;  %v4166_v51 = vadd.f32 %v12381_v48, %v4112_v41  ;;  %v6536_v8 = vld [vmem:[%s8264_s21 + $0x190] sm:$0xff] }
 0x2ec   : > { %v4976_v3 = vadd.f32 %v4928_v54, %v4876_v40  ;;  %v4877_v57 = vadd.f32 %v4829_v17, %v4777_v45  ;;  %vm15127_vm15 = vcmp.eq.s32.totalorder %v15126_v1, 1  ;;  %v4216_v11 = vmax.f32 %v4168_v12, 0.0  ;;  %v15130_v54 = vld [vmem:[#allocation49_spill] sm:$0xff] }
 0x2ed   : > { %v4263_v53 = vsel %vm15127_vm15, %v4215_v28, 0.0  ;;  %v5228_v37 = vadd.f32 %v12608_v26, %v5128_v21  ;;  %v5129_v10 = vadd.f32 %v12628_v46, %v4975_v38  ;;  %vm15129_vm13 = vcmp.eq.s32.totalorder %v15128_v13, 1  ;;  %v6534_v45 = vld [vmem:[%s8264_s21 + $0x180] sm:$0xff]  ;;  %v6535_v28 = vld [vmem:[%s8264_s21 + $0x188] sm:$0xff]  ;;  %v6537_v21 = vld [vmem:[%s8264_s21 + $0x198] sm:$0xff] }
 0x2ee   : > { %4311 = vst.msk [vmem:[#allocation3 + $0x120] sm:$0xff] %vm671_vm11, %v4263_v53  ;;  %v4261_v49 = vsel %vm15129_vm13, %v4213_v22, 0.0  ;;  %v4214_v50 = vmax.f32 %v4166_v51, 0.0  ;;  %v5130_v29 = vadd.f32 %v12632_v2, %v4976_v3  ;;  %v4977_v30 = vadd.f32 %v4929_v16, %v4877_v57 }
 0x2ef   : > { %4309 = vst.msk [vmem:[#allocation3 + $0x110] sm:$0xff] %vm671_vm11, %v4261_v49  ;;  %vm15131_vm0 = vcmp.eq.s32.totalorder %v15130_v54, 1  ;;  %v5328_v19 = vadd.f32 %v5280_v62, %v5228_v37  ;;  %v5229_v26 = vadd.f32 %v12638_v24, %v5129_v10  ;;  %v4477_v46 = vmul.f32 %v15077_v61, %v12686_v5 }
 0x2f0   : > { %v4264_v17 = vsel %vm15131_vm0, %v4216_v11, 0.0  ;;  %vm15133_vm15 = vcmp.eq.s32.totalorder %v15132_v39, 1  ;;  %v5230_v2 = vadd.f32 %v12690_v60, %v5130_v29  ;;  %v5131_v16 = vadd.f32 %v12661_v56, %v4977_v30 }
 0x2f1   : > { %4312 = vst.msk [vmem:[#allocation3 + $0x128] sm:$0xff] %vm671_vm11, %v4264_v17  ;;  %v4262_v25 = vsel %vm15133_vm15, %v4214_v50, 0.0  ;;  %v4478_v23 = vmul.f32 %v15077_v61, %v12668_v6  ;;  %v5365_v24 = vpack.c.bf16 %v5328_v19, %v12707_v9  ;;  %v5329_v62 = vadd.f32 %v5281_v59, %v5229_v26  ;;  %v15137_v19 = vld [vmem:[#allocation57_spill] sm:$0xff] }
 0x2f2   : > { %4310 = vst.msk [vmem:[#allocation3 + $0x118] sm:$0xff] %vm671_vm11, %v4262_v25  ;;  %v4524_v41 = vadd.f32 %v4476_v44, %v12644_v35  ;;  %v5183_v40 = vmul.f32 %v11626_v18, %v12680_v42  ;;  %v5330_v60 = vadd.f32 %v12701_v36, %v5230_v2  ;;  %v12775_v56 = vmul.f32 %v11626_v18, %v12697_v32 }
 0x2f3   : > { %v4525_v12 = vadd.f32 %v4477_v46, %v12676_v33  ;;  %v12780_v9 = vmul.f32 %v11605_v15, %v12550_v27  ;;  %7660 = vmatprep.mubr.msk.bf16.mxu0 %vm671_vm11, %v5365_v24  ;;  %v4526_v59 = vadd.f32 %v4478_v23, %v4426_v52  ;;  %v12785_v44 = vmul.f32 %v11605_v15, %v12651_v58 }
 0x2f4   : > { %v5231_v35 = vadd.f32 %v5183_v40, %v5131_v16  ;;  %v12789_v36 = vmul.f32 %v11608_v63, %v12634_v31  ;;  %v5366_v38 = vpack.c.bf16 %v5330_v60, %v5329_v62  ;;  %v12795_v33 = vmul.f32 %v11608_v63, %v12716_v43 }
 0x2f5   : > { %v12799_v27 = vmul.f32 %v11617_v34, %v12653_v20  ;;  %v7840_v52 = vpack.c.bf16 %v6535_v28, %v6534_v45  ;;  %v12801_v22 = vld [vmem:[#allocation3 + $0x120] sm:$0xff]  ;;  %v12805_v58 = vmul.f32 %v11617_v34, %v12680_v42  ;;  %v12809_v51 = vmul.f32 %v11626_v18, %v12666_v47 }
 0x2f6   : > { %v4427_v3 = vmul.f32 %v11584_v55, %v12684_v4  ;;  %v12815_v57 = vmul.f32 %v11584_v55, %v12686_v5  ;;  %7661 = vmatmul.mubr.msk.bf16.gmra.mrb[68].mxu0 %vm671_vm11, %v5366_v38  ;;  %v12818_v20 = vld [vmem:[#allocation3 + $0x10f] sm:$0xff]  ;;  %v4733_v42 = vmul.f32 %v11605_v15, %v12695_v0  ;;  %v12828_v37 = vmul.f32 %v11605_v15, %v12634_v31  ;;  %v15135_v5 = vld [vmem:[#allocation69_spill] sm:$0xff] }
 0x2f7   : > { %v12820_v53 = vld [vmem:[#allocation3 + $0x110] sm:$0xff]  ;;  %7841 = vmatprep.subr.bf16.mxu1 %v7840_v52  ;;  %v7844_v4 = vpack.c.bf16 %v6537_v21, %v6536_v8  ;;  %v4576_v10 = vmul.f32 %v15135_v5, %v12818_v20  ;;  %v4932_v49 = vmul.f32 %v11614_v14, %v12801_v22  ;;  %v12840_v30 = vmul.f32 %v11617_v34, %v12697_v32 }
 0x2f8   : > { %v12822_v11 = vld [vmem:[#allocation3 + $0x109] sm:$0xff]  ;;  %15134 = vst [vmem:[#allocation10_spill] sm:$0xff] %v12828_v37  ;;  %v12834_v50 = vld [vmem:[#allocation3 + $0x121] sm:$0xff]  ;;  %7843 = vmatpush3.bf16.msra.mxu1 %v7840_v52  ;;  %v12844_v31 = vmul.f32 %v11617_v34, %v12666_v47  ;;  %v4930_v0 = vmul.f32 %v11614_v14, %v12820_v53  ;;  %v4479_v47 = vmul.f32 %v15077_v61, %v12818_v20 }
 0x2f9   : > { %v12836_v29 = vld [vmem:[#allocation3 + $0x127] sm:$0xff]  ;;  %v12848_v17 = vld [vmem:[#allocation3 + $0x111] sm:$0xff]  ;;  %v5283_v26 = vmul.f32 %v15137_v19, %v12822_v11  ;;  %v12854_v25 = vld [vmem:[#allocation3 + $0x11f] sm:$0xff]  ;;  %v12858_v32 = vmul.f32 %v11626_v18, %v12822_v11  ;;  %7845 = vmatprep.subr.bf16.mxu1 %v7844_v4  ;;  %v4624_v2 = vadd.f32 %v4576_v10, %v4524_v41  ;;  %v12870_v62 = vmul.f32 %v15137_v19, %v12834_v50  ;;  %v7618_v54 = vpop.f32.mrb[32].mxu1 }
 0x2fa   : > { %15136 = vst [vmem:[#allocation11_spill] sm:$0xff] %v12844_v31  ;;  %v12852_v46 = vld [vmem:[#allocation3 + $0x117] sm:$0xff]  ;;  %v4579_v40 = vmul.f32 %v15135_v5, %v12836_v29  ;;  %v5284_v45 = vmul.f32 %v15137_v19, %v12848_v17  ;;  %v4578_v41 = vmul.f32 %v15135_v5, %v12854_v25  ;;  %v4833_v60 = vmul.f32 %v11608_v63, %v12820_v53  ;;  %v12885_v39 = vld [vmem:[#allocation3 + $0x128] sm:$0xff] }
 0x2fb   : > { %v4577_v16 = vmul.f32 %v15135_v5, %v12852_v46  ;;  %v12864_v23 = vld [vmem:[#allocation3 + $0x118] sm:$0xff]  ;;  %v12876_v28 = vadd.f32 %v5283_v26, %v5231_v35  ;;  %v15139_v8 = vld [vmem:[#allocation71_spill] sm:$0xff]  ;;  %v4527_v10 = vadd.f32 %v4479_v47, %v4427_v3  ;;  %v4480_v26 = vmul.f32 %v15077_v61, %v12852_v46 }
 0x2fc   : > { %15138 = vst [vmem:[#allocation9_spill] sm:$0xff] %v12864_v23  ;;  %v12866_v24 = vld [vmem:[#allocation3 + $0x119] sm:$0xff]  ;;  %v4778_v21 = vadd.f32 %v15139_v8, %v4624_v2  ;;  %v4931_v52 = vmul.f32 %v11614_v14, %v12864_v23  ;;  %7847 = vmatpush3.bf16.msra.mxu1 %v7844_v4  ;;  %v4626_v13 = vadd.f32 %v4578_v41, %v4526_v59  ;;  %v4014_v2 = vpop.f32.mrb[33].mxu1 }
 0x2fd   : > { %v4625_v38 = vadd.f32 %v4577_v16, %v4525_v12  ;;  %v5285_v35 = vmul.f32 %v15137_v19, %v12866_v24  ;;  %v12893_v1 = vmul.f32 %v11608_v63, %v12864_v23  ;;  %v4117_v12 = vmul.f32 %v12364_v7, %v7618_v54  ;;  %v15141_v16 = vld [vmem:[#allocation12_spill] sm:$0xff]  ;;  %v7619_v41 = vpop.f32.mrb[34].mxu1 }
 0x2fe   : > { %v4878_v3 = vadd.f32 %v15141_v16, %v4778_v21  ;;  %v4627_v4 = vadd.f32 %v4579_v40, %v4527_v10  ;;  %v4115_v59 = vmul.f32 %v12364_v7, %v4014_v2  ;;  %v4780_v8 = vadd.f32 %v12785_v44, %v4626_v13  ;;  %v4017_v19 = vpop.f32.mrb[35].mxu1  ;;  %v15142_v16 = vld [vmem:[#allocation58_spill] sm:$0xff] }
 0x2ff   : > { %15140 = vst [vmem:[#allocation14_spill] sm:$0xff] %v12893_v1  ;;  %v4779_v47 = vadd.f32 %v12780_v9, %v4625_v38  ;;  %v4933_v31 = vmul.f32 %v11614_v14, %v12885_v39  ;;  %v5187_v37 = vmul.f32 %v11626_v18, %v12848_v17  ;;  %v4171_v1 = vadd.f32 %v12381_v48, %v4117_v12 }
 0x300   : > { %v4118_v54 = vmul.f32 %v12364_v7, %v7619_v41  ;;  %v4978_v21 = vadd.f32 %v4930_v0, %v4878_v3  ;;  %v4169_v40 = vadd.f32 %v12381_v48, %v4115_v59  ;;  %v4116_v38 = vmul.f32 %v12364_v7, %v4017_v19  ;;  %v15143_v3 = vld [vmem:[#allocation56_spill] sm:$0xff] }
 0x301   : > { %v4879_v9 = vadd.f32 %v12789_v36, %v4779_v47  ;;  %v4880_v13 = vadd.f32 %v12795_v33, %v4780_v8  ;;  %v4781_v44 = vadd.f32 %v4733_v42, %v4627_v4  ;;  %v4219_v10 = vmax.f32 %v4171_v1, 0.0  ;;  %v15145_v1 = vld [vmem:[#allocation50_spill] sm:$0xff] }
 0x302   : > { %v4172_v2 = vadd.f32 %v12381_v48, %v4118_v54  ;;  %v5132_v14 = vadd.f32 %v15142_v16, %v4978_v21  ;;  %v4217_v12 = vmax.f32 %v4169_v40, 0.0  ;;  %v4170_v41 = vadd.f32 %v12381_v48, %v4116_v38  ;;  %v6538_v21 = vld [vmem:[%s8264_s21 + $0x1a0] sm:$0xff]  ;;  %v5921_v16 = vld [vmem:[%s15072_s26 + $0x28] sm:$0xff] }
 0x303   : > { %v4979_v5 = vadd.f32 %v4931_v52, %v4879_v9  ;;  %v4980_v23 = vadd.f32 %v4932_v49, %v4880_v13  ;;  %v4881_v0 = vadd.f32 %v4833_v60, %v4781_v44  ;;  %vm15144_vm13 = vcmp.eq.s32.totalorder %v15143_v3, 1  ;;  %v15147_v49 = vld [vmem:[#allocation45_spill] sm:$0xff]  ;;  %v6539_v9 = vld [vmem:[%s8264_s21 + $0x1a8] sm:$0xff]  ;;  %s568_s21 = scalar_lea.vmem [#allocation4], %s7169_s20  ;;  %s8019_s20 = sshll.u32 %s8082_s6, 4  ;;  %s8020_s20 = int_to_ptr.vmem [resolvable:$false] %s8019_s20 }
 0x304   : > { %v4267_v36 = vsel %vm15144_vm13, %v4219_v10, 0.0  ;;  %v4220_v47 = vmax.f32 %v4172_v2, 0.0  ;;  %v5232_v19 = vadd.f32 %v12775_v56, %v5132_v14  ;;  %vm15146_vm0 = vcmp.eq.s32.totalorder %v15145_v1, 1  ;;  %s7103_s25 = sshll.u32 %s568_s21, 4  ;;  %s8021_s24 = scalar_lea.vmem %s8020_s20, 2048  ;;  %s14642_s25 = int_to_ptr.vmem [resolvable:$true] %s7103_s25 }
 0x305   : > { %v5133_v33 = vadd.f32 %v12799_v27, %v4979_v5  ;;  %4315 = vst.msk [vmem:[#allocation3 + $0x140] sm:$0xff] %vm671_vm11, %v4267_v36  ;;  %v4265_v42 = vsel %vm15146_vm0, %v4217_v12, 0.0  ;;  %v4218_v4 = vmax.f32 %v4170_v41, 0.0  ;;  %v5134_v52 = vadd.f32 %v12805_v58, %v4980_v23  ;;  %v15149_v27 = vld [vmem:[#allocation51_spill] sm:$0xff]  ;;  %s8015_s5 = scalar_lea.vmem %s14642_s25, 1024  ;;  %p8022_p0 = scmp.lt.s32.totalorder %s14642_s25, %s8020_s20 }
 0x306   : > { %v4981_v59 = vadd.f32 %v4933_v31, %v4881_v0  ;;  %4313 = vst.msk [vmem:[#allocation3 + $0x130] sm:$0xff] %vm671_vm11, %v4265_v42  ;;  %vm15148_vm15 = vcmp.eq.s32.totalorder %v15147_v49, 1  ;;  %v5332_v8 = vadd.f32 %v5284_v45, %v5232_v19  ;;  %v4430_v56 = vmul.f32 %v11584_v55, %v12818_v20  ;;  %v15151_v0 = vld [vmem:[#allocation9_spill] sm:$0xff]  ;;  %p8016_p11 = scmp.ne.s32.totalorder %s14642_s25, %s8015_s5  ;;  %p8023_p1 = scmp.lt.s32.totalorder %s8021_s24, %s8015_s5 }
 0x307   : > { %v4268_v60 = vsel %vm15148_vm15, %v4220_v47, 0.0  ;;  %v5233_v14 = vadd.f32 %v12809_v51, %v5133_v33  ;;  %vm15150_vm13 = vcmp.eq.s32.totalorder %v15149_v27, 1  ;;  %v5234_v58 = vadd.f32 %v12858_v32, %v5134_v52  ;;  %v15153_v47 = vld [vmem:[#allocation69_spill] sm:$0xff]  ;;  %v15154_v33 = vld [vmem:[#allocation74_spill] sm:$0xff] }
 0x308   : > { %4316 = vst.msk [vmem:[#allocation3 + $0x148] sm:$0xff] %vm671_vm11, %v4268_v60  ;;  %v4266_v5 = vsel %vm15150_vm13, %v4218_v4, 0.0  ;;  %v5135_v31 = vadd.f32 %v12840_v30, %v4981_v59  ;;  %v4481_v23 = vmul.f32 %v15077_v61, %v12854_v25  ;;  %v5367_v45 = vpack.c.bf16 %v5332_v8, %v12876_v28  ;;  %v5924_v59 = vld [vmem:[%s15072_s26 + $0x40] sm:$0xff]  ;;  %p8017_p12 = pnand %p8016_p11, %p8218_p5  ;;  %p8024_p2 = por %p8023_p1, %p8022_p0 }
 0x309   : > { %4314 = vst.msk [vmem:[#allocation3 + $0x138] sm:$0xff] %vm671_vm11, %v4266_v5  ;;  %v5333_v51 = vadd.f32 %v5285_v35, %v5233_v14  ;;  %v4429_v20 = vmul.f32 %v11584_v55, %v12668_v6  ;;  %v4482_v54 = vmul.f32 %v15077_v61, %v12836_v29  ;;  %v5334_v32 = vadd.f32 %v12870_v62, %v5234_v58  ;;  %v15156_v14 = vld [vmem:[#allocation57_spill] sm:$0xff] }
 0x30a   : > { %v4528_v30 = vadd.f32 %v4480_v26, %v12815_v57  ;;  %v12946_v40 = vmul.f32 %v11626_v18, %v12866_v24  ;;  %v12950_v28 = vmul.f32 %v11605_v15, %v12716_v43  ;;  %7664 = vmatprep.mubr.msk.bf16.mxu0 %vm671_vm11, %v5367_v45  ;;  %v5235_v6 = vadd.f32 %v5187_v37, %v5135_v31  ;;  %p8018_p13 = pneg %p8017_p12 }
 0x30b   : > { %v4529_v35 = vadd.f32 %v4481_v23, %v4429_v20  ;;  %v4530_v38 = vadd.f32 %v4482_v54, %v4430_v56  ;;  %v12955_v13 = vmul.f32 %v11605_v15, %v12820_v53  ;;  %v5368_v62 = vpack.c.bf16 %v5334_v32, %v5333_v51 }
 0x30c   : > { %v12959_v57 = vmul.f32 %v11608_v63, %v12801_v22  ;;  %v12963_v26 = vmul.f32 %v11608_v63, %v12885_v39  ;;  %v7848_v43 = vpack.c.bf16 %v6539_v9, %v6538_v21  ;;  %v12965_v44 = vld [vmem:[#allocation3 + $0x140] sm:$0xff]  ;;  %v12969_v37 = vmul.f32 %v11617_v34, %v12822_v11  ;;  %p8025_p3 = pnand %p8024_p2, %p8018_p13 }
 0x30d   : > { %v12973_v53 = vmul.f32 %v11617_v34, %v12848_v17  ;;  %v12977_v10 = vmul.f32 %v11626_v18, %v12834_v50  ;;  %v4431_v2 = vmul.f32 %v11584_v55, %v12852_v46  ;;  %7665 = vmatmul.mubr.msk.bf16.gmra.mrb[72].mxu0 %vm671_vm11, %v5368_v62  ;;  %v12985_v12 = vld [vmem:[#allocation3 + $0x12f] sm:$0xff]  ;;  %v12993_v17 = vmul.f32 %v11584_v55, %v12854_v25 }
 0x30e   : > { %v12987_v11 = vld [vmem:[#allocation3 + $0x130] sm:$0xff]  ;;  %7849 = vmatprep.subr.bf16.mxu1 %v7848_v43  ;;  %v4737_v46 = vmul.f32 %v11605_v15, %v15151_v0  ;;  %v12999_v36 = vmul.f32 %v11605_v15, %v12801_v22  ;;  %v4580_v19 = vmul.f32 %v15153_v47, %v12985_v12  ;;  %v13005_v42 = vmul.f32 %v15154_v33, %v12965_v44  ;;  %v15157_v62 = vld [vmem:[#allocation10_spill] sm:$0xff] }
 0x30f   : > { %v12989_v41 = vld [vmem:[#allocation3 + $0x129] sm:$0xff]  ;;  %v13007_v4 = vld [vmem:[#allocation3 + $0x141] sm:$0xff]  ;;  %7851 = vmatpush3.bf16.msra.mxu1 %v7848_v43  ;;  %v13013_v25 = vmul.f32 %v11617_v34, %v12866_v24  ;;  %v13017_v22 = vmul.f32 %v11617_v34, %v12834_v50  ;;  %v4934_v60 = vmul.f32 %v15154_v33, %v12987_v11  ;;  %v4483_v58 = vmul.f32 %v15077_v61, %v12985_v12 }
 0x310   : > { %15152 = vst [vmem:[#allocation15_spill] sm:$0xff] %v12999_v36  ;;  %v13009_v52 = vld [vmem:[#allocation3 + $0x147] sm:$0xff]  ;;  %v13024_v8 = vld [vmem:[#allocation3 + $0x131] sm:$0xff]  ;;  %v5287_v56 = vmul.f32 %v15156_v14, %v12989_v41  ;;  %v13030_v24 = vld [vmem:[#allocation3 + $0x13f] sm:$0xff]  ;;  %v13034_v50 = vmul.f32 %v11626_v18, %v12989_v41  ;;  %v4628_v31 = vadd.f32 %v4580_v19, %v4528_v30  ;;  %v13046_v20 = vmul.f32 %v15156_v14, %v13007_v4 }
 0x311   : > { %15155 = vst [vmem:[#allocation13_spill] sm:$0xff] %v13017_v22  ;;  %v13028_v5 = vld [vmem:[#allocation3 + $0x137] sm:$0xff]  ;;  %v4583_v54 = vmul.f32 %v15153_v47, %v13009_v52  ;;  %v13052_v21 = vmul.f32 %v15156_v14, %v13024_v8  ;;  %v4582_v32 = vmul.f32 %v15153_v47, %v13030_v24  ;;  %v4837_v30 = vmul.f32 %v11608_v63, %v12987_v11  ;;  %v13063_v49 = vld [vmem:[#allocation3 + $0x148] sm:$0xff] }
 0x312   : > { %v4581_v23 = vmul.f32 %v15153_v47, %v13028_v5  ;;  %v13040_v45 = vld [vmem:[#allocation3 + $0x138] sm:$0xff]  ;;  %v13054_v9 = vadd.f32 %v5287_v56, %v5235_v6  ;;  %7721 = vmatmul.mubr.f32.vlgmr.msra.gmra.mrb[64].mxu1 %v5921_v16  ;;  %v4782_v43 = vadd.f32 %v15157_v62, %v4628_v31  ;;  %v4531_v27 = vadd.f32 %v4483_v58, %v4431_v2  ;;  %v7622_v56 = vpop.f32.mrb[36].mxu1  ;;  %v5930_v2 = vld [vmem:[%s15072_s26 + $0x70] sm:$0xff]  ;;  %v15159_v31 = vld [vmem:[#allocation14_spill] sm:$0xff] }
 0x313   : > { %v13042_v51 = vld [vmem:[#allocation3 + $0x139] sm:$0xff]  ;;  %v4935_v19 = vmul.f32 %v15154_v33, %v13040_v45  ;;  %7723 = vmatprep.mubr.f32.mxu1 %v5924_v59  ;;  %v4630_v1 = vadd.f32 %v4582_v32, %v4530_v38  ;;  %v13072_v16 = vmul.f32 %v15077_v61, %v13028_v5  ;;  %v4121_v59 = vmul.f32 %v12364_v7, %v7622_v56  ;;  %v4030_v58 = vpop.f32.mrb[37].mxu1 }
 0x314   : > { %v4629_v0 = vadd.f32 %v4581_v23, %v4529_v35  ;;  %v5927_v6 = vld [vmem:[%s15072_s26 + $0x58] sm:$0xff]  ;;  %v5289_v3 = vmul.f32 %v15156_v14, %v13042_v51  ;;  %v13076_v35 = vmul.f32 %v11608_v63, %v13040_v45  ;;  %v4882_v38 = vadd.f32 %v15159_v31, %v4782_v43  ;;  %v7623_v22 = vpop.f32.mrb[38].mxu1 }
 0x315   : > { %v4631_v32 = vadd.f32 %v4583_v54, %v4531_v27  ;;  %v4119_v62 = vmul.f32 %v12364_v7, %v4030_v58  ;;  %v4784_v36 = vadd.f32 %v12955_v13, %v4630_v1  ;;  %v5191_v14 = vmul.f32 %v11626_v18, %v13024_v8  ;;  %v4033_v43 = vpop.f32.mrb[39].mxu1  ;;  %v5933_v1 = vld [vmem:[%s15072_s26 + $0x88] sm:$0xff] }
 0x316   : > { %15158 = vst [vmem:[#allocation16_spill] sm:$0xff] %v13076_v35  ;;  %v4783_v23 = vadd.f32 %v12950_v28, %v4629_v0  ;;  %v4937_v35 = vmul.f32 %v15154_v33, %v13063_v49  ;;  %7724 = vmatmul.mubr.f32.gmra.mrb[66].mxu1 %v5927_v6  ;;  %v4175_v56 = vadd.f32 %v12381_v48, %v4121_v59 }
 0x317   : > { %v4122_v47 = vmul.f32 %v12364_v7, %v7623_v22  ;;  %v4982_v31 = vadd.f32 %v4934_v60, %v4882_v38  ;;  %7726 = vmatprep.mubr.f32.mxu1 %v5930_v2  ;;  %v4173_v28 = vadd.f32 %v12381_v48, %v4119_v62  ;;  %v4120_v13 = vmul.f32 %v12364_v7, %v4033_v43  ;;  %v5936_v22 = vld [vmem:[%s15072_s26 + $0xa0] sm:$0xff]  ;;  %v15161_v7 = vld [vmem:[#allocation63_spill] sm:$0xff]  ;;  %v15165_v43 = vld [vmem:[#allocation64_spill] sm:$0xff] }
 0x318   : > { %v4883_v27 = vadd.f32 %v12959_v57, %v4783_v23  ;;  %v4884_v54 = vadd.f32 %v12963_v26, %v4784_v36  ;;  %v4785_v0 = vadd.f32 %v4737_v46, %v4631_v32  ;;  %v4223_v6 = vmax.f32 %v4175_v56, 0.0  ;;  %v15160_v57 = vld [vmem:[#allocation11_spill] sm:$0xff] }
 0x319   : > { %v4176_v60 = vadd.f32 %v12381_v48, %v4122_v47  ;;  %v5136_v2 = vadd.f32 %v15160_v57, %v4982_v31  ;;  %v4221_v58 = vmax.f32 %v4173_v28, 0.0  ;;  %v4174_v38 = vadd.f32 %v12381_v48, %v4120_v13  ;;  %v5939_v47 = vld [vmem:[%s15072_s26 + $0xb8] sm:$0xff] }
 0x31a   : > { %v4983_v59 = vadd.f32 %v4935_v19, %v4883_v27  ;;  %v4984_v23 = vadd.f32 %v13005_v42, %v4884_v54  ;;  %v4885_v62 = vadd.f32 %v4837_v30, %v4785_v0  ;;  %7727 = vmatmul.mubr.f32.gmra.mrb[68].mxu1 %v5933_v1  ;;  %vm15162_vm0 = vcmp.eq.s32.totalorder %v15161_v7, 1  ;;  %v15163_v48 = vld [vmem:[#allocation60_spill] sm:$0xff]  ;;  %v15167_v1 = vld [vmem:[#allocation62_spill] sm:$0xff] }
 0x31b   : > { %v4271_v26 = vsel %vm15162_vm0, %v4223_v6, 0.0  ;;  %v4224_v46 = vmax.f32 %v4176_v60, 0.0  ;;  %v5236_v36 = vadd.f32 %v12946_v40, %v5136_v2  ;;  %7729 = vmatprep.mubr.f32.mxu1 %v5936_v22  ;;  %vm15164_vm15 = vcmp.eq.s32.totalorder %v15163_v48, 1 }
 0x31c   : > { %v5137_v32 = vadd.f32 %v12969_v37, %v4983_v59  ;;  %4319 = vst.msk [vmem:[#allocation3 + $0x160] sm:$0xff] %vm671_vm11, %v4271_v26  ;;  %v4269_v42 = vsel %vm15164_vm15, %v4221_v58, 0.0  ;;  %v4222_v30 = vmax.f32 %v4174_v38, 0.0  ;;  %v5138_v19 = vadd.f32 %v12973_v53, %v4984_v23 }
 0x31d   : > { %v4985_v56 = vadd.f32 %v4937_v35, %v4885_v62  ;;  %4317 = vst.msk [vmem:[#allocation3 + $0x150] sm:$0xff] %vm671_vm11, %v4269_v42  ;;  %vm15166_vm13 = vcmp.eq.s32.totalorder %v15165_v43, 1  ;;  %v5336_v37 = vadd.f32 %v13052_v21, %v5236_v36  ;;  %v4434_v27 = vmul.f32 %v11584_v55, %v12985_v12 }
 0x31e   : > { %v4272_v40 = vsel %vm15166_vm13, %v4224_v46, 0.0  ;;  %v5237_v31 = vadd.f32 %v12977_v10, %v5137_v32  ;;  %vm15168_vm0 = vcmp.eq.s32.totalorder %v15167_v1, 1  ;;  %v5238_v53 = vadd.f32 %v13034_v50, %v5138_v19  ;;  %7730 = vmatmul.mubr.f32.gmra.mrb[70].mxu1 %v5939_v47  ;;  %v15169_v32 = vld [vmem:[#allocation69_spill] sm:$0xff] }
 0x31f   : > { %4320 = vst.msk [vmem:[#allocation3 + $0x168] sm:$0xff] %vm671_vm11, %v4272_v40  ;;  %v4270_v28 = vsel %vm15168_vm0, %v4222_v30, 0.0  ;;  %v5139_v35 = vadd.f32 %v13013_v25, %v4985_v56  ;;  %v4485_v13 = vmul.f32 %v15077_v61, %v13030_v24  ;;  %v5369_v10 = vpack.c.bf16 %v5336_v37, %v13054_v9 }
 0x320   : > { %4318 = vst.msk [vmem:[#allocation3 + $0x158] sm:$0xff] %vm671_vm11, %v4270_v28  ;;  %v5337_v21 = vadd.f32 %v5289_v3, %v5237_v31  ;;  %v4433_v12 = vmul.f32 %v11584_v55, %v12836_v29  ;;  %v4486_v54 = vmul.f32 %v15077_v61, %v13009_v52  ;;  %v5338_v0 = vadd.f32 %v13046_v20, %v5238_v53  ;;  %v15170_v53 = vld [vmem:[#allocation57_spill] sm:$0xff] }
 0x321   : > { %v4532_v25 = vadd.f32 %v13072_v16, %v12993_v17  ;;  %v13142_v50 = vmul.f32 %v11626_v18, %v13042_v51  ;;  %v13146_v22 = vmul.f32 %v11605_v15, %v12885_v39  ;;  %7668 = vmatprep.mubr.msk.bf16.mxu0 %vm671_vm11, %v5369_v10  ;;  %v13149_v3 = vadd.f32 %v5191_v14, %v5139_v35  ;;  %v7626_v14 = vpop.f32.mrb[40].mxu1 }
 0x322   : > { %v4533_v29 = vadd.f32 %v4485_v13, %v4433_v12  ;;  %v4534_v9 = vadd.f32 %v4486_v54, %v4434_v27  ;;  %v13153_v20 = vmul.f32 %v11605_v15, %v12987_v11  ;;  %v5370_v6 = vpack.c.bf16 %v5338_v0, %v5337_v21  ;;  %v4046_v58 = vpop.f32.mrb[41].mxu1 }
 0x323   : > { %v13157_v17 = vmul.f32 %v11608_v63, %v12965_v44  ;;  %v13161_v16 = vmul.f32 %v11608_v63, %v13063_v49  ;;  %v13165_v39 = vmul.f32 %v11617_v34, %v12989_v41  ;;  %v13167_v60 = vld [vmem:[#allocation3 + $0x160] sm:$0xff]  ;;  %v13171_v11 = vmul.f32 %v11617_v34, %v13024_v8  ;;  %v7627_v36 = vpop.f32.mrb[42].mxu1 }
 0x324   : > { %v13175_v57 = vmul.f32 %v11626_v18, %v13007_v4  ;;  %v13179_v2 = vmul.f32 %v11584_v55, %v13028_v5  ;;  %v13183_v59 = vmul.f32 %v11584_v55, %v13030_v24  ;;  %v13188_v41 = vld [vmem:[%s14698_s9] ss:$0 sm:$0xff]  ;;  %7669 = vmatmul.mubr.msk.bf16.gmra.mrb[76].mxu0 %vm671_vm11, %v5370_v6  ;;  %v13192_v38 = vld [vmem:[#allocation3 + $0x14f] sm:$0xff]  ;;  %v13200_v24 = vmul.f32 %v11605_v15, %v13040_v45  ;;  %v4049_v19 = vpop.f32.mrb[43].mxu1 }
 0x325   : > { %v4125_v8 = vmul.f32 %v13188_v41, %v7626_v14  ;;  %v13194_v23 = vld [vmem:[#allocation3 + $0x150] sm:$0xff]  ;;  %v13204_v62 = vmul.f32 %v11605_v15, %v12965_v44  ;;  %v13208_v26 = vmul.f32 %v11617_v34, %v13042_v51  ;;  %v4123_v46 = vmul.f32 %v13188_v41, %v4046_v58  ;;  %v13222_v44 = vld [vmem:[%s14699_s10] ss:$0 sm:$0xff] }
 0x326   : > { %v13196_v5 = vld [vmem:[#allocation3 + $0x149] sm:$0xff]  ;;  %v4584_v47 = vmul.f32 %v15169_v32, %v13192_v38  ;;  %v4940_v42 = vmul.f32 %v15154_v33, %v13167_v60  ;;  %v13217_v45 = vmul.f32 %v11617_v34, %v13007_v4  ;;  %v4126_v30 = vmul.f32 %v13188_v41, %v7627_v36  ;;  %v13240_v13 = vld [vmem:[#allocation3 + $0x161] sm:$0xff] }
 0x327   : > { %v4179_v51 = vadd.f32 %v13222_v44, %v4125_v8  ;;  %v4938_v56 = vmul.f32 %v15154_v33, %v13194_v23  ;;  %v13228_v40 = vld [vmem:[#allocation3 + $0x157] sm:$0xff]  ;;  %v13230_v37 = vld [vmem:[#allocation3 + $0x15f] sm:$0xff]  ;;  %v13234_v4 = vmul.f32 %v11584_v55, %v13009_v52  ;;  %v4177_v31 = vadd.f32 %v13222_v44, %v4123_v46  ;;  %v13267_v43 = vld [vmem:[#allocation3 + $0x167] sm:$0xff] }
 0x328   : > { %v4124_v27 = vmul.f32 %v13188_v41, %v4049_v19  ;;  %v4632_v28 = vadd.f32 %v4584_v47, %v4532_v25  ;;  %v5291_v35 = vmul.f32 %v15170_v53, %v13196_v5  ;;  %v4180_v21 = vadd.f32 %v13222_v44, %v4126_v30  ;;  %v15171_v6 = vld [vmem:[#allocation15_spill] sm:$0xff]  ;;  %v15174_v30 = vld [vmem:[#allocation65_spill] sm:$0xff]  ;;  %v13265_v1 = vld [vmem:[#allocation3 + $0x158] sm:$0xff] }
 0x329   : > { %v4227_v10 = vmax.f32 %v4179_v51, 0.0  ;;  %v4585_v12 = vmul.f32 %v15169_v32, %v13228_v40  ;;  %v13247_v52 = vmul.f32 %v11626_v18, %v13196_v5  ;;  %v4225_v54 = vmax.f32 %v4177_v31, 0.0  ;;  %v13251_v14 = vld [vmem:[#allocation3 + $0x151] sm:$0xff] }
 0x32a   : > { %v4178_v0 = vadd.f32 %v13222_v44, %v4124_v27  ;;  %v4786_v25 = vadd.f32 %v15171_v6, %v4632_v28  ;;  %v4586_v8 = vmul.f32 %v15169_v32, %v13230_v37  ;;  %v15172_v58 = vld [vmem:[#allocation67_spill] sm:$0xff]  ;;  %v4228_v36 = vmax.f32 %v4180_v21, 0.0  ;;  %v15176_v27 = vld [vmem:[#allocation16_spill] sm:$0xff] }
 0x32b   : > { %vm15173_vm15 = vcmp.eq.s32.totalorder %v15172_v58, 1  ;;  %v4633_v47 = vadd.f32 %v4585_v12, %v4533_v29  ;;  %v13259_v51 = vmul.f32 %v15170_v53, %v13240_v13  ;;  %vm15175_vm13 = vcmp.eq.s32.totalorder %v15174_v30, 1  ;;  %v15177_v29 = vld [vmem:[#allocation68_spill] sm:$0xff] }
 0x32c   : > { %v4275_v46 = vsel %vm15173_vm15, %v4227_v10, 0.0  ;;  %v4273_v19 = vsel %vm15175_vm13, %v4225_v54, 0.0  ;;  %v4226_v31 = vmax.f32 %v4178_v0, 0.0  ;;  %v4886_v28 = vadd.f32 %v15176_v27, %v4786_v25  ;;  %v13292_v27 = vld [vmem:[#allocation3 + $0x168] sm:$0xff] }
 0x32d   : > { %4323 = vst.msk [vmem:[#allocation3 + $0x180] sm:$0xff] %vm671_vm11, %v4275_v46  ;;  %v4634_v6 = vadd.f32 %v4586_v8, %v4534_v9  ;;  %4321 = vst.msk [vmem:[#allocation3 + $0x170] sm:$0xff] %vm671_vm11, %v4273_v19  ;;  %vm15178_vm0 = vcmp.eq.s32.totalorder %v15177_v29, 1  ;;  %v5292_v21 = vmul.f32 %v15170_v53, %v13251_v14  ;;  %v4787_v12 = vadd.f32 %v13146_v22, %v4633_v47  ;;  %v13275_v46 = vld [vmem:[#allocation3 + $0x159] sm:$0xff]  ;;  %v15179_v9 = vld [vmem:[#allocation66_spill] sm:$0xff] }
 0x32e   : > { %v4276_v10 = vsel %vm15178_vm0, %v4228_v36, 0.0  ;;  %v4487_v54 = vmul.f32 %v15077_v61, %v13192_v38  ;;  %vm15180_vm15 = vcmp.eq.s32.totalorder %v15179_v9, 1  ;;  %v4986_v25 = vadd.f32 %v4938_v56, %v4886_v28  ;;  %v15181_v56 = vld [vmem:[#allocation13_spill] sm:$0xff] }
 0x32f   : > { %4324 = vst.msk [vmem:[#allocation3 + $0x188] sm:$0xff] %vm671_vm11, %v4276_v10  ;;  %v4274_v0 = vsel %vm15180_vm15, %v4226_v31, 0.0  ;;  %v4788_v8 = vadd.f32 %v13153_v20, %v4634_v6  ;;  %v4488_v36 = vmul.f32 %v15077_v61, %v13228_v40  ;;  %v4887_v22 = vadd.f32 %v13157_v17, %v4787_v12  ;;  %v13300_v17 = vld [vmem:[%s14700_s11 + $0x8] ss:$0 sm:$0xff] }
 0x330   : > { %4322 = vst.msk [vmem:[#allocation3 + $0x178] sm:$0xff] %vm671_vm11, %v4274_v0  ;;  %v4939_v53 = vmul.f32 %v15154_v33, %v13265_v1  ;;  %v4535_v47 = vadd.f32 %v4487_v54, %v13179_v2  ;;  %v4587_v19 = vmul.f32 %v15169_v32, %v13267_v43  ;;  %v5140_v31 = vadd.f32 %v15181_v56, %v4986_v25 }
 0x331   : > { %v5339_v20 = vadd.f32 %v5291_v35, %v13149_v3  ;;  %v4888_v28 = vadd.f32 %v13161_v16, %v4788_v8  ;;  %v5293_v6 = vmul.f32 %v13300_v17, %v13275_v46  ;;  %v4536_v10 = vadd.f32 %v4488_v36, %v13183_v59 }
 0x332   : > { %v4987_v2 = vadd.f32 %v4939_v53, %v4887_v22  ;;  %v4635_v12 = vadd.f32 %v4587_v19, %v4535_v47  ;;  %v4841_v54 = vmul.f32 %v11608_v63, %v13194_v23  ;;  %v5240_v0 = vadd.f32 %v13142_v50, %v5140_v31 }
 0x333   : > { %v4988_v3 = vadd.f32 %v4940_v42, %v4888_v28  ;;  %v4842_v16 = vmul.f32 %v11608_v63, %v13265_v1  ;;  %v4941_v35 = vmul.f32 %v15154_v33, %v13292_v27  ;;  %v5195_v59 = vmul.f32 %v11626_v18, %v13251_v14 }
 0x334   : > { %v5141_v25 = vadd.f32 %v13165_v39, %v4987_v2  ;;  %v4789_v8 = vadd.f32 %v13200_v24, %v4635_v12  ;;  %v13318_v36 = vmul.f32 %v11626_v18, %v13275_v46  ;;  %v5340_v22 = vadd.f32 %v5292_v21, %v5240_v0  ;;  %v13321_v42 = vld [vmem:[#allocation3 + $0x16f] sm:$0xff] }
 0x335   : > { %v5142_v50 = vadd.f32 %v13171_v11, %v4988_v3  ;;  %v4438_v53 = vmul.f32 %v11584_v55, %v13192_v38  ;;  %v4489_v39 = vmul.f32 %v15077_v61, %v13230_v37  ;;  %v4588_v47 = vmul.f32 %v15169_v32, %v13321_v42  ;;  %v13330_v19 = vld [vmem:[#allocation3 + $0x170] sm:$0xff]  ;;  %v7630_v11 = vpop.f32.mrb[44].mxu1 }
 0x336   : > { %v5241_v24 = vadd.f32 %v13175_v57, %v5141_v25  ;;  %v4889_v56 = vadd.f32 %v4841_v54, %v4789_v8  ;;  %v4490_v21 = vmul.f32 %v15077_v61, %v13267_v43  ;;  %v5371_v31 = vpack.c.bf16 %v5340_v22, %v5339_v20  ;;  %v4062_v12 = vpop.f32.mrb[45].mxu1 }
 0x337   : > { %v5242_v28 = vadd.f32 %v13247_v52, %v5142_v50  ;;  %v4743_v38 = vmul.f32 %v11605_v15, %v13063_v49  ;;  %v4744_v2 = vmul.f32 %v11605_v15, %v13194_v23  ;;  %v4129_v57 = vmul.f32 %v13188_v41, %v7630_v11  ;;  %v13340_v54 = vld [vmem:[#allocation3 + $0x177] sm:$0xff]  ;;  %v7631_v9 = vpop.f32.mrb[46].mxu1  ;;  %v13352_v50 = vld [vmem:[#allocation3 + $0x17f] sm:$0xff] }
 0x338   : > { %v5341_v0 = vadd.f32 %v5293_v6, %v5241_v24  ;;  %v4636_v3 = vadd.f32 %v4588_v47, %v4536_v10  ;;  %v4989_v25 = vadd.f32 %v4941_v35, %v4889_v56  ;;  %v4127_v8 = vmul.f32 %v13188_v41, %v4062_v12  ;;  %7672 = vmatprep.mubr.msk.bf16.mxu0 %vm671_vm11, %v5371_v31  ;;  %v4065_v10 = vpop.f32.mrb[47].mxu1 }
 0x339   : > { %v5342_v52 = vadd.f32 %v13259_v51, %v5242_v28  ;;  %v4942_v49 = vmul.f32 %v15154_v33, %v13330_v19  ;;  %v4537_v23 = vadd.f32 %v4489_v39, %v13234_v4  ;;  %v4183_v20 = vadd.f32 %v13222_v44, %v4129_v57 }
 0x33a   : > { %v4130_v6 = vmul.f32 %v13188_v41, %v7631_v9  ;;  %v4790_v35 = vadd.f32 %v13204_v62, %v4636_v3  ;;  %v5143_v22 = vadd.f32 %v13208_v26, %v4989_v25  ;;  %v4181_v24 = vadd.f32 %v13222_v44, %v4127_v8  ;;  %v13361_v26 = vld [vmem:[#allocation3 + $0x169] sm:$0xff]  ;;  %v13367_v25 = vld [vmem:[#allocation3 + $0x171] sm:$0xff] }
 0x33b   : > { %v4128_v51 = vmul.f32 %v13188_v41, %v4065_v10  ;;  %v5372_v47 = vpack.c.bf16 %v5342_v52, %v5341_v0  ;;  %v4589_v56 = vmul.f32 %v15169_v32, %v13340_v54  ;;  %v4231_v4 = vmax.f32 %v4183_v20, 0.0  ;;  %v13372_v52 = vld [vmem:[#allocation3 + $0x178] sm:$0xff]  ;;  %v13380_v10 = vld [vmem:[#allocation3 + $0x180] sm:$0xff] }
 0x33c   : > { %v4184_v39 = vadd.f32 %v13222_v44, %v4130_v6  ;;  %v4890_v11 = vadd.f32 %v4842_v16, %v4790_v35  ;;  %v4538_v9 = vadd.f32 %v4490_v21, %v4438_v53  ;;  %v4229_v31 = vmax.f32 %v4181_v24, 0.0 }
 0x33d   : > { %v4182_v62 = vadd.f32 %v13222_v44, %v4128_v51  ;;  %7673 = vmatmul.mubr.msk.bf16.gmra.mrb[80].mxu0 %vm671_vm11, %v5372_v47  ;;  %v4590_v28 = vmul.f32 %v15169_v32, %v13352_v50  ;;  %v4637_v41 = vadd.f32 %v4589_v56, %v4537_v23  ;;  %v4279_v12 = vsel %vm2608_vm1, %v4231_v4, 0.0 }
 0x33e   : > { %v4232_v0 = vmax.f32 %v4184_v39, 0.0  ;;  %v4990_v3 = vadd.f32 %v4942_v49, %v4890_v11  ;;  %v5243_v16 = vadd.f32 %v5195_v59, %v5143_v22  ;;  %4327 = vst.msk [vmem:[#allocation3 + $0x1a0] sm:$0xff] %vm671_vm11, %v4279_v12  ;;  %v4277_v44 = vsel %vm2606_vm2, %v4229_v31, 0.0  ;;  %v13405_v12 = vld [vmem:[#allocation3 + $0x181] sm:$0xff] }
 0x33f   : > { %v4230_v21 = vmax.f32 %v4182_v62, 0.0  ;;  %v4638_v8 = vadd.f32 %v4590_v28, %v4538_v9  ;;  %v4791_v20 = vadd.f32 %v4743_v38, %v4637_v41  ;;  %4325 = vst.msk [vmem:[#allocation3 + $0x190] sm:$0xff] %vm671_vm11, %v4277_v44  ;;  %v5295_v59 = vmul.f32 %v13300_v17, %v13361_v26  ;;  %v13401_v62 = vld [vmem:[#allocation3 + $0x187] sm:$0xff] }
 0x340   : > { %v4280_v6 = vsel %vm2609_vm3, %v4232_v0, 0.0  ;;  %v5144_v49 = vadd.f32 %v13217_v45, %v4990_v3  ;;  %v4843_v35 = vmul.f32 %v11608_v63, %v13167_v60  ;;  %v5296_v24 = vmul.f32 %v13300_v17, %v13367_v25  ;;  %v13789_v22 = vld [vmem:[#allocation2 + $0x28] sm:$0xff] }
 0x341   : > { %4328 = vst.msk [vmem:[#allocation3 + $0x1a8] sm:$0xff] %vm671_vm11, %v4280_v6  ;;  %v4278_v38 = vsel %vm2607_vm14, %v4230_v21, 0.0  ;;  %v4792_v51 = vadd.f32 %v4744_v2, %v4638_v8  ;;  %v4844_v45 = vmul.f32 %v11608_v63, %v13292_v27  ;;  %v5343_v56 = vadd.f32 %v5295_v59, %v5243_v16 }
 0x342   : > { %4326 = vst.msk [vmem:[#allocation3 + $0x198] sm:$0xff] %vm671_vm11, %v4278_v38  ;;  %v5244_v47 = vadd.f32 %v13318_v36, %v5144_v49  ;;  %v4891_v4 = vadd.f32 %v4843_v35, %v4791_v20  ;;  %v4943_v39 = vmul.f32 %v15154_v33, %v13372_v52  ;;  %v4944_v9 = vmul.f32 %v15154_v33, %v13380_v10  ;;  %v13403_v36 = vld [vmem:[#allocation3 + $0x179] sm:$0xff] }
 0x343   : > { %v4892_v11 = vadd.f32 %v4844_v45, %v4792_v51  ;;  %v5097_v31 = vmul.f32 %v11617_v34, %v13196_v5  ;;  %v5098_v2 = vmul.f32 %v11617_v34, %v13251_v14  ;;  %v5197_v0 = vmul.f32 %v11626_v18, %v13240_v13 }
 0x344   : > { %v5344_v28 = vadd.f32 %v5296_v24, %v5244_v47  ;;  %v4991_v41 = vadd.f32 %v4943_v39, %v4891_v4  ;;  %v5198_v3 = vmul.f32 %v11626_v18, %v13361_v26  ;;  %v4439_v5 = vmul.f32 %v11584_v55, %v13228_v40  ;;  %v13427_v24 = vld [vmem:[#allocation3 + $0x188] sm:$0xff] }
 0x345   : > { %v4992_v16 = vadd.f32 %v4944_v9, %v4892_v11  ;;  %v4491_v14 = vmul.f32 %v15077_v61, %v13321_v42  ;;  %v4492_v44 = vmul.f32 %v15077_v61, %v13340_v54  ;;  %v4440_v20 = vmul.f32 %v11584_v55, %v13230_v37 }
 0x346   : > { %v5373_v21 = vpack.c.bf16 %v5344_v28, %v5343_v56  ;;  %v5145_v8 = vadd.f32 %v5097_v31, %v4991_v41  ;;  %v4591_v6 = vmul.f32 %v15169_v32, %v13401_v62  ;;  %v5297_v59 = vmul.f32 %v13300_v17, %v13403_v36  ;;  %v13425_v35 = vld [vmem:[#allocation3 + $0x18f] sm:$0xff] }
 0x347   : > { %v5146_v49 = vadd.f32 %v5098_v2, %v4992_v16  ;;  %v5298_v40 = vmul.f32 %v13300_v17, %v13405_v12  ;;  %v4539_v38 = vadd.f32 %v4491_v14, %v4439_v5  ;;  %v4540_v45 = vadd.f32 %v4492_v44, %v4440_v20  ;;  %v13432_v47 = vld [vmem:[#allocation3 + $0x190] sm:$0xff] }
 0x348   : > { %7676 = vmatprep.mubr.msk.bf16.mxu0 %vm671_vm11, %v5373_v21  ;;  %v5245_v51 = vadd.f32 %v5197_v0, %v5145_v8  ;;  %v4592_v37 = vmul.f32 %v15169_v32, %v13425_v35  ;;  %v4745_v56 = vmul.f32 %v11605_v15, %v13265_v1  ;;  %v4746_v11 = vmul.f32 %v11605_v15, %v13167_v60  ;;  %v13450_v44 = vld [vmem:[#allocation3 + $0x189] sm:$0xff] }
 0x349   : > { %v5246_v4 = vadd.f32 %v5198_v3, %v5146_v49  ;;  %v4639_v39 = vadd.f32 %v4591_v6, %v4539_v38  ;;  %v4845_v9 = vmul.f32 %v11608_v63, %v13330_v19  ;;  %v4846_v28 = vmul.f32 %v11608_v63, %v13372_v52  ;;  %v4389_v60 = vld [vmem:[#allocation3 + $0x197] sm:$0xff]  ;;  %v13448_v5 = vld [vmem:[#allocation3 + $0x19f] sm:$0xff] }
 0x34a   : > { %v5345_v31 = vadd.f32 %v5297_v59, %v5245_v51  ;;  %v4640_v2 = vadd.f32 %v4592_v37, %v4540_v45  ;;  %v4945_v41 = vmul.f32 %v15154_v33, %v13427_v24  ;;  %v4946_v1 = vmul.f32 %v15154_v33, %v13432_v47  ;;  %v13458_v59 = vld [vmem:[#allocation3 + $0x191] sm:$0xff] }
 0x34b   : > { %v5346_v0 = vadd.f32 %v5298_v40, %v5246_v4  ;;  %v4793_v16 = vadd.f32 %v4745_v56, %v4639_v39  ;;  %v5099_v3 = vmul.f32 %v11617_v34, %v13275_v46  ;;  %v5100_v21 = vmul.f32 %v11617_v34, %v13240_v13  ;;  %v4695_v4 = vld [vmem:[#allocation3 + $0x198] sm:$0xff] }
 0x34c   : > { %v4794_v14 = vadd.f32 %v4746_v11, %v4640_v2  ;;  %v5199_v8 = vmul.f32 %v11626_v18, %v13367_v25  ;;  %v4441_v20 = vmul.f32 %v11584_v55, %v13267_v43  ;;  %v4442_v46 = vmul.f32 %v11584_v55, %v13321_v42 }
 0x34d   : > { %v5374_v6 = vpack.c.bf16 %v5346_v0, %v5345_v31  ;;  %v4893_v49 = vadd.f32 %v4845_v9, %v4793_v16  ;;  %v4493_v40 = vmul.f32 %v15077_v61, %v13352_v50  ;;  %v4494_v13 = vmul.f32 %v15077_v61, %v13401_v62  ;;  %v13476_v31 = vld [vmem:[#allocation3 + $0x1a0] sm:$0xff] }
 0x34e   : > { %v4894_v38 = vadd.f32 %v4846_v28, %v4794_v14  ;;  %v4593_v51 = vmul.f32 %v15169_v32, %v4389_v60  ;;  %v4594_v45 = vmul.f32 %v15169_v32, %v13448_v5  ;;  %v5200_v37 = vmul.f32 %v11626_v18, %v13403_v36 }
 0x34f   : > { %7677 = vmatmul.mubr.msk.bf16.gmra.mrb[84].mxu0 %vm671_vm11, %v5374_v6  ;;  %v4993_v43 = vadd.f32 %v4945_v41, %v4893_v49  ;;  %v5299_v42 = vmul.f32 %v13300_v17, %v13450_v44  ;;  %v4541_v56 = vadd.f32 %v4493_v40, %v4441_v20  ;;  %v5300_v11 = vmul.f32 %v13300_v17, %v13458_v59 }
 0x350   : > { %v4994_v39 = vadd.f32 %v4946_v1, %v4894_v38  ;;  %v4542_v9 = vadd.f32 %v4494_v13, %v4442_v46  ;;  %v4747_v2 = vmul.f32 %v11605_v15, %v13292_v27  ;;  %v4748_v0 = vmul.f32 %v11605_v15, %v13330_v19  ;;  %v4391_v13 = vld [vmem:[#allocation3 + $0x1a7] sm:$0xff] }
 0x351   : > { %v5147_v28 = vadd.f32 %v5099_v3, %v4993_v43  ;;  %v4641_v41 = vadd.f32 %v4593_v51, %v4541_v56  ;;  %v4847_v16 = vmul.f32 %v11608_v63, %v13380_v10  ;;  %v4848_v1 = vmul.f32 %v11608_v63, %v13427_v24  ;;  %v4392_v51 = vld [vmem:[#allocation3 + $0x1af] sm:$0xff] }
 0x352   : > { %v5148_v14 = vadd.f32 %v5100_v21, %v4994_v39  ;;  %v4642_v20 = vadd.f32 %v4594_v45, %v4542_v9  ;;  %v4947_v6 = vmul.f32 %v15154_v33, %v4695_v4  ;;  %v4948_v27 = vmul.f32 %v15154_v33, %v13476_v31  ;;  %v13499_v9 = vld [vmem:[#allocation3 + $0x1a1] sm:$0xff] }
 0x353   : > { %v5247_v49 = vadd.f32 %v5199_v8, %v5147_v28  ;;  %v4795_v46 = vadd.f32 %v4747_v2, %v4641_v41  ;;  %v5101_v3 = vmul.f32 %v11617_v34, %v13361_v26  ;;  %v5102_v38 = vmul.f32 %v11617_v34, %v13367_v25 }
 0x354   : > { %v5248_v40 = vadd.f32 %v5200_v37, %v5148_v14  ;;  %v4796_v19 = vadd.f32 %v4748_v0, %v4642_v20  ;;  %v5201_v21 = vmul.f32 %v11626_v18, %v13405_v12  ;;  %v4443_v8 = vmul.f32 %v11584_v55, %v13340_v54  ;;  %v5049_v37 = vld [vmem:[#allocation3 + $0x199] sm:$0xff]  ;;  %v4697_v14 = vld [vmem:[#allocation3 + $0x1a8] sm:$0xff] }
 0x355   : > { %v5347_v45 = vadd.f32 %v5299_v42, %v5247_v49  ;;  %v4895_v43 = vadd.f32 %v4847_v16, %v4795_v46  ;;  %v4444_v56 = vmul.f32 %v11584_v55, %v13352_v50  ;;  %v4495_v25 = vmul.f32 %v15077_v61, %v13425_v35 }
 0x356   : > { %v5348_v39 = vadd.f32 %v5300_v11, %v5248_v40  ;;  %v4896_v26 = vadd.f32 %v4848_v1, %v4796_v19  ;;  %v4496_v2 = vmul.f32 %v15077_v61, %v4389_v60  ;;  %v5202_v42 = vmul.f32 %v11626_v18, %v13450_v44  ;;  %v4698_v60 = vld [vmem:[#allocation3 + $0x1b0] sm:$0xff] }
 0x357   : > { %v4995_v28 = vadd.f32 %v4947_v6, %v4895_v43  ;;  %v4595_v41 = vmul.f32 %v15169_v32, %v4391_v13  ;;  %v4596_v54 = vmul.f32 %v15169_v32, %v4392_v51  ;;  %v4543_v11 = vadd.f32 %v4495_v25, %v4443_v8 }
 0x358   : > { %v5375_v0 = vpack.c.bf16 %v5348_v39, %v5347_v45  ;;  %v4996_v50 = vadd.f32 %v4948_v27, %v4896_v26  ;;  %v4544_v16 = vadd.f32 %v4496_v2, %v4444_v56  ;;  %v5301_v1 = vmul.f32 %v13300_v17, %v5049_v37  ;;  %v4393_v26 = vld [vmem:[#allocation3 + $0x1b7] sm:$0xff]  ;;  %v4394_v2 = vld [vmem:[#allocation3 + $0x1bf] sm:$0xff] }
 0x359   : > { %v5149_v20 = vadd.f32 %v5101_v3, %v4995_v28  ;;  %v5302_v49 = vmul.f32 %v13300_v17, %v13499_v9  ;;  %v4749_v6 = vmul.f32 %v11605_v15, %v13372_v52  ;;  %v4643_v40 = vadd.f32 %v4595_v41, %v4543_v11 }
 0x35a   : > { %7680 = vmatprep.mubr.msk.bf16.mxu0 %vm671_vm11, %v5375_v0  ;;  %v5150_v46 = vadd.f32 %v5102_v38, %v4996_v50  ;;  %v4644_v19 = vadd.f32 %v4596_v54, %v4544_v16  ;;  %v4750_v27 = vmul.f32 %v11605_v15, %v13380_v10  ;;  %v4849_v3 = vmul.f32 %v11608_v63, %v13432_v47  ;;  %v5052_v0 = vld [vmem:[#allocation3 + $0x1b1] sm:$0xff]  ;;  %v7642_v16 = vpop.f32.mrb[48].mxu0 }
 0x35b   : > { %v5249_v51 = vadd.f32 %v5201_v21, %v5149_v20  ;;  %v4850_v45 = vmul.f32 %v11608_v63, %v4695_v4  ;;  %v4949_v43 = vmul.f32 %v15154_v33, %v4697_v14  ;;  %v4797_v56 = vadd.f32 %v4749_v6, %v4643_v40  ;;  %v5509_v6 = vpop.f32.mrb[49].mxu0 }
 0x35c   : > { %v5250_v8 = vadd.f32 %v5202_v42, %v5150_v46  ;;  %v4798_v39 = vadd.f32 %v4750_v27, %v4644_v19  ;;  %v4950_v52 = vmul.f32 %v15154_v33, %v4698_v60  ;;  %v5103_v25 = vmul.f32 %v11617_v34, %v13403_v36  ;;  %v5051_v42 = vld [vmem:[#allocation3 + $0x1a9] sm:$0xff]  ;;  %v7643_v19 = vpop.f32.mrb[50].mxu0  ;;  %v4700_v27 = vld [vmem:[#allocation3 + $0x1c0] sm:$0xff] }
 0x35d   : > { %v5349_v38 = vadd.f32 %v5301_v1, %v5249_v51  ;;  %v5104_v10 = vmul.f32 %v11617_v34, %v13405_v12  ;;  %v5203_v21 = vmul.f32 %v11626_v18, %v13458_v59  ;;  %v4897_v28 = vadd.f32 %v4849_v3, %v4797_v56 }
 0x35e   : > { %v5350_v4 = vadd.f32 %v5302_v49, %v5250_v8  ;;  %v4898_v41 = vadd.f32 %v4850_v45, %v4798_v39  ;;  %v4445_v54 = vmul.f32 %v11584_v55, %v13401_v62  ;;  %v4446_v50 = vmul.f32 %v11584_v55, %v13425_v35  ;;  %v4699_v35 = vld [vmem:[#allocation3 + $0x1b8] sm:$0xff] }
 0x35f   : > { %v4497_v36 = vmul.f32 %v15077_v61, %v13448_v5  ;;  %v4498_v12 = vmul.f32 %v15077_v61, %v4391_v13  ;;  %v4597_v11 = vmul.f32 %v15169_v32, %v4393_v26  ;;  %v4997_v1 = vadd.f32 %v4949_v43, %v4897_v28  ;;  %v13551_v26 = vld [vmem:[%s14702_s13] ss:$0 sm:$0xff] }
 0x360   : > { %v5376_v20 = vpack.c.bf16 %v5350_v4, %v5349_v38  ;;  %v4998_v49 = vadd.f32 %v4950_v52, %v4898_v41  ;;  %v4598_v60 = vmul.f32 %v15169_v32, %v4394_v2  ;;  %v5204_v62 = vmul.f32 %v11626_v18, %v5049_v37  ;;  %v5512_v32 = vpop.f32.mrb[51].mxu0  ;;  %v5053_v4 = vld [vmem:[#allocation3 + $0x1b9] sm:$0xff] }
 0x361   : > { %v5303_v46 = vmul.f32 %v13300_v17, %v5051_v42  ;;  %v4545_v40 = vadd.f32 %v4497_v36, %v4445_v54  ;;  %v4546_v55 = vadd.f32 %v4498_v12, %v4446_v50  ;;  %v5151_v61 = vadd.f32 %v5103_v25, %v4997_v1 }
 0x362   : > { %7681 = vmatmul.mubr.msk.bf16.gmra.mrb[88].mxu0 %vm671_vm11, %v5376_v20  ;;  %v5152_v5 = vadd.f32 %v5104_v10, %v4998_v49  ;;  %v5304_v13 = vmul.f32 %v13300_v17, %v5052_v0  ;;  %v4751_v51 = vmul.f32 %v11605_v15, %v13427_v24  ;;  %v4752_v37 = vmul.f32 %v11605_v15, %v13432_v47 }
 0x363   : > { %v4645_v3 = vadd.f32 %v4597_v11, %v4545_v40  ;;  %v4646_v45 = vadd.f32 %v4598_v60, %v4546_v55  ;;  %v4851_v43 = vmul.f32 %v11608_v63, %v13476_v31  ;;  %v5251_v8 = vadd.f32 %v5203_v21, %v5151_v61 }
 0x364   : > { %v5252_v56 = vadd.f32 %v5204_v62, %v5152_v5  ;;  %v4852_v39 = vmul.f32 %v11608_v63, %v4697_v14  ;;  %v4951_v52 = vmul.f32 %v15154_v33, %v4699_v35  ;;  %v4952_v25 = vmul.f32 %v15154_v33, %v4700_v27  ;;  %v13563_v14 = vld [vmem:[%s14703_s14] ss:$0 sm:$0xff]  ;;  %v5054_v33 = vld [vmem:[#allocation3 + $0x1c1] sm:$0xff] }
 0x365   : > { %v4799_v24 = vadd.f32 %v4751_v51, %v4645_v3  ;;  %v4800_v38 = vadd.f32 %v4752_v37, %v4646_v45  ;;  %v5105_v15 = vmul.f32 %v11617_v34, %v13450_v44  ;;  %v5351_v47 = vadd.f32 %v5303_v46, %v5251_v8 }
 0x366   : > { %v5352_v31 = vadd.f32 %v5304_v13, %v5252_v56  ;;  %v5106_v10 = vmul.f32 %v11617_v34, %v13458_v59  ;;  %v5205_v63 = vmul.f32 %v11626_v18, %v13499_v9  ;;  %v5708_v28 = vmul.f32 %v7642_v16, %v13551_v26  ;;  %v7989_v13 = vld [vmem:[%s15072_s26 + $0x10] sm:$0xff] }
 0x367   : > { %v4899_v21 = vadd.f32 %v4851_v43, %v4799_v24  ;;  %v4900_v2 = vadd.f32 %v4852_v39, %v4800_v38  ;;  %v5706_v44 = vmul.f32 %v13551_v26, %v5509_v6  ;;  %v5206_v54 = vmul.f32 %v11626_v18, %v5051_v42 }
 0x368   : > { %v5377_v41 = vpack.c.bf16 %v5352_v31, %v5351_v47  ;;  %v5709_v34 = vmul.f32 %v7643_v19, %v13551_v26  ;;  %v5707_v59 = vmul.f32 %v13551_v26, %v5512_v32  ;;  %v5762_v50 = vadd.f32 %v13563_v14, %v5708_v28 }
 0x369   : > { %v4999_v9 = vadd.f32 %v4951_v52, %v4899_v21  ;;  %v5000_v0 = vadd.f32 %v4952_v25, %v4900_v2  ;;  %v5760_v36 = vadd.f32 %v13563_v14, %v5706_v44  ;;  %v5305_v12 = vmul.f32 %v13300_v17, %v5053_v4  ;;  %v7973_v44 = vld [vmem:[%s14704_s15] sm:$0xff]  }
 0x36a   : > { %7684 = vmatprep.mubr.msk.bf16.mxu0 %vm671_vm11, %v5377_v41  ;;  %v5306_v11 = vmul.f32 %v13300_v17, %v5054_v33  ;;  %v5763_v16 = vadd.f32 %v13563_v14, %v5709_v34  ;;  %v5761_v18 = vadd.f32 %v13563_v14, %v5707_v59  ;;  %v5810_v49 = vsel %vm2564_vm5, %v5762_v50, -1e+30  ;;  %7732 = vmatprep.subr.bf16.mxu1 %v7973_v44 }
 0x36b   : > { %v5153_v42 = vadd.f32 %v5105_v15, %v4999_v9  ;;  %v5154_v20 = vadd.f32 %v5106_v10, %v5000_v0  ;;  %v5808_v6 = vsel %vm2562_vm4, %v5760_v36, -1e+30  ;;  %5858 = vst.msk [vmem:[#allocation2 + $0x40] sm:$0xff] %vm671_vm11, %v5810_v49  ;;  %7733 = vmatpush3.bf16.msra.mxu1 %v7973_v44  ;;  %v15204_v44 = vld [vmem:[#allocation31_spill] sm:$0xff] }
 0x36c   : > { %5856 = vst.msk [vmem:[#allocation2 + $0x30] sm:$0xff] %vm671_vm11, %v5808_v6  ;;  %v5811_v46 = vsel %vm2565_vm7, %v5763_v16, -1e+30  ;;  %v5809_v40 = vsel %vm2563_vm6, %v5761_v18, -1e+30  ;;  %v7646_v27 = vpop.f32.mrb[52].mxu0 }
 0x36d   : > { %v5253_v55 = vadd.f32 %v5205_v63, %v5153_v42  ;;  %v5254_v35 = vadd.f32 %v5206_v54, %v5154_v20  ;;  %5859 = vst.msk [vmem:[#allocation2 + $0x48] sm:$0xff] %vm671_vm11, %v5811_v46  ;;  %5857 = vst.msk [vmem:[#allocation2 + $0x38] sm:$0xff] %vm671_vm11, %v5809_v40  ;;  %v5712_v51 = vmul.f32 %v7646_v27, %v13551_v26  ;;  %v5525_v32 = vpop.f32.mrb[53].mxu0  ;;  %v15194_v46 = vld [vmem:[#allocation27_spill] sm:$0xff] }
 0x36e   : > { %v5710_v3 = vmul.f32 %v13551_v26, %v5525_v32  ;;  %v7647_v45 = vpop.f32.mrb[54].mxu0  ;;  %vm15195_vm4 = vcmp.eq.s32.totalorder %v15194_v46, 1 }
 0x36f   : > { %v5353_v19 = vadd.f32 %v5305_v12, %v5253_v55  ;;  %v5354_v61 = vadd.f32 %v5306_v11, %v5254_v35  ;;  %v5766_v37 = vadd.f32 %v13563_v14, %v5712_v51  ;;  %v5713_v43 = vmul.f32 %v7647_v45, %v13551_v26  ;;  %v5528_v8 = vpop.f32.mrb[55].mxu0  ;;  %v15196_v35 = vld [vmem:[#allocation25_spill] sm:$0xff]  ;;  %v15200_v51 = vld [vmem:[#allocation26_spill] sm:$0xff] }
 0x370   : > { %v5764_v56 = vadd.f32 %v13563_v14, %v5710_v3  ;;  %v5711_v39 = vmul.f32 %v13551_v26, %v5528_v8  ;;  %vm15197_vm5 = vcmp.eq.s32.totalorder %v15196_v35, 1  ;;  %vm15201_vm7 = vcmp.eq.s32.totalorder %v15200_v51, 1 }
 0x371   : > { %v5378_v5 = vpack.c.bf16 %v5354_v61, %v5353_v19  ;;  %v5814_v24 = vsel %vm2568_vm9, %v5766_v37, -1e+30  ;;  %v5767_v38 = vadd.f32 %v13563_v14, %v5713_v43 }
 0x372   : > { %5862 = vst.msk [vmem:[#allocation2 + $0x60] sm:$0xff] %vm671_vm11, %v5814_v24  ;;  %v5812_v15 = vsel %vm2566_vm8, %v5764_v56, -1e+30  ;;  %v5765_v47 = vadd.f32 %v13563_v14, %v5711_v39  ;;  %v7974_v56 = vld [vmem:[%s14704_s15 + $0x8] sm:$0xff]   ;;  %vm15205_vm8 = vcmp.eq.s32.totalorder %v15204_v44, 1 }
 0x373   : > { %7685 = vmatmul.mubr.msk.bf16.gmra.mrb[92].mxu0 %vm671_vm11, %v5378_v5  ;;  %5860 = vst.msk [vmem:[#allocation2 + $0x50] sm:$0xff] %vm671_vm11, %v5812_v15  ;;  %v5815_v10 = vsel %vm2569_vm10, %v5767_v38, -1e+30  ;;  %7734 = vmatprep.subr.bf16.mxu1 %v7974_v56 }
 0x374   : > { %7776 = vmatprep.mubr.f32.mxu0 %v7989_v13  ;;  %5863 = vst.msk [vmem:[#allocation2 + $0x68] sm:$0xff] %vm671_vm11, %v5815_v10  ;;  %v5813_v21 = vsel %vm2567_vm12, %v5765_v47, -1e+30  ;;  %v15198_v13 = vld [vmem:[#allocation28_spill] sm:$0xff]  ;;  %7735 = vmatpush3.bf16.msra.mxu1 %v7974_v56 }
 0x375   : > { %5861 = vst.msk [vmem:[#allocation2 + $0x58] sm:$0xff] %vm671_vm11, %v5813_v21  ;;  %vm15199_vm6 = vcmp.eq.s32.totalorder %v15198_v13, 1 }
 0x376   : > { %v7390_v2 = vpop.f32.mrb[48].mxu1 }
 0x377   : > { %v7391_v4 = vpop.f32.mrb[49].mxu1 }
 0x378   : > { %v13613_v33 = vadd.f32 %v7391_v4, %v7390_v2 }
 0x37a   : > { %v7393_v28 = vpop.f32.mrb[50].mxu1 }
 0x37b   : > { %v7394_v41 = vpop.f32.mrb[51].mxu1 }
 0x37c   : > { %v13618_v54 = vadd.f32 %v7394_v41, %v7393_v28 }
 0x37e   : > { %v7396_v34 = vpop.f32.mrb[52].mxu1 }
 0x37f   : > { %v7397_v59 = vpop.f32.mrb[53].mxu1 }
 0x380   : > { %v13620_v9 = vadd.f32 %v7397_v59, %v7396_v34  ;;  %v15206_v59 = vld [vmem:[#allocation29_spill] sm:$0xff] }
 0x381   : > { %vm15207_vm9 = vcmp.eq.s32.totalorder %v15206_v59, 1 }
 0x383   : > { %v7399_v0 = vpop.f32.mrb[54].mxu1 }
 0x384   : > { %v7400_v50 = vpop.f32.mrb[55].mxu1 }
 0x385   : > { %v7650_v36 = vpop.f32.mrb[56].mxu0  ;;  %v13622_v12 = vadd.f32 %v7400_v50, %v7399_v0 }
 0x386   : > { %v5716_v11 = vmul.f32 %v7650_v36, %v13551_v26  ;;  %v5541_v16 = vpop.f32.mrb[57].mxu0  ;;  %v15208_v36 = vld [vmem:[#allocation32_spill] sm:$0xff] }
 0x387   : > { %v5714_v18 = vmul.f32 %v13551_v26, %v5541_v16  ;;  %v7651_v42 = vpop.f32.mrb[58].mxu0  ;;  %vm15209_vm10 = vcmp.eq.s32.totalorder %v15208_v36, 1  ;;  %v15210_v16 = vld [vmem:[#allocation30_spill] sm:$0xff] }
 0x388   : > { %v5770_v20 = vadd.f32 %v13563_v14, %v5716_v11  ;;  %v5717_v1 = vmul.f32 %v7651_v42, %v13551_v26  ;;  %v5544_v49 = vpop.f32.mrb[59].mxu0  ;;  %vm15211_vm12 = vcmp.eq.s32.totalorder %v15210_v16, 1  ;;  %v5948_v36 = vld [vmem:[#allocation2 + $0x27] sm:$0xff] }
 0x389   : > { %v5768_v60 = vadd.f32 %v13563_v14, %v5714_v18  ;;  %v5715_v6 = vmul.f32 %v13551_v26, %v5544_v49 }
 0x38a   : > { %v7402_v62 = vpop.f32.mrb[56].mxu1  ;;  %v5818_v17 = vsel %vm15195_vm4, %v5770_v20, -1e+30  ;;  %v5771_v40 = vadd.f32 %v13563_v14, %v5717_v1 }
 0x38b   : > { %v7403_v55 = vpop.f32.mrb[57].mxu1  ;;  %5866 = vst.msk [vmem:[#allocation2 + $0x80] sm:$0xff] %vm671_vm11, %v5818_v17  ;;  %v5816_v19 = vsel %vm15197_vm5, %v5768_v60, -1e+30  ;;  %v5769_v61 = vadd.f32 %v13563_v14, %v5715_v6 }
 0x38c   : > { %v13637_v5 = vadd.f32 %v7403_v55, %v7402_v62  ;;  %5864 = vst.msk [vmem:[#allocation2 + $0x70] sm:$0xff] %vm671_vm11, %v5816_v19  ;;  %v5819_v27 = vsel %vm15199_vm6, %v5771_v40, -1e+30 }
 0x38d   : > { %5867 = vst.msk [vmem:[#allocation2 + $0x88] sm:$0xff] %vm671_vm11, %v5819_v27  ;;  %v5817_v32 = vsel %vm15201_vm7, %v5769_v61, -1e+30 }
 0x38e   : > { %v7405_v3 = vpop.f32.mrb[58].mxu1  ;;  %5865 = vst.msk [vmem:[#allocation2 + $0x78] sm:$0xff] %vm671_vm11, %v5817_v32 }
 0x38f   : > { %v7406_v45 = vpop.f32.mrb[59].mxu1 }
 0x390   : > { %v13646_v37 = vadd.f32 %v7406_v45, %v7405_v3 }
 0x392   : > { %v7408_v43 = vpop.f32.mrb[60].mxu1 }
 0x393   : > { %v7409_v8 = vpop.f32.mrb[61].mxu1 }
 0x394   : > { %v13651_v39 = vadd.f32 %v7409_v8, %v7408_v43  ;;  %v15214_v8 = vld [vmem:[#allocation35_spill] sm:$0xff] }
 0x395   : > { %v13675_v42 = vld [vmem:[#allocation2 + $0x77] sm:$0xff]  ;;  %vm15215_vm13 = vcmp.eq.s32.totalorder %v15214_v8, 1 }
 0x396   : > { %15202 = vst [vmem:[#allocation53_spill] sm:$0xff] %v13651_v39  ;;  %v7411_v52 = vpop.f32.mrb[62].mxu1  ;;  %v13684_v6 = vld [vmem:[#allocation2 + $0x78] sm:$0xff] }
 0x397   : > { %v7412_v24 = vpop.f32.mrb[63].mxu1 }
 0x398   : > { %v13653_v38 = vadd.f32 %v7412_v24, %v7411_v52  ;;  %v15216_v24 = vld [vmem:[#allocation33_spill] sm:$0xff] }
 0x399   : > { %vm15217_vm0 = vcmp.eq.s32.totalorder %v15216_v24, 1 }
 0x39a   : > { %15203 = vst [vmem:[#allocation54_spill] sm:$0xff] %v13653_v38  ;;  %v13838_v38 = vld [vmem:[#allocation2 + $0x48] sm:$0xff] }
 0x39c   : > { %v7654_v25 = vpop.f32.mrb[60].mxu0 }
 0x39d   : > { %v5720_v15 = vmul.f32 %v7654_v25, %v13551_v26  ;;  %v5557_v47 = vpop.f32.mrb[61].mxu0 }
 0x39e   : > { %v5718_v31 = vmul.f32 %v13551_v26, %v5557_v47  ;;  %v7655_v10 = vpop.f32.mrb[62].mxu0  ;;  %v13706_v47 = vld [vmem:[#allocation2 + $0x79] sm:$0xff] }
 0x39f   : > { %v5774_v63 = vadd.f32 %v13563_v14, %v5720_v15  ;;  %v5721_v21 = vmul.f32 %v7655_v10, %v13551_v26  ;;  %v5560_v2 = vpop.f32.mrb[63].mxu0  ;;  %15218 = vst [vmem:[#allocation59_spill] sm:$0xff] %v13706_v47 }
 0x3a0   : > { %v5772_v4 = vadd.f32 %v13563_v14, %v5718_v31  ;;  %v5719_v28 = vmul.f32 %v13551_v26, %v5560_v2  ;;  %v15219_v31 = vld [vmem:[#allocation36_spill] sm:$0xff] }
 0x3a1   : > { %v5822_v41 = vsel %vm15205_vm8, %v5774_v63, -1e+30  ;;  %v5775_v34 = vadd.f32 %v13563_v14, %v5721_v21  ;;  %vm15220_vm15 = vcmp.eq.s32.totalorder %v15219_v31, 1  ;;  %v5946_v63 = vld [vmem:[#allocation2 + $0x17] sm:$0xff]  ;;  %v13711_v21 = vld [vmem:[#allocation2 + $0x2f] sm:$0xff] }
 0x3a2   : > { %5870 = vst.msk [vmem:[#allocation2 + $0xa0] sm:$0xff] %vm671_vm11, %v5822_v41  ;;  %v5820_v0 = vsel %vm15207_vm9, %v5772_v4, -1e+30  ;;  %v5773_v50 = vadd.f32 %v13563_v14, %v5719_v28  ;;  %v15221_v4 = vld [vmem:[#allocation34_spill] sm:$0xff]  ;;  %v6000_v44 = vmax.f32 %v5946_v63, %v13711_v21 }
 0x3a3   : > { %5868 = vst.msk [vmem:[#allocation2 + $0x90] sm:$0xff] %vm671_vm11, %v5820_v0  ;;  %v5823_v11 = vsel %vm15209_vm10, %v5775_v34, -1e+30  ;;  %vm15222_vm4 = vcmp.eq.s32.totalorder %v15221_v4, 1  ;;  %v13721_v34 = vld [vmem:[#allocation2 + $0x47] sm:$0xff]  ;;  %v5947_v0 = vld [vmem:[#allocation2 + $0x1f] sm:$0xff] }
 0x3a4   : > { %5871 = vst.msk [vmem:[#allocation2 + $0xa8] sm:$0xff] %vm671_vm11, %v5823_v11  ;;  %v5821_v18 = vsel %vm15211_vm12, %v5773_v50, -1e+30  ;;  %v5950_v50 = vld [vmem:[#allocation2 + $0x37] sm:$0xff] }
 0x3a5   : > { %5869 = vst.msk [vmem:[#allocation2 + $0x98] sm:$0xff] %vm671_vm11, %v5821_v18  ;;  %v6048_v18 = vmax.f32 %v6000_v44, %v13721_v34  ;;  %v13769_v4 = vld [vmem:[#allocation2 + $0x30] sm:$0xff] }
 0x3aa   : > { %v13677_v20 = vld [vmem:[#allocation2 + $0x8f] sm:$0xff] }
 0x3ab   : > { %15212 = vst [vmem:[#allocation52_spill] sm:$0xff] %v13677_v20  ;;  %v13679_v1 = vld [vmem:[#allocation2 + $0xa7] sm:$0xff]  ;;  %v6012_v49 = vmax.f32 %v13675_v42, %v13677_v20  ;;  %v13687_v17 = vld [vmem:[#allocation2 + $0x90] sm:$0xff] }
 0x3ac   : > { %15213 = vst [vmem:[#allocation55_spill] sm:$0xff] %v13687_v17  ;;  %v13692_v13 = vld [vmem:[#allocation2 + $0xa8] sm:$0xff]  ;;  %v13719_v41 = vld [vmem:[#allocation2 + $0x91] sm:$0xff]  ;;  %v13773_v44 = vld [vmem:[#allocation2 + $0x99] sm:$0xff] }
 0x3ad   : > { %v6060_v60 = vmax.f32 %v6012_v49, %v13679_v1  ;;  %15223 = vst [vmem:[#allocation71_spill] sm:$0xff] %v13719_v41  ;;  %v13724_v11 = vld [vmem:[#allocation2 + $0x97] sm:$0xff]  ;;  %15229 = vst [vmem:[#allocation14_spill] sm:$0xff] %v13773_v44 }
 0x3ae   : > { %15224 = vst [vmem:[#allocation12_spill] sm:$0xff] %v13724_v11 }
 0x3af   : > { %v6162_v62 = vmax.f32 %v6060_v60, %v13684_v6 }
 0x3b1   : > { %v6210_v35 = vmax.f32 %v6162_v62, %v13687_v17  ;;  %v13733_v62 = vld [vmem:[#allocation2 + $0x4f] sm:$0xff] }
 0x3b2   : > { %v7658_v46 = vpop.f32.mrb[64].mxu0 }
 0x3b3   : > { %v5724_v40 = vmul.f32 %v7658_v46, %v13551_v26  ;;  %v5573_v55 = vpop.f32.mrb[65].mxu0  ;;  %v6258_v3 = vmax.f32 %v6210_v35, %v13692_v13  ;;  %v6096_v46 = vld [vmem:[#allocation2 + $0x18] sm:$0xff] }
 0x3b4   : > { %v5722_v19 = vmul.f32 %v13551_v26, %v5573_v55  ;;  %v7659_v61 = vpop.f32.mrb[66].mxu0  ;;  %v13740_v35 = vld [vmem:[#allocation2 + $0x9f] sm:$0xff] }
 0x3b5   : > { %v5778_v27 = vadd.f32 %v13563_v14, %v5724_v40  ;;  %v5725_v51 = vmul.f32 %v7659_v61, %v13551_v26  ;;  %v5576_v32 = vpop.f32.mrb[67].mxu0  ;;  %v6360_v2 = vmax.f32 %v6258_v3, %v13706_v47  ;;  %v13735_v40 = vld [vmem:[#allocation2 + $0x3f] sm:$0xff]  ;;  %15226 = vst [vmem:[#allocation9_spill] sm:$0xff] %v13740_v35 }
 0x3b6   : > { %v5776_v45 = vadd.f32 %v13563_v14, %v5722_v19  ;;  %v5723_v43 = vmul.f32 %v13551_v26, %v5576_v32  ;;  %v13744_v61 = vld [vmem:[#allocation2 + $0x98] sm:$0xff]  ;;  %v6002_v31 = vmax.f32 %v5948_v36, %v13735_v40  ;;  %v6004_v36 = vmax.f32 %v5950_v50, %v13733_v62 }
 0x3b7   : > { %v5826_v56 = vsel %vm15215_vm13, %v5778_v27, -1e+30  ;;  %v5779_v52 = vadd.f32 %v13563_v14, %v5725_v51  ;;  %v6408_v59 = vmax.f32 %v6360_v2, %v13719_v41  ;;  %15227 = vst [vmem:[#allocation74_spill] sm:$0xff] %v13744_v61  ;;  %v6001_v27 = vmax.f32 %v5947_v0, %v5950_v50  ;;  %v6097_v2 = vld [vmem:[#allocation2 + $0x20] sm:$0xff] }
 0x3b8   : > { %5874 = vst.msk [vmem:[#allocation2 + $0xc0] sm:$0xff] %vm671_vm11, %v5826_v56  ;;  %v5824_v25 = vsel %vm15217_vm0, %v5776_v45, -1e+30  ;;  %v5777_v15 = vadd.f32 %v13563_v14, %v5723_v43  ;;  %v13753_v43 = vld [vmem:[#allocation2 + $0x57] sm:$0xff]  ;;  %v13757_v56 = vld [vmem:[#allocation2 + $0xa0] sm:$0xff]  ;;  %vm15260_vm0 = vcmask 261120  }
 0x3b9   : > { %5872 = vst.msk [vmem:[#allocation2 + $0xb0] sm:$0xff] %vm671_vm11, %v5824_v25  ;;  %v5827_v10 = vsel %vm15220_vm15, %v5779_v52, -1e+30  ;;  %15228 = vst [vmem:[#allocation10_spill] sm:$0xff] %v13757_v56  ;;  %v13762_v24 = vmax.f32 %v6001_v27, %v13733_v62  ;;  %v6150_v25 = vmax.f32 %v6048_v18, %v6096_v46  ;;  %v13776_v0 = vld [vmem:[#allocation2 + $0x5f] sm:$0xff]  ;;  %v13779_v18 = vmax.f32 %v6002_v31, %v13753_v43 }
 0x3ba   : > { %5875 = vst.msk [vmem:[#allocation2 + $0xc8] sm:$0xff] %vm671_vm11, %v5827_v10  ;;  %v5825_v28 = vsel %vm15222_vm4, %v5777_v15, -1e+30  ;;  %v13793_v31 = vld [vmem:[#allocation2 + $0xa1] sm:$0xff]  ;;  %vm15263_vm15 = vmmov %vm15260_vm0 }
 0x3bb   : > { %5873 = vst.msk [vmem:[#allocation2 + $0xb8] sm:$0xff] %vm671_vm11, %v5825_v28  ;;  %15231 = vst [vmem:[#allocation69_spill] sm:$0xff] %v13793_v31  ;;  %v6151_v50 = vmax.f32 %v13762_v24, %v6097_v2 }
 0x3bc   : > { %vm15267_vm4 = vmmov %vm15260_vm0 }
 0x3c0   : > { %v13726_v16 = vld [vmem:[#allocation2 + $0xaf] sm:$0xff] }
 0x3c1   : > { %v13729_v49 = vld [vmem:[#allocation2 + $0xa9] sm:$0xff]  ;;  %v6013_v60 = vmax.f32 %v13726_v16, %v13724_v11  ;;  %v6016_v32 = vmax.f32 %v13724_v11, %v13726_v16  ;;  %v13819_v11 = vld [vmem:[#allocation2 + $0x7f] sm:$0xff] }
 0x3c2   : > { %v13738_v55 = vmax.f32 %v6408_v59, %v13729_v49  ;;  %v13742_v19 = vld [vmem:[#allocation2 + $0xb7] sm:$0xff]  ;;  %v13751_v45 = vld [vmem:[#allocation2 + $0xbf] sm:$0xff]  ;;  %v13755_v8 = vld [vmem:[#allocation2 + $0xc7] sm:$0xff]  ;;  %15232 = vst [vmem:[#allocation57_spill] sm:$0xff] %v13819_v11 }
 0x3c3   : > { %v6014_v51 = vmax.f32 %v13742_v19, %v13740_v35  ;;  %v6061_v3 = vmax.f32 %v6013_v60, %v13744_v61  ;;  %v13759_v52 = vld [vmem:[#allocation2 + $0xb0] sm:$0xff]  ;;  %v6015_v15 = vmax.f32 %v13751_v45, %v13679_v1  ;;  %v13771_v28 = vld [vmem:[#allocation2 + $0xb8] sm:$0xff]  ;;  %v6064_v60 = vmax.f32 %v6016_v32, %v13755_v8 }
 0x3c4   : > { %15225 = vst [vmem:[#allocation58_spill] sm:$0xff] %v13738_v55  ;;  %v13795_v53 = vld [vmem:[#allocation2 + $0xb1] sm:$0xff]  ;;  %v13799_v32 = vmax.f32 %v6150_v25, %v13769_v4  ;;  %v13807_v7 = vld [vmem:[#allocation2 + $0xb9] sm:$0xff]  ;;  %v6152_v25 = vmax.f32 %v13779_v18, %v13789_v22 }
 0x3c5   : > { %v6062_v10 = vmax.f32 %v6014_v51, %v13757_v56  ;;  %v6163_v63 = vmax.f32 %v6061_v3, %v13759_v52  ;;  %v6063_v59 = vmax.f32 %v6015_v15, %v13692_v13  ;;  %v13785_v51 = vld [vmem:[#allocation2 + $0xc0] sm:$0xff]  ;;  %v6003_v3 = vmax.f32 %v13711_v21, %v13721_v34 }
 0x3c6   : > { %v13791_v15 = vld [vmem:[#allocation2 + $0x67] sm:$0xff] }
 0x3c7   : > { %v6164_v46 = vmax.f32 %v6062_v10, %v13771_v28  ;;  %v6211_v27 = vmax.f32 %v6163_v63, %v13773_v44  ;;  %15230 = vst [vmem:[#allocation11_spill] sm:$0xff] %v13791_v15  ;;  %v6165_v10 = vmax.f32 %v6063_v59, %v13785_v51  ;;  %v6051_v30 = vmax.f32 %v6003_v3, %v13776_v0 }
 0x3c8   : > { %v6052_v2 = vmax.f32 %v6004_v36, %v13791_v15  ;;  %v13825_v36 = vld [vmem:[#allocation2 + $0x87] sm:$0xff] }
 0x3c9   : > { %v7662_v23 = vpop.f32.mrb[68].mxu0  ;;  %v6212_v21 = vmax.f32 %v6164_v46, %v13793_v31  ;;  %v6259_v29 = vmax.f32 %v6211_v27, %v13795_v53  ;;  %v6213_v24 = vmax.f32 %v6165_v10, %v13729_v49  ;;  %v6166_v27 = vmax.f32 %v6064_v60, %v13744_v61  ;;  %v13831_v61 = vld [vmem:[#allocation2 + $0x80] sm:$0xff] }
 0x3ca   : > { %v5728_v63 = vmul.f32 %v7662_v23, %v13551_v26  ;;  %v5589_v57 = vpop.f32.mrb[69].mxu0 }
 0x3cb   : > { %v5726_v58 = vmul.f32 %v13551_v26, %v5589_v57  ;;  %v7663_v48 = vpop.f32.mrb[70].mxu0  ;;  %v6260_v3 = vmax.f32 %v6212_v21, %v13807_v7  ;;  %v13817_v57 = vld [vmem:[#allocation2 + $0xc1] sm:$0xff]  ;;  %v6361_v18 = vmax.f32 %v6259_v29, %v13819_v11  ;;  %v6153_v21 = vmax.f32 %v6051_v30, %v13769_v4  ;;  %v15238_v30 = vld [vmem:[#allocation40_spill] sm:$0xff] }
 0x3cc   : > { %v5782_v23 = vadd.f32 %v13563_v14, %v5728_v63  ;;  %v5729_v59 = vmul.f32 %v7663_v48, %v13551_v26  ;;  %v5592_v46 = vpop.f32.mrb[71].mxu0  ;;  %v6261_v22 = vmax.f32 %v6213_v24, %v13817_v57  ;;  %v15233_v48 = vld [vmem:[#allocation39_spill] sm:$0xff]  ;;  %vm15239_vm7 = vcmp.eq.s32.totalorder %v15238_v30, 1 }
 0x3cd   : > { %v5780_v10 = vadd.f32 %v13563_v14, %v5726_v58  ;;  %v5727_v47 = vmul.f32 %v13551_v26, %v5592_v46  ;;  %vm15234_vm5 = vcmp.eq.s32.totalorder %v15233_v48, 1  ;;  %v6362_v39 = vmax.f32 %v6260_v3, %v13825_v36  ;;  %v15235_v58 = vld [vmem:[#allocation37_spill] sm:$0xff]  ;;  %v6100_v46 = vld [vmem:[#allocation2 + $0x38] sm:$0xff]  ;;  %v13842_v48 = vld [vmem:[#allocation2 + $0x88] sm:$0xff] }
 0x3ce   : > { %v5830_v63 = vsel %vm15234_vm5, %v5782_v23, -1e+30  ;;  %v5783_v60 = vadd.f32 %v13563_v14, %v5729_v59  ;;  %vm15236_vm6 = vcmp.eq.s32.totalorder %v15235_v58, 1  ;;  %v6409_v23 = vmax.f32 %v6361_v18, %v13831_v61  ;;  %15237 = vst [vmem:[#allocation15_spill] sm:$0xff] %v13842_v48  ;;  %v15241_v18 = vld [vmem:[#allocation38_spill] sm:$0xff]  ;;  %vm15276_vm5 = vmmov %vm15260_vm0 }
 0x3cf   : > { %5878 = vst.msk [vmem:[#allocation2 + $0xe0] sm:$0xff] %vm671_vm11, %v5830_v63  ;;  %v5828_v24 = vsel %vm15236_vm6, %v5780_v10, -1e+30  ;;  %v5781_v29 = vadd.f32 %v13563_v14, %v5727_v47  ;;  %v6363_v59 = vmax.f32 %v6261_v22, %v13677_v20  ;;  %v6199_v3 = vmax.f32 %v6151_v50, %v6100_v46  ;;  %v13849_v63 = vld [vmem:[#allocation2 + $0x81] sm:$0xff]  ;;  %v6294_v20 = vld [vmem:[#allocation2 + $0x19] sm:$0xff]  ;;  %v13863_v30 = vld [vmem:[#allocation2 + $0x6f] sm:$0xff] }
 0x3d0   : > { %5876 = vst.msk [vmem:[#allocation2 + $0xd0] sm:$0xff] %vm671_vm11, %v5828_v24  ;;  %v5831_v4 = vsel %vm15239_vm7, %v5783_v60, -1e+30  ;;  %v6246_v10 = vmax.f32 %v13799_v32, %v13838_v38  ;;  %15240 = vst [vmem:[#allocation16_spill] sm:$0xff] %v13849_v63  ;;  %v6410_v47 = vmax.f32 %v6362_v39, %v13842_v48  ;;  %vm15242_vm8 = vcmp.eq.s32.totalorder %v15241_v18, 1  ;;  %v13860_v60 = vld [vmem:[#allocation2 + $0x89] sm:$0xff] }
 0x3d1   : > { %5879 = vst.msk [vmem:[#allocation2 + $0xe8] sm:$0xff] %vm671_vm11, %v5831_v4  ;;  %v5829_v22 = vsel %vm15242_vm8, %v5781_v29, -1e+30  ;;  %v6214_v58 = vmax.f32 %v6166_v27, %v13759_v52  ;;  %v13857_v24 = vmax.f32 %v6409_v23, %v13849_v63  ;;  %v6411_v50 = vmax.f32 %v6363_v59, %v13687_v17  ;;  %15244 = vst [vmem:[#allocation18_spill] sm:$0xff] %v13860_v60  ;;  %v6101_v32 = vld [vmem:[#allocation2 + $0x40] sm:$0xff]  ;;  %v13878_v48 = vld [vmem:[#allocation2 + $0x50] sm:$0xff] }
 0x3d2   : > { %5877 = vst.msk [vmem:[#allocation2 + $0xd8] sm:$0xff] %vm671_vm11, %v5829_v22  ;;  %v6005_v39 = vmax.f32 %v13735_v40, %v13753_v43  ;;  %v6154_v4 = vmax.f32 %v6052_v2, %v6100_v46  ;;  %v13868_v29 = vmax.f32 %v6410_v47, %v13860_v60  ;;  %v6200_v27 = vmax.f32 %v6152_v25, %v6101_v32  ;;  %v13876_v22 = vld [vmem:[#allocation2 + $0xc8] sm:$0xff]  ;;  %v13889_v59 = vld [vmem:[#allocation2 + $0x60] sm:$0xff] }
 0x3d3   : > { %15243 = vst [vmem:[#allocation13_spill] sm:$0xff] %v13857_v24  ;;  %v6201_v23 = vmax.f32 %v6153_v21, %v13838_v38  ;;  %v13872_v18 = vmax.f32 %v6411_v50, %v13719_v41  ;;  %15247 = vst [vmem:[#allocation19_spill] sm:$0xff] %v13876_v22  ;;  %v6348_v17 = vmax.f32 %v6246_v10, %v6294_v20  ;;  %v6295_v47 = vld [vmem:[#allocation2 + $0x21] sm:$0xff]  ;;  %v13887_v50 = vld [vmem:[#allocation2 + $0x58] sm:$0xff] }
 0x3d4   : > { %15245 = vst [vmem:[#allocation17_spill] sm:$0xff] %v13868_v29  ;;  %v6262_v40 = vmax.f32 %v6214_v58, %v13876_v22  ;;  %v6247_v2 = vmax.f32 %v6199_v3, %v13878_v48  ;;  %v6053_v46 = vmax.f32 %v6005_v39, %v13863_v30  ;;  %v6017_v21 = vmax.f32 %v13740_v35, %v13742_v19  ;;  %v6297_v10 = vld [vmem:[#allocation2 + $0x31] sm:$0xff] }
 0x3d5   : > { %15246 = vst [vmem:[#allocation20_spill] sm:$0xff] %v13872_v18  ;;  %15248 = vst [vmem:[#allocation23_spill] sm:$0xff] %v13889_v59  ;;  %v6202_v55 = vmax.f32 %v6154_v4, %v13878_v48  ;;  %v6248_v3 = vmax.f32 %v6200_v27, %v13887_v50  ;;  %v6249_v58 = vmax.f32 %v6201_v23, %v13889_v59 }
 0x3d6   : > { %v6006_v39 = vmax.f32 %v13721_v34, %v13776_v0  ;;  %v6007_v25 = vmax.f32 %v13733_v62, %v13791_v15  ;;  %v6396_v18 = vmax.f32 %v6348_v17, %v6297_v10  ;;  %v6018_v24 = vmax.f32 %v13679_v1, %v13751_v45  ;;  %v13912_v34 = vld [vmem:[#allocation2 + $0x68] sm:$0xff] }
 0x3d7   : > { %v13892_v20 = vld [vmem:[#allocation2 + $0xcf] sm:$0xff]  ;;  %v6019_v4 = vmax.f32 %v13726_v16, %v13755_v8  ;;  %v6364_v60 = vmax.f32 %v6262_v40, %v13773_v44  ;;  %v13906_v27 = vmax.f32 %v6247_v2, %v6295_v47  ;;  %v6155_v62 = vmax.f32 %v6053_v46, %v6101_v32 }
 0x3d8   : > { %v6065_v29 = vmax.f32 %v6017_v21, %v13892_v20  ;;  %v6054_v21 = vmax.f32 %v6006_v39, %v13675_v42  ;;  %v6296_v16 = vld [vmem:[#allocation2 + $0x29] sm:$0xff]  ;;  %v6250_v40 = vmax.f32 %v6202_v55, %v13912_v34  ;;  %v13923_v44 = vmax.f32 %v6249_v58, %v6297_v10 }
 0x3d9   : > { %v13908_v23 = vld [vmem:[#allocation2 + $0xd7] sm:$0xff]  ;;  %v13910_v41 = vld [vmem:[#allocation2 + $0xdf] sm:$0xff]  ;;  %v13919_v2 = vld [vmem:[#allocation2 + $0x49] sm:$0xff]  ;;  %v13921_v47 = vmax.f32 %v6248_v3, %v6296_v16  ;;  %v6020_v32 = vmax.f32 %v13742_v19, %v13892_v20  ;;  %v13928_v46 = vmax.f32 %v6007_v25, %v13819_v11  ;;  %v6412_v19 = vmax.f32 %v6364_v60, %v13795_v53 }
 0x3da   : > { %v6167_v17 = vmax.f32 %v6065_v29, %v13757_v56  ;;  %v6066_v1 = vmax.f32 %v6018_v24, %v13908_v23  ;;  %v6067_v63 = vmax.f32 %v6019_v4, %v13910_v41  ;;  %v13931_v24 = vld [vmem:[#allocation2 + $0x39] sm:$0xff]  ;;  %v13934_v39 = vmax.f32 %v6396_v18, %v13919_v2  ;;  %v13938_v4 = vld [vmem:[#allocation2 + $0xe7] sm:$0xff]  ;;  %v13940_v10 = vld [vmem:[#allocation2 + $0xd0] sm:$0xff] }
 0x3db   : > { %v6203_v58 = vmax.f32 %v6155_v62, %v13887_v50  ;;  %v13955_v60 = vld [vmem:[#allocation2 + $0xd8] sm:$0xff]  ;;  %v13957_v56 = vld [vmem:[#allocation2 + $0xe0] sm:$0xff]  ;;  %v13972_v62 = vld [vmem:[#allocation2 + $0x70] sm:$0xff] }
 0x3dc   : > { %v6215_v29 = vmax.f32 %v6167_v17, %v13771_v28  ;;  %v6168_v55 = vmax.f32 %v6066_v1, %v13692_v13  ;;  %v6169_v3 = vmax.f32 %v6067_v63, %v13759_v52  ;;  %v6156_v17 = vmax.f32 %v6054_v21, %v13838_v38  ;;  %v13950_v52 = vld [vmem:[#allocation2 + $0x41] sm:$0xff]  ;;  %15249 = vst [vmem:[#allocation21_spill] sm:$0xff] %v13957_v56 }
 0x3dd   : > { %v13953_v63 = vmax.f32 %v6250_v40, %v13931_v24  ;;  %v6068_v21 = vmax.f32 %v6020_v32, %v13938_v4  ;;  %15250 = vst [vmem:[#allocation24_spill] sm:$0xff] %v13972_v62 }
 0x3de   : > { %v6263_v18 = vmax.f32 %v6215_v29, %v13940_v10  ;;  %v6216_v16 = vmax.f32 %v6168_v55, %v13785_v51  ;;  %v6217_v13 = vmax.f32 %v6169_v3, %v13876_v22  ;;  %v6157_v29 = vmax.f32 %v13928_v46, %v13878_v48  ;;  %v13967_v3 = vld [vmem:[#allocation2 + $0xc9] sm:$0xff] }
 0x3df   : > { %v6460_v32 = vmax.f32 %v6412_v19, %v13967_v3  ;;  %v6251_v48 = vmax.f32 %v6203_v58, %v13972_v62  ;;  %v13978_v46 = vmax.f32 %v6156_v17, %v13889_v59  ;;  %v13986_v19 = vld [vmem:[#allocation2 + $0xd1] sm:$0xff]  ;;  %v6170_v17 = vmax.f32 %v6068_v21, %v13771_v28 }
 0x3e0   : > { %v7666_v1 = vpop.f32.mrb[72].mxu0  ;;  %v6365_v25 = vmax.f32 %v6263_v18, %v13793_v31  ;;  %v6264_v35 = vmax.f32 %v6216_v16, %v13955_v60  ;;  %v6265_v15 = vmax.f32 %v6217_v13, %v13957_v56  ;;  %v15251_v62 = vld [vmem:[#allocation43_spill] sm:$0xff] }
 0x3e1   : > { %v5732_v55 = vmul.f32 %v7666_v1, %v13551_v26  ;;  %v5605_v40 = vpop.f32.mrb[73].mxu0  ;;  %vm15252_vm9 = vcmp.eq.s32.totalorder %v15251_v62, 1 }
 0x3e2   : > { %v5730_v38 = vmul.f32 %v13551_v26, %v5605_v40  ;;  %v7667_v11 = vpop.f32.mrb[74].mxu0  ;;  %v6413_v16 = vmax.f32 %v6365_v25, %v13807_v7  ;;  %v6366_v13 = vmax.f32 %v6264_v35, %v13729_v49  ;;  %v6367_v58 = vmax.f32 %v6265_v15, %v13795_v53  ;;  %v15253_v35 = vld [vmem:[#allocation41_spill] sm:$0xff]  ;;  %v15255_v15 = vld [vmem:[#allocation44_spill] sm:$0xff] }
 0x3e3   : > { %v5786_v1 = vadd.f32 %v13563_v14, %v5732_v55  ;;  %v5733_v18 = vmul.f32 %v7667_v11, %v13551_v26  ;;  %v5608_v31 = vpop.f32.mrb[75].mxu0  ;;  %vm15254_vm10 = vcmp.eq.s32.totalorder %v15253_v35, 1  ;;  %vm15256_vm12 = vcmp.eq.s32.totalorder %v15255_v15, 1 }
 0x3e4   : > { %v5784_v56 = vadd.f32 %v13563_v14, %v5730_v38  ;;  %v5731_v40 = vmul.f32 %v13551_v26, %v5608_v31  ;;  %v6461_v49 = vmax.f32 %v6413_v16, %v13986_v19  ;;  %v6414_v28 = vmax.f32 %v6366_v13, %v13817_v57  ;;  %v6301_v16 = vld [vmem:[#allocation2 + $0x51] sm:$0xff]  ;;  %v14011_v13 = vld [vmem:[#allocation2 + $0xe1] sm:$0xff] }
 0x3e5   : > { %v7722_v22 = vpop.f32.mrb[64].mxu1  ;;  %v5834_v55 = vsel %vm15252_vm9, %v5786_v1, -1e+30  ;;  %v5787_v11 = vadd.f32 %v13563_v14, %v5733_v18  ;;  %v6415_v21 = vmax.f32 %v6367_v58, %v13967_v3  ;;  %v6353_v1 = vmax.f32 %v6251_v48, %v13950_v52 }
 0x3e6   : > { %v6717_v25 = vadd.f32 %v7722_v22, %v13618_v54  ;;  %v6711_v59 = vpop.f32.mrb[65].mxu1  ;;  %5882 = vst.msk [vmem:[#allocation2 + $0x100] sm:$0xff] %vm671_vm11, %v5834_v55  ;;  %v5832_v31 = vsel %vm15254_vm10, %v5784_v56, -1e+30  ;;  %v5785_v38 = vadd.f32 %v13563_v14, %v5731_v40  ;;  %v7852_v54 = vpack.c.bf16 %v6461_v49, %v6460_v32  ;;  %v14004_v22 = vld [vmem:[#allocation2 + $0xd9] sm:$0xff]  ;;  %v15257_v56 = vld [vmem:[#allocation42_spill] sm:$0xff] }
 0x3e7   : > { %v6712_v53 = vadd.f32 %v13613_v33, %v6711_v59  ;;  %5880 = vst.msk [vmem:[#allocation2 + $0xf0] sm:$0xff] %vm671_vm11, %v5832_v31  ;;  %v5835_v62 = vsel %vm15256_vm12, %v5787_v11, -1e+30  ;;  %vm15258_vm13 = vcmp.eq.s32.totalorder %v15257_v56, 1  ;;  %v6462_v40 = vmax.f32 %v6414_v28, %v14004_v22  ;;  %v14027_v31 = vld [vmem:[#allocation2 + $0x61] sm:$0xff] }
 0x3e8   : > { %5883 = vst.msk [vmem:[#allocation2 + $0x108] sm:$0xff] %vm671_vm11, %v5835_v62  ;;  %v5833_v18 = vsel %vm15258_vm13, %v5785_v38, -1e+30  ;;  %v6205_v32 = vmax.f32 %v6157_v29, %v13912_v34  ;;  %7853 = vmatprep.subr.bf16.mxu1 %v7852_v54  ;;  %v15259_v48 = vmax.f32 %v13906_v27, %v13931_v24  ;;  %v6008_v49 = vmax.f32 %v13753_v43, %v13863_v30  ;;  %v14025_v29 = vld [vmem:[#allocation2 + $0x59] sm:$0xff] }
 0x3e9   : > { %v6750_v33 = vpack.c.bf16 %v6717_v25, %v6712_v53  ;;  %v7725_v59 = vpop.f32.mrb[66].mxu1  ;;  %5881 = vst.msk [vmem:[#allocation2 + $0xf8] sm:$0xff] %vm671_vm11, %v5833_v18  ;;  %v6463_v25 = vmax.f32 %v6415_v21, %v14011_v13  ;;  %v6400_v38 = vmax.f32 %v13953_v63, %v6301_v16  ;;  %v6252_v27 = vmax.f32 %v13978_v46, %v13684_v6  ;;  %v14052_v21 = vld [vmem:[#allocation2 + $0x69] sm:$0xff] }
 0x3ea   : > { %v6727_v58 = vadd.f32 %v7725_v59, %v13622_v12  ;;  %v6721_v55 = vpop.f32.mrb[67].mxu1  ;;  %v6445_v11 = vmax.f32 %v15259_v48, %v6301_v16  ;;  %v6218_v12 = vmax.f32 %v6170_v17, %v13940_v10  ;;  %v15261_v24 = vmax.f32 %v13921_v47, %v13950_v52 }
 0x3eb   : > { %v6722_v35 = vadd.f32 %v13620_v9, %v6721_v55  ;;  %7736 = vmatprep.mubr.msk.bf16.mxu1 %vm15260_vm0, %v6750_v33  ;;  %v15262_v9 = vmax.f32 %v13923_v44, %v13919_v2  ;;  %v6009_v28 = vmax.f32 %v13776_v0, %v13675_v42  ;;  %v6011_v17 = vmax.f32 %v13863_v30, %v13825_v36  ;;  %v14050_v44 = vld [vmem:[#allocation2 + $0xe8] sm:$0xff] }
 0x3ec   : > { %v6446_v43 = vmax.f32 %v15261_v24, %v14025_v29  ;;  %v7856_v15 = vpack.c.bf16 %v6463_v25, %v6462_v40  ;;  %v6401_v46 = vmax.f32 %v6353_v1, %v14025_v29  ;;  %v6253_v62 = vmax.f32 %v6205_v32, %v13831_v61  ;;  %v14066_v32 = vld [vmem:[#allocation2 + $0x71] sm:$0xff] }
 0x3ed   : > { %v6447_v53 = vmax.f32 %v15262_v9, %v14027_v31  ;;  %v6751_v63 = vpack.c.bf16 %v6727_v58, %v6722_v35  ;;  %v7728_v54 = vpop.f32.mrb[68].mxu1  ;;  %v7854_v47 = vpack.c.bf16 %v6445_v11, %v13934_v39  ;;  %v6021_v52 = vmax.f32 %v13751_v45, %v13908_v23  ;;  %v15264_v11 = vld [vmem:[#allocation52_spill] sm:$0xff]  ;;  %v15265_v9 = vld [vmem:[#allocation54_spill] sm:$0xff] }
 0x3ee   : > { %v6056_v42 = vmax.f32 %v6008_v49, %v13825_v36  ;;  %v6737_v0 = vadd.f32 %v7728_v54, %v13646_v37  ;;  %v6731_v56 = vpop.f32.mrb[69].mxu1  ;;  %v14057_v1 = vld [vmem:[#allocation2 + $0xef] sm:$0xff]  ;;  %v6266_v18 = vmax.f32 %v6218_v12, %v14050_v44  ;;  %v14061_v39 = vmax.f32 %v6400_v38, %v14052_v21 }
 0x3ef   : > { %7737 = vmatmul.mubr.msk.bf16.vlgmr.msra.gmra.mrb[72].mxu1 %vm15263_vm15, %v6751_v63  ;;  %v6354_v45 = vmax.f32 %v6252_v27, %v13919_v2  ;;  %v6732_v33 = vadd.f32 %v13637_v5, %v6731_v56  ;;  %v7858_v59 = vpack.c.bf16 %v6447_v53, %v6446_v43  ;;  %v6069_v40 = vmax.f32 %v6021_v52, %v14057_v1  ;;  %v15266_v53 = vld [vmem:[#allocation53_spill] sm:$0xff] }
 0x3f0   : > { %7855 = vmatpush3.bf16.msra.mxu1 %v7854_v47  ;;  %v6022_v37 = vmax.f32 %v13755_v8, %v13910_v41  ;;  %v6023_v58 = vmax.f32 %v13892_v20, %v13938_v4  ;;  %v14073_v55 = vmax.f32 %v6401_v46, %v14066_v32  ;;  %v14075_v48 = vld [vmem:[#allocation2 + $0xf7] sm:$0xff]  ;;  %v14077_v2 = vld [vmem:[#allocation2 + $0xff] sm:$0xff]  ;;  %v14079_v5 = vmax.f32 %v6253_v62, %v6301_v16 }
 0x3f1   : > { %7857 = vmatprep.subr.bf16.mxu1 %v7856_v15  ;;  %v6057_v25 = vmax.f32 %v6009_v28, %v15264_v11  ;;  %v6752_v49 = vpack.c.bf16 %v6737_v0, %v6732_v33  ;;  %v7731_v35 = vpop.f32.mrb[70].mxu1  ;;  %v6171_v12 = vmax.f32 %v6069_v40, %v13785_v51  ;;  %v6158_v38 = vmax.f32 %v6056_v42, %v13887_v50  ;;  %v15268_v28 = vld [vmem:[#allocation19_spill] sm:$0xff]  ;;  %v15269_v62 = vld [vmem:[#allocation57_spill] sm:$0xff] }
 0x3f2   : > { %v6070_v8 = vmax.f32 %v6022_v37, %v14075_v48  ;;  %v6071_v20 = vmax.f32 %v6023_v58, %v14077_v2  ;;  %v6741_v27 = vpop.f32.mrb[71].mxu1  ;;  %v6368_v24 = vmax.f32 %v6266_v18, %v13807_v7  ;;  %v6402_v43 = vmax.f32 %v6354_v45, %v14027_v31  ;;  %v15270_v50 = vld [vmem:[#allocation11_spill] sm:$0xff]  ;;  %v15272_v45 = vld [vmem:[#allocation21_spill] sm:$0xff]  ;;  %v14111_v58 = vld [vmem:[#allocation2 + $0xf8] sm:$0xff] }
 0x3f3   : > { %v6747_v16 = vadd.f32 %v7731_v35, %v15265_v9  ;;  %v6742_v63 = vadd.f32 %v15266_v53, %v6741_v27  ;;  %7740 = vmatprep.mubr.msk.bf16.mxu1 %vm15267_vm4, %v6752_v49  ;;  %v6219_v51 = vmax.f32 %v6171_v12, %v13955_v60  ;;  %v6010_v54 = vmax.f32 %v15270_v50, %v15269_v62  ;;  %v14096_v47 = vld [vmem:[#allocation2 + $0xf0] sm:$0xff]  ;;  %v14108_v40 = vld [vmem:[#allocation2 + $0x107] sm:$0xff]  ;;  %v15275_v35 = vld [vmem:[#allocation12_spill] sm:$0xff] }
 0x3f4   : > { %7859 = vmatpush3.bf16.msra.mxu1 %v7858_v59  ;;  %v6172_v15 = vmax.f32 %v6070_v8, %v15268_v28  ;;  %v6173_v46 = vmax.f32 %v6071_v20, %v13940_v10  ;;  %v7862_v7 = vpack.c.bf16 %v14073_v55, %v14061_v39  ;;  %v6024_v52 = vmax.f32 %v13908_v23, %v14057_v1  ;;  %v15271_v42 = vld [vmem:[#allocation23_spill] sm:$0xff]  ;;  %v14113_v23 = vld [vmem:[#allocation2 + $0x100] sm:$0xff] }
 0x3f5   : > { %v6159_v0 = vmax.f32 %v6057_v25, %v15271_v42  ;;  %v6753_v56 = vpack.c.bf16 %v6747_v16, %v6742_v63  ;;  %v6267_v18 = vmax.f32 %v6219_v51, %v14096_v47  ;;  %v6403_v59 = vmax.f32 %v14079_v5, %v14052_v21  ;;  %v15273_v55 = vld [vmem:[#allocation59_spill] sm:$0xff]  ;;  %v15274_v25 = vld [vmem:[#allocation24_spill] sm:$0xff]  ;;  %v15277_v63 = vld [vmem:[#allocation9_spill] sm:$0xff] }
 0x3f6   : > { %v6220_v33 = vmax.f32 %v6172_v15, %v15272_v45  ;;  %v6221_v10 = vmax.f32 %v6173_v46, %v14050_v44  ;;  %v6416_v39 = vmax.f32 %v6368_v24, %v13986_v19  ;;  %v6450_v11 = vmax.f32 %v6402_v43, %v15273_v55  ;;  %v7990_v43 = vld [vmem:[%s15072_s26 + $0x8] sm:$0xff] }
 0x3f7   : > { %v7670_v37 = vpop.f32.mrb[76].mxu0  ;;  %v14117_v49 = vmax.f32 %v6158_v38, %v15274_v25  ;;  %v6058_v12 = vmax.f32 %v6010_v54, %v15275_v35  ;;  %7741 = vmatmul.mubr.msk.bf16.gmra.mrb[76].mxu1 %vm15276_vm5, %v6753_v56  ;;  %v6369_v20 = vmax.f32 %v6267_v18, %v13817_v57  ;;  %v6072_v16 = vmax.f32 %v6024_v52, %v14108_v40  ;;  %v14137_v46 = vld [vmem:[#allocation2 + $0xe9] sm:$0xff]  ;;  %v14143_v52 = vld [vmem:[#allocation2 + $0xf1] sm:$0xff] }
 0x3f8   : > { %v5736_v5 = vmul.f32 %v7670_v37, %v13551_v26  ;;  %v5621_v8 = vpop.f32.mrb[77].mxu0  ;;  %v6268_v27 = vmax.f32 %v6220_v33, %v14111_v58  ;;  %v6269_v24 = vmax.f32 %v6221_v10, %v14113_v23  ;;  %6935 = vmatprep.mubr.f32.mxu1 %v7990_v43  ;;  %v6207_v53 = vmax.f32 %v6159_v0, %v13684_v6  ;;  %v14156_v10 = vld [vmem:[#allocation2 + $0xf9] sm:$0xff] }
 0x3f9   : > { %v5734_v38 = vmul.f32 %v13551_v26, %v5621_v8  ;;  %v7671_v9 = vpop.f32.mrb[78].mxu0  ;;  %v6059_v57 = vmax.f32 %v6011_v17, %v15277_v63  ;;  %v6417_v62 = vmax.f32 %v6369_v20, %v14004_v22  ;;  %v6464_v36 = vmax.f32 %v6416_v39, %v14137_v46  ;;  %v15278_v17 = vld [vmem:[#allocation48_spill] sm:$0xff]  ;;  %v15282_v39 = vld [vmem:[#allocation49_spill] sm:$0xff] }
 0x3fa   : > { %v5790_v51 = vadd.f32 %v13563_v14, %v5736_v5  ;;  %v5737_v28 = vmul.f32 %v7671_v9, %v13551_v26  ;;  %v5624_v15 = vpop.f32.mrb[79].mxu0  ;;  %v6370_v50 = vmax.f32 %v6268_v27, %v13967_v3  ;;  %v6371_v30 = vmax.f32 %v6269_v24, %v13986_v19  ;;  %v15280_v3 = vld [vmem:[#allocation46_spill] sm:$0xff]  ;;  %v15284_v27 = vld [vmem:[#allocation16_spill] sm:$0xff] }
 0x3fb   : > { %v5788_v54 = vadd.f32 %v13563_v14, %v5734_v38  ;;  %v5735_v6 = vmul.f32 %v13551_v26, %v5624_v15  ;;  %vm15279_vm6 = vcmp.eq.s32.totalorder %v15278_v17, 1  ;;  %v6465_v56 = vmax.f32 %v6417_v62, %v14143_v52  ;;  %v14163_v8 = vld [vmem:[#allocation2 + $0x101] sm:$0xff] }
 0x3fc   : > { %v5838_v42 = vsel %vm15279_vm6, %v5790_v51, -1e+30  ;;  %v5791_v0 = vadd.f32 %v13563_v14, %v5737_v28  ;;  %v6418_v18 = vmax.f32 %v6370_v50, %v14011_v13  ;;  %vm15281_vm7 = vcmp.eq.s32.totalorder %v15280_v3, 1  ;;  %v15287_v51 = vld [vmem:[#allocation55_spill] sm:$0xff]  ;;  %v15290_v17 = vld [vmem:[#allocation10_spill] sm:$0xff] }
 0x3fd   : > { %5886 = vst.msk [vmem:[#allocation2 + $0x120] sm:$0xff] %vm671_vm11, %v5838_v42  ;;  %v5836_v26 = vsel %vm15281_vm7, %v5788_v54, -1e+30  ;;  %v5789_v33 = vadd.f32 %v13563_v14, %v5735_v6  ;;  %v6419_v19 = vmax.f32 %v6371_v30, %v14137_v46  ;;  %v6174_v37 = vmax.f32 %v6072_v16, %v13955_v60  ;;  %v15285_v14 = vld [vmem:[#allocation47_spill] sm:$0xff] }
 0x3fe   : > { %5884 = vst.msk [vmem:[#allocation2 + $0x110] sm:$0xff] %vm671_vm11, %v5836_v26  ;;  %vm15283_vm8 = vcmp.eq.s32.totalorder %v15282_v39, 1  ;;  %v7860_v5 = vpack.c.bf16 %v6465_v56, %v6464_v36  ;;  %v6466_v20 = vmax.f32 %v6418_v18, %v14156_v10  ;;  %v6451_v24 = vmax.f32 %v6403_v59, %v15284_v27  ;;  %v15288_v28 = vld [vmem:[#allocation15_spill] sm:$0xff]  ;;  %v15289_v36 = vld [vmem:[#allocation74_spill] sm:$0xff] }
 0x3ff   : > { %v5839_v35 = vsel %vm15283_vm8, %v5791_v0, -1e+30  ;;  %vm15286_vm9 = vcmp.eq.s32.totalorder %v15285_v14, 1  ;;  %v6467_v38 = vmax.f32 %v6419_v19, %v14163_v8  ;;  %v6160_v60 = vmax.f32 %v6058_v12, %v13912_v34  ;;  %v14182_v12 = vld [vmem:[#allocation2 + $0x108] sm:$0xff] }
 0x400   : > { %5887 = vst.msk [vmem:[#allocation2 + $0x128] sm:$0xff] %vm671_vm11, %v5839_v35  ;;  %v5837_v43 = vsel %vm15286_vm9, %v5789_v33, -1e+30  ;;  %v6161_v9 = vmax.f32 %v6059_v57, %v15274_v25  ;;  %7861 = vmatprep.subr.bf16.mxu1 %v7860_v5  ;;  %v6222_v63 = vmax.f32 %v6174_v37, %v14096_v47  ;;  %v6255_v59 = vmax.f32 %v6207_v53, %v15287_v51 }
 0x401   : > { %5885 = vst.msk [vmem:[#allocation2 + $0x118] sm:$0xff] %vm671_vm11, %v5837_v43  ;;  %7863 = vmatpush3.bf16.msra.mxu1 %v7862_v7  ;;  %v7864_v16 = vpack.c.bf16 %v6467_v38, %v6466_v20  ;;  %v6254_v15 = vmax.f32 %v14117_v49, %v15288_v28  ;;  %v7866_v62 = vpack.c.bf16 %v6451_v24, %v6450_v11 }
 0x402   : > { %v6208_v50 = vmax.f32 %v6160_v60, %v13831_v61  ;;  %v6209_v34 = vmax.f32 %v6161_v9, %v15288_v28  ;;  %v6025_v25 = vmax.f32 %v13910_v41, %v14075_v48  ;;  %v6270_v57 = vmax.f32 %v6222_v63, %v14182_v12  ;;  %v14233_v60 = vld [vmem:[%s14702_s13] ss:$0 sm:$0xff] }
 0x403   : > { %7865 = vmatprep.subr.bf16.mxu1 %v7864_v16  ;;  %v6357_v53 = vmax.f32 %v6255_v59, %v14027_v31  ;;  %v6356_v11 = vmax.f32 %v6254_v15, %v14025_v29  ;;  %v6026_v61 = vmax.f32 %v13938_v4, %v14077_v2  ;;  %v6027_v54 = vmax.f32 %v14057_v1, %v14108_v40 }
 0x404   : > { %v6256_v30 = vmax.f32 %v6208_v50, %v15289_v36  ;;  %v6257_v42 = vmax.f32 %v6209_v34, %v15290_v17  ;;  %v6372_v56 = vmax.f32 %v6270_v57, %v14004_v22 }
 0x405   : > { %7867 = vmatpush3.bf16.msra.mxu1 %v7866_v62  ;;  %v14184_v7 = vld [vmem:[#allocation2 + $0x10f] sm:$0xff]  ;;  %v6405_v4 = vmax.f32 %v6357_v53, %v15273_v55  ;;  %v6404_v18 = vmax.f32 %v6356_v11, %v14066_v32 }
 0x406   : > { %v6073_v49 = vmax.f32 %v6025_v25, %v14184_v7  ;;  %v14209_v33 = vld [vmem:[#allocation2 + $0x110] sm:$0xff]  ;;  %v6359_v19 = vmax.f32 %v6257_v42, %v14066_v32  ;;  %v6028_v37 = vmax.f32 %v14075_v48, %v14184_v7  ;;  %v15292_v48 = vld [vmem:[#allocation18_spill] sm:$0xff]  ;;  %v14248_v25 = vld [vmem:[%s14703_s14] ss:$0 sm:$0xff] }
 0x407   : > { %v14218_v35 = vld [vmem:[#allocation2 + $0x127] sm:$0xff]  ;;  %v6452_v14 = vmax.f32 %v6404_v18, %v15292_v48 }
 0x408   : > { %v14194_v41 = vld [vmem:[#allocation2 + $0x117] sm:$0xff]  ;;  %v14196_v6 = vld [vmem:[#allocation2 + $0x11f] sm:$0xff]  ;;  %v6175_v31 = vmax.f32 %v6073_v49, %v15272_v45  ;;  %v6358_v45 = vmax.f32 %v6256_v30, %v14052_v21  ;;  %v6407_v51 = vmax.f32 %v6359_v19, %v15292_v48  ;;  %v14240_v15 = vld [vmem:[#allocation2 + $0x109] sm:$0xff] }
 0x409   : > { %v6074_v0 = vmax.f32 %v6026_v61, %v14194_v41  ;;  %v6075_v29 = vmax.f32 %v6027_v54, %v14196_v6  ;;  %v14222_v20 = vld [vmem:[#allocation2 + $0x118] sm:$0xff]  ;;  %v14224_v21 = vld [vmem:[#allocation2 + $0x120] sm:$0xff]  ;;  %v6029_v48 = vmax.f32 %v14077_v2, %v14194_v41 }
 0x40a   : > { %v6223_v1 = vmax.f32 %v6175_v31, %v14111_v58  ;;  %v6406_v63 = vmax.f32 %v6358_v45, %v15284_v27  ;;  %v14252_v49 = vld [vmem:[#allocation2 + $0x111] sm:$0xff]  ;;  %v14262_v31 = vld [vmem:[#allocation2 + $0x119] sm:$0xff] }
 0x40b   : > { %v6176_v3 = vmax.f32 %v6074_v0, %v14050_v44  ;;  %v6177_v26 = vmax.f32 %v6075_v29, %v14096_v47  ;;  %v6420_v44 = vmax.f32 %v6372_v56, %v14143_v52  ;;  %v15291_v47 = vld [vmem:[#allocation71_spill] sm:$0xff]  ;;  %v15293_v30 = vld [vmem:[#allocation56_spill] sm:$0xff]  ;;  %v15295_v56 = vld [vmem:[#allocation50_spill] sm:$0xff] }
 0x40c   : > { %v6271_v22 = vmax.f32 %v6223_v1, %v14209_v33  ;;  %v6453_v5 = vmax.f32 %v6405_v4, %v15291_v47  ;;  %vm15294_vm10 = vcmp.eq.s32.totalorder %v15293_v30, 1  ;;  %vm15296_vm12 = vcmp.eq.s32.totalorder %v15295_v56, 1  ;;  %v15297_v45 = vld [vmem:[#allocation45_spill] sm:$0xff] }
 0x40d   : > { %v6224_v55 = vmax.f32 %v6176_v3, %v14113_v23  ;;  %v6225_v39 = vmax.f32 %v6177_v26, %v14182_v12  ;;  %v6468_v11 = vmax.f32 %v6420_v44, %v14240_v15  ;;  %v14270_v3 = vld [vmem:[#allocation2 + $0x121] sm:$0xff]  ;;  %vm15298_vm13 = vcmp.eq.s32.totalorder %v15297_v45, 1  ;;  %v15301_v44 = vld [vmem:[#allocation51_spill] sm:$0xff]  ;;  %v15305_v45 = vld [vmem:[#allocation60_spill] sm:$0xff] }
 0x40e   : > { %v6373_v24 = vmax.f32 %v6271_v22, %v14011_v13  ;;  %v6076_v13 = vmax.f32 %v6028_v37, %v14218_v35  ;;  %v7870_v61 = vpack.c.bf16 %v6453_v5, %v6452_v14  ;;  %vm15302_vm0 = vcmp.eq.s32.totalorder %v15301_v44, 1  ;;  %v14286_v14 = vld [vmem:[#allocation2 + $0x128] sm:$0xff] }
 0x40f   : > { %v6272_v43 = vmax.f32 %v6224_v55, %v14222_v20  ;;  %v6273_v38 = vmax.f32 %v6225_v39, %v14224_v21  ;;  %v15300_v55 = vld [vmem:[#allocation69_spill] sm:$0xff]  ;;  %vm15306_vm4 = vcmp.eq.s32.totalorder %v15305_v45, 1 }
 0x410   : > { %v7674_v32 = vpop.f32.mrb[80].mxu0  ;;  %v6421_v62 = vmax.f32 %v6373_v24, %v14156_v10  ;;  %v6178_v29 = vmax.f32 %v6076_v13, %v14111_v58  ;;  %v15299_v58 = vld [vmem:[#allocation14_spill] sm:$0xff]  ;;  %v6455_v39 = vmax.f32 %v6407_v51, %v15300_v55  ;;  %v15307_v55 = vld [vmem:[#allocation64_spill] sm:$0xff] }
 0x411   : > { %v5740_v9 = vmul.f32 %v14233_v60, %v7674_v32  ;;  %v5637_v16 = vpop.f32.mrb[81].mxu0  ;;  %v6374_v50 = vmax.f32 %v6272_v43, %v14137_v46  ;;  %v6375_v34 = vmax.f32 %v6273_v38, %v14143_v52  ;;  %v6454_v22 = vmax.f32 %v6406_v63, %v15299_v58 }
 0x412   : > { %v5738_v59 = vmul.f32 %v14233_v60, %v5637_v16  ;;  %v7675_v28 = vpop.f32.mrb[82].mxu0  ;;  %v6469_v52 = vmax.f32 %v6421_v62, %v14252_v49  ;;  %v6226_v32 = vmax.f32 %v6178_v29, %v14209_v33  ;;  %v6030_v16 = vmax.f32 %v14108_v40, %v14196_v6  ;;  %v15303_v29 = vld [vmem:[#allocation63_spill] sm:$0xff] }
 0x413   : > { %v5794_v27 = vadd.f32 %v14248_v25, %v5740_v9  ;;  %v5741_v57 = vmul.f32 %v14233_v60, %v7675_v28  ;;  %v5640_v53 = vpop.f32.mrb[83].mxu0  ;;  %v6422_v36 = vmax.f32 %v6374_v50, %v14163_v8  ;;  %v6423_v0 = vmax.f32 %v6375_v34, %v14240_v15 }
 0x414   : > { %v5792_v54 = vadd.f32 %v14248_v25, %v5738_v59  ;;  %v5739_v46 = vmul.f32 %v14233_v60, %v5640_v53  ;;  %v7868_v18 = vpack.c.bf16 %v6469_v52, %v6468_v11  ;;  %v7874_v24 = vpack.c.bf16 %v6455_v39, %v6454_v22 }
 0x415   : > { %v5842_v17 = vsel %vm15294_vm10, %v5794_v27, -1e+30  ;;  %v5795_v42 = vadd.f32 %v14248_v25, %v5741_v57  ;;  %v6470_v26 = vmax.f32 %v6422_v36, %v14262_v31  ;;  %v6471_v37 = vmax.f32 %v6423_v0, %v14270_v3 }
 0x416   : > { %5890 = vst.msk [vmem:[#allocation2 + $0x140] sm:$0xff] %vm671_vm11, %v5842_v17  ;;  %v5840_v4 = vsel %vm15296_vm12, %v5792_v54, -1e+30  ;;  %v5793_v1 = vadd.f32 %v14248_v25, %v5739_v46  ;;  %7869 = vmatprep.subr.bf16.mxu1 %v7868_v18  ;;  %v6274_v38 = vmax.f32 %v6226_v32, %v14286_v14  ;;  %v6031_v63 = vmax.f32 %v14184_v7, %v14218_v35 }
 0x417   : > { %5888 = vst.msk [vmem:[#allocation2 + $0x130] sm:$0xff] %vm671_vm11, %v5840_v4  ;;  %v5843_v19 = vsel %vm15298_vm13, %v5795_v42, -1e+30  ;;  %7871 = vmatpush3.bf16.msra.mxu1 %v7870_v61  ;;  %v7872_v5 = vpack.c.bf16 %v6471_v37, %v6470_v26  ;;  %vm15304_vm15 = vcmp.eq.s32.totalorder %v15303_v29, 1  ;;  %vm15308_vm5 = vcmp.eq.s32.totalorder %v15307_v55, 1 }
 0x418   : > { %5891 = vst.msk [vmem:[#allocation2 + $0x148] sm:$0xff] %vm671_vm11, %v5843_v19  ;;  %v5841_v47 = vsel %vm15302_vm0, %v5793_v1, -1e+30  ;;  %v6376_v40 = vmax.f32 %v6274_v38, %v14156_v10 }
 0x419   : > { %5889 = vst.msk [vmem:[#allocation2 + $0x138] sm:$0xff] %vm671_vm11, %v5841_v47  ;;  %7873 = vmatprep.subr.bf16.mxu1 %v7872_v5  ;;  %v15309_v47 = vld [vmem:[#allocation62_spill] sm:$0xff] }
 0x41a   : > { %v6424_v17 = vmax.f32 %v6376_v40, %v14252_v49  ;;  %vm15310_vm6 = vcmp.eq.s32.totalorder %v15309_v47, 1  ;;  %v15311_v40 = vld [vmem:[#allocation13_spill] sm:$0xff] }
 0x41b   : > { %7875 = vmatpush3.bf16.msra.mxu1 %v7874_v24  ;;  %v7994_v47 = vld [vmem:[%s15072_s26 + $0x20] sm:$0xff] }
 0x41d   : > { %v14330_v18 = vld [vmem:[#allocation2 + $0x140] sm:$0xff] }
 0x41e   : > { %v14288_v43 = vld [vmem:[#allocation2 + $0x12f] sm:$0xff] }
 0x41f   : > { %v6077_v9 = vmax.f32 %v6029_v48, %v14288_v43  ;;  %v6032_v2 = vmax.f32 %v14194_v41, %v14288_v43  ;;  %v14305_v50 = vld [vmem:[#allocation2 + $0x147] sm:$0xff]  ;;  %v14313_v61 = vld [vmem:[#allocation2 + $0x130] sm:$0xff] }
 0x420   : > { %v14296_v51 = vld [vmem:[#allocation2 + $0x137] sm:$0xff]  ;;  %v14298_v13 = vld [vmem:[#allocation2 + $0x13f] sm:$0xff]  ;;  %v14347_v32 = vld [vmem:[#allocation2 + $0x129] sm:$0xff] }
 0x421   : > { %v6179_v59 = vmax.f32 %v6077_v9, %v14113_v23  ;;  %v6078_v28 = vmax.f32 %v6030_v16, %v14296_v51  ;;  %v6079_v62 = vmax.f32 %v6031_v63, %v14298_v13  ;;  %v6080_v54 = vmax.f32 %v6032_v2, %v14305_v50  ;;  %v14323_v42 = vld [vmem:[#allocation2 + $0x138] sm:$0xff] }
 0x422   : > { %v7678_v34 = vpop.f32.mrb[84].mxu0  ;;  %v14349_v24 = vld [vmem:[#allocation2 + $0x131] sm:$0xff]  ;;  %v6472_v48 = vmax.f32 %v6424_v17, %v14347_v32 }
 0x423   : > { %v5744_v7 = vmul.f32 %v14233_v60, %v7678_v34  ;;  %v5653_v27 = vpop.f32.mrb[85].mxu0  ;;  %v6227_v57 = vmax.f32 %v6179_v59, %v14222_v20  ;;  %v6180_v53 = vmax.f32 %v6078_v28, %v14182_v12  ;;  %v6181_v41 = vmax.f32 %v6079_v62, %v14209_v33  ;;  %v14360_v59 = vld [vmem:[#allocation2 + $0x141] sm:$0xff] }
 0x424   : > { %v5742_v23 = vmul.f32 %v14233_v60, %v5653_v27  ;;  %v7679_v11 = vpop.f32.mrb[86].mxu0  ;;  %v6182_v22 = vmax.f32 %v6080_v54, %v14222_v20  ;;  %v6033_v62 = vmax.f32 %v14196_v6, %v14296_v51  ;;  %v14366_v34 = vld [vmem:[#allocation2 + $0x148] sm:$0xff]  ;;  %v6035_v54 = vmax.f32 %v14288_v43, %v14305_v50 }
 0x425   : > { %v5798_v46 = vadd.f32 %v14248_v25, %v5744_v7  ;;  %v5745_v10 = vmul.f32 %v14233_v60, %v7679_v11  ;;  %v5656_v52 = vpop.f32.mrb[87].mxu0  ;;  %v6275_v36 = vmax.f32 %v6227_v57, %v14313_v61  ;;  %v6228_v30 = vmax.f32 %v6180_v53, %v14224_v21  ;;  %v15312_v7 = vld [vmem:[#allocation58_spill] sm:$0xff] }
 0x426   : > { %v5796_v12 = vadd.f32 %v14248_v25, %v5742_v23  ;;  %v5743_v33 = vmul.f32 %v14233_v60, %v5656_v52  ;;  %v6229_v0 = vmax.f32 %v6181_v41, %v14286_v14  ;;  %v6230_v63 = vmax.f32 %v6182_v22, %v14313_v61 }
 0x427   : > { %v5846_v56 = vsel %vm15304_vm15, %v5798_v46, -1e+30  ;;  %v5799_v4 = vadd.f32 %v14248_v25, %v5745_v10  ;;  %v6377_v1 = vmax.f32 %v6275_v36, %v14163_v8  ;;  %v6276_v26 = vmax.f32 %v6228_v30, %v14323_v42 }
 0x428   : > { %5894 = vst.msk [vmem:[#allocation2 + $0x160] sm:$0xff] %vm671_vm11, %v5846_v56  ;;  %v5844_v19 = vsel %vm15306_vm4, %v5796_v12, -1e+30  ;;  %v5797_v37 = vadd.f32 %v14248_v25, %v5743_v33  ;;  %v6277_v58 = vmax.f32 %v6229_v0, %v14330_v18  ;;  %v15313_v27 = vpack.c.bf16 %v15311_v40, %v15312_v7  ;;  %v15315_v33 = vld [vmem:[#allocation17_spill] sm:$0xff] }
 0x429   : > { %5892 = vst.msk [vmem:[#allocation2 + $0x150] sm:$0xff] %vm671_vm11, %v5844_v19  ;;  %v5847_v8 = vsel %vm15308_vm5, %v5799_v4, -1e+30  ;;  %v6425_v39 = vmax.f32 %v6377_v1, %v14262_v31  ;;  %v6378_v44 = vmax.f32 %v6276_v26, %v14240_v15  ;;  %v14356_v15 = vld [vmem:[#allocation2 + $0x139] sm:$0xff]  ;;  %v6278_v41 = vmax.f32 %v6230_v63, %v14366_v34 }
 0x42a   : > { %5895 = vst.msk [vmem:[#allocation2 + $0x168] sm:$0xff] %vm671_vm11, %v5847_v8  ;;  %v5845_v5 = vsel %vm15310_vm6, %v5797_v37, -1e+30  ;;  %v6379_v20 = vmax.f32 %v6277_v58, %v14252_v49  ;;  %v6034_v11 = vmax.f32 %v14218_v35, %v14298_v13  ;;  %v15314_v35 = vld [vmem:[#allocation20_spill] sm:$0xff] }
 0x42b   : > { %5893 = vst.msk [vmem:[#allocation2 + $0x158] sm:$0xff] %vm671_vm11, %v5845_v5  ;;  %v6473_v38 = vmax.f32 %v6425_v39, %v14349_v24  ;;  %v6426_v9 = vmax.f32 %v6378_v44, %v14270_v3  ;;  %v15316_v17 = vpack.c.bf16 %v15314_v35, %v15315_v33  ;;  %v6380_v43 = vmax.f32 %v6278_v41, %v14262_v31 }
 0x42c   : > { %v6427_v16 = vmax.f32 %v6379_v20, %v14347_v32 }
 0x42d   : > { %v7876_v2 = vpack.c.bf16 %v6473_v38, %v6472_v48  ;;  %v6474_v28 = vmax.f32 %v6426_v9, %v14356_v15  ;;  %v6428_v8 = vmax.f32 %v6380_v43, %v14349_v24 }
 0x42e   : > { %v6475_v49 = vmax.f32 %v6427_v16, %v14360_v59  ;;  %v15317_v16 = vld [vmem:[#allocation67_spill] sm:$0xff] }
 0x42f   : > { %7877 = vmatprep.subr.bf16.mxu1 %v7876_v2  ;;  %v14420_v38 = vld [vmem:[#allocation2 + $0x160] sm:$0xff]  ;;  %vm15318_vm7 = vcmp.eq.s32.totalorder %v15317_v16, 1 }
 0x430   : > { %7879 = vmatpush3.bf16.msra.mxu1 %v15313_v27  ;;  %v7880_v57 = vpack.c.bf16 %v6475_v49, %v6474_v28  ;;  %v14371_v53 = vld [vmem:[#allocation2 + $0x14f] sm:$0xff]  ;;  %v15319_v28 = vld [vmem:[#allocation65_spill] sm:$0xff]  ;;  %v7995_v27 = vld [vmem:[%s15072_s26 + $0x18] sm:$0xff] }
 0x431   : > { %v6081_v23 = vmax.f32 %v6033_v62, %v14371_v53  ;;  %v14379_v6 = vld [vmem:[#allocation2 + $0x167] sm:$0xff]  ;;  %v6036_v46 = vmax.f32 %v14296_v51, %v14371_v53  ;;  %v14399_v26 = vld [vmem:[#allocation2 + $0x150] sm:$0xff]  ;;  %vm15320_vm8 = vcmp.eq.s32.totalorder %v15319_v28, 1 }
 0x432   : > { %7881 = vmatprep.subr.bf16.mxu1 %v7880_v57  ;;  %v14383_v10 = vld [vmem:[#allocation2 + $0x157] sm:$0xff]  ;;  %v14385_v52 = vld [vmem:[#allocation2 + $0x15f] sm:$0xff]  ;;  %v14431_v40 = vld [vmem:[#allocation2 + $0x149] sm:$0xff] }
 0x433   : > { %v6183_v36 = vmax.f32 %v6081_v23, %v14224_v21  ;;  %v6082_v30 = vmax.f32 %v6034_v11, %v14383_v10  ;;  %v6083_v12 = vmax.f32 %v6035_v54, %v14385_v52  ;;  %v6084_v0 = vmax.f32 %v6036_v46, %v14379_v6  ;;  %v14411_v39 = vld [vmem:[#allocation2 + $0x158] sm:$0xff]  ;;  %v15323_v46 = vld [vmem:[#allocation66_spill] sm:$0xff] }
 0x434   : > { %7883 = vmatpush3.bf16.msra.mxu1 %v15316_v17  ;;  %v15321_v57 = vld [vmem:[#allocation68_spill] sm:$0xff]  ;;  %v6476_v11 = vmax.f32 %v6428_v8, %v14431_v40  ;;  %vm15324_vm10 = vcmp.eq.s32.totalorder %v15323_v46, 1  ;;  %v14458_v43 = vld [vmem:[#allocation2 + $0x161] sm:$0xff] }
 0x435   : > { %v7682_v51 = vpop.f32.mrb[88].mxu0  ;;  %v6231_v29 = vmax.f32 %v6183_v36, %v14323_v42  ;;  %v6184_v56 = vmax.f32 %v6082_v30, %v14286_v14  ;;  %v6185_v4 = vmax.f32 %v6083_v12, %v14313_v61  ;;  %v7993_v14 = vld [vmem:[%s15072_s26] sm:$0xff]  ;;  %v6186_v44 = vmax.f32 %v6084_v0, %v14323_v42  ;;  %v14441_v23 = vld [vmem:[#allocation2 + $0x151] sm:$0xff] }
 0x436   : > { %v5748_v21 = vmul.f32 %v14233_v60, %v7682_v51  ;;  %v5669_v1 = vpop.f32.mrb[89].mxu0  ;;  %vm15322_vm9 = vcmp.eq.s32.totalorder %v15321_v57, 1  ;;  %v14455_v33 = vld [vmem:[#allocation2 + $0x159] sm:$0xff]  ;;  %v7997_v51 = vld [vmem:[%s15072_s26 + $0x30] sm:$0xff] }
 0x437   : > { %v5746_v45 = vmul.f32 %v14233_v60, %v5669_v1  ;;  %v7683_v19 = vpop.f32.mrb[90].mxu0  ;;  %v6279_v37 = vmax.f32 %v6231_v29, %v14399_v26  ;;  %v6232_v31 = vmax.f32 %v6184_v56, %v14330_v18  ;;  %v6233_v58 = vmax.f32 %v6185_v4, %v14366_v34  ;;  %6936 = vmatmul.mubr.f32.vlgmr.msra.gmra.mrb[80].mxu1 %v7993_v14  ;;  %v14465_v56 = vld [vmem:[#allocation2 + $0x168] sm:$0xff]  ;;  %v7998_v4 = vld [vmem:[%s15072_s26 + $0x50] sm:$0xff] }
 0x438   : > { %v5802_v61 = vadd.f32 %v14248_v25, %v5748_v21  ;;  %v5749_v22 = vmul.f32 %v14233_v60, %v7683_v19  ;;  %v5672_v55 = vpop.f32.mrb[91].mxu0  ;;  %6940 = vmatprep.mubr.f32.mxu1 %v7994_v47  ;;  %v6234_v35 = vmax.f32 %v6186_v44, %v14399_v26  ;;  %v6038_v14 = vmax.f32 %v14305_v50, %v14385_v52 }
 0x439   : > { %v5800_v5 = vadd.f32 %v14248_v25, %v5746_v45  ;;  %v5747_v20 = vmul.f32 %v14233_v60, %v5672_v55  ;;  %v6381_v48 = vmax.f32 %v6279_v37, %v14270_v3  ;;  %v6280_v9 = vmax.f32 %v6232_v31, %v14411_v39  ;;  %v7999_v31 = vld [vmem:[%s15072_s26 + $0x48] sm:$0xff] }
 0x43a   : > { %v5850_v63 = vsel %vm15318_vm7, %v5802_v61, -1e+30  ;;  %v5803_v42 = vadd.f32 %v14248_v25, %v5749_v22  ;;  %v6281_v2 = vmax.f32 %v6233_v58, %v14420_v38  ;;  %v6282_v21 = vmax.f32 %v6234_v35, %v14465_v56 }
 0x43b   : > { %5898 = vst.msk [vmem:[#allocation2 + $0x180] sm:$0xff] %vm671_vm11, %v5850_v63  ;;  %v5848_v49 = vsel %vm15320_vm8, %v5800_v5, -1e+30  ;;  %v5801_v62 = vadd.f32 %v14248_v25, %v5747_v20  ;;  %v6429_v3 = vmax.f32 %v6381_v48, %v14356_v15  ;;  %v6382_v7 = vmax.f32 %v6280_v9, %v14347_v32  ;;  %6941 = vmatmul.mubr.f32.gmra.mrb[82].mxu1 %v7995_v27  ;;  %v7996_v32 = vld [vmem:[%s15072_s26 + $0x38] sm:$0xff] }
 0x43c   : > { %5896 = vst.msk [vmem:[#allocation2 + $0x170] sm:$0xff] %vm671_vm11, %v5848_v49  ;;  %v5851_v41 = vsel %vm15322_vm9, %v5803_v42, -1e+30  ;;  %v6383_v54 = vmax.f32 %v6281_v2, %v14349_v24  ;;  %6945 = vmatprep.mubr.f32.mxu1 %v7996_v32  ;;  %v6037_v45 = vmax.f32 %v14298_v13, %v14383_v10  ;;  %v6039_v37 = vmax.f32 %v14371_v53, %v14379_v6  ;;  %v8000_v53 = vld [vmem:[%s15072_s26 + $0x68] sm:$0xff]  ;;  %v8002_v2 = vld [vmem:[%s15072_s26 + $0x80] sm:$0xff] }
 0x43d   : > { %5899 = vst.msk [vmem:[#allocation2 + $0x188] sm:$0xff] %vm671_vm11, %v5851_v41  ;;  %v5849_v36 = vsel %vm15324_vm10, %v5801_v62, -1e+30  ;;  %v6477_v30 = vmax.f32 %v6429_v3, %v14441_v23  ;;  %v6430_v12 = vmax.f32 %v6382_v7, %v14360_v59  ;;  %v6384_v22 = vmax.f32 %v6282_v21, %v14356_v15  ;;  %v8001_v15 = vld [vmem:[%s15072_s26 + $0x60] sm:$0xff]  ;;  %v5998_v41 = vld [vmem:[#allocation2 + $0x1b7] sm:$0xff] }
 0x43e   : > { %5897 = vst.msk [vmem:[#allocation2 + $0x178] sm:$0xff] %vm671_vm11, %v5849_v36  ;;  %v6431_v24 = vmax.f32 %v6383_v54, %v14431_v40 }
 0x43f   : > { %v7884_v17 = vpack.c.bf16 %v6477_v30, %v6476_v11  ;;  %v6478_v0 = vmax.f32 %v6430_v12, %v14455_v33  ;;  %6946 = vmatmul.mubr.f32.gmra.mrb[84].mxu1 %v7997_v51  ;;  %v6432_v7 = vmax.f32 %v6384_v22, %v14441_v23  ;;  %v8003_v30 = vld [vmem:[%s15072_s26 + $0x78] sm:$0xff]  ;;  %v8006_v22 = vld [vmem:[%s15072_s26 + $0xb0] sm:$0xff] }
 0x440   : > { %v6479_v29 = vmax.f32 %v6431_v24, %v14458_v43  ;;  %6950 = vmatprep.mubr.f32.mxu1 %v7998_v4 }
 0x441   : > { %7885 = vmatprep.subr.bf16.mxu0 %v7884_v17 }
 0x442   : > { %7887 = vmatpush3.bf16.msra.mxu0 %v7884_v17  ;;  %v7888_v1 = vpack.c.bf16 %v6479_v29, %v6478_v0  ;;  %v14534_v17 = vld [vmem:[#allocation2 + $0x180] sm:$0xff] }
 0x443   : > { %v14473_v19 = vld [vmem:[#allocation2 + $0x16f] sm:$0xff]  ;;  %6951 = vmatmul.mubr.f32.gmra.mrb[86].mxu1 %v7999_v31 }
 0x444   : > { %7889 = vmatprep.subr.bf16.mxu0 %v7888_v1  ;;  %v6085_v58 = vmax.f32 %v6037_v45, %v14473_v19  ;;  %v14483_v61 = vld [vmem:[#allocation2 + $0x187] sm:$0xff]  ;;  %v6040_v13 = vmax.f32 %v14383_v10, %v14473_v19  ;;  %6955 = vmatprep.mubr.f32.mxu1 %v8000_v53  ;;  %v14512_v3 = vld [vmem:[#allocation2 + $0x170] sm:$0xff] }
 0x445   : > { %v14491_v55 = vld [vmem:[#allocation2 + $0x177] sm:$0xff]  ;;  %v14493_v8 = vld [vmem:[#allocation2 + $0x17f] sm:$0xff]  ;;  %v14550_v45 = vld [vmem:[#allocation2 + $0x169] sm:$0xff] }
 0x446   : > { %v7686_v44 = vpop.f32.mrb[92].mxu0  ;;  %7891 = vmatpush3.bf16.msra.mxu0 %v7888_v1  ;;  %v6187_v50 = vmax.f32 %v6085_v58, %v14330_v18  ;;  %v6086_v47 = vmax.f32 %v6038_v14, %v14491_v55  ;;  %v6087_v5 = vmax.f32 %v6039_v37, %v14493_v8  ;;  %v6088_v48 = vmax.f32 %v6040_v13, %v14483_v61  ;;  %v14522_v32 = vld [vmem:[#allocation2 + $0x178] sm:$0xff]  ;;  %v8005_v58 = vld [vmem:[%s15072_s26 + $0x90] sm:$0xff] }
 0x447   : > { %v5752_v10 = vmul.f32 %v14233_v60, %v7686_v44  ;;  %v5685_v20 = vpop.f32.mrb[93].mxu0  ;;  %6956 = vmatmul.mubr.f32.gmra.mrb[88].mxu1 %v8001_v15  ;;  %v14552_v37 = vld [vmem:[#allocation2 + $0x171] sm:$0xff]  ;;  %v6480_v14 = vmax.f32 %v6432_v7, %v14550_v45  ;;  %v14565_v44 = vld [vmem:[#allocation2 + $0x179] sm:$0xff]  ;;  %v8007_v15 = vld [vmem:[%s15072_s26 + $0xa8] sm:$0xff] }
 0x448   : > { %v5750_v9 = vmul.f32 %v14233_v60, %v5685_v20  ;;  %v7687_v16 = vpop.f32.mrb[94].mxu0  ;;  %v6235_v63 = vmax.f32 %v6187_v50, %v14411_v39  ;;  %v6188_v18 = vmax.f32 %v6086_v47, %v14366_v34  ;;  %v6189_v42 = vmax.f32 %v6087_v5, %v14399_v26  ;;  %6960 = vmatprep.mubr.f32.mxu1 %v8002_v2  ;;  %v14568_v47 = vld [vmem:[#allocation2 + $0x181] sm:$0xff] }
 0x449   : > { %v5806_v28 = vadd.f32 %v14248_v25, %v5752_v10  ;;  %v5753_v49 = vmul.f32 %v14233_v60, %v7687_v16  ;;  %v5688_v62 = vpop.f32.mrb[95].mxu0  ;;  %v6190_v36 = vmax.f32 %v6088_v48, %v14411_v39  ;;  %v8004_v39 = vld [vmem:[%s15072_s26 + $0x98] sm:$0xff]  ;;  %v6041_v20 = vmax.f32 %v14385_v52, %v14491_v55  ;;  %v6142_v48 = vld [vmem:[#allocation2 + $0x188] sm:$0xff] }
 0x44a   : > { %v5804_v27 = vadd.f32 %v14248_v25, %v5750_v9  ;;  %v5751_v34 = vmul.f32 %v14233_v60, %v5688_v62  ;;  %v6283_v26 = vmax.f32 %v6235_v63, %v14512_v3  ;;  %v6236_v57 = vmax.f32 %v6188_v18, %v14420_v38 }
 0x44b   : > { %v5854_v11 = vsel %vm2608_vm1, %v5806_v28, -1e+30  ;;  %v5807_v54 = vadd.f32 %v14248_v25, %v5753_v49  ;;  %v6237_v46 = vmax.f32 %v6189_v42, %v14465_v56  ;;  %6961 = vmatmul.mubr.f32.gmra.mrb[90].mxu1 %v8003_v30  ;;  %v6043_v63 = vmax.f32 %v14473_v19, %v14483_v61  ;;  %v5999_v49 = vld [vmem:[#allocation2 + $0x1bf] sm:$0xff] }
 0x44c   : > { %5902 = vst.msk [vmem:[#allocation2 + $0x1a0] sm:$0xff] %vm671_vm11, %v5854_v11  ;;  %v5852_v12 = vsel %vm2606_vm2, %v5804_v27, -1e+30  ;;  %v5805_v35 = vadd.f32 %v14248_v25, %v5751_v34  ;;  %v6385_v24 = vmax.f32 %v6283_v26, %v14360_v59  ;;  %v6284_v0 = vmax.f32 %v6236_v57, %v14522_v32  ;;  %6965 = vmatprep.mubr.f32.mxu1 %v8004_v39 }
 0x44d   : > { %5900 = vst.msk [vmem:[#allocation2 + $0x190] sm:$0xff] %vm671_vm11, %v5852_v12  ;;  %v5855_v29 = vsel %vm2609_vm3, %v5807_v54, -1e+30  ;;  %v6285_v4 = vmax.f32 %v6237_v46, %v14534_v17  ;;  %v6042_v2 = vmax.f32 %v14379_v6, %v14493_v8 }
 0x44e   : > { %5903 = vst.msk [vmem:[#allocation2 + $0x1a8] sm:$0xff] %vm671_vm11, %v5855_v29  ;;  %v5853_v59 = vsel %vm2607_vm14, %v5805_v35, -1e+30  ;;  %v6433_v21 = vmax.f32 %v6385_v24, %v14455_v33  ;;  %v6386_v1 = vmax.f32 %v6284_v0, %v14431_v40  ;;  %v6238_v40 = vmax.f32 %v6190_v36, %v14512_v3  ;;  %v6149_v29 = vld [vmem:[#allocation2 + $0x1c0] sm:$0xff] }
 0x44f   : > { %5901 = vst.msk [vmem:[#allocation2 + $0x198] sm:$0xff] %vm671_vm11, %v5853_v59  ;;  %v6387_v31 = vmax.f32 %v6285_v4, %v14441_v23  ;;  %6966 = vmatmul.mubr.f32.gmra.mrb[92].mxu1 %v8005_v58 }
 0x450   : > { %v6481_v13 = vmax.f32 %v6433_v21, %v14552_v37  ;;  %v6434_v53 = vmax.f32 %v6386_v1, %v14458_v43  ;;  %6970 = vmatprep.mubr.f32.mxu1 %v8006_v22  ;;  %v6286_v16 = vmax.f32 %v6238_v40, %v6142_v48 }
 0x451   : > { %v6435_v23 = vmax.f32 %v6387_v31, %v14550_v45 }
 0x452   : > { %v7892_v50 = vpack.c.bf16 %v6481_v13, %v6480_v14  ;;  %v6482_v5 = vmax.f32 %v6434_v53, %v14565_v44  ;;  %v6388_v11 = vmax.f32 %v6286_v16, %v14455_v33  ;;  %v6148_v13 = vld [vmem:[#allocation2 + $0x1b8] sm:$0xff] }
 0x453   : > { %v6483_v10 = vmax.f32 %v6435_v23, %v14568_v47  ;;  %6971 = vmatmul.mubr.f32.gmra.mrb[94].mxu1 %v8007_v15  ;;  %v6145_v59 = vld [vmem:[#allocation2 + $0x1a0] sm:$0xff] }
 0x454   : > { %7893 = vmatprep.subr.bf16.mxu0 %v7892_v50  ;;  %v5993_v9 = vld [vmem:[#allocation2 + $0x18f] sm:$0xff]  ;;  %v6436_v4 = vmax.f32 %v6388_v11, %v14552_v37  ;;  %v6347_v11 = vld [vmem:[#allocation2 + $0x1c1] sm:$0xff] }
 0x455   : > { %7895 = vmatpush3.bf16.msra.mxu0 %v7892_v50  ;;  %v7896_v18 = vpack.c.bf16 %v6483_v10, %v6482_v5  ;;  %v6089_v42 = vmax.f32 %v6041_v20, %v5993_v9  ;;  %v5996_v28 = vld [vmem:[#allocation2 + $0x1a7] sm:$0xff]  ;;  %v6044_v52 = vmax.f32 %v14491_v55, %v5993_v9  ;;  %v5997_v54 = vld [vmem:[#allocation2 + $0x1af] sm:$0xff] }
 0x456   : > { %v5994_v62 = vld [vmem:[#allocation2 + $0x197] sm:$0xff]  ;;  %v5995_v7 = vld [vmem:[#allocation2 + $0x19f] sm:$0xff]  ;;  %v6047_v27 = vmax.f32 %v5993_v9, %v5996_v28  ;;  %v6146_v51 = vld [vmem:[#allocation2 + $0x1a8] sm:$0xff] }
 0x457   : > { %7897 = vmatprep.subr.bf16.mxu0 %v7896_v18  ;;  %v6191_v34 = vmax.f32 %v6089_v42, %v14420_v38  ;;  %v6090_v26 = vmax.f32 %v6042_v2, %v5994_v62  ;;  %v6091_v57 = vmax.f32 %v6043_v63, %v5995_v7  ;;  %v6045_v19 = vmax.f32 %v14493_v8, %v5994_v62  ;;  %v6143_v55 = vld [vmem:[#allocation2 + $0x190] sm:$0xff]  ;;  %v6144_v25 = vld [vmem:[#allocation2 + $0x198] sm:$0xff] }
 0x458   : > { %v6092_v46 = vmax.f32 %v6044_v52, %v5996_v28  ;;  %v6046_v6 = vmax.f32 %v14483_v61, %v5995_v7  ;;  %v6095_v36 = vmax.f32 %v6047_v27, %v5999_v49  ;;  %v6340_v23 = vld [vmem:[#allocation2 + $0x189] sm:$0xff]  ;;  %v6342_v2 = vld [vmem:[#allocation2 + $0x199] sm:$0xff]  ;;  %v6343_v28 = vld [vmem:[#allocation2 + $0x1a1] sm:$0xff] }
 0x459   : > { %7899 = vmatpush3.bf16.msra.mxu0 %v7896_v18  ;;  %v6239_v30 = vmax.f32 %v6191_v34, %v14522_v32  ;;  %v6192_v60 = vmax.f32 %v6090_v26, %v14465_v56  ;;  %v6193_v38 = vmax.f32 %v6091_v57, %v14512_v3  ;;  %v6093_v12 = vmax.f32 %v6045_v19, %v5997_v54  ;;  %v6147_v56 = vld [vmem:[#allocation2 + $0x1b0] sm:$0xff] }
 0x45a   : > { %v6194_v35 = vmax.f32 %v6092_v46, %v14522_v32  ;;  %v6094_v8 = vmax.f32 %v6046_v6, %v5998_v41  ;;  %v6197_v24 = vmax.f32 %v6095_v36, %v6143_v55  ;;  %v6345_v52 = vld [vmem:[#allocation2 + $0x1b1] sm:$0xff]  ;;  %v6344_v34 = vld [vmem:[#allocation2 + $0x1a9] sm:$0xff]  ;;  %v6346_v41 = vld [vmem:[#allocation2 + $0x1b9] sm:$0xff] }
 0x45b   : > { %v6287_v0 = vmax.f32 %v6239_v30, %v6143_v55  ;;  %v6240_v33 = vmax.f32 %v6192_v60, %v14534_v17  ;;  %v6241_v39 = vmax.f32 %v6193_v38, %v6142_v48  ;;  %v6195_v61 = vmax.f32 %v6093_v12, %v14534_v17  ;;  %v6341_v17 = vld [vmem:[#allocation2 + $0x191] sm:$0xff]  ;;  %v8009_v30 = vld [vmem:[%s15072_s26 + $0x40] sm:$0xff]  ;;  %v8012_v12 = vld [vmem:[%s15072_s26 + $0x88] sm:$0xff] }
 0x45c   : > { %v6242_v21 = vmax.f32 %v6194_v35, %v6143_v55  ;;  %v6196_v3 = vmax.f32 %v6094_v8, %v6142_v48  ;;  %v6245_v1 = vmax.f32 %v6197_v24, %v6146_v51  ;;  %v6484_v48 = vmax.f32 %v6436_v4, %v6340_v23  ;;  %v8008_v55 = vld [vmem:[%s15072_s26 + $0x28] sm:$0xff]  ;;  %v8010_v60 = vld [vmem:[%s15072_s26 + $0x58] sm:$0xff]  ;;  %v8011_v38 = vld [vmem:[%s15072_s26 + $0x70] sm:$0xff] }
 0x45d   : > { %v6389_v32 = vmax.f32 %v6287_v0, %v14458_v43  ;;  %v6288_v31 = vmax.f32 %v6240_v33, %v6144_v25  ;;  %v6289_v58 = vmax.f32 %v6241_v39, %v6145_v59  ;;  %v6243_v14 = vmax.f32 %v6195_v61, %v6144_v25  ;;  %v8013_v35 = vld [vmem:[%s15072_s26 + $0xa0] sm:$0xff]  ;;  %v8014_v8 = vld [vmem:[%s15072_s26 + $0xb8] sm:$0xff] }
 0x45e   : > { %v6290_v53 = vmax.f32 %v6242_v21, %v6146_v51  ;;  %v6244_v40 = vmax.f32 %v6196_v3, %v6145_v59  ;;  %v6293_v22 = vmax.f32 %v6245_v1, %v6149_v29  ;;  %v7268_v25 = vld [vmem:[%s14705_s16] ss:$0 sm:$0xff] }
 0x45f   : > { %v6437_v50 = vmax.f32 %v6389_v32, %v14565_v44  ;;  %v6390_v5 = vmax.f32 %v6288_v31, %v14550_v45  ;;  %v6391_v10 = vmax.f32 %v6289_v58, %v14552_v37  ;;  %v6291_v20 = vmax.f32 %v6243_v14, %v6147_v56  ;;  %v7269_v56 = vld [vmem:[%s14706_s17] ss:$0 sm:$0xff] }
 0x460   : > { %v6392_v15 = vmax.f32 %v6290_v53, %v14565_v44  ;;  %v6292_v43 = vmax.f32 %v6244_v40, %v6148_v13  ;;  %v6395_v9 = vmax.f32 %v6293_v22, %v6341_v17 }
 0x461   : > { %v6485_v16 = vmax.f32 %v6437_v50, %v6341_v17  ;;  %v6438_v63 = vmax.f32 %v6390_v5, %v14568_v47  ;;  %v6439_v18 = vmax.f32 %v6391_v10, %v6340_v23  ;;  %v6393_v42 = vmax.f32 %v6291_v20, %v14568_v47 }
 0x462   : > { %v6440_v49 = vmax.f32 %v6392_v15, %v6341_v17  ;;  %v6394_v62 = vmax.f32 %v6292_v43, %v6340_v23  ;;  %v6443_v19 = vmax.f32 %v6395_v9, %v6344_v34 }
 0x463   : > { %v7900_v45 = vpack.c.bf16 %v6485_v16, %v6484_v48  ;;  %v6486_v7 = vmax.f32 %v6438_v63, %v6342_v2  ;;  %v6487_v37 = vmax.f32 %v6439_v18, %v6343_v28  ;;  %v6441_v27 = vmax.f32 %v6393_v42, %v6342_v2 }
 0x464   : > { %v6442_v57 = vmax.f32 %v6394_v62, %v6343_v28  ;;  %v6488_v47 = vmax.f32 %v6440_v49, %v6344_v34  ;;  %v6491_v6 = vmax.f32 %v6443_v19, %v6347_v11 }
 0x465   : > { %7901 = vmatprep.subr.bf16.mxu0 %v7900_v45  ;;  %v7904_v44 = vpack.c.bf16 %v6487_v37, %v6486_v7  ;;  %v6489_v26 = vmax.f32 %v6441_v27, %v6345_v52 }
 0x466   : > { %7903 = vmatpush3.bf16.msra.mxu0 %v7900_v45  ;;  %v6490_v46 = vmax.f32 %v6442_v57, %v6346_v41 }
 0x467   : > { %7905 = vmatprep.subr.bf16.mxu0 %v7904_v44  ;;  %v7908_v54 = vpack.c.bf16 %v6489_v26, %v6488_v47 }
 0x468   : > { %v7912_v36 = vpack.c.bf16 %v6491_v6, %v6490_v46 }
 0x46a   : > { %7907 = vmatpush3.bf16.msra.mxu0 %v7904_v44 }
 0x46b   : > { %7909 = vmatprep.subr.bf16.mxu0 %v7908_v54 }
 0x46e   : > { %7911 = vmatpush3.bf16.msra.mxu0 %v7908_v54 }
 0x46f   : > { %7913 = vmatprep.subr.bf16.mxu0 %v7912_v36 }
 0x472   : > { %7915 = vmatpush3.bf16.msra.mxu0 %v7912_v36 }
 0x475   : > { %7777 = vmatmul.mubr.f32.vlgmr.msra.gmra.mrb[96].mxu0 %v8008_v55 }
 0x476   : > { %7779 = vmatprep.mubr.f32.mxu0 %v8009_v30 }
 0x479   : > { %7780 = vmatmul.mubr.f32.gmra.mrb[98].mxu0 %v8010_v60 }
 0x47a   : > { %7782 = vmatprep.mubr.f32.mxu0 %v8011_v38 }
 0x47d   : > { %7783 = vmatmul.mubr.f32.gmra.mrb[100].mxu0 %v8012_v12 }
 0x47e   : > { %7785 = vmatprep.mubr.f32.mxu0 %v8013_v35 }
 0x481   : > { %7786 = vmatmul.mubr.f32.gmra.mrb[102].mxu0 %v8014_v8 }
 0x4c2   : > { %v7738_v24 = vpop.f32.mrb[72].mxu1 }
 0x4c3   : > { %v6812_v0 = vpop.f32.mrb[73].mxu1  ;;  %v6851_v53 = vmul.f32 %v7738_v24, %v7268_v25 }
 0x4c4   : > { %v7739_v33 = vpop.f32.mrb[74].mxu1  ;;  %v6849_v59 = vmul.f32 %v7268_v25, %v6812_v0 }
 0x4c5   : > { %v6815_v39 = vpop.f32.mrb[75].mxu1  ;;  %v6865_v5 = vadd.f32 %v7269_v56, %v6851_v53  ;;  %v6852_v10 = vmul.f32 %v7739_v33, %v7268_v25 }
 0x4c6   : > { %v6863_v1 = vadd.f32 %v7269_v56, %v6849_v59  ;;  %v6850_v32 = vmul.f32 %v7268_v25, %v6815_v39 }
 0x4c7   : > { %v6866_v9 = vadd.f32 %v7269_v56, %v6852_v10 }
 0x4c8   : > { %v6864_v40 = vadd.f32 %v7269_v56, %v6850_v32 }
 0x4ca   : > { %v7742_v51 = vpop.f32.mrb[76].mxu1 }
 0x4cb   : > { %v6828_v61 = vpop.f32.mrb[77].mxu1  ;;  %v6855_v37 = vmul.f32 %v7742_v51, %v7268_v25 }
 0x4cc   : > { %v7743_v29 = vpop.f32.mrb[78].mxu1  ;;  %v6853_v16 = vmul.f32 %v7268_v25, %v6828_v61 }
 0x4cd   : > { %v6831_v4 = vpop.f32.mrb[79].mxu1  ;;  %v6869_v19 = vadd.f32 %v7269_v56, %v6855_v37  ;;  %v6856_v41 = vmul.f32 %v7743_v29, %v7268_v25 }
 0x4ce   : > { %v6867_v28 = vadd.f32 %v7269_v56, %v6853_v16  ;;  %v6854_v52 = vmul.f32 %v7268_v25, %v6831_v4 }
 0x4cf   : > { %v6870_v6 = vadd.f32 %v7269_v56, %v6856_v41 }
 0x4d0   : > { %v6868_v27 = vadd.f32 %v7269_v56, %v6854_v52 }
 0x50a   : > { %v7476_v21 = vpop.f32.mrb[80].mxu1 }
 0x50b   : > { %v7477_v3 = vpop.f32.mrb[81].mxu1 }
 0x50c   : > { %v7478_v31 = vadd.f32 %v7477_v3, %v7476_v21 }
 0x50e   : > { %v7479_v58 = vpop.f32.mrb[82].mxu1  ;;  %v6938_v14 = vadd.f32 %v7478_v31, %v6863_v1 }
 0x50f   : > { %v7480_v13 = vpop.f32.mrb[83].mxu1 }
 0x510   : > { %v7481_v22 = vadd.f32 %v7480_v13, %v7479_v58 }
 0x512   : > { %v7482_v23 = vpop.f32.mrb[84].mxu1  ;;  %v6943_v17 = vadd.f32 %v7481_v22, %v6864_v40 }
 0x513   : > { %v7483_v50 = vpop.f32.mrb[85].mxu1 }
 0x514   : > { %v7484_v20 = vadd.f32 %v7483_v50, %v7482_v23 }
 0x516   : > { %v7485_v48 = vpop.f32.mrb[86].mxu1  ;;  %v6948_v15 = vadd.f32 %v7484_v20, %v6865_v5 }
 0x517   : > { %v7486_v43 = vpop.f32.mrb[87].mxu1 }
 0x518   : > { %v7487_v63 = vadd.f32 %v7486_v43, %v7485_v48 }
 0x51a   : > { %v7488_v18 = vpop.f32.mrb[88].mxu1  ;;  %v6953_v42 = vadd.f32 %v7487_v63, %v6866_v9 }
 0x51b   : > { %v7489_v2 = vpop.f32.mrb[89].mxu1 }
 0x51c   : > { %v7490_v49 = vadd.f32 %v7489_v2, %v7488_v18 }
 0x51e   : > { %v7491_v62 = vpop.f32.mrb[90].mxu1  ;;  %v6958_v45 = vadd.f32 %v7490_v49, %v6867_v28 }
 0x51f   : > { %v7492_v7 = vpop.f32.mrb[91].mxu1 }
 0x520   : > { %v7493_v34 = vadd.f32 %v7492_v7, %v7491_v62 }
 0x522   : > { %v7494_v44 = vpop.f32.mrb[92].mxu1  ;;  %v6963_v26 = vadd.f32 %v7493_v34, %v6868_v27 }
 0x523   : > { %v7495_v57 = vpop.f32.mrb[93].mxu1 }
 0x524   : > { %v7496_v11 = vadd.f32 %v7495_v57, %v7494_v44 }
 0x526   : > { %v7497_v47 = vpop.f32.mrb[94].mxu1  ;;  %v6968_v54 = vadd.f32 %v7496_v11, %v6869_v19 }
 0x527   : > { %v7498_v46 = vpop.f32.mrb[95].mxu1 }
 0x528   : > { %v7499_v36 = vadd.f32 %v7498_v46, %v7497_v47 }
 0x52a   : > { %v6973_v55 = vadd.f32 %v7499_v36, %v6870_v6 }
 0x548   : > { %v7778_v30 = vpop.f32.mrb[96].mxu0 }
 0x549   : > { %v7048_v60 = vadd.f32 %v7778_v30, %v6943_v17  ;;  %v7042_v38 = vpop.f32.mrb[97].mxu0 }
 0x54a   : > { %v7043_v12 = vadd.f32 %v7042_v38, %v6938_v14 }
 0x54b   : > { %7082 = vst.msk [vmem:[%s568_s21 + $0x8] sm:$0xff] %vm671_vm11, %v7048_v60 }
 0x54c   : > { %7081 = vst.msk [vmem:[%s568_s21] sm:$0xff] %vm671_vm11, %v7043_v12  ;;  %v7781_v35 = vpop.f32.mrb[98].mxu0 }
 0x54d   : > { %v7058_v8 = vadd.f32 %v7781_v35, %v6953_v42  ;;  %v7052_v24 = vpop.f32.mrb[99].mxu0 }
 0x54e   : > { %v7053_v0 = vadd.f32 %v7052_v24, %v6948_v15 }
 0x54f   : > { %7084 = vst.msk [vmem:[%s568_s21 + $0x18] sm:$0xff] %vm671_vm11, %v7058_v8 }
 0x550   : > { %7083 = vst.msk [vmem:[%s568_s21 + $0x10] sm:$0xff] %vm671_vm11, %v7053_v0  ;;  %v7784_v33 = vpop.f32.mrb[100].mxu0 }
 0x551   : > { %v7068_v39 = vadd.f32 %v7784_v33, %v6963_v26  ;;  %v7062_v51 = vpop.f32.mrb[101].mxu0 }
 0x552   : > { %v7063_v61 = vadd.f32 %v7062_v51, %v6958_v45 }
 0x553   : > { %7086 = vst.msk [vmem:[%s568_s21 + $0x28] sm:$0xff] %vm671_vm11, %v7068_v39 }
 0x554   : > { %7085 = vst.msk [vmem:[%s568_s21 + $0x20] sm:$0xff] %vm671_vm11, %v7063_v61  ;;  %v7787_v29 = vpop.f32.mrb[102].mxu0 }
 0x555   : > { %v7078_v4 = vadd.f32 %v7787_v29, %v6973_v55  ;;  %v7072_v25 = vpop.f32.mrb[103].mxu0 }
 0x556   : > { %v7073_v59 = vadd.f32 %v7072_v25, %v6968_v54 }
 0x557   : > { %7088 = vst.msk [vmem:[%s568_s21 + $0x38] sm:$0xff] %vm671_vm11, %v7078_v4 }
 0x558   : > { %7087 = vst.msk [vmem:[%s568_s21 + $0x30] sm:$0xff] %vm671_vm11, %v7073_v59 }
 0x559   : > { %8028 = shalt.err (!%p8025_p3)
}
 0x55a   : > { %s8029_s19 = scalar_lea.hbm %s14640_s4, 1024  ;;  %s8033_s3 = scalar_lea.hbm %s14707_s18, 2048 }
 0x55b   : > { %p8030_p4 = scmp.ne.s32.totalorder %s14640_s4, %s8029_s19  ;;  %p8034_p9 = scmp.lt.u32.totalorder %s14640_s4, %s14707_s18 }
 0x55c   : > { %p8035_p10 = scmp.lt.u32.totalorder %s8033_s3, %s8029_s19  ;;  %p8037_p12 = scmp.lt.u32.totalorder %s8029_s19, %s14640_s4 }
 0x55d   : > { %p8031_p7 = pnand %p8030_p4, %p8218_p5 }
 0x55e   : > { %p8036_p11 = por %p8035_p10, %p8034_p9 }
 0x55f   : > { %p8032_p8 = pneg %p8031_p7 }
 0x560   : > { %p8038_p13 = por %p8037_p12, %p8036_p11 }
 0x562   : > { %p8039_p0 = pnand %p8038_p13, %p8032_p8 }
 0x564   : > { %8042 = shalt.err (!%p8039_p0)
}
 0x565   : > { %s8083_s5 = smov 128   ;;  %s8084_s24 = smov 8  }
 0x566   : > { %7917 = dma.vmem_to_hbm [thread:$0]  (%p8218_p5), %s14642_s25, 1024, %s14640_s4, %s14648_s0, %s8083_s5, %s8083_s5, %s8084_s24  }
 0x567 PF: > { %p7923_p1 = scmp.ge.s32.totalorder %s8077_s30, 2  ;;  %s7118_s21 = sand.u32 1, %s8065_s27  }
 0x568   : > { %s7119_s19 = scalar_lea.sflag [#allocation5], %s7118_s21 }
 0x569   : > { %p7920_p2 = pnand %p7923_p1, %p8222_p6 }
 0x56b   : > { %8060 = dma.done.wait (!%p7920_p2), %s7119_s19, 1024  }
 0x56c   : > { %8062 = vsyncadd (!%p7920_p2), %s7119_s19, 4294966272  ;;  %s15329_s29 = sld [smem:[#allocation7_spill]]  ;;  %s15330_s3 = sld [smem:[#allocation8_spill]] }
 0x56d   : > { %p28_p3 = scmp.ge.s32.totalorder %s8205_s1, 4   ;;  %s15331_s27 = smov %s8069_s28 }
 0x56e   : > { %s15334_s30 = smov %s8205_s1 }
 0x56f   :  { %30 = sbr.rel (!%p28_p3) target bundleno = 11 (0xb), region = 127 }
 0x572   : > { %s15332_s28 = smov %s15329_s29  ;;  %s15333_s29 = smov %s15330_s3 }
 0x576   :  { %7124 = vsyncpa [#allocation5], 1 }
 0x577   :  { %7126 = vsyncpa [#allocation5 + $0x1], 1 }

</bundles_post_ra>
